<compile_context>
chip_gen: v7x
topology: tpu7x:2x2x1
jax: 0.10.0
libtpu: 0.0.40
codegen_flags: <defaults>
</compile_context>

<pallas_src>
import functools

import jax
import jax.numpy as jnp
from jax import lax
from jax.experimental import pallas as pl
from jax.experimental.pallas import tpu as pltpu

K = 7           # conv kernel size
PAD = K // 2    # 3
IN_CH = 2       # channels after concat([avg, max])
OUT_CH = 2      # out_channels as declared in the module


def _location_attention_kernel(x_ref, w_ref, b_ref, o_ref, *, C, H, W):
    # x_ref: (C, H, W) VMEM block (batch dim squeezed)
    # w_ref: (OUT_CH*IN_CH*K*K,) f32 in SMEM ; b_ref: (OUT_CH,) f32 in SMEM
    # o_ref: (OUT_CH, H, W) VMEM block
    x = x_ref[...].astype(jnp.float32)

    # Channel pooling over the untiled C axis (VPU).
    x_avg = jnp.sum(x, axis=0) * (1.0 / C)        # (H, W)
    x_max = jnp.max(x, axis=0)                    # (H, W)

    # Zero-pad each pooled plane once (hoisted out of the tap loops).
    zrow = jnp.zeros((PAD, W + 2 * PAD), jnp.float32)
    zcol = jnp.zeros((H, PAD), jnp.float32)

    def pad2d(p):
        p = jnp.concatenate([zcol, p, zcol], axis=1)      # (H, W+6)
        return jnp.concatenate([zrow, p, zrow], axis=0)   # (H+6, W+6)

    padded = (pad2d(x_avg), pad2d(x_max))                 # IN_CH planes

    # 7x7 conv, stride 1, padding 3: fully unrolled shifted multiply-adds.
    for o in range(OUT_CH):
        acc = jnp.full((H, W), b_ref[o], dtype=jnp.float32)
        for c in range(IN_CH):
            pc = padded[c]
            for dy in range(K):
                rows = pc[dy:dy + H, :]                   # (H, W+6) static slice
                for dx in range(K):
                    wv = w_ref[((o * IN_CH + c) * K + dy) * K + dx]
                    acc = acc + wv * rows[:, dx:dx + W]
        o_ref[o] = acc.astype(o_ref.dtype)                # direct store, no concat


def location_attention(x_nchw, w, b):
    """x_nchw: (B, C, H, W) f32; w: (OUT_CH, IN_CH, 7, 7); b: (OUT_CH,).

    Returns Conv2d_{7x7,pad=3}(concat([mean_c(x), max_c(x)], axis=1)) : (B, 2, H, W)."""
    B, C, H, W = x_nchw.shape
    assert w.shape == (OUT_CH, IN_CH, K, K) and b.shape == (OUT_CH,)
    w_flat = w.reshape(-1).astype(jnp.float32)            # 1D SMEM (no 2D padding)
    b = b.astype(jnp.float32)

    flops = B * H * W * (2 * (C - 1)                      # mean + max pooling
                         + OUT_CH * IN_CH * K * K * 2)    # conv MACs
    bytes_accessed = (B * C * H * W + B * OUT_CH * H * W) * 4

    return pl.pallas_call(
        functools.partial(_location_attention_kernel, C=C, H=H, W=W),
        out_shape=jax.ShapeDtypeStruct((B, OUT_CH, H, W), jnp.float32),
        grid=(B,),
        in_specs=[
            pl.BlockSpec((None, C, H, W), lambda bi: (bi, 0, 0, 0)),
            pl.BlockSpec(memory_space=pltpu.MemorySpace.SMEM),   # w_flat
            pl.BlockSpec(memory_space=pltpu.MemorySpace.SMEM),   # b
        ],
        out_specs=pl.BlockSpec((None, OUT_CH, H, W), lambda bi: (bi, 0, 0, 0)),
        compiler_params=pltpu.CompilerParams(
            dimension_semantics=("parallel",),
            vmem_limit_bytes=32 * 1024 * 1024),
        cost_estimate=pl.CostEstimate(flops=flops, transcendentals=0,
                                      bytes_accessed=bytes_accessed),
    )(x_nchw, w_flat, b)


def reference(x, w, b):
    """Pure-JAX reference mirroring the (intended) PyTorch forward."""
    x_avg = jnp.mean(x, axis=1, keepdims=True)
    x_max = jnp.max(x, axis=1, keepdims=True)
    x2 = jnp.concatenate([x_avg, x_max], axis=1)          # (B, 2, H, W)
    y = lax.conv_general_dilated(
        x2, w, window_strides=(1, 1), padding=((PAD, PAD), (PAD, PAD)),
        dimension_numbers=("NCHW", "OIHW", "NCHW"),
        precision=lax.Precision.HIGHEST)
    return y + b[None, :, None, None]


if __name__ == "__main__":
    # Small demo shapes; H multiple of 8 (sublane-dense) and W multiple of 128
    # (lane-dense stores) per the perf review — the kernel is correct for any
    # H, W since the block covers the full spatial extent.
    B, C, H, W = 2, 4, 16, 128

    key = jax.random.PRNGKey(0)
    kx, kw, kb = jax.random.split(key, 3)
    x = jax.random.normal(kx, (B, C, H, W), jnp.float32)
    # Conv2d(2, 2, 7) weight in OIHW and bias.
    w = jax.random.normal(kw, (OUT_CH, IN_CH, K, K), jnp.float32) * 0.1
    b = jax.random.normal(kb, (OUT_CH,), jnp.float32) * 0.1

    y = location_attention(x, w, b)
    jax.block_until_ready(y)

    y_ref = reference(x, w, b)
    assert y.shape == (B, OUT_CH, H, W)
    assert jnp.allclose(y, y_ref, atol=1e-4, rtol=1e-4), "mismatch vs reference"

    print("KERNEL_OK")
</pallas_src>

<mosaic_0001>
module attributes {stable_mosaic.version = 11 : i64} {
  func.func @_location_attention_kernel(%arg0: i32, %arg1: memref<1x4x16x128xf32, #tpu.memory_space<vmem>>, %arg2: memref<196xf32, #tpu.memory_space<smem>>, %arg3: memref<2xf32, #tpu.memory_space<smem>>, %arg4: memref<1x2x16x128xf32, #tpu.memory_space<vmem>>) attributes {dimension_semantics = [#tpu.dimension_semantics<parallel>], iteration_bounds = array<i64: 2>, scalar_prefetch = 0 : i64, scratch_operands = 0 : i64, tpu.core_type = #tpu.core_type<tc>, window_params = [{transform_indices = @transform_0, window_bounds = array<i64: 1, 4, 16, 128>}, {transform_indices = @transform_1, window_bounds = array<i64: 196>}, {transform_indices = @transform_2, window_bounds = array<i64: 2>}, {transform_indices = @transform_3, window_bounds = array<i64: 1, 2, 16, 128>}]} {
    %c0 = arith.constant 0 : index
    %c0_0 = arith.constant 0 : index
    %c0_1 = arith.constant 0 : index
    %c0_2 = arith.constant 0 : index
    %0 = vector.load %arg1[%c0, %c0_0, %c0_1, %c0_2] : memref<1x4x16x128xf32, #tpu.memory_space<vmem>>, vector<1x4x16x128xf32>
    %1 = vector.shape_cast %0 : vector<1x4x16x128xf32> to vector<4x16x128xf32>
    %cst = arith.constant dense<0.000000e+00> : vector<16x128xf32>
    %2 = vector.multi_reduction <add>, %1, %cst [0] : vector<4x16x128xf32> to vector<16x128xf32>
    %cst_3 = arith.constant 2.500000e-01 : f32
    %3 = vector.broadcast %cst_3 : f32 to vector<16x128xf32>
    %4 = arith.mulf %2, %3 : vector<16x128xf32>
    %cst_4 = arith.constant dense<0xFF800000> : vector<16x128xf32>
    %5 = vector.multi_reduction <maximumf>, %1, %cst_4 [0] : vector<4x16x128xf32> to vector<16x128xf32>
    %cst_5 = arith.constant 0.000000e+00 : f32
    %6 = vector.broadcast %cst_5 : f32 to vector<3x134xf32>
    %cst_6 = arith.constant 0.000000e+00 : f32
    %7 = vector.broadcast %cst_6 : f32 to vector<16x3xf32>
    %8 = tpu.concatenate %7, %4, %7 in 1 : vector<16x3xf32>, vector<16x128xf32>, vector<16x3xf32> -> vector<16x134xf32>
    %9 = tpu.concatenate %6, %8, %6 in 0 : vector<3x134xf32>, vector<16x134xf32>, vector<3x134xf32> -> vector<22x134xf32>
    %10 = tpu.concatenate %7, %5, %7 in 1 : vector<16x3xf32>, vector<16x128xf32>, vector<16x3xf32> -> vector<16x134xf32>
    %11 = tpu.concatenate %6, %10, %6 in 0 : vector<3x134xf32>, vector<16x134xf32>, vector<3x134xf32> -> vector<22x134xf32>
    %c0_7 = arith.constant 0 : index
    %12 = memref.load %arg3[%c0_7] : memref<2xf32, #tpu.memory_space<smem>>
    %13 = vector.broadcast %12 : f32 to vector<16x128xf32>
    %14 = vector.extract_strided_slice %9 {offsets = [0, 0], sizes = [16, 134], strides = [1, 1]} : vector<22x134xf32> to vector<16x134xf32>
    %c0_8 = arith.constant 0 : index
    %15 = memref.load %arg2[%c0_8] : memref<196xf32, #tpu.memory_space<smem>>
    %16 = vector.extract_strided_slice %14 {offsets = [0, 0], sizes = [16, 128], strides = [1, 1]} : vector<16x134xf32> to vector<16x128xf32>
    %17 = vector.broadcast %15 : f32 to vector<16x128xf32>
    %18 = arith.mulf %17, %16 : vector<16x128xf32>
    %19 = arith.addf %13, %18 : vector<16x128xf32>
    %c1 = arith.constant 1 : index
    %20 = memref.load %arg2[%c1] : memref<196xf32, #tpu.memory_space<smem>>
    %21 = vector.extract_strided_slice %14 {offsets = [0, 1], sizes = [16, 128], strides = [1, 1]} : vector<16x134xf32> to vector<16x128xf32>
    %22 = vector.broadcast %20 : f32 to vector<16x128xf32>
    %23 = arith.mulf %22, %21 : vector<16x128xf32>
    %24 = arith.addf %19, %23 : vector<16x128xf32>
    %c2 = arith.constant 2 : index
    %25 = memref.load %arg2[%c2] : memref<196xf32, #tpu.memory_space<smem>>
    %26 = vector.extract_strided_slice %14 {offsets = [0, 2], sizes = [16, 128], strides = [1, 1]} : vector<16x134xf32> to vector<16x128xf32>
    %27 = vector.broadcast %25 : f32 to vector<16x128xf32>
    %28 = arith.mulf %27, %26 : vector<16x128xf32>
    %29 = arith.addf %24, %28 : vector<16x128xf32>
    %c3 = arith.constant 3 : index
    %30 = memref.load %arg2[%c3] : memref<196xf32, #tpu.memory_space<smem>>
    %31 = vector.extract_strided_slice %14 {offsets = [0, 3], sizes = [16, 128], strides = [1, 1]} : vector<16x134xf32> to vector<16x128xf32>
    %32 = vector.broadcast %30 : f32 to vector<16x128xf32>
    %33 = arith.mulf %32, %31 : vector<16x128xf32>
    %34 = arith.addf %29, %33 : vector<16x128xf32>
    %c4 = arith.constant 4 : index
    %35 = memref.load %arg2[%c4] : memref<196xf32, #tpu.memory_space<smem>>
    %36 = vector.extract_strided_slice %14 {offsets = [0, 4], sizes = [16, 128], strides = [1, 1]} : vector<16x134xf32> to vector<16x128xf32>
    %37 = vector.broadcast %35 : f32 to vector<16x128xf32>
    %38 = arith.mulf %37, %36 : vector<16x128xf32>
    %39 = arith.addf %34, %38 : vector<16x128xf32>
    %c5 = arith.constant 5 : index
    %40 = memref.load %arg2[%c5] : memref<196xf32, #tpu.memory_space<smem>>
    %41 = vector.extract_strided_slice %14 {offsets = [0, 5], sizes = [16, 128], strides = [1, 1]} : vector<16x134xf32> to vector<16x128xf32>
    %42 = vector.broadcast %40 : f32 to vector<16x128xf32>
    %43 = arith.mulf %42, %41 : vector<16x128xf32>
    %44 = arith.addf %39, %43 : vector<16x128xf32>
    %c6 = arith.constant 6 : index
    %45 = memref.load %arg2[%c6] : memref<196xf32, #tpu.memory_space<smem>>
    %46 = vector.extract_strided_slice %14 {offsets = [0, 6], sizes = [16, 128], strides = [1, 1]} : vector<16x134xf32> to vector<16x128xf32>
    %47 = vector.broadcast %45 : f32 to vector<16x128xf32>
    %48 = arith.mulf %47, %46 : vector<16x128xf32>
    %49 = arith.addf %44, %48 : vector<16x128xf32>
    %50 = vector.extract_strided_slice %9 {offsets = [1, 0], sizes = [16, 134], strides = [1, 1]} : vector<22x134xf32> to vector<16x134xf32>
    %c7 = arith.constant 7 : index
    %51 = memref.load %arg2[%c7] : memref<196xf32, #tpu.memory_space<smem>>
    %52 = vector.extract_strided_slice %50 {offsets = [0, 0], sizes = [16, 128], strides = [1, 1]} : vector<16x134xf32> to vector<16x128xf32>
    %53 = vector.broadcast %51 : f32 to vector<16x128xf32>
    %54 = arith.mulf %53, %52 : vector<16x128xf32>
    %55 = arith.addf %49, %54 : vector<16x128xf32>
    %c8 = arith.constant 8 : index
    %56 = memref.load %arg2[%c8] : memref<196xf32, #tpu.memory_space<smem>>
    %57 = vector.extract_strided_slice %50 {offsets = [0, 1], sizes = [16, 128], strides = [1, 1]} : vector<16x134xf32> to vector<16x128xf32>
    %58 = vector.broadcast %56 : f32 to vector<16x128xf32>
    %59 = arith.mulf %58, %57 : vector<16x128xf32>
    %60 = arith.addf %55, %59 : vector<16x128xf32>
    %c9 = arith.constant 9 : index
    %61 = memref.load %arg2[%c9] : memref<196xf32, #tpu.memory_space<smem>>
    %62 = vector.extract_strided_slice %50 {offsets = [0, 2], sizes = [16, 128], strides = [1, 1]} : vector<16x134xf32> to vector<16x128xf32>
    %63 = vector.broadcast %61 : f32 to vector<16x128xf32>
    %64 = arith.mulf %63, %62 : vector<16x128xf32>
    %65 = arith.addf %60, %64 : vector<16x128xf32>
    %c10 = arith.constant 10 : index
    %66 = memref.load %arg2[%c10] : memref<196xf32, #tpu.memory_space<smem>>
    %67 = vector.extract_strided_slice %50 {offsets = [0, 3], sizes = [16, 128], strides = [1, 1]} : vector<16x134xf32> to vector<16x128xf32>
    %68 = vector.broadcast %66 : f32 to vector<16x128xf32>
    %69 = arith.mulf %68, %67 : vector<16x128xf32>
    %70 = arith.addf %65, %69 : vector<16x128xf32>
    %c11 = arith.constant 11 : index
    %71 = memref.load %arg2[%c11] : memref<196xf32, #tpu.memory_space<smem>>
    %72 = vector.extract_strided_slice %50 {offsets = [0, 4], sizes = [16, 128], strides = [1, 1]} : vector<16x134xf32> to vector<16x128xf32>
    %73 = vector.broadcast %71 : f32 to vector<16x128xf32>
    %74 = arith.mulf %73, %72 : vector<16x128xf32>
    %75 = arith.addf %70, %74 : vector<16x128xf32>
    %c12 = arith.constant 12 : index
    %76 = memref.load %arg2[%c12] : memref<196xf32, #tpu.memory_space<smem>>
    %77 = vector.extract_strided_slice %50 {offsets = [0, 5], sizes = [16, 128], strides = [1, 1]} : vector<16x134xf32> to vector<16x128xf32>
    %78 = vector.broadcast %76 : f32 to vector<16x128xf32>
    %79 = arith.mulf %78, %77 : vector<16x128xf32>
    %80 = arith.addf %75, %79 : vector<16x128xf32>
    %c13 = arith.constant 13 : index
    %81 = memref.load %arg2[%c13] : memref<196xf32, #tpu.memory_space<smem>>
    %82 = vector.extract_strided_slice %50 {offsets = [0, 6], sizes = [16, 128], strides = [1, 1]} : vector<16x134xf32> to vector<16x128xf32>
    %83 = vector.broadcast %81 : f32 to vector<16x128xf32>
    %84 = arith.mulf %83, %82 : vector<16x128xf32>
    %85 = arith.addf %80, %84 : vector<16x128xf32>
    %86 = vector.extract_strided_slice %9 {offsets = [2, 0], sizes = [16, 134], strides = [1, 1]} : vector<22x134xf32> to vector<16x134xf32>
    %c14 = arith.constant 14 : index
    %87 = memref.load %arg2[%c14] : memref<196xf32, #tpu.memory_space<smem>>
    %88 = vector.extract_strided_slice %86 {offsets = [0, 0], sizes = [16, 128], strides = [1, 1]} : vector<16x134xf32> to vector<16x128xf32>
    %89 = vector.broadcast %87 : f32 to vector<16x128xf32>
    %90 = arith.mulf %89, %88 : vector<16x128xf32>
    %91 = arith.addf %85, %90 : vector<16x128xf32>
    %c15 = arith.constant 15 : index
    %92 = memref.load %arg2[%c15] : memref<196xf32, #tpu.memory_space<smem>>
    %93 = vector.extract_strided_slice %86 {offsets = [0, 1], sizes = [16, 128], strides = [1, 1]} : vector<16x134xf32> to vector<16x128xf32>
    %94 = vector.broadcast %92 : f32 to vector<16x128xf32>
    %95 = arith.mulf %94, %93 : vector<16x128xf32>
    %96 = arith.addf %91, %95 : vector<16x128xf32>
    %c16 = arith.constant 16 : index
    %97 = memref.load %arg2[%c16] : memref<196xf32, #tpu.memory_space<smem>>
    %98 = vector.extract_strided_slice %86 {offsets = [0, 2], sizes = [16, 128], strides = [1, 1]} : vector<16x134xf32> to vector<16x128xf32>
    %99 = vector.broadcast %97 : f32 to vector<16x128xf32>
    %100 = arith.mulf %99, %98 : vector<16x128xf32>
    %101 = arith.addf %96, %100 : vector<16x128xf32>
    %c17 = arith.constant 17 : index
    %102 = memref.load %arg2[%c17] : memref<196xf32, #tpu.memory_space<smem>>
    %103 = vector.extract_strided_slice %86 {offsets = [0, 3], sizes = [16, 128], strides = [1, 1]} : vector<16x134xf32> to vector<16x128xf32>
    %104 = vector.broadcast %102 : f32 to vector<16x128xf32>
    %105 = arith.mulf %104, %103 : vector<16x128xf32>
    %106 = arith.addf %101, %105 : vector<16x128xf32>
    %c18 = arith.constant 18 : index
    %107 = memref.load %arg2[%c18] : memref<196xf32, #tpu.memory_space<smem>>
    %108 = vector.extract_strided_slice %86 {offsets = [0, 4], sizes = [16, 128], strides = [1, 1]} : vector<16x134xf32> to vector<16x128xf32>
    %109 = vector.broadcast %107 : f32 to vector<16x128xf32>
    %110 = arith.mulf %109, %108 : vector<16x128xf32>
    %111 = arith.addf %106, %110 : vector<16x128xf32>
    %c19 = arith.constant 19 : index
    %112 = memref.load %arg2[%c19] : memref<196xf32, #tpu.memory_space<smem>>
    %113 = vector.extract_strided_slice %86 {offsets = [0, 5], sizes = [16, 128], strides = [1, 1]} : vector<16x134xf32> to vector<16x128xf32>
    %114 = vector.broadcast %112 : f32 to vector<16x128xf32>
    %115 = arith.mulf %114, %113 : vector<16x128xf32>
    %116 = arith.addf %111, %115 : vector<16x128xf32>
    %c20 = arith.constant 20 : index
    %117 = memref.load %arg2[%c20] : memref<196xf32, #tpu.memory_space<smem>>
    %118 = vector.extract_strided_slice %86 {offsets = [0, 6], sizes = [16, 128], strides = [1, 1]} : vector<16x134xf32> to vector<16x128xf32>
    %119 = vector.broadcast %117 : f32 to vector<16x128xf32>
    %120 = arith.mulf %119, %118 : vector<16x128xf32>
    %121 = arith.addf %116, %120 : vector<16x128xf32>
    %122 = vector.extract_strided_slice %9 {offsets = [3, 0], sizes = [16, 134], strides = [1, 1]} : vector<22x134xf32> to vector<16x134xf32>
    %c21 = arith.constant 21 : index
    %123 = memref.load %arg2[%c21] : memref<196xf32, #tpu.memory_space<smem>>
    %124 = vector.extract_strided_slice %122 {offsets = [0, 0], sizes = [16, 128], strides = [1, 1]} : vector<16x134xf32> to vector<16x128xf32>
    %125 = vector.broadcast %123 : f32 to vector<16x128xf32>
    %126 = arith.mulf %125, %124 : vector<16x128xf32>
    %127 = arith.addf %121, %126 : vector<16x128xf32>
    %c22 = arith.constant 22 : index
    %128 = memref.load %arg2[%c22] : memref<196xf32, #tpu.memory_space<smem>>
    %129 = vector.extract_strided_slice %122 {offsets = [0, 1], sizes = [16, 128], strides = [1, 1]} : vector<16x134xf32> to vector<16x128xf32>
    %130 = vector.broadcast %128 : f32 to vector<16x128xf32>
    %131 = arith.mulf %130, %129 : vector<16x128xf32>
    %132 = arith.addf %127, %131 : vector<16x128xf32>
    %c23 = arith.constant 23 : index
    %133 = memref.load %arg2[%c23] : memref<196xf32, #tpu.memory_space<smem>>
    %134 = vector.extract_strided_slice %122 {offsets = [0, 2], sizes = [16, 128], strides = [1, 1]} : vector<16x134xf32> to vector<16x128xf32>
    %135 = vector.broadcast %133 : f32 to vector<16x128xf32>
    %136 = arith.mulf %135, %134 : vector<16x128xf32>
    %137 = arith.addf %132, %136 : vector<16x128xf32>
    %c24 = arith.constant 24 : index
    %138 = memref.load %arg2[%c24] : memref<196xf32, #tpu.memory_space<smem>>
    %139 = vector.extract_strided_slice %122 {offsets = [0, 3], sizes = [16, 128], strides = [1, 1]} : vector<16x134xf32> to vector<16x128xf32>
    %140 = vector.broadcast %138 : f32 to vector<16x128xf32>
    %141 = arith.mulf %140, %139 : vector<16x128xf32>
    %142 = arith.addf %137, %141 : vector<16x128xf32>
    %c25 = arith.constant 25 : index
    %143 = memref.load %arg2[%c25] : memref<196xf32, #tpu.memory_space<smem>>
    %144 = vector.extract_strided_slice %122 {offsets = [0, 4], sizes = [16, 128], strides = [1, 1]} : vector<16x134xf32> to vector<16x128xf32>
    %145 = vector.broadcast %143 : f32 to vector<16x128xf32>
    %146 = arith.mulf %145, %144 : vector<16x128xf32>
    %147 = arith.addf %142, %146 : vector<16x128xf32>
    %c26 = arith.constant 26 : index
    %148 = memref.load %arg2[%c26] : memref<196xf32, #tpu.memory_space<smem>>
    %149 = vector.extract_strided_slice %122 {offsets = [0, 5], sizes = [16, 128], strides = [1, 1]} : vector<16x134xf32> to vector<16x128xf32>
    %150 = vector.broadcast %148 : f32 to vector<16x128xf32>
    %151 = arith.mulf %150, %149 : vector<16x128xf32>
    %152 = arith.addf %147, %151 : vector<16x128xf32>
    %c27 = arith.constant 27 : index
    %153 = memref.load %arg2[%c27] : memref<196xf32, #tpu.memory_space<smem>>
    %154 = vector.extract_strided_slice %122 {offsets = [0, 6], sizes = [16, 128], strides = [1, 1]} : vector<16x134xf32> to vector<16x128xf32>
    %155 = vector.broadcast %153 : f32 to vector<16x128xf32>
    %156 = arith.mulf %155, %154 : vector<16x128xf32>
    %157 = arith.addf %152, %156 : vector<16x128xf32>
    %158 = vector.extract_strided_slice %9 {offsets = [4, 0], sizes = [16, 134], strides = [1, 1]} : vector<22x134xf32> to vector<16x134xf32>
    %c28 = arith.constant 28 : index
    %159 = memref.load %arg2[%c28] : memref<196xf32, #tpu.memory_space<smem>>
    %160 = vector.extract_strided_slice %158 {offsets = [0, 0], sizes = [16, 128], strides = [1, 1]} : vector<16x134xf32> to vector<16x128xf32>
    %161 = vector.broadcast %159 : f32 to vector<16x128xf32>
    %162 = arith.mulf %161, %160 : vector<16x128xf32>
    %163 = arith.addf %157, %162 : vector<16x128xf32>
    %c29 = arith.constant 29 : index
    %164 = memref.load %arg2[%c29] : memref<196xf32, #tpu.memory_space<smem>>
    %165 = vector.extract_strided_slice %158 {offsets = [0, 1], sizes = [16, 128], strides = [1, 1]} : vector<16x134xf32> to vector<16x128xf32>
    %166 = vector.broadcast %164 : f32 to vector<16x128xf32>
    %167 = arith.mulf %166, %165 : vector<16x128xf32>
    %168 = arith.addf %163, %167 : vector<16x128xf32>
    %c30 = arith.constant 30 : index
    %169 = memref.load %arg2[%c30] : memref<196xf32, #tpu.memory_space<smem>>
    %170 = vector.extract_strided_slice %158 {offsets = [0, 2], sizes = [16, 128], strides = [1, 1]} : vector<16x134xf32> to vector<16x128xf32>
    %171 = vector.broadcast %169 : f32 to vector<16x128xf32>
    %172 = arith.mulf %171, %170 : vector<16x128xf32>
    %173 = arith.addf %168, %172 : vector<16x128xf32>
    %c31 = arith.constant 31 : index
    %174 = memref.load %arg2[%c31] : memref<196xf32, #tpu.memory_space<smem>>
    %175 = vector.extract_strided_slice %158 {offsets = [0, 3], sizes = [16, 128], strides = [1, 1]} : vector<16x134xf32> to vector<16x128xf32>
    %176 = vector.broadcast %174 : f32 to vector<16x128xf32>
    %177 = arith.mulf %176, %175 : vector<16x128xf32>
    %178 = arith.addf %173, %177 : vector<16x128xf32>
    %c32 = arith.constant 32 : index
    %179 = memref.load %arg2[%c32] : memref<196xf32, #tpu.memory_space<smem>>
    %180 = vector.extract_strided_slice %158 {offsets = [0, 4], sizes = [16, 128], strides = [1, 1]} : vector<16x134xf32> to vector<16x128xf32>
    %181 = vector.broadcast %179 : f32 to vector<16x128xf32>
    %182 = arith.mulf %181, %180 : vector<16x128xf32>
    %183 = arith.addf %178, %182 : vector<16x128xf32>
    %c33 = arith.constant 33 : index
    %184 = memref.load %arg2[%c33] : memref<196xf32, #tpu.memory_space<smem>>
    %185 = vector.extract_strided_slice %158 {offsets = [0, 5], sizes = [16, 128], strides = [1, 1]} : vector<16x134xf32> to vector<16x128xf32>
    %186 = vector.broadcast %184 : f32 to vector<16x128xf32>
    %187 = arith.mulf %186, %185 : vector<16x128xf32>
    %188 = arith.addf %183, %187 : vector<16x128xf32>
    %c34 = arith.constant 34 : index
    %189 = memref.load %arg2[%c34] : memref<196xf32, #tpu.memory_space<smem>>
    %190 = vector.extract_strided_slice %158 {offsets = [0, 6], sizes = [16, 128], strides = [1, 1]} : vector<16x134xf32> to vector<16x128xf32>
    %191 = vector.broadcast %189 : f32 to vector<16x128xf32>
    %192 = arith.mulf %191, %190 : vector<16x128xf32>
    %193 = arith.addf %188, %192 : vector<16x128xf32>
    %194 = vector.extract_strided_slice %9 {offsets = [5, 0], sizes = [16, 134], strides = [1, 1]} : vector<22x134xf32> to vector<16x134xf32>
    %c35 = arith.constant 35 : index
    %195 = memref.load %arg2[%c35] : memref<196xf32, #tpu.memory_space<smem>>
    %196 = vector.extract_strided_slice %194 {offsets = [0, 0], sizes = [16, 128], strides = [1, 1]} : vector<16x134xf32> to vector<16x128xf32>
    %197 = vector.broadcast %195 : f32 to vector<16x128xf32>
    %198 = arith.mulf %197, %196 : vector<16x128xf32>
    %199 = arith.addf %193, %198 : vector<16x128xf32>
    %c36 = arith.constant 36 : index
    %200 = memref.load %arg2[%c36] : memref<196xf32, #tpu.memory_space<smem>>
    %201 = vector.extract_strided_slice %194 {offsets = [0, 1], sizes = [16, 128], strides = [1, 1]} : vector<16x134xf32> to vector<16x128xf32>
    %202 = vector.broadcast %200 : f32 to vector<16x128xf32>
    %203 = arith.mulf %202, %201 : vector<16x128xf32>
    %204 = arith.addf %199, %203 : vector<16x128xf32>
    %c37 = arith.constant 37 : index
    %205 = memref.load %arg2[%c37] : memref<196xf32, #tpu.memory_space<smem>>
    %206 = vector.extract_strided_slice %194 {offsets = [0, 2], sizes = [16, 128], strides = [1, 1]} : vector<16x134xf32> to vector<16x128xf32>
    %207 = vector.broadcast %205 : f32 to vector<16x128xf32>
    %208 = arith.mulf %207, %206 : vector<16x128xf32>
    %209 = arith.addf %204, %208 : vector<16x128xf32>
    %c38 = arith.constant 38 : index
    %210 = memref.load %arg2[%c38] : memref<196xf32, #tpu.memory_space<smem>>
    %211 = vector.extract_strided_slice %194 {offsets = [0, 3], sizes = [16, 128], strides = [1, 1]} : vector<16x134xf32> to vector<16x128xf32>
    %212 = vector.broadcast %210 : f32 to vector<16x128xf32>
    %213 = arith.mulf %212, %211 : vector<16x128xf32>
    %214 = arith.addf %209, %213 : vector<16x128xf32>
    %c39 = arith.constant 39 : index
    %215 = memref.load %arg2[%c39] : memref<196xf32, #tpu.memory_space<smem>>
    %216 = vector.extract_strided_slice %194 {offsets = [0, 4], sizes = [16, 128], strides = [1, 1]} : vector<16x134xf32> to vector<16x128xf32>
    %217 = vector.broadcast %215 : f32 to vector<16x128xf32>
    %218 = arith.mulf %217, %216 : vector<16x128xf32>
    %219 = arith.addf %214, %218 : vector<16x128xf32>
    %c40 = arith.constant 40 : index
    %220 = memref.load %arg2[%c40] : memref<196xf32, #tpu.memory_space<smem>>
    %221 = vector.extract_strided_slice %194 {offsets = [0, 5], sizes = [16, 128], strides = [1, 1]} : vector<16x134xf32> to vector<16x128xf32>
    %222 = vector.broadcast %220 : f32 to vector<16x128xf32>
    %223 = arith.mulf %222, %221 : vector<16x128xf32>
    %224 = arith.addf %219, %223 : vector<16x128xf32>
    %c41 = arith.constant 41 : index
    %225 = memref.load %arg2[%c41] : memref<196xf32, #tpu.memory_space<smem>>
    %226 = vector.extract_strided_slice %194 {offsets = [0, 6], sizes = [16, 128], strides = [1, 1]} : vector<16x134xf32> to vector<16x128xf32>
    %227 = vector.broadcast %225 : f32 to vector<16x128xf32>
    %228 = arith.mulf %227, %226 : vector<16x128xf32>
    %229 = arith.addf %224, %228 : vector<16x128xf32>
    %230 = vector.extract_strided_slice %9 {offsets = [6, 0], sizes = [16, 134], strides = [1, 1]} : vector<22x134xf32> to vector<16x134xf32>
    %c42 = arith.constant 42 : index
    %231 = memref.load %arg2[%c42] : memref<196xf32, #tpu.memory_space<smem>>
    %232 = vector.extract_strided_slice %230 {offsets = [0, 0], sizes = [16, 128], strides = [1, 1]} : vector<16x134xf32> to vector<16x128xf32>
    %233 = vector.broadcast %231 : f32 to vector<16x128xf32>
    %234 = arith.mulf %233, %232 : vector<16x128xf32>
    %235 = arith.addf %229, %234 : vector<16x128xf32>
    %c43 = arith.constant 43 : index
    %236 = memref.load %arg2[%c43] : memref<196xf32, #tpu.memory_space<smem>>
    %237 = vector.extract_strided_slice %230 {offsets = [0, 1], sizes = [16, 128], strides = [1, 1]} : vector<16x134xf32> to vector<16x128xf32>
    %238 = vector.broadcast %236 : f32 to vector<16x128xf32>
    %239 = arith.mulf %238, %237 : vector<16x128xf32>
    %240 = arith.addf %235, %239 : vector<16x128xf32>
    %c44 = arith.constant 44 : index
    %241 = memref.load %arg2[%c44] : memref<196xf32, #tpu.memory_space<smem>>
    %242 = vector.extract_strided_slice %230 {offsets = [0, 2], sizes = [16, 128], strides = [1, 1]} : vector<16x134xf32> to vector<16x128xf32>
    %243 = vector.broadcast %241 : f32 to vector<16x128xf32>
    %244 = arith.mulf %243, %242 : vector<16x128xf32>
    %245 = arith.addf %240, %244 : vector<16x128xf32>
    %c45 = arith.constant 45 : index
    %246 = memref.load %arg2[%c45] : memref<196xf32, #tpu.memory_space<smem>>
    %247 = vector.extract_strided_slice %230 {offsets = [0, 3], sizes = [16, 128], strides = [1, 1]} : vector<16x134xf32> to vector<16x128xf32>
    %248 = vector.broadcast %246 : f32 to vector<16x128xf32>
    %249 = arith.mulf %248, %247 : vector<16x128xf32>
    %250 = arith.addf %245, %249 : vector<16x128xf32>
    %c46 = arith.constant 46 : index
    %251 = memref.load %arg2[%c46] : memref<196xf32, #tpu.memory_space<smem>>
    %252 = vector.extract_strided_slice %230 {offsets = [0, 4], sizes = [16, 128], strides = [1, 1]} : vector<16x134xf32> to vector<16x128xf32>
    %253 = vector.broadcast %251 : f32 to vector<16x128xf32>
    %254 = arith.mulf %253, %252 : vector<16x128xf32>
    %255 = arith.addf %250, %254 : vector<16x128xf32>
    %c47 = arith.constant 47 : index
    %256 = memref.load %arg2[%c47] : memref<196xf32, #tpu.memory_space<smem>>
    %257 = vector.extract_strided_slice %230 {offsets = [0, 5], sizes = [16, 128], strides = [1, 1]} : vector<16x134xf32> to vector<16x128xf32>
    %258 = vector.broadcast %256 : f32 to vector<16x128xf32>
    %259 = arith.mulf %258, %257 : vector<16x128xf32>
    %260 = arith.addf %255, %259 : vector<16x128xf32>
    %c48 = arith.constant 48 : index
    %261 = memref.load %arg2[%c48] : memref<196xf32, #tpu.memory_space<smem>>
    %262 = vector.extract_strided_slice %230 {offsets = [0, 6], sizes = [16, 128], strides = [1, 1]} : vector<16x134xf32> to vector<16x128xf32>
    %263 = vector.broadcast %261 : f32 to vector<16x128xf32>
    %264 = arith.mulf %263, %262 : vector<16x128xf32>
    %265 = arith.addf %260, %264 : vector<16x128xf32>
    %266 = vector.extract_strided_slice %11 {offsets = [0, 0], sizes = [16, 134], strides = [1, 1]} : vector<22x134xf32> to vector<16x134xf32>
    %c49 = arith.constant 49 : index
    %267 = memref.load %arg2[%c49] : memref<196xf32, #tpu.memory_space<smem>>
    %268 = vector.extract_strided_slice %266 {offsets = [0, 0], sizes = [16, 128], strides = [1, 1]} : vector<16x134xf32> to vector<16x128xf32>
    %269 = vector.broadcast %267 : f32 to vector<16x128xf32>
    %270 = arith.mulf %269, %268 : vector<16x128xf32>
    %271 = arith.addf %265, %270 : vector<16x128xf32>
    %c50 = arith.constant 50 : index
    %272 = memref.load %arg2[%c50] : memref<196xf32, #tpu.memory_space<smem>>
    %273 = vector.extract_strided_slice %266 {offsets = [0, 1], sizes = [16, 128], strides = [1, 1]} : vector<16x134xf32> to vector<16x128xf32>
    %274 = vector.broadcast %272 : f32 to vector<16x128xf32>
    %275 = arith.mulf %274, %273 : vector<16x128xf32>
    %276 = arith.addf %271, %275 : vector<16x128xf32>
    %c51 = arith.constant 51 : index
    %277 = memref.load %arg2[%c51] : memref<196xf32, #tpu.memory_space<smem>>
    %278 = vector.extract_strided_slice %266 {offsets = [0, 2], sizes = [16, 128], strides = [1, 1]} : vector<16x134xf32> to vector<16x128xf32>
    %279 = vector.broadcast %277 : f32 to vector<16x128xf32>
    %280 = arith.mulf %279, %278 : vector<16x128xf32>
    %281 = arith.addf %276, %280 : vector<16x128xf32>
    %c52 = arith.constant 52 : index
    %282 = memref.load %arg2[%c52] : memref<196xf32, #tpu.memory_space<smem>>
    %283 = vector.extract_strided_slice %266 {offsets = [0, 3], sizes = [16, 128], strides = [1, 1]} : vector<16x134xf32> to vector<16x128xf32>
    %284 = vector.broadcast %282 : f32 to vector<16x128xf32>
    %285 = arith.mulf %284, %283 : vector<16x128xf32>
    %286 = arith.addf %281, %285 : vector<16x128xf32>
    %c53 = arith.constant 53 : index
    %287 = memref.load %arg2[%c53] : memref<196xf32, #tpu.memory_space<smem>>
    %288 = vector.extract_strided_slice %266 {offsets = [0, 4], sizes = [16, 128], strides = [1, 1]} : vector<16x134xf32> to vector<16x128xf32>
    %289 = vector.broadcast %287 : f32 to vector<16x128xf32>
    %290 = arith.mulf %289, %288 : vector<16x128xf32>
    %291 = arith.addf %286, %290 : vector<16x128xf32>
    %c54 = arith.constant 54 : index
    %292 = memref.load %arg2[%c54] : memref<196xf32, #tpu.memory_space<smem>>
    %293 = vector.extract_strided_slice %266 {offsets = [0, 5], sizes = [16, 128], strides = [1, 1]} : vector<16x134xf32> to vector<16x128xf32>
    %294 = vector.broadcast %292 : f32 to vector<16x128xf32>
    %295 = arith.mulf %294, %293 : vector<16x128xf32>
    %296 = arith.addf %291, %295 : vector<16x128xf32>
    %c55 = arith.constant 55 : index
    %297 = memref.load %arg2[%c55] : memref<196xf32, #tpu.memory_space<smem>>
    %298 = vector.extract_strided_slice %266 {offsets = [0, 6], sizes = [16, 128], strides = [1, 1]} : vector<16x134xf32> to vector<16x128xf32>
    %299 = vector.broadcast %297 : f32 to vector<16x128xf32>
    %300 = arith.mulf %299, %298 : vector<16x128xf32>
    %301 = arith.addf %296, %300 : vector<16x128xf32>
    %302 = vector.extract_strided_slice %11 {offsets = [1, 0], sizes = [16, 134], strides = [1, 1]} : vector<22x134xf32> to vector<16x134xf32>
    %c56 = arith.constant 56 : index
    %303 = memref.load %arg2[%c56] : memref<196xf32, #tpu.memory_space<smem>>
    %304 = vector.extract_strided_slice %302 {offsets = [0, 0], sizes = [16, 128], strides = [1, 1]} : vector<16x134xf32> to vector<16x128xf32>
    %305 = vector.broadcast %303 : f32 to vector<16x128xf32>
    %306 = arith.mulf %305, %304 : vector<16x128xf32>
    %307 = arith.addf %301, %306 : vector<16x128xf32>
    %c57 = arith.constant 57 : index
    %308 = memref.load %arg2[%c57] : memref<196xf32, #tpu.memory_space<smem>>
    %309 = vector.extract_strided_slice %302 {offsets = [0, 1], sizes = [16, 128], strides = [1, 1]} : vector<16x134xf32> to vector<16x128xf32>
    %310 = vector.broadcast %308 : f32 to vector<16x128xf32>
    %311 = arith.mulf %310, %309 : vector<16x128xf32>
    %312 = arith.addf %307, %311 : vector<16x128xf32>
    %c58 = arith.constant 58 : index
    %313 = memref.load %arg2[%c58] : memref<196xf32, #tpu.memory_space<smem>>
    %314 = vector.extract_strided_slice %302 {offsets = [0, 2], sizes = [16, 128], strides = [1, 1]} : vector<16x134xf32> to vector<16x128xf32>
    %315 = vector.broadcast %313 : f32 to vector<16x128xf32>
    %316 = arith.mulf %315, %314 : vector<16x128xf32>
    %317 = arith.addf %312, %316 : vector<16x128xf32>
    %c59 = arith.constant 59 : index
    %318 = memref.load %arg2[%c59] : memref<196xf32, #tpu.memory_space<smem>>
    %319 = vector.extract_strided_slice %302 {offsets = [0, 3], sizes = [16, 128], strides = [1, 1]} : vector<16x134xf32> to vector<16x128xf32>
    %320 = vector.broadcast %318 : f32 to vector<16x128xf32>
    %321 = arith.mulf %320, %319 : vector<16x128xf32>
    %322 = arith.addf %317, %321 : vector<16x128xf32>
    %c60 = arith.constant 60 : index
    %323 = memref.load %arg2[%c60] : memref<196xf32, #tpu.memory_space<smem>>
    %324 = vector.extract_strided_slice %302 {offsets = [0, 4], sizes = [16, 128], strides = [1, 1]} : vector<16x134xf32> to vector<16x128xf32>
    %325 = vector.broadcast %323 : f32 to vector<16x128xf32>
    %326 = arith.mulf %325, %324 : vector<16x128xf32>
    %327 = arith.addf %322, %326 : vector<16x128xf32>
    %c61 = arith.constant 61 : index
    %328 = memref.load %arg2[%c61] : memref<196xf32, #tpu.memory_space<smem>>
    %329 = vector.extract_strided_slice %302 {offsets = [0, 5], sizes = [16, 128], strides = [1, 1]} : vector<16x134xf32> to vector<16x128xf32>
    %330 = vector.broadcast %328 : f32 to vector<16x128xf32>
    %331 = arith.mulf %330, %329 : vector<16x128xf32>
    %332 = arith.addf %327, %331 : vector<16x128xf32>
    %c62 = arith.constant 62 : index
    %333 = memref.load %arg2[%c62] : memref<196xf32, #tpu.memory_space<smem>>
    %334 = vector.extract_strided_slice %302 {offsets = [0, 6], sizes = [16, 128], strides = [1, 1]} : vector<16x134xf32> to vector<16x128xf32>
    %335 = vector.broadcast %333 : f32 to vector<16x128xf32>
    %336 = arith.mulf %335, %334 : vector<16x128xf32>
    %337 = arith.addf %332, %336 : vector<16x128xf32>
    %338 = vector.extract_strided_slice %11 {offsets = [2, 0], sizes = [16, 134], strides = [1, 1]} : vector<22x134xf32> to vector<16x134xf32>
    %c63 = arith.constant 63 : index
    %339 = memref.load %arg2[%c63] : memref<196xf32, #tpu.memory_space<smem>>
    %340 = vector.extract_strided_slice %338 {offsets = [0, 0], sizes = [16, 128], strides = [1, 1]} : vector<16x134xf32> to vector<16x128xf32>
    %341 = vector.broadcast %339 : f32 to vector<16x128xf32>
    %342 = arith.mulf %341, %340 : vector<16x128xf32>
    %343 = arith.addf %337, %342 : vector<16x128xf32>
    %c64 = arith.constant 64 : index
    %344 = memref.load %arg2[%c64] : memref<196xf32, #tpu.memory_space<smem>>
    %345 = vector.extract_strided_slice %338 {offsets = [0, 1], sizes = [16, 128], strides = [1, 1]} : vector<16x134xf32> to vector<16x128xf32>
    %346 = vector.broadcast %344 : f32 to vector<16x128xf32>
    %347 = arith.mulf %346, %345 : vector<16x128xf32>
    %348 = arith.addf %343, %347 : vector<16x128xf32>
    %c65 = arith.constant 65 : index
    %349 = memref.load %arg2[%c65] : memref<196xf32, #tpu.memory_space<smem>>
    %350 = vector.extract_strided_slice %338 {offsets = [0, 2], sizes = [16, 128], strides = [1, 1]} : vector<16x134xf32> to vector<16x128xf32>
    %351 = vector.broadcast %349 : f32 to vector<16x128xf32>
    %352 = arith.mulf %351, %350 : vector<16x128xf32>
    %353 = arith.addf %348, %352 : vector<16x128xf32>
    %c66 = arith.constant 66 : index
    %354 = memref.load %arg2[%c66] : memref<196xf32, #tpu.memory_space<smem>>
    %355 = vector.extract_strided_slice %338 {offsets = [0, 3], sizes = [16, 128], strides = [1, 1]} : vector<16x134xf32> to vector<16x128xf32>
    %356 = vector.broadcast %354 : f32 to vector<16x128xf32>
    %357 = arith.mulf %356, %355 : vector<16x128xf32>
    %358 = arith.addf %353, %357 : vector<16x128xf32>
    %c67 = arith.constant 67 : index
    %359 = memref.load %arg2[%c67] : memref<196xf32, #tpu.memory_space<smem>>
    %360 = vector.extract_strided_slice %338 {offsets = [0, 4], sizes = [16, 128], strides = [1, 1]} : vector<16x134xf32> to vector<16x128xf32>
    %361 = vector.broadcast %359 : f32 to vector<16x128xf32>
    %362 = arith.mulf %361, %360 : vector<16x128xf32>
    %363 = arith.addf %358, %362 : vector<16x128xf32>
    %c68 = arith.constant 68 : index
    %364 = memref.load %arg2[%c68] : memref<196xf32, #tpu.memory_space<smem>>
    %365 = vector.extract_strided_slice %338 {offsets = [0, 5], sizes = [16, 128], strides = [1, 1]} : vector<16x134xf32> to vector<16x128xf32>
    %366 = vector.broadcast %364 : f32 to vector<16x128xf32>
    %367 = arith.mulf %366, %365 : vector<16x128xf32>
    %368 = arith.addf %363, %367 : vector<16x128xf32>
    %c69 = arith.constant 69 : index
    %369 = memref.load %arg2[%c69] : memref<196xf32, #tpu.memory_space<smem>>
    %370 = vector.extract_strided_slice %338 {offsets = [0, 6], sizes = [16, 128], strides = [1, 1]} : vector<16x134xf32> to vector<16x128xf32>
    %371 = vector.broadcast %369 : f32 to vector<16x128xf32>
    %372 = arith.mulf %371, %370 : vector<16x128xf32>
    %373 = arith.addf %368, %372 : vector<16x128xf32>
    %374 = vector.extract_strided_slice %11 {offsets = [3, 0], sizes = [16, 134], strides = [1, 1]} : vector<22x134xf32> to vector<16x134xf32>
    %c70 = arith.constant 70 : index
    %375 = memref.load %arg2[%c70] : memref<196xf32, #tpu.memory_space<smem>>
    %376 = vector.extract_strided_slice %374 {offsets = [0, 0], sizes = [16, 128], strides = [1, 1]} : vector<16x134xf32> to vector<16x128xf32>
    %377 = vector.broadcast %375 : f32 to vector<16x128xf32>
    %378 = arith.mulf %377, %376 : vector<16x128xf32>
    %379 = arith.addf %373, %378 : vector<16x128xf32>
    %c71 = arith.constant 71 : index
    %380 = memref.load %arg2[%c71] : memref<196xf32, #tpu.memory_space<smem>>
    %381 = vector.extract_strided_slice %374 {offsets = [0, 1], sizes = [16, 128], strides = [1, 1]} : vector<16x134xf32> to vector<16x128xf32>
    %382 = vector.broadcast %380 : f32 to vector<16x128xf32>
    %383 = arith.mulf %382, %381 : vector<16x128xf32>
    %384 = arith.addf %379, %383 : vector<16x128xf32>
    %c72 = arith.constant 72 : index
    %385 = memref.load %arg2[%c72] : memref<196xf32, #tpu.memory_space<smem>>
    %386 = vector.extract_strided_slice %374 {offsets = [0, 2], sizes = [16, 128], strides = [1, 1]} : vector<16x134xf32> to vector<16x128xf32>
    %387 = vector.broadcast %385 : f32 to vector<16x128xf32>
    %388 = arith.mulf %387, %386 : vector<16x128xf32>
    %389 = arith.addf %384, %388 : vector<16x128xf32>
    %c73 = arith.constant 73 : index
    %390 = memref.load %arg2[%c73] : memref<196xf32, #tpu.memory_space<smem>>
    %391 = vector.extract_strided_slice %374 {offsets = [0, 3], sizes = [16, 128], strides = [1, 1]} : vector<16x134xf32> to vector<16x128xf32>
    %392 = vector.broadcast %390 : f32 to vector<16x128xf32>
    %393 = arith.mulf %392, %391 : vector<16x128xf32>
    %394 = arith.addf %389, %393 : vector<16x128xf32>
    %c74 = arith.constant 74 : index
    %395 = memref.load %arg2[%c74] : memref<196xf32, #tpu.memory_space<smem>>
    %396 = vector.extract_strided_slice %374 {offsets = [0, 4], sizes = [16, 128], strides = [1, 1]} : vector<16x134xf32> to vector<16x128xf32>
    %397 = vector.broadcast %395 : f32 to vector<16x128xf32>
    %398 = arith.mulf %397, %396 : vector<16x128xf32>
    %399 = arith.addf %394, %398 : vector<16x128xf32>
    %c75 = arith.constant 75 : index
    %400 = memref.load %arg2[%c75] : memref<196xf32, #tpu.memory_space<smem>>
    %401 = vector.extract_strided_slice %374 {offsets = [0, 5], sizes = [16, 128], strides = [1, 1]} : vector<16x134xf32> to vector<16x128xf32>
    %402 = vector.broadcast %400 : f32 to vector<16x128xf32>
    %403 = arith.mulf %402, %401 : vector<16x128xf32>
    %404 = arith.addf %399, %403 : vector<16x128xf32>
    %c76 = arith.constant 76 : index
    %405 = memref.load %arg2[%c76] : memref<196xf32, #tpu.memory_space<smem>>
    %406 = vector.extract_strided_slice %374 {offsets = [0, 6], sizes = [16, 128], strides = [1, 1]} : vector<16x134xf32> to vector<16x128xf32>
    %407 = vector.broadcast %405 : f32 to vector<16x128xf32>
    %408 = arith.mulf %407, %406 : vector<16x128xf32>
    %409 = arith.addf %404, %408 : vector<16x128xf32>
    %410 = vector.extract_strided_slice %11 {offsets = [4, 0], sizes = [16, 134], strides = [1, 1]} : vector<22x134xf32> to vector<16x134xf32>
    %c77 = arith.constant 77 : index
    %411 = memref.load %arg2[%c77] : memref<196xf32, #tpu.memory_space<smem>>
    %412 = vector.extract_strided_slice %410 {offsets = [0, 0], sizes = [16, 128], strides = [1, 1]} : vector<16x134xf32> to vector<16x128xf32>
    %413 = vector.broadcast %411 : f32 to vector<16x128xf32>
    %414 = arith.mulf %413, %412 : vector<16x128xf32>
    %415 = arith.addf %409, %414 : vector<16x128xf32>
    %c78 = arith.constant 78 : index
    %416 = memref.load %arg2[%c78] : memref<196xf32, #tpu.memory_space<smem>>
    %417 = vector.extract_strided_slice %410 {offsets = [0, 1], sizes = [16, 128], strides = [1, 1]} : vector<16x134xf32> to vector<16x128xf32>
    %418 = vector.broadcast %416 : f32 to vector<16x128xf32>
    %419 = arith.mulf %418, %417 : vector<16x128xf32>
    %420 = arith.addf %415, %419 : vector<16x128xf32>
    %c79 = arith.constant 79 : index
    %421 = memref.load %arg2[%c79] : memref<196xf32, #tpu.memory_space<smem>>
    %422 = vector.extract_strided_slice %410 {offsets = [0, 2], sizes = [16, 128], strides = [1, 1]} : vector<16x134xf32> to vector<16x128xf32>
    %423 = vector.broadcast %421 : f32 to vector<16x128xf32>
    %424 = arith.mulf %423, %422 : vector<16x128xf32>
    %425 = arith.addf %420, %424 : vector<16x128xf32>
    %c80 = arith.constant 80 : index
    %426 = memref.load %arg2[%c80] : memref<196xf32, #tpu.memory_space<smem>>
    %427 = vector.extract_strided_slice %410 {offsets = [0, 3], sizes = [16, 128], strides = [1, 1]} : vector<16x134xf32> to vector<16x128xf32>
    %428 = vector.broadcast %426 : f32 to vector<16x128xf32>
    %429 = arith.mulf %428, %427 : vector<16x128xf32>
    %430 = arith.addf %425, %429 : vector<16x128xf32>
    %c81 = arith.constant 81 : index
    %431 = memref.load %arg2[%c81] : memref<196xf32, #tpu.memory_space<smem>>
    %432 = vector.extract_strided_slice %410 {offsets = [0, 4], sizes = [16, 128], strides = [1, 1]} : vector<16x134xf32> to vector<16x128xf32>
    %433 = vector.broadcast %431 : f32 to vector<16x128xf32>
    %434 = arith.mulf %433, %432 : vector<16x128xf32>
    %435 = arith.addf %430, %434 : vector<16x128xf32>
    %c82 = arith.constant 82 : index
    %436 = memref.load %arg2[%c82] : memref<196xf32, #tpu.memory_space<smem>>
    %437 = vector.extract_strided_slice %410 {offsets = [0, 5], sizes = [16, 128], strides = [1, 1]} : vector<16x134xf32> to vector<16x128xf32>
    %438 = vector.broadcast %436 : f32 to vector<16x128xf32>
    %439 = arith.mulf %438, %437 : vector<16x128xf32>
    %440 = arith.addf %435, %439 : vector<16x128xf32>
    %c83 = arith.constant 83 : index
    %441 = memref.load %arg2[%c83] : memref<196xf32, #tpu.memory_space<smem>>
    %442 = vector.extract_strided_slice %410 {offsets = [0, 6], sizes = [16, 128], strides = [1, 1]} : vector<16x134xf32> to vector<16x128xf32>
    %443 = vector.broadcast %441 : f32 to vector<16x128xf32>
    %444 = arith.mulf %443, %442 : vector<16x128xf32>
    %445 = arith.addf %440, %444 : vector<16x128xf32>
    %446 = vector.extract_strided_slice %11 {offsets = [5, 0], sizes = [16, 134], strides = [1, 1]} : vector<22x134xf32> to vector<16x134xf32>
    %c84 = arith.constant 84 : index
    %447 = memref.load %arg2[%c84] : memref<196xf32, #tpu.memory_space<smem>>
    %448 = vector.extract_strided_slice %446 {offsets = [0, 0], sizes = [16, 128], strides = [1, 1]} : vector<16x134xf32> to vector<16x128xf32>
    %449 = vector.broadcast %447 : f32 to vector<16x128xf32>
    %450 = arith.mulf %449, %448 : vector<16x128xf32>
    %451 = arith.addf %445, %450 : vector<16x128xf32>
    %c85 = arith.constant 85 : index
    %452 = memref.load %arg2[%c85] : memref<196xf32, #tpu.memory_space<smem>>
    %453 = vector.extract_strided_slice %446 {offsets = [0, 1], sizes = [16, 128], strides = [1, 1]} : vector<16x134xf32> to vector<16x128xf32>
    %454 = vector.broadcast %452 : f32 to vector<16x128xf32>
    %455 = arith.mulf %454, %453 : vector<16x128xf32>
    %456 = arith.addf %451, %455 : vector<16x128xf32>
    %c86 = arith.constant 86 : index
    %457 = memref.load %arg2[%c86] : memref<196xf32, #tpu.memory_space<smem>>
    %458 = vector.extract_strided_slice %446 {offsets = [0, 2], sizes = [16, 128], strides = [1, 1]} : vector<16x134xf32> to vector<16x128xf32>
    %459 = vector.broadcast %457 : f32 to vector<16x128xf32>
    %460 = arith.mulf %459, %458 : vector<16x128xf32>
    %461 = arith.addf %456, %460 : vector<16x128xf32>
    %c87 = arith.constant 87 : index
    %462 = memref.load %arg2[%c87] : memref<196xf32, #tpu.memory_space<smem>>
    %463 = vector.extract_strided_slice %446 {offsets = [0, 3], sizes = [16, 128], strides = [1, 1]} : vector<16x134xf32> to vector<16x128xf32>
    %464 = vector.broadcast %462 : f32 to vector<16x128xf32>
    %465 = arith.mulf %464, %463 : vector<16x128xf32>
    %466 = arith.addf %461, %465 : vector<16x128xf32>
    %c88 = arith.constant 88 : index
    %467 = memref.load %arg2[%c88] : memref<196xf32, #tpu.memory_space<smem>>
    %468 = vector.extract_strided_slice %446 {offsets = [0, 4], sizes = [16, 128], strides = [1, 1]} : vector<16x134xf32> to vector<16x128xf32>
    %469 = vector.broadcast %467 : f32 to vector<16x128xf32>
    %470 = arith.mulf %469, %468 : vector<16x128xf32>
    %471 = arith.addf %466, %470 : vector<16x128xf32>
    %c89 = arith.constant 89 : index
    %472 = memref.load %arg2[%c89] : memref<196xf32, #tpu.memory_space<smem>>
    %473 = vector.extract_strided_slice %446 {offsets = [0, 5], sizes = [16, 128], strides = [1, 1]} : vector<16x134xf32> to vector<16x128xf32>
    %474 = vector.broadcast %472 : f32 to vector<16x128xf32>
    %475 = arith.mulf %474, %473 : vector<16x128xf32>
    %476 = arith.addf %471, %475 : vector<16x128xf32>
    %c90 = arith.constant 90 : index
    %477 = memref.load %arg2[%c90] : memref<196xf32, #tpu.memory_space<smem>>
    %478 = vector.extract_strided_slice %446 {offsets = [0, 6], sizes = [16, 128], strides = [1, 1]} : vector<16x134xf32> to vector<16x128xf32>
    %479 = vector.broadcast %477 : f32 to vector<16x128xf32>
    %480 = arith.mulf %479, %478 : vector<16x128xf32>
    %481 = arith.addf %476, %480 : vector<16x128xf32>
    %482 = vector.extract_strided_slice %11 {offsets = [6, 0], sizes = [16, 134], strides = [1, 1]} : vector<22x134xf32> to vector<16x134xf32>
    %c91 = arith.constant 91 : index
    %483 = memref.load %arg2[%c91] : memref<196xf32, #tpu.memory_space<smem>>
    %484 = vector.extract_strided_slice %482 {offsets = [0, 0], sizes = [16, 128], strides = [1, 1]} : vector<16x134xf32> to vector<16x128xf32>
    %485 = vector.broadcast %483 : f32 to vector<16x128xf32>
    %486 = arith.mulf %485, %484 : vector<16x128xf32>
    %487 = arith.addf %481, %486 : vector<16x128xf32>
    %c92 = arith.constant 92 : index
    %488 = memref.load %arg2[%c92] : memref<196xf32, #tpu.memory_space<smem>>
    %489 = vector.extract_strided_slice %482 {offsets = [0, 1], sizes = [16, 128], strides = [1, 1]} : vector<16x134xf32> to vector<16x128xf32>
    %490 = vector.broadcast %488 : f32 to vector<16x128xf32>
    %491 = arith.mulf %490, %489 : vector<16x128xf32>
    %492 = arith.addf %487, %491 : vector<16x128xf32>
    %c93 = arith.constant 93 : index
    %493 = memref.load %arg2[%c93] : memref<196xf32, #tpu.memory_space<smem>>
    %494 = vector.extract_strided_slice %482 {offsets = [0, 2], sizes = [16, 128], strides = [1, 1]} : vector<16x134xf32> to vector<16x128xf32>
    %495 = vector.broadcast %493 : f32 to vector<16x128xf32>
    %496 = arith.mulf %495, %494 : vector<16x128xf32>
    %497 = arith.addf %492, %496 : vector<16x128xf32>
    %c94 = arith.constant 94 : index
    %498 = memref.load %arg2[%c94] : memref<196xf32, #tpu.memory_space<smem>>
    %499 = vector.extract_strided_slice %482 {offsets = [0, 3], sizes = [16, 128], strides = [1, 1]} : vector<16x134xf32> to vector<16x128xf32>
    %500 = vector.broadcast %498 : f32 to vector<16x128xf32>
    %501 = arith.mulf %500, %499 : vector<16x128xf32>
    %502 = arith.addf %497, %501 : vector<16x128xf32>
    %c95 = arith.constant 95 : index
    %503 = memref.load %arg2[%c95] : memref<196xf32, #tpu.memory_space<smem>>
    %504 = vector.extract_strided_slice %482 {offsets = [0, 4], sizes = [16, 128], strides = [1, 1]} : vector<16x134xf32> to vector<16x128xf32>
    %505 = vector.broadcast %503 : f32 to vector<16x128xf32>
    %506 = arith.mulf %505, %504 : vector<16x128xf32>
    %507 = arith.addf %502, %506 : vector<16x128xf32>
    %c96 = arith.constant 96 : index
    %508 = memref.load %arg2[%c96] : memref<196xf32, #tpu.memory_space<smem>>
    %509 = vector.extract_strided_slice %482 {offsets = [0, 5], sizes = [16, 128], strides = [1, 1]} : vector<16x134xf32> to vector<16x128xf32>
    %510 = vector.broadcast %508 : f32 to vector<16x128xf32>
    %511 = arith.mulf %510, %509 : vector<16x128xf32>
    %512 = arith.addf %507, %511 : vector<16x128xf32>
    %c97 = arith.constant 97 : index
    %513 = memref.load %arg2[%c97] : memref<196xf32, #tpu.memory_space<smem>>
    %514 = vector.extract_strided_slice %482 {offsets = [0, 6], sizes = [16, 128], strides = [1, 1]} : vector<16x134xf32> to vector<16x128xf32>
    %515 = vector.broadcast %513 : f32 to vector<16x128xf32>
    %516 = arith.mulf %515, %514 : vector<16x128xf32>
    %517 = arith.addf %512, %516 : vector<16x128xf32>
    %c0_9 = arith.constant 0 : index
    %c0_10 = arith.constant 0 : index
    %c0_11 = arith.constant 0 : index
    %c0_12 = arith.constant 0 : index
    %518 = vector.load %arg4[%c0_9, %c0_10, %c0_11, %c0_12] : memref<1x2x16x128xf32, #tpu.memory_space<vmem>>, vector<1x1x16x128xf32>
    %519 = vector.shape_cast %518 : vector<1x1x16x128xf32> to vector<16x128xf32>
    %520 = vector.shape_cast %517 : vector<16x128xf32> to vector<1x1x16x128xf32>
    tpu.vector_store %arg4[%c0_9, %c0_10, %c0_11, %c0_12], %520 {strides = array<i32>} : memref<1x2x16x128xf32, #tpu.memory_space<vmem>>, vector<1x1x16x128xf32>,
    %c1_13 = arith.constant 1 : index
    %521 = memref.load %arg3[%c1_13] : memref<2xf32, #tpu.memory_space<smem>>
    %522 = vector.broadcast %521 : f32 to vector<16x128xf32>
    %523 = vector.extract_strided_slice %9 {offsets = [0, 0], sizes = [16, 134], strides = [1, 1]} : vector<22x134xf32> to vector<16x134xf32>
    %c98 = arith.constant 98 : index
    %524 = memref.load %arg2[%c98] : memref<196xf32, #tpu.memory_space<smem>>
    %525 = vector.extract_strided_slice %523 {offsets = [0, 0], sizes = [16, 128], strides = [1, 1]} : vector<16x134xf32> to vector<16x128xf32>
    %526 = vector.broadcast %524 : f32 to vector<16x128xf32>
    %527 = arith.mulf %526, %525 : vector<16x128xf32>
    %528 = arith.addf %522, %527 : vector<16x128xf32>
    %c99 = arith.constant 99 : index
    %529 = memref.load %arg2[%c99] : memref<196xf32, #tpu.memory_space<smem>>
    %530 = vector.extract_strided_slice %523 {offsets = [0, 1], sizes = [16, 128], strides = [1, 1]} : vector<16x134xf32> to vector<16x128xf32>
    %531 = vector.broadcast %529 : f32 to vector<16x128xf32>
    %532 = arith.mulf %531, %530 : vector<16x128xf32>
    %533 = arith.addf %528, %532 : vector<16x128xf32>
    %c100 = arith.constant 100 : index
    %534 = memref.load %arg2[%c100] : memref<196xf32, #tpu.memory_space<smem>>
    %535 = vector.extract_strided_slice %523 {offsets = [0, 2], sizes = [16, 128], strides = [1, 1]} : vector<16x134xf32> to vector<16x128xf32>
    %536 = vector.broadcast %534 : f32 to vector<16x128xf32>
    %537 = arith.mulf %536, %535 : vector<16x128xf32>
    %538 = arith.addf %533, %537 : vector<16x128xf32>
    %c101 = arith.constant 101 : index
    %539 = memref.load %arg2[%c101] : memref<196xf32, #tpu.memory_space<smem>>
    %540 = vector.extract_strided_slice %523 {offsets = [0, 3], sizes = [16, 128], strides = [1, 1]} : vector<16x134xf32> to vector<16x128xf32>
    %541 = vector.broadcast %539 : f32 to vector<16x128xf32>
    %542 = arith.mulf %541, %540 : vector<16x128xf32>
    %543 = arith.addf %538, %542 : vector<16x128xf32>
    %c102 = arith.constant 102 : index
    %544 = memref.load %arg2[%c102] : memref<196xf32, #tpu.memory_space<smem>>
    %545 = vector.extract_strided_slice %523 {offsets = [0, 4], sizes = [16, 128], strides = [1, 1]} : vector<16x134xf32> to vector<16x128xf32>
    %546 = vector.broadcast %544 : f32 to vector<16x128xf32>
    %547 = arith.mulf %546, %545 : vector<16x128xf32>
    %548 = arith.addf %543, %547 : vector<16x128xf32>
    %c103 = arith.constant 103 : index
    %549 = memref.load %arg2[%c103] : memref<196xf32, #tpu.memory_space<smem>>
    %550 = vector.extract_strided_slice %523 {offsets = [0, 5], sizes = [16, 128], strides = [1, 1]} : vector<16x134xf32> to vector<16x128xf32>
    %551 = vector.broadcast %549 : f32 to vector<16x128xf32>
    %552 = arith.mulf %551, %550 : vector<16x128xf32>
    %553 = arith.addf %548, %552 : vector<16x128xf32>
    %c104 = arith.constant 104 : index
    %554 = memref.load %arg2[%c104] : memref<196xf32, #tpu.memory_space<smem>>
    %555 = vector.extract_strided_slice %523 {offsets = [0, 6], sizes = [16, 128], strides = [1, 1]} : vector<16x134xf32> to vector<16x128xf32>
    %556 = vector.broadcast %554 : f32 to vector<16x128xf32>
    %557 = arith.mulf %556, %555 : vector<16x128xf32>
    %558 = arith.addf %553, %557 : vector<16x128xf32>
    %559 = vector.extract_strided_slice %9 {offsets = [1, 0], sizes = [16, 134], strides = [1, 1]} : vector<22x134xf32> to vector<16x134xf32>
    %c105 = arith.constant 105 : index
    %560 = memref.load %arg2[%c105] : memref<196xf32, #tpu.memory_space<smem>>
    %561 = vector.extract_strided_slice %559 {offsets = [0, 0], sizes = [16, 128], strides = [1, 1]} : vector<16x134xf32> to vector<16x128xf32>
    %562 = vector.broadcast %560 : f32 to vector<16x128xf32>
    %563 = arith.mulf %562, %561 : vector<16x128xf32>
    %564 = arith.addf %558, %563 : vector<16x128xf32>
    %c106 = arith.constant 106 : index
    %565 = memref.load %arg2[%c106] : memref<196xf32, #tpu.memory_space<smem>>
    %566 = vector.extract_strided_slice %559 {offsets = [0, 1], sizes = [16, 128], strides = [1, 1]} : vector<16x134xf32> to vector<16x128xf32>
    %567 = vector.broadcast %565 : f32 to vector<16x128xf32>
    %568 = arith.mulf %567, %566 : vector<16x128xf32>
    %569 = arith.addf %564, %568 : vector<16x128xf32>
    %c107 = arith.constant 107 : index
    %570 = memref.load %arg2[%c107] : memref<196xf32, #tpu.memory_space<smem>>
    %571 = vector.extract_strided_slice %559 {offsets = [0, 2], sizes = [16, 128], strides = [1, 1]} : vector<16x134xf32> to vector<16x128xf32>
    %572 = vector.broadcast %570 : f32 to vector<16x128xf32>
    %573 = arith.mulf %572, %571 : vector<16x128xf32>
    %574 = arith.addf %569, %573 : vector<16x128xf32>
    %c108 = arith.constant 108 : index
    %575 = memref.load %arg2[%c108] : memref<196xf32, #tpu.memory_space<smem>>
    %576 = vector.extract_strided_slice %559 {offsets = [0, 3], sizes = [16, 128], strides = [1, 1]} : vector<16x134xf32> to vector<16x128xf32>
    %577 = vector.broadcast %575 : f32 to vector<16x128xf32>
    %578 = arith.mulf %577, %576 : vector<16x128xf32>
    %579 = arith.addf %574, %578 : vector<16x128xf32>
    %c109 = arith.constant 109 : index
    %580 = memref.load %arg2[%c109] : memref<196xf32, #tpu.memory_space<smem>>
    %581 = vector.extract_strided_slice %559 {offsets = [0, 4], sizes = [16, 128], strides = [1, 1]} : vector<16x134xf32> to vector<16x128xf32>
    %582 = vector.broadcast %580 : f32 to vector<16x128xf32>
    %583 = arith.mulf %582, %581 : vector<16x128xf32>
    %584 = arith.addf %579, %583 : vector<16x128xf32>
    %c110 = arith.constant 110 : index
    %585 = memref.load %arg2[%c110] : memref<196xf32, #tpu.memory_space<smem>>
    %586 = vector.extract_strided_slice %559 {offsets = [0, 5], sizes = [16, 128], strides = [1, 1]} : vector<16x134xf32> to vector<16x128xf32>
    %587 = vector.broadcast %585 : f32 to vector<16x128xf32>
    %588 = arith.mulf %587, %586 : vector<16x128xf32>
    %589 = arith.addf %584, %588 : vector<16x128xf32>
    %c111 = arith.constant 111 : index
    %590 = memref.load %arg2[%c111] : memref<196xf32, #tpu.memory_space<smem>>
    %591 = vector.extract_strided_slice %559 {offsets = [0, 6], sizes = [16, 128], strides = [1, 1]} : vector<16x134xf32> to vector<16x128xf32>
    %592 = vector.broadcast %590 : f32 to vector<16x128xf32>
    %593 = arith.mulf %592, %591 : vector<16x128xf32>
    %594 = arith.addf %589, %593 : vector<16x128xf32>
    %595 = vector.extract_strided_slice %9 {offsets = [2, 0], sizes = [16, 134], strides = [1, 1]} : vector<22x134xf32> to vector<16x134xf32>
    %c112 = arith.constant 112 : index
    %596 = memref.load %arg2[%c112] : memref<196xf32, #tpu.memory_space<smem>>
    %597 = vector.extract_strided_slice %595 {offsets = [0, 0], sizes = [16, 128], strides = [1, 1]} : vector<16x134xf32> to vector<16x128xf32>
    %598 = vector.broadcast %596 : f32 to vector<16x128xf32>
    %599 = arith.mulf %598, %597 : vector<16x128xf32>
    %600 = arith.addf %594, %599 : vector<16x128xf32>
    %c113 = arith.constant 113 : index
    %601 = memref.load %arg2[%c113] : memref<196xf32, #tpu.memory_space<smem>>
    %602 = vector.extract_strided_slice %595 {offsets = [0, 1], sizes = [16, 128], strides = [1, 1]} : vector<16x134xf32> to vector<16x128xf32>
    %603 = vector.broadcast %601 : f32 to vector<16x128xf32>
    %604 = arith.mulf %603, %602 : vector<16x128xf32>
    %605 = arith.addf %600, %604 : vector<16x128xf32>
    %c114 = arith.constant 114 : index
    %606 = memref.load %arg2[%c114] : memref<196xf32, #tpu.memory_space<smem>>
    %607 = vector.extract_strided_slice %595 {offsets = [0, 2], sizes = [16, 128], strides = [1, 1]} : vector<16x134xf32> to vector<16x128xf32>
    %608 = vector.broadcast %606 : f32 to vector<16x128xf32>
    %609 = arith.mulf %608, %607 : vector<16x128xf32>
    %610 = arith.addf %605, %609 : vector<16x128xf32>
    %c115 = arith.constant 115 : index
    %611 = memref.load %arg2[%c115] : memref<196xf32, #tpu.memory_space<smem>>
    %612 = vector.extract_strided_slice %595 {offsets = [0, 3], sizes = [16, 128], strides = [1, 1]} : vector<16x134xf32> to vector<16x128xf32>
    %613 = vector.broadcast %611 : f32 to vector<16x128xf32>
    %614 = arith.mulf %613, %612 : vector<16x128xf32>
    %615 = arith.addf %610, %614 : vector<16x128xf32>
    %c116 = arith.constant 116 : index
    %616 = memref.load %arg2[%c116] : memref<196xf32, #tpu.memory_space<smem>>
    %617 = vector.extract_strided_slice %595 {offsets = [0, 4], sizes = [16, 128], strides = [1, 1]} : vector<16x134xf32> to vector<16x128xf32>
    %618 = vector.broadcast %616 : f32 to vector<16x128xf32>
    %619 = arith.mulf %618, %617 : vector<16x128xf32>
    %620 = arith.addf %615, %619 : vector<16x128xf32>
    %c117 = arith.constant 117 : index
    %621 = memref.load %arg2[%c117] : memref<196xf32, #tpu.memory_space<smem>>
    %622 = vector.extract_strided_slice %595 {offsets = [0, 5], sizes = [16, 128], strides = [1, 1]} : vector<16x134xf32> to vector<16x128xf32>
    %623 = vector.broadcast %621 : f32 to vector<16x128xf32>
    %624 = arith.mulf %623, %622 : vector<16x128xf32>
    %625 = arith.addf %620, %624 : vector<16x128xf32>
    %c118 = arith.constant 118 : index
    %626 = memref.load %arg2[%c118] : memref<196xf32, #tpu.memory_space<smem>>
    %627 = vector.extract_strided_slice %595 {offsets = [0, 6], sizes = [16, 128], strides = [1, 1]} : vector<16x134xf32> to vector<16x128xf32>
    %628 = vector.broadcast %626 : f32 to vector<16x128xf32>
    %629 = arith.mulf %628, %627 : vector<16x128xf32>
    %630 = arith.addf %625, %629 : vector<16x128xf32>
    %631 = vector.extract_strided_slice %9 {offsets = [3, 0], sizes = [16, 134], strides = [1, 1]} : vector<22x134xf32> to vector<16x134xf32>
    %c119 = arith.constant 119 : index
    %632 = memref.load %arg2[%c119] : memref<196xf32, #tpu.memory_space<smem>>
    %633 = vector.extract_strided_slice %631 {offsets = [0, 0], sizes = [16, 128], strides = [1, 1]} : vector<16x134xf32> to vector<16x128xf32>
    %634 = vector.broadcast %632 : f32 to vector<16x128xf32>
    %635 = arith.mulf %634, %633 : vector<16x128xf32>
    %636 = arith.addf %630, %635 : vector<16x128xf32>
    %c120 = arith.constant 120 : index
    %637 = memref.load %arg2[%c120] : memref<196xf32, #tpu.memory_space<smem>>
    %638 = vector.extract_strided_slice %631 {offsets = [0, 1], sizes = [16, 128], strides = [1, 1]} : vector<16x134xf32> to vector<16x128xf32>
    %639 = vector.broadcast %637 : f32 to vector<16x128xf32>
    %640 = arith.mulf %639, %638 : vector<16x128xf32>
    %641 = arith.addf %636, %640 : vector<16x128xf32>
    %c121 = arith.constant 121 : index
    %642 = memref.load %arg2[%c121] : memref<196xf32, #tpu.memory_space<smem>>
    %643 = vector.extract_strided_slice %631 {offsets = [0, 2], sizes = [16, 128], strides = [1, 1]} : vector<16x134xf32> to vector<16x128xf32>
    %644 = vector.broadcast %642 : f32 to vector<16x128xf32>
    %645 = arith.mulf %644, %643 : vector<16x128xf32>
    %646 = arith.addf %641, %645 : vector<16x128xf32>
    %c122 = arith.constant 122 : index
    %647 = memref.load %arg2[%c122] : memref<196xf32, #tpu.memory_space<smem>>
    %648 = vector.extract_strided_slice %631 {offsets = [0, 3], sizes = [16, 128], strides = [1, 1]} : vector<16x134xf32> to vector<16x128xf32>
    %649 = vector.broadcast %647 : f32 to vector<16x128xf32>
    %650 = arith.mulf %649, %648 : vector<16x128xf32>
    %651 = arith.addf %646, %650 : vector<16x128xf32>
    %c123 = arith.constant 123 : index
    %652 = memref.load %arg2[%c123] : memref<196xf32, #tpu.memory_space<smem>>
    %653 = vector.extract_strided_slice %631 {offsets = [0, 4], sizes = [16, 128], strides = [1, 1]} : vector<16x134xf32> to vector<16x128xf32>
    %654 = vector.broadcast %652 : f32 to vector<16x128xf32>
    %655 = arith.mulf %654, %653 : vector<16x128xf32>
    %656 = arith.addf %651, %655 : vector<16x128xf32>
    %c124 = arith.constant 124 : index
    %657 = memref.load %arg2[%c124] : memref<196xf32, #tpu.memory_space<smem>>
    %658 = vector.extract_strided_slice %631 {offsets = [0, 5], sizes = [16, 128], strides = [1, 1]} : vector<16x134xf32> to vector<16x128xf32>
    %659 = vector.broadcast %657 : f32 to vector<16x128xf32>
    %660 = arith.mulf %659, %658 : vector<16x128xf32>
    %661 = arith.addf %656, %660 : vector<16x128xf32>
    %c125 = arith.constant 125 : index
    %662 = memref.load %arg2[%c125] : memref<196xf32, #tpu.memory_space<smem>>
    %663 = vector.extract_strided_slice %631 {offsets = [0, 6], sizes = [16, 128], strides = [1, 1]} : vector<16x134xf32> to vector<16x128xf32>
    %664 = vector.broadcast %662 : f32 to vector<16x128xf32>
    %665 = arith.mulf %664, %663 : vector<16x128xf32>
    %666 = arith.addf %661, %665 : vector<16x128xf32>
    %667 = vector.extract_strided_slice %9 {offsets = [4, 0], sizes = [16, 134], strides = [1, 1]} : vector<22x134xf32> to vector<16x134xf32>
    %c126 = arith.constant 126 : index
    %668 = memref.load %arg2[%c126] : memref<196xf32, #tpu.memory_space<smem>>
    %669 = vector.extract_strided_slice %667 {offsets = [0, 0], sizes = [16, 128], strides = [1, 1]} : vector<16x134xf32> to vector<16x128xf32>
    %670 = vector.broadcast %668 : f32 to vector<16x128xf32>
    %671 = arith.mulf %670, %669 : vector<16x128xf32>
    %672 = arith.addf %666, %671 : vector<16x128xf32>
    %c127 = arith.constant 127 : index
    %673 = memref.load %arg2[%c127] : memref<196xf32, #tpu.memory_space<smem>>
    %674 = vector.extract_strided_slice %667 {offsets = [0, 1], sizes = [16, 128], strides = [1, 1]} : vector<16x134xf32> to vector<16x128xf32>
    %675 = vector.broadcast %673 : f32 to vector<16x128xf32>
    %676 = arith.mulf %675, %674 : vector<16x128xf32>
    %677 = arith.addf %672, %676 : vector<16x128xf32>
    %c128 = arith.constant 128 : index
    %678 = memref.load %arg2[%c128] : memref<196xf32, #tpu.memory_space<smem>>
    %679 = vector.extract_strided_slice %667 {offsets = [0, 2], sizes = [16, 128], strides = [1, 1]} : vector<16x134xf32> to vector<16x128xf32>
    %680 = vector.broadcast %678 : f32 to vector<16x128xf32>
    %681 = arith.mulf %680, %679 : vector<16x128xf32>
    %682 = arith.addf %677, %681 : vector<16x128xf32>
    %c129 = arith.constant 129 : index
    %683 = memref.load %arg2[%c129] : memref<196xf32, #tpu.memory_space<smem>>
    %684 = vector.extract_strided_slice %667 {offsets = [0, 3], sizes = [16, 128], strides = [1, 1]} : vector<16x134xf32> to vector<16x128xf32>
    %685 = vector.broadcast %683 : f32 to vector<16x128xf32>
    %686 = arith.mulf %685, %684 : vector<16x128xf32>
    %687 = arith.addf %682, %686 : vector<16x128xf32>
    %c130 = arith.constant 130 : index
    %688 = memref.load %arg2[%c130] : memref<196xf32, #tpu.memory_space<smem>>
    %689 = vector.extract_strided_slice %667 {offsets = [0, 4], sizes = [16, 128], strides = [1, 1]} : vector<16x134xf32> to vector<16x128xf32>
    %690 = vector.broadcast %688 : f32 to vector<16x128xf32>
    %691 = arith.mulf %690, %689 : vector<16x128xf32>
    %692 = arith.addf %687, %691 : vector<16x128xf32>
    %c131 = arith.constant 131 : index
    %693 = memref.load %arg2[%c131] : memref<196xf32, #tpu.memory_space<smem>>
    %694 = vector.extract_strided_slice %667 {offsets = [0, 5], sizes = [16, 128], strides = [1, 1]} : vector<16x134xf32> to vector<16x128xf32>
    %695 = vector.broadcast %693 : f32 to vector<16x128xf32>
    %696 = arith.mulf %695, %694 : vector<16x128xf32>
    %697 = arith.addf %692, %696 : vector<16x128xf32>
    %c132 = arith.constant 132 : index
    %698 = memref.load %arg2[%c132] : memref<196xf32, #tpu.memory_space<smem>>
    %699 = vector.extract_strided_slice %667 {offsets = [0, 6], sizes = [16, 128], strides = [1, 1]} : vector<16x134xf32> to vector<16x128xf32>
    %700 = vector.broadcast %698 : f32 to vector<16x128xf32>
    %701 = arith.mulf %700, %699 : vector<16x128xf32>
    %702 = arith.addf %697, %701 : vector<16x128xf32>
    %703 = vector.extract_strided_slice %9 {offsets = [5, 0], sizes = [16, 134], strides = [1, 1]} : vector<22x134xf32> to vector<16x134xf32>
    %c133 = arith.constant 133 : index
    %704 = memref.load %arg2[%c133] : memref<196xf32, #tpu.memory_space<smem>>
    %705 = vector.extract_strided_slice %703 {offsets = [0, 0], sizes = [16, 128], strides = [1, 1]} : vector<16x134xf32> to vector<16x128xf32>
    %706 = vector.broadcast %704 : f32 to vector<16x128xf32>
    %707 = arith.mulf %706, %705 : vector<16x128xf32>
    %708 = arith.addf %702, %707 : vector<16x128xf32>
    %c134 = arith.constant 134 : index
    %709 = memref.load %arg2[%c134] : memref<196xf32, #tpu.memory_space<smem>>
    %710 = vector.extract_strided_slice %703 {offsets = [0, 1], sizes = [16, 128], strides = [1, 1]} : vector<16x134xf32> to vector<16x128xf32>
    %711 = vector.broadcast %709 : f32 to vector<16x128xf32>
    %712 = arith.mulf %711, %710 : vector<16x128xf32>
    %713 = arith.addf %708, %712 : vector<16x128xf32>
    %c135 = arith.constant 135 : index
    %714 = memref.load %arg2[%c135] : memref<196xf32, #tpu.memory_space<smem>>
    %715 = vector.extract_strided_slice %703 {offsets = [0, 2], sizes = [16, 128], strides = [1, 1]} : vector<16x134xf32> to vector<16x128xf32>
    %716 = vector.broadcast %714 : f32 to vector<16x128xf32>
    %717 = arith.mulf %716, %715 : vector<16x128xf32>
    %718 = arith.addf %713, %717 : vector<16x128xf32>
    %c136 = arith.constant 136 : index
    %719 = memref.load %arg2[%c136] : memref<196xf32, #tpu.memory_space<smem>>
    %720 = vector.extract_strided_slice %703 {offsets = [0, 3], sizes = [16, 128], strides = [1, 1]} : vector<16x134xf32> to vector<16x128xf32>
    %721 = vector.broadcast %719 : f32 to vector<16x128xf32>
    %722 = arith.mulf %721, %720 : vector<16x128xf32>
    %723 = arith.addf %718, %722 : vector<16x128xf32>
    %c137 = arith.constant 137 : index
    %724 = memref.load %arg2[%c137] : memref<196xf32, #tpu.memory_space<smem>>
    %725 = vector.extract_strided_slice %703 {offsets = [0, 4], sizes = [16, 128], strides = [1, 1]} : vector<16x134xf32> to vector<16x128xf32>
    %726 = vector.broadcast %724 : f32 to vector<16x128xf32>
    %727 = arith.mulf %726, %725 : vector<16x128xf32>
    %728 = arith.addf %723, %727 : vector<16x128xf32>
    %c138 = arith.constant 138 : index
    %729 = memref.load %arg2[%c138] : memref<196xf32, #tpu.memory_space<smem>>
    %730 = vector.extract_strided_slice %703 {offsets = [0, 5], sizes = [16, 128], strides = [1, 1]} : vector<16x134xf32> to vector<16x128xf32>
    %731 = vector.broadcast %729 : f32 to vector<16x128xf32>
    %732 = arith.mulf %731, %730 : vector<16x128xf32>
    %733 = arith.addf %728, %732 : vector<16x128xf32>
    %c139 = arith.constant 139 : index
    %734 = memref.load %arg2[%c139] : memref<196xf32, #tpu.memory_space<smem>>
    %735 = vector.extract_strided_slice %703 {offsets = [0, 6], sizes = [16, 128], strides = [1, 1]} : vector<16x134xf32> to vector<16x128xf32>
    %736 = vector.broadcast %734 : f32 to vector<16x128xf32>
    %737 = arith.mulf %736, %735 : vector<16x128xf32>
    %738 = arith.addf %733, %737 : vector<16x128xf32>
    %739 = vector.extract_strided_slice %9 {offsets = [6, 0], sizes = [16, 134], strides = [1, 1]} : vector<22x134xf32> to vector<16x134xf32>
    %c140 = arith.constant 140 : index
    %740 = memref.load %arg2[%c140] : memref<196xf32, #tpu.memory_space<smem>>
    %741 = vector.extract_strided_slice %739 {offsets = [0, 0], sizes = [16, 128], strides = [1, 1]} : vector<16x134xf32> to vector<16x128xf32>
    %742 = vector.broadcast %740 : f32 to vector<16x128xf32>
    %743 = arith.mulf %742, %741 : vector<16x128xf32>
    %744 = arith.addf %738, %743 : vector<16x128xf32>
    %c141 = arith.constant 141 : index
    %745 = memref.load %arg2[%c141] : memref<196xf32, #tpu.memory_space<smem>>
    %746 = vector.extract_strided_slice %739 {offsets = [0, 1], sizes = [16, 128], strides = [1, 1]} : vector<16x134xf32> to vector<16x128xf32>
    %747 = vector.broadcast %745 : f32 to vector<16x128xf32>
    %748 = arith.mulf %747, %746 : vector<16x128xf32>
    %749 = arith.addf %744, %748 : vector<16x128xf32>
    %c142 = arith.constant 142 : index
    %750 = memref.load %arg2[%c142] : memref<196xf32, #tpu.memory_space<smem>>
    %751 = vector.extract_strided_slice %739 {offsets = [0, 2], sizes = [16, 128], strides = [1, 1]} : vector<16x134xf32> to vector<16x128xf32>
    %752 = vector.broadcast %750 : f32 to vector<16x128xf32>
    %753 = arith.mulf %752, %751 : vector<16x128xf32>
    %754 = arith.addf %749, %753 : vector<16x128xf32>
    %c143 = arith.constant 143 : index
    %755 = memref.load %arg2[%c143] : memref<196xf32, #tpu.memory_space<smem>>
    %756 = vector.extract_strided_slice %739 {offsets = [0, 3], sizes = [16, 128], strides = [1, 1]} : vector<16x134xf32> to vector<16x128xf32>
    %757 = vector.broadcast %755 : f32 to vector<16x128xf32>
    %758 = arith.mulf %757, %756 : vector<16x128xf32>
    %759 = arith.addf %754, %758 : vector<16x128xf32>
    %c144 = arith.constant 144 : index
    %760 = memref.load %arg2[%c144] : memref<196xf32, #tpu.memory_space<smem>>
    %761 = vector.extract_strided_slice %739 {offsets = [0, 4], sizes = [16, 128], strides = [1, 1]} : vector<16x134xf32> to vector<16x128xf32>
    %762 = vector.broadcast %760 : f32 to vector<16x128xf32>
    %763 = arith.mulf %762, %761 : vector<16x128xf32>
    %764 = arith.addf %759, %763 : vector<16x128xf32>
    %c145 = arith.constant 145 : index
    %765 = memref.load %arg2[%c145] : memref<196xf32, #tpu.memory_space<smem>>
    %766 = vector.extract_strided_slice %739 {offsets = [0, 5], sizes = [16, 128], strides = [1, 1]} : vector<16x134xf32> to vector<16x128xf32>
    %767 = vector.broadcast %765 : f32 to vector<16x128xf32>
    %768 = arith.mulf %767, %766 : vector<16x128xf32>
    %769 = arith.addf %764, %768 : vector<16x128xf32>
    %c146 = arith.constant 146 : index
    %770 = memref.load %arg2[%c146] : memref<196xf32, #tpu.memory_space<smem>>
    %771 = vector.extract_strided_slice %739 {offsets = [0, 6], sizes = [16, 128], strides = [1, 1]} : vector<16x134xf32> to vector<16x128xf32>
    %772 = vector.broadcast %770 : f32 to vector<16x128xf32>
    %773 = arith.mulf %772, %771 : vector<16x128xf32>
    %774 = arith.addf %769, %773 : vector<16x128xf32>
    %775 = vector.extract_strided_slice %11 {offsets = [0, 0], sizes = [16, 134], strides = [1, 1]} : vector<22x134xf32> to vector<16x134xf32>
    %c147 = arith.constant 147 : index
    %776 = memref.load %arg2[%c147] : memref<196xf32, #tpu.memory_space<smem>>
    %777 = vector.extract_strided_slice %775 {offsets = [0, 0], sizes = [16, 128], strides = [1, 1]} : vector<16x134xf32> to vector<16x128xf32>
    %778 = vector.broadcast %776 : f32 to vector<16x128xf32>
    %779 = arith.mulf %778, %777 : vector<16x128xf32>
    %780 = arith.addf %774, %779 : vector<16x128xf32>
    %c148 = arith.constant 148 : index
    %781 = memref.load %arg2[%c148] : memref<196xf32, #tpu.memory_space<smem>>
    %782 = vector.extract_strided_slice %775 {offsets = [0, 1], sizes = [16, 128], strides = [1, 1]} : vector<16x134xf32> to vector<16x128xf32>
    %783 = vector.broadcast %781 : f32 to vector<16x128xf32>
    %784 = arith.mulf %783, %782 : vector<16x128xf32>
    %785 = arith.addf %780, %784 : vector<16x128xf32>
    %c149 = arith.constant 149 : index
    %786 = memref.load %arg2[%c149] : memref<196xf32, #tpu.memory_space<smem>>
    %787 = vector.extract_strided_slice %775 {offsets = [0, 2], sizes = [16, 128], strides = [1, 1]} : vector<16x134xf32> to vector<16x128xf32>
    %788 = vector.broadcast %786 : f32 to vector<16x128xf32>
    %789 = arith.mulf %788, %787 : vector<16x128xf32>
    %790 = arith.addf %785, %789 : vector<16x128xf32>
    %c150 = arith.constant 150 : index
    %791 = memref.load %arg2[%c150] : memref<196xf32, #tpu.memory_space<smem>>
    %792 = vector.extract_strided_slice %775 {offsets = [0, 3], sizes = [16, 128], strides = [1, 1]} : vector<16x134xf32> to vector<16x128xf32>
    %793 = vector.broadcast %791 : f32 to vector<16x128xf32>
    %794 = arith.mulf %793, %792 : vector<16x128xf32>
    %795 = arith.addf %790, %794 : vector<16x128xf32>
    %c151 = arith.constant 151 : index
    %796 = memref.load %arg2[%c151] : memref<196xf32, #tpu.memory_space<smem>>
    %797 = vector.extract_strided_slice %775 {offsets = [0, 4], sizes = [16, 128], strides = [1, 1]} : vector<16x134xf32> to vector<16x128xf32>
    %798 = vector.broadcast %796 : f32 to vector<16x128xf32>
    %799 = arith.mulf %798, %797 : vector<16x128xf32>
    %800 = arith.addf %795, %799 : vector<16x128xf32>
    %c152 = arith.constant 152 : index
    %801 = memref.load %arg2[%c152] : memref<196xf32, #tpu.memory_space<smem>>
    %802 = vector.extract_strided_slice %775 {offsets = [0, 5], sizes = [16, 128], strides = [1, 1]} : vector<16x134xf32> to vector<16x128xf32>
    %803 = vector.broadcast %801 : f32 to vector<16x128xf32>
    %804 = arith.mulf %803, %802 : vector<16x128xf32>
    %805 = arith.addf %800, %804 : vector<16x128xf32>
    %c153 = arith.constant 153 : index
    %806 = memref.load %arg2[%c153] : memref<196xf32, #tpu.memory_space<smem>>
    %807 = vector.extract_strided_slice %775 {offsets = [0, 6], sizes = [16, 128], strides = [1, 1]} : vector<16x134xf32> to vector<16x128xf32>
    %808 = vector.broadcast %806 : f32 to vector<16x128xf32>
    %809 = arith.mulf %808, %807 : vector<16x128xf32>
    %810 = arith.addf %805, %809 : vector<16x128xf32>
    %811 = vector.extract_strided_slice %11 {offsets = [1, 0], sizes = [16, 134], strides = [1, 1]} : vector<22x134xf32> to vector<16x134xf32>
    %c154 = arith.constant 154 : index
    %812 = memref.load %arg2[%c154] : memref<196xf32, #tpu.memory_space<smem>>
    %813 = vector.extract_strided_slice %811 {offsets = [0, 0], sizes = [16, 128], strides = [1, 1]} : vector<16x134xf32> to vector<16x128xf32>
    %814 = vector.broadcast %812 : f32 to vector<16x128xf32>
    %815 = arith.mulf %814, %813 : vector<16x128xf32>
    %816 = arith.addf %810, %815 : vector<16x128xf32>
    %c155 = arith.constant 155 : index
    %817 = memref.load %arg2[%c155] : memref<196xf32, #tpu.memory_space<smem>>
    %818 = vector.extract_strided_slice %811 {offsets = [0, 1], sizes = [16, 128], strides = [1, 1]} : vector<16x134xf32> to vector<16x128xf32>
    %819 = vector.broadcast %817 : f32 to vector<16x128xf32>
    %820 = arith.mulf %819, %818 : vector<16x128xf32>
    %821 = arith.addf %816, %820 : vector<16x128xf32>
    %c156 = arith.constant 156 : index
    %822 = memref.load %arg2[%c156] : memref<196xf32, #tpu.memory_space<smem>>
    %823 = vector.extract_strided_slice %811 {offsets = [0, 2], sizes = [16, 128], strides = [1, 1]} : vector<16x134xf32> to vector<16x128xf32>
    %824 = vector.broadcast %822 : f32 to vector<16x128xf32>
    %825 = arith.mulf %824, %823 : vector<16x128xf32>
    %826 = arith.addf %821, %825 : vector<16x128xf32>
    %c157 = arith.constant 157 : index
    %827 = memref.load %arg2[%c157] : memref<196xf32, #tpu.memory_space<smem>>
    %828 = vector.extract_strided_slice %811 {offsets = [0, 3], sizes = [16, 128], strides = [1, 1]} : vector<16x134xf32> to vector<16x128xf32>
    %829 = vector.broadcast %827 : f32 to vector<16x128xf32>
    %830 = arith.mulf %829, %828 : vector<16x128xf32>
    %831 = arith.addf %826, %830 : vector<16x128xf32>
    %c158 = arith.constant 158 : index
    %832 = memref.load %arg2[%c158] : memref<196xf32, #tpu.memory_space<smem>>
    %833 = vector.extract_strided_slice %811 {offsets = [0, 4], sizes = [16, 128], strides = [1, 1]} : vector<16x134xf32> to vector<16x128xf32>
    %834 = vector.broadcast %832 : f32 to vector<16x128xf32>
    %835 = arith.mulf %834, %833 : vector<16x128xf32>
    %836 = arith.addf %831, %835 : vector<16x128xf32>
    %c159 = arith.constant 159 : index
    %837 = memref.load %arg2[%c159] : memref<196xf32, #tpu.memory_space<smem>>
    %838 = vector.extract_strided_slice %811 {offsets = [0, 5], sizes = [16, 128], strides = [1, 1]} : vector<16x134xf32> to vector<16x128xf32>
    %839 = vector.broadcast %837 : f32 to vector<16x128xf32>
    %840 = arith.mulf %839, %838 : vector<16x128xf32>
    %841 = arith.addf %836, %840 : vector<16x128xf32>
    %c160 = arith.constant 160 : index
    %842 = memref.load %arg2[%c160] : memref<196xf32, #tpu.memory_space<smem>>
    %843 = vector.extract_strided_slice %811 {offsets = [0, 6], sizes = [16, 128], strides = [1, 1]} : vector<16x134xf32> to vector<16x128xf32>
    %844 = vector.broadcast %842 : f32 to vector<16x128xf32>
    %845 = arith.mulf %844, %843 : vector<16x128xf32>
    %846 = arith.addf %841, %845 : vector<16x128xf32>
    %847 = vector.extract_strided_slice %11 {offsets = [2, 0], sizes = [16, 134], strides = [1, 1]} : vector<22x134xf32> to vector<16x134xf32>
    %c161 = arith.constant 161 : index
    %848 = memref.load %arg2[%c161] : memref<196xf32, #tpu.memory_space<smem>>
    %849 = vector.extract_strided_slice %847 {offsets = [0, 0], sizes = [16, 128], strides = [1, 1]} : vector<16x134xf32> to vector<16x128xf32>
    %850 = vector.broadcast %848 : f32 to vector<16x128xf32>
    %851 = arith.mulf %850, %849 : vector<16x128xf32>
    %852 = arith.addf %846, %851 : vector<16x128xf32>
    %c162 = arith.constant 162 : index
    %853 = memref.load %arg2[%c162] : memref<196xf32, #tpu.memory_space<smem>>
    %854 = vector.extract_strided_slice %847 {offsets = [0, 1], sizes = [16, 128], strides = [1, 1]} : vector<16x134xf32> to vector<16x128xf32>
    %855 = vector.broadcast %853 : f32 to vector<16x128xf32>
    %856 = arith.mulf %855, %854 : vector<16x128xf32>
    %857 = arith.addf %852, %856 : vector<16x128xf32>
    %c163 = arith.constant 163 : index
    %858 = memref.load %arg2[%c163] : memref<196xf32, #tpu.memory_space<smem>>
    %859 = vector.extract_strided_slice %847 {offsets = [0, 2], sizes = [16, 128], strides = [1, 1]} : vector<16x134xf32> to vector<16x128xf32>
    %860 = vector.broadcast %858 : f32 to vector<16x128xf32>
    %861 = arith.mulf %860, %859 : vector<16x128xf32>
    %862 = arith.addf %857, %861 : vector<16x128xf32>
    %c164 = arith.constant 164 : index
    %863 = memref.load %arg2[%c164] : memref<196xf32, #tpu.memory_space<smem>>
    %864 = vector.extract_strided_slice %847 {offsets = [0, 3], sizes = [16, 128], strides = [1, 1]} : vector<16x134xf32> to vector<16x128xf32>
    %865 = vector.broadcast %863 : f32 to vector<16x128xf32>
    %866 = arith.mulf %865, %864 : vector<16x128xf32>
    %867 = arith.addf %862, %866 : vector<16x128xf32>
    %c165 = arith.constant 165 : index
    %868 = memref.load %arg2[%c165] : memref<196xf32, #tpu.memory_space<smem>>
    %869 = vector.extract_strided_slice %847 {offsets = [0, 4], sizes = [16, 128], strides = [1, 1]} : vector<16x134xf32> to vector<16x128xf32>
    %870 = vector.broadcast %868 : f32 to vector<16x128xf32>
    %871 = arith.mulf %870, %869 : vector<16x128xf32>
    %872 = arith.addf %867, %871 : vector<16x128xf32>
    %c166 = arith.constant 166 : index
    %873 = memref.load %arg2[%c166] : memref<196xf32, #tpu.memory_space<smem>>
    %874 = vector.extract_strided_slice %847 {offsets = [0, 5], sizes = [16, 128], strides = [1, 1]} : vector<16x134xf32> to vector<16x128xf32>
    %875 = vector.broadcast %873 : f32 to vector<16x128xf32>
    %876 = arith.mulf %875, %874 : vector<16x128xf32>
    %877 = arith.addf %872, %876 : vector<16x128xf32>
    %c167 = arith.constant 167 : index
    %878 = memref.load %arg2[%c167] : memref<196xf32, #tpu.memory_space<smem>>
    %879 = vector.extract_strided_slice %847 {offsets = [0, 6], sizes = [16, 128], strides = [1, 1]} : vector<16x134xf32> to vector<16x128xf32>
    %880 = vector.broadcast %878 : f32 to vector<16x128xf32>
    %881 = arith.mulf %880, %879 : vector<16x128xf32>
    %882 = arith.addf %877, %881 : vector<16x128xf32>
    %883 = vector.extract_strided_slice %11 {offsets = [3, 0], sizes = [16, 134], strides = [1, 1]} : vector<22x134xf32> to vector<16x134xf32>
    %c168 = arith.constant 168 : index
    %884 = memref.load %arg2[%c168] : memref<196xf32, #tpu.memory_space<smem>>
    %885 = vector.extract_strided_slice %883 {offsets = [0, 0], sizes = [16, 128], strides = [1, 1]} : vector<16x134xf32> to vector<16x128xf32>
    %886 = vector.broadcast %884 : f32 to vector<16x128xf32>
    %887 = arith.mulf %886, %885 : vector<16x128xf32>
    %888 = arith.addf %882, %887 : vector<16x128xf32>
    %c169 = arith.constant 169 : index
    %889 = memref.load %arg2[%c169] : memref<196xf32, #tpu.memory_space<smem>>
    %890 = vector.extract_strided_slice %883 {offsets = [0, 1], sizes = [16, 128], strides = [1, 1]} : vector<16x134xf32> to vector<16x128xf32>
    %891 = vector.broadcast %889 : f32 to vector<16x128xf32>
    %892 = arith.mulf %891, %890 : vector<16x128xf32>
    %893 = arith.addf %888, %892 : vector<16x128xf32>
    %c170 = arith.constant 170 : index
    %894 = memref.load %arg2[%c170] : memref<196xf32, #tpu.memory_space<smem>>
    %895 = vector.extract_strided_slice %883 {offsets = [0, 2], sizes = [16, 128], strides = [1, 1]} : vector<16x134xf32> to vector<16x128xf32>
    %896 = vector.broadcast %894 : f32 to vector<16x128xf32>
    %897 = arith.mulf %896, %895 : vector<16x128xf32>
    %898 = arith.addf %893, %897 : vector<16x128xf32>
    %c171 = arith.constant 171 : index
    %899 = memref.load %arg2[%c171] : memref<196xf32, #tpu.memory_space<smem>>
    %900 = vector.extract_strided_slice %883 {offsets = [0, 3], sizes = [16, 128], strides = [1, 1]} : vector<16x134xf32> to vector<16x128xf32>
    %901 = vector.broadcast %899 : f32 to vector<16x128xf32>
    %902 = arith.mulf %901, %900 : vector<16x128xf32>
    %903 = arith.addf %898, %902 : vector<16x128xf32>
    %c172 = arith.constant 172 : index
    %904 = memref.load %arg2[%c172] : memref<196xf32, #tpu.memory_space<smem>>
    %905 = vector.extract_strided_slice %883 {offsets = [0, 4], sizes = [16, 128], strides = [1, 1]} : vector<16x134xf32> to vector<16x128xf32>
    %906 = vector.broadcast %904 : f32 to vector<16x128xf32>
    %907 = arith.mulf %906, %905 : vector<16x128xf32>
    %908 = arith.addf %903, %907 : vector<16x128xf32>
    %c173 = arith.constant 173 : index
    %909 = memref.load %arg2[%c173] : memref<196xf32, #tpu.memory_space<smem>>
    %910 = vector.extract_strided_slice %883 {offsets = [0, 5], sizes = [16, 128], strides = [1, 1]} : vector<16x134xf32> to vector<16x128xf32>
    %911 = vector.broadcast %909 : f32 to vector<16x128xf32>
    %912 = arith.mulf %911, %910 : vector<16x128xf32>
    %913 = arith.addf %908, %912 : vector<16x128xf32>
    %c174 = arith.constant 174 : index
    %914 = memref.load %arg2[%c174] : memref<196xf32, #tpu.memory_space<smem>>
    %915 = vector.extract_strided_slice %883 {offsets = [0, 6], sizes = [16, 128], strides = [1, 1]} : vector<16x134xf32> to vector<16x128xf32>
    %916 = vector.broadcast %914 : f32 to vector<16x128xf32>
    %917 = arith.mulf %916, %915 : vector<16x128xf32>
    %918 = arith.addf %913, %917 : vector<16x128xf32>
    %919 = vector.extract_strided_slice %11 {offsets = [4, 0], sizes = [16, 134], strides = [1, 1]} : vector<22x134xf32> to vector<16x134xf32>
    %c175 = arith.constant 175 : index
    %920 = memref.load %arg2[%c175] : memref<196xf32, #tpu.memory_space<smem>>
    %921 = vector.extract_strided_slice %919 {offsets = [0, 0], sizes = [16, 128], strides = [1, 1]} : vector<16x134xf32> to vector<16x128xf32>
    %922 = vector.broadcast %920 : f32 to vector<16x128xf32>
    %923 = arith.mulf %922, %921 : vector<16x128xf32>
    %924 = arith.addf %918, %923 : vector<16x128xf32>
    %c176 = arith.constant 176 : index
    %925 = memref.load %arg2[%c176] : memref<196xf32, #tpu.memory_space<smem>>
    %926 = vector.extract_strided_slice %919 {offsets = [0, 1], sizes = [16, 128], strides = [1, 1]} : vector<16x134xf32> to vector<16x128xf32>
    %927 = vector.broadcast %925 : f32 to vector<16x128xf32>
    %928 = arith.mulf %927, %926 : vector<16x128xf32>
    %929 = arith.addf %924, %928 : vector<16x128xf32>
    %c177 = arith.constant 177 : index
    %930 = memref.load %arg2[%c177] : memref<196xf32, #tpu.memory_space<smem>>
    %931 = vector.extract_strided_slice %919 {offsets = [0, 2], sizes = [16, 128], strides = [1, 1]} : vector<16x134xf32> to vector<16x128xf32>
    %932 = vector.broadcast %930 : f32 to vector<16x128xf32>
    %933 = arith.mulf %932, %931 : vector<16x128xf32>
    %934 = arith.addf %929, %933 : vector<16x128xf32>
    %c178 = arith.constant 178 : index
    %935 = memref.load %arg2[%c178] : memref<196xf32, #tpu.memory_space<smem>>
    %936 = vector.extract_strided_slice %919 {offsets = [0, 3], sizes = [16, 128], strides = [1, 1]} : vector<16x134xf32> to vector<16x128xf32>
    %937 = vector.broadcast %935 : f32 to vector<16x128xf32>
    %938 = arith.mulf %937, %936 : vector<16x128xf32>
    %939 = arith.addf %934, %938 : vector<16x128xf32>
    %c179 = arith.constant 179 : index
    %940 = memref.load %arg2[%c179] : memref<196xf32, #tpu.memory_space<smem>>
    %941 = vector.extract_strided_slice %919 {offsets = [0, 4], sizes = [16, 128], strides = [1, 1]} : vector<16x134xf32> to vector<16x128xf32>
    %942 = vector.broadcast %940 : f32 to vector<16x128xf32>
    %943 = arith.mulf %942, %941 : vector<16x128xf32>
    %944 = arith.addf %939, %943 : vector<16x128xf32>
    %c180 = arith.constant 180 : index
    %945 = memref.load %arg2[%c180] : memref<196xf32, #tpu.memory_space<smem>>
    %946 = vector.extract_strided_slice %919 {offsets = [0, 5], sizes = [16, 128], strides = [1, 1]} : vector<16x134xf32> to vector<16x128xf32>
    %947 = vector.broadcast %945 : f32 to vector<16x128xf32>
    %948 = arith.mulf %947, %946 : vector<16x128xf32>
    %949 = arith.addf %944, %948 : vector<16x128xf32>
    %c181 = arith.constant 181 : index
    %950 = memref.load %arg2[%c181] : memref<196xf32, #tpu.memory_space<smem>>
    %951 = vector.extract_strided_slice %919 {offsets = [0, 6], sizes = [16, 128], strides = [1, 1]} : vector<16x134xf32> to vector<16x128xf32>
    %952 = vector.broadcast %950 : f32 to vector<16x128xf32>
    %953 = arith.mulf %952, %951 : vector<16x128xf32>
    %954 = arith.addf %949, %953 : vector<16x128xf32>
    %955 = vector.extract_strided_slice %11 {offsets = [5, 0], sizes = [16, 134], strides = [1, 1]} : vector<22x134xf32> to vector<16x134xf32>
    %c182 = arith.constant 182 : index
    %956 = memref.load %arg2[%c182] : memref<196xf32, #tpu.memory_space<smem>>
    %957 = vector.extract_strided_slice %955 {offsets = [0, 0], sizes = [16, 128], strides = [1, 1]} : vector<16x134xf32> to vector<16x128xf32>
    %958 = vector.broadcast %956 : f32 to vector<16x128xf32>
    %959 = arith.mulf %958, %957 : vector<16x128xf32>
    %960 = arith.addf %954, %959 : vector<16x128xf32>
    %c183 = arith.constant 183 : index
    %961 = memref.load %arg2[%c183] : memref<196xf32, #tpu.memory_space<smem>>
    %962 = vector.extract_strided_slice %955 {offsets = [0, 1], sizes = [16, 128], strides = [1, 1]} : vector<16x134xf32> to vector<16x128xf32>
    %963 = vector.broadcast %961 : f32 to vector<16x128xf32>
    %964 = arith.mulf %963, %962 : vector<16x128xf32>
    %965 = arith.addf %960, %964 : vector<16x128xf32>
    %c184 = arith.constant 184 : index
    %966 = memref.load %arg2[%c184] : memref<196xf32, #tpu.memory_space<smem>>
    %967 = vector.extract_strided_slice %955 {offsets = [0, 2], sizes = [16, 128], strides = [1, 1]} : vector<16x134xf32> to vector<16x128xf32>
    %968 = vector.broadcast %966 : f32 to vector<16x128xf32>
    %969 = arith.mulf %968, %967 : vector<16x128xf32>
    %970 = arith.addf %965, %969 : vector<16x128xf32>
    %c185 = arith.constant 185 : index
    %971 = memref.load %arg2[%c185] : memref<196xf32, #tpu.memory_space<smem>>
    %972 = vector.extract_strided_slice %955 {offsets = [0, 3], sizes = [16, 128], strides = [1, 1]} : vector<16x134xf32> to vector<16x128xf32>
    %973 = vector.broadcast %971 : f32 to vector<16x128xf32>
    %974 = arith.mulf %973, %972 : vector<16x128xf32>
    %975 = arith.addf %970, %974 : vector<16x128xf32>
    %c186 = arith.constant 186 : index
    %976 = memref.load %arg2[%c186] : memref<196xf32, #tpu.memory_space<smem>>
    %977 = vector.extract_strided_slice %955 {offsets = [0, 4], sizes = [16, 128], strides = [1, 1]} : vector<16x134xf32> to vector<16x128xf32>
    %978 = vector.broadcast %976 : f32 to vector<16x128xf32>
    %979 = arith.mulf %978, %977 : vector<16x128xf32>
    %980 = arith.addf %975, %979 : vector<16x128xf32>
    %c187 = arith.constant 187 : index
    %981 = memref.load %arg2[%c187] : memref<196xf32, #tpu.memory_space<smem>>
    %982 = vector.extract_strided_slice %955 {offsets = [0, 5], sizes = [16, 128], strides = [1, 1]} : vector<16x134xf32> to vector<16x128xf32>
    %983 = vector.broadcast %981 : f32 to vector<16x128xf32>
    %984 = arith.mulf %983, %982 : vector<16x128xf32>
    %985 = arith.addf %980, %984 : vector<16x128xf32>
    %c188 = arith.constant 188 : index
    %986 = memref.load %arg2[%c188] : memref<196xf32, #tpu.memory_space<smem>>
    %987 = vector.extract_strided_slice %955 {offsets = [0, 6], sizes = [16, 128], strides = [1, 1]} : vector<16x134xf32> to vector<16x128xf32>
    %988 = vector.broadcast %986 : f32 to vector<16x128xf32>
    %989 = arith.mulf %988, %987 : vector<16x128xf32>
    %990 = arith.addf %985, %989 : vector<16x128xf32>
    %991 = vector.extract_strided_slice %11 {offsets = [6, 0], sizes = [16, 134], strides = [1, 1]} : vector<22x134xf32> to vector<16x134xf32>
    %c189 = arith.constant 189 : index
    %992 = memref.load %arg2[%c189] : memref<196xf32, #tpu.memory_space<smem>>
    %993 = vector.extract_strided_slice %991 {offsets = [0, 0], sizes = [16, 128], strides = [1, 1]} : vector<16x134xf32> to vector<16x128xf32>
    %994 = vector.broadcast %992 : f32 to vector<16x128xf32>
    %995 = arith.mulf %994, %993 : vector<16x128xf32>
    %996 = arith.addf %990, %995 : vector<16x128xf32>
    %c190 = arith.constant 190 : index
    %997 = memref.load %arg2[%c190] : memref<196xf32, #tpu.memory_space<smem>>
    %998 = vector.extract_strided_slice %991 {offsets = [0, 1], sizes = [16, 128], strides = [1, 1]} : vector<16x134xf32> to vector<16x128xf32>
    %999 = vector.broadcast %997 : f32 to vector<16x128xf32>
    %1000 = arith.mulf %999, %998 : vector<16x128xf32>
    %1001 = arith.addf %996, %1000 : vector<16x128xf32>
    %c191 = arith.constant 191 : index
    %1002 = memref.load %arg2[%c191] : memref<196xf32, #tpu.memory_space<smem>>
    %1003 = vector.extract_strided_slice %991 {offsets = [0, 2], sizes = [16, 128], strides = [1, 1]} : vector<16x134xf32> to vector<16x128xf32>
    %1004 = vector.broadcast %1002 : f32 to vector<16x128xf32>
    %1005 = arith.mulf %1004, %1003 : vector<16x128xf32>
    %1006 = arith.addf %1001, %1005 : vector<16x128xf32>
    %c192 = arith.constant 192 : index
    %1007 = memref.load %arg2[%c192] : memref<196xf32, #tpu.memory_space<smem>>
    %1008 = vector.extract_strided_slice %991 {offsets = [0, 3], sizes = [16, 128], strides = [1, 1]} : vector<16x134xf32> to vector<16x128xf32>
    %1009 = vector.broadcast %1007 : f32 to vector<16x128xf32>
    %1010 = arith.mulf %1009, %1008 : vector<16x128xf32>
    %1011 = arith.addf %1006, %1010 : vector<16x128xf32>
    %c193 = arith.constant 193 : index
    %1012 = memref.load %arg2[%c193] : memref<196xf32, #tpu.memory_space<smem>>
    %1013 = vector.extract_strided_slice %991 {offsets = [0, 4], sizes = [16, 128], strides = [1, 1]} : vector<16x134xf32> to vector<16x128xf32>
    %1014 = vector.broadcast %1012 : f32 to vector<16x128xf32>
    %1015 = arith.mulf %1014, %1013 : vector<16x128xf32>
    %1016 = arith.addf %1011, %1015 : vector<16x128xf32>
    %c194 = arith.constant 194 : index
    %1017 = memref.load %arg2[%c194] : memref<196xf32, #tpu.memory_space<smem>>
    %1018 = vector.extract_strided_slice %991 {offsets = [0, 5], sizes = [16, 128], strides = [1, 1]} : vector<16x134xf32> to vector<16x128xf32>
    %1019 = vector.broadcast %1017 : f32 to vector<16x128xf32>
    %1020 = arith.mulf %1019, %1018 : vector<16x128xf32>
    %1021 = arith.addf %1016, %1020 : vector<16x128xf32>
    %c195 = arith.constant 195 : index
    %1022 = memref.load %arg2[%c195] : memref<196xf32, #tpu.memory_space<smem>>
    %1023 = vector.extract_strided_slice %991 {offsets = [0, 6], sizes = [16, 128], strides = [1, 1]} : vector<16x134xf32> to vector<16x128xf32>
    %1024 = vector.broadcast %1022 : f32 to vector<16x128xf32>
    %1025 = arith.mulf %1024, %1023 : vector<16x128xf32>
    %1026 = arith.addf %1021, %1025 : vector<16x128xf32>
    %c0_14 = arith.constant 0 : index
    %c1_15 = arith.constant 1 : index
    %c0_16 = arith.constant 0 : index
    %c0_17 = arith.constant 0 : index
    %1027 = vector.load %arg4[%c0_14, %c1_15, %c0_16, %c0_17] : memref<1x2x16x128xf32, #tpu.memory_space<vmem>>, vector<1x1x16x128xf32>
    %1028 = vector.shape_cast %1027 : vector<1x1x16x128xf32> to vector<16x128xf32>
    %1029 = vector.shape_cast %1026 : vector<16x128xf32> to vector<1x1x16x128xf32>
    tpu.vector_store %arg4[%c0_14, %c1_15, %c0_16, %c0_17], %1029 {strides = array<i32>} : memref<1x2x16x128xf32, #tpu.memory_space<vmem>>, vector<1x1x16x128xf32>,
    return
  }
  func.func @transform_0(%arg0: i32) -> (i32, i32, i32, i32) {
    %c0_i32 = arith.constant 0 : i32
    %c0_i32_0 = arith.constant 0 : i32
    %c0_i32_1 = arith.constant 0 : i32
    %c0_i32_2 = arith.constant 0 : i32
    return %arg0, %c0_i32, %c0_i32_0, %c0_i32_1 : i32, i32, i32, i32
  }
  func.func @transform_1(%arg0: i32) -> i32 {
    %c0_i32 = arith.constant 0 : i32
    %c0_i32_0 = arith.constant 0 : i32
    return %c0_i32 : i32
  }
  func.func @transform_2(%arg0: i32) -> i32 {
    %c0_i32 = arith.constant 0 : i32
    %c0_i32_0 = arith.constant 0 : i32
    return %c0_i32 : i32
  }
  func.func @transform_3(%arg0: i32) -> (i32, i32, i32, i32) {
    %c0_i32 = arith.constant 0 : i32
    %c0_i32_0 = arith.constant 0 : i32
    %c0_i32_1 = arith.constant 0 : i32
    %c0_i32_2 = arith.constant 0 : i32
    return %arg0, %c0_i32, %c0_i32_0, %c0_i32_1 : i32, i32, i32, i32
  }
}

</mosaic_0001>

<bundles_post_ra>
// kernel: tpu_custom_call.1
= control target key start
LH: loop header
LB: loop body
LE: loop exit
PB: predicated region body
PF: predicated region fallthrough
CT: control target
= control target key end

     0   :  { %8 = vsyncpa [#allocation3], 0  ;;  %s12627_s0 = inlined_call_operand.hbm [shape: f32[2,4,16,128], index: 0, kind: input, shape index: {}]   ;;  %s12628_s1 = inlined_call_operand.vmem [shape: f32[196], index: 1, kind: input, shape index: {}]   ;;  %s12629_s2 = inlined_call_operand.vmem [shape: f32[2], index: 2, kind: input, shape index: {}]   ;;  %s12630_s3 = inlined_call_operand.hbm [shape: f32[2,2,16,128], index: 3, kind: output, shape index: {}]  }
   0x1   :  { %10 = vsyncpa [#allocation3 + $0x1], 0 }
   0x2   :  { %11 = vsyncpa [#allocation5], 0 }
   0x3   :  { %12 = vsyncpa [#allocation8], 0 }
   0x4   :  { %13 = vsyncpa [#allocation4], 0 }
   0x5   :  { %15 = vsyncpa [#allocation4 + $0x1], 0  ;;  %s7380_s12 = smov 0   ;;  %s7382_s13 = smov 0  }
   0x6   :  { %s7384_s14 = smov 0   ;;  %s7386_s15 = smov 0  }
   0x7 LB: > { %s7401_s16 = sadd.s32 4294967295, %s7343_s15   ;;  %s6913_s17 = sadd.s32 4294967294, %s7343_s15   ;;  %s7343_s15 = sphi %s7386_s15, %s13519_s15   ;;  %s7339_s14 = sphi %s7384_s14, %s13518_s14   ;;  %s7335_s13 = sphi %s7382_s13, %s13517_s13   ;;  %s7331_s12 = sphi %s7380_s12, %s13516_s12  }
   0x8   : > { %s7405_s18 = sadd.s32 1, %s7343_s15   ;;  %s28_s19 = sadd.s32 1, %s7339_s14 }
   0x9   : > { %s25_s20 = ssub.s32 %s7343_s15, %s7405_s18  ;;  %p35_p0 = scmp.ne.s32.totalorder %s7339_s14, %s7335_s13 }
   0xa   : > { %p26_p1 = scmp.eq.s32.totalorder %s25_s20, 0  ;;  %p36_p2 = scmp.eq.s32.totalorder %s7343_s15, 0 }
   0xb   : > { %p41_p3 = scmp.ne.s32.totalorder %s7335_s13, %s7331_s12  ;;  %p12631_p4 = scmp.eq.s32.totalorder %s7401_s16, 0 }
   0xc   : > { %s7417_s21 = scalar_select %p26_p1, %s7339_s14, %s28_s19  }
   0xd   : > { %p7419_p5 = por %p36_p2, %p35_p0  ;;  %p7425_p6 = por %p12631_p4, %p41_p3 }
   0xe   : > { %p107_p7 = scmp.eq.s32.totalorder %s7401_s16, 1  ;;  %p113_p8 = scmp.eq.s32.totalorder %s6913_s17, 1 }
   0xf   : > { %s12659_s23 = scalar_select %p7425_p6, 1, 0 }
  0x10   : > { %p6914_p9 = scmp.ge.s32.totalorder %s7343_s15, 1  ;;  %p120_p10 = scmp.lt.s32.totalorder %s7343_s15, 3 }
  0x11   : > { %p7432_p11 = por %p107_p7, %p35_p0  ;;  %p7436_p12 = por %p113_p8, %p41_p3 }
  0x12   : > { %p7440_p13 = pnand %p6914_p9, %p120_p10  ;;  %s133_s29 = sshll.u32 %s12628_s1, 4  ;;  %s134_s29 = int_to_ptr.vmem [resolvable:$true] %s133_s29 }
  0x13   : > { %s12660_s24 = scalar_select %p7432_p11, 1, 0 }
  0x14   : > { %s12661_s25 = scalar_select %p7436_p12, 1, 0 }
  0x15   : > { %s12662_s26 = scalar_select %p7440_p13, 1, 0 }
  0x16   : > { %p7143_p1 = pneg %p7440_p13  ;;  %p7160_p2 = scmp.lt.s32.totalorder %s7343_s15, 2 }
  0x17   : > { %s144_s6 = sshll.u32 %s12629_s2, 4  ;;  %s7209_s8 = scalar_lea.vmem %s134_s29, 32  ;;  %s145_s6 = int_to_ptr.vmem [resolvable:$true] %s144_s6 }
  0x18   : > { %p7453_p7 = pnand %p7143_p1, %p12631_p4  ;;  %p7462_p3 = pnand %p7160_p2, %p7419_p5 }
  0x19   : > { %p7210_p8 = scmp.ne.s32.totalorder %s134_s29, %s7209_s8  ;;  %p7217_p0 = scmp.lt.s32.totalorder %s134_s29, %s134_s29 }
  0x1a   : > { %s12664_s7 = scalar_select %p7462_p3, 1, 0 }
  0x1b   : > { %p7211_p9 = pneg %p7453_p7  ;;  %p7218_p4 = scmp.lt.s32.totalorder %s7209_s8, %s7209_s8 }
  0x1d   : > { %p7212_p10 = pnand %p7211_p9, %p7210_p8  ;;  %p7219_p12 = por %p7218_p4, %p7217_p0 }
  0x1f   : > { %p7213_p1 = pneg %p7212_p10 }
  0x21   : > { %p7220_p11 = pnand %p7219_p12, %p7213_p1 }
  0x23   : > { %7223 = shalt.err (!%p7220_p11)
}
  0x24   : > { %s7345_s9 = smov [#allocation6]   ;;  %s155_s10 = sand.u32 1, %s7339_s14  }
  0x25   : > { %7146 = dma.vmem_to_smem (!%p7453_p7), %s134_s29, 32, %s7345_s9, [#allocation5]  }
  0x26   : > { %s7224_s11 = scalar_lea.vmem %s145_s6, 16  ;;  %p7232_p8 = scmp.lt.s32.totalorder %s145_s6, %s145_s6 }
  0x27   : > { %p7225_p5 = scmp.ne.s32.totalorder %s145_s6, %s7224_s11  ;;  %p7233_p10 = scmp.lt.s32.totalorder %s7224_s11, %s7224_s11 }
  0x29   : > { %p7227_p2 = pnand %p7225_p5, %p7211_p9  ;;  %p7234_p13 = por %p7233_p10, %p7232_p8 }
  0x2b   : > { %p7228_p6 = pneg %p7227_p2 }
  0x2d   : > { %p7235_p3 = pnand %p7234_p13, %p7228_p6 }
  0x2f   : > { %7238 = shalt.err (!%p7235_p3)
}
  0x30   : > { %s7346_s17 = smov [#allocation7]   ;;  %s6918_s19 = sshll.u32 %s155_s10, 6 }
  0x31   : > { %7149 = dma.vmem_to_smem (!%p7453_p7), %s145_s6, 16, %s7346_s17, [#allocation8]  }
  0x32   : > { %s7129_s20 = sshll.u32 %s7343_s15, 10  ;;  %s159_s29 = scalar_lea.vmem [#allocation2], %s6918_s19 }
  0x33   : > { %s7483_s28 = scalar_lea.hbm %s12627_s0, %s7129_s20  ;;  %s166_s4 = sshll.u32 %s159_s29, 4  ;;  %s7485_s4 = int_to_ptr.vmem [resolvable:$true] %s166_s4 }
  0x34   : > { %s7487_s30 = scalar_lea.sflag [#allocation3], %s155_s10  ;;  %s7239_s5 = scalar_lea.hbm %s7483_s28, 1024 }
  0x35   : > { %p7240_p4 = scmp.ne.s32.totalorder %s7483_s28, %s7239_s5  ;;  %p12665_p6 = scmp.ne.s32.totalorder %s12664_s7, 0 }
  0x36   : > { %s7244_s9 = scalar_lea.hbm %s12627_s0, 2048  ;;  %p7245_p0 = scmp.lt.u32.totalorder %s7483_s28, %s12627_s0 }
  0x37   : > { %p7241_p11 = pneg %p12665_p6  ;;  %p7246_p7 = scmp.lt.u32.totalorder %s7244_s9, %s7239_s5 }
  0x38   : > { %p7248_p9 = scmp.lt.u32.totalorder %s7239_s5, %s7483_s28 }
  0x39   : > { %p7242_p12 = pnand %p7241_p11, %p7240_p4  ;;  %p7247_p3 = por %p7246_p7, %p7245_p0 }
  0x3b   : > { %p7243_p13 = pneg %p7242_p12  ;;  %p7249_p1 = por %p7248_p9, %p7247_p3 }
  0x3d   : > { %p7250_p5 = pnand %p7249_p1, %p7243_p13 }
  0x3f   : > { %7253 = shalt.err (!%p7250_p5)
}
  0x40   : > { %s7254_s10 = scalar_lea.vmem %s7485_s4, 1024  ;;  %s7347_s19 = smov [#allocation2]  }
  0x41   : > { %p7255_p2 = scmp.ne.s32.totalorder %s7485_s4, %s7254_s10  ;;  %s7259_s20 = sshll.u32 %s7347_s19, 4  ;;  %s7260_s20 = int_to_ptr.vmem [resolvable:$false] %s7259_s20 }
  0x42   : > { %s7261_s22 = scalar_lea.vmem %s7260_s20, 2048  ;;  %p7262_p4 = scmp.lt.s32.totalorder %s7485_s4, %s7260_s20 }
  0x43   : > { %p7257_p8 = pnand %p7255_p2, %p7241_p11  ;;  %p7263_p12 = scmp.lt.s32.totalorder %s7261_s22, %s7254_s10 }
  0x45   : > { %p7258_p10 = pneg %p7257_p8  ;;  %p7264_p0 = por %p7263_p12, %p7262_p4 }
  0x47   : > { %p7265_p7 = pnand %p7264_p0, %p7258_p10 }
  0x49   : > { %7268 = shalt.err (!%p7265_p7)
}
  0x4a   : > { %s7348_s27 = smov 128   ;;  %s7349_s29 = smov 8  }
  0x4b   : > { %7153 = dma.hbm_to_vmem [thread:$0]  (!%p12665_p6), %s7483_s28, 1024, %s7485_s4, %s7487_s30, %s7348_s27, %s7348_s27, %s7349_s29  }
  0x4c   : > { %p12666_p11 = scmp.ne.s32.totalorder %s12662_s26, 0 }
  0x4e   : > { %178 = sbr.rel (%p12666_p11) target bundleno = 1701 (0x6a5), region = 32 }
  0x55   : > { %s7518_s5 = sand.u32 1, %s7335_s13   ;;  %p12667_p13 = scmp.ne.s32.totalorder %s12659_s23, 0 }
  0x56   : > { %s6922_s6 = sshll.u32 %s7518_s5, 6  ;;  %s181_s8 = scalar_lea.sflag [#allocation3], %s7518_s5 }
  0x57   : > { %s184_s9 = scalar_lea.vmem [#allocation2], %s6922_s6 }
  0x58   : > { %7314 = dma.done.wait (%p12667_p13), %s181_s8, 1024  }
  0x59   : > { %7316 = vsyncadd (%p12667_p13), %s181_s8, 4294966272  ;;  %p12668_p3 = scmp.eq.s32.totalorder %s7401_s16, 0 }
  0x5b   : > { %7318 = dma.done.wait (%p12668_p3), [#allocation5], 32   ;;  %p12669_p6 = pmov %p12668_p3 }
  0x5c   : > { %p12670_p9 = pmov %p12668_p3 }
  0x5d   : > { %7320 = vsyncadd (%p12669_p6), [#allocation5], 4294967264 }
  0x5e   : > { %7322 = dma.done.wait (%p12670_p9), [#allocation8], 16   ;;  %p12671_p1 = pmov %p12668_p3 }
  0x60   : > { %7324 = vsyncadd (%p12671_p1), [#allocation8], 4294967280 }
  0x61   : > { %197 = sfence }
  0x62   : > { %v216_v0 = vld [vmem:[%s184_s9] sm:$0xff]  ;;  %v218_v1 = vld [vmem:[%s184_s9 + $0x10] sm:$0xff]  ;;  %v217_v5 = vld [vmem:[%s184_s9 + $0x8] sm:$0xff]  ;;  %s7350_s23 = smov 3   ;;  %s6926_s26 = sld [smem:[#allocation6 + $0x1]]  ;;  %vm246_vm0 = vcmask 23552  }
  0x63   : > { %v220_v2 = vld [vmem:[%s184_s9 + $0x20] sm:$0xff]  ;;  %v222_v3 = vld [vmem:[%s184_s9 + $0x30] sm:$0xff]  ;;  %v224_v4 = vadd.f32 %v218_v1, %v216_v0  ;;  %v219_v6 = vld [vmem:[%s184_s9 + $0x18] sm:$0xff]  ;;  %vm255_vm1 = vcmask 1042432   ;;  %s6927_s7 = sld [smem:[#allocation6 + $0x2]]  ;;  %s7351_s28 = smov 127  }
  0x64   : > { %v232_v7 = vmax.f32 %v216_v0, %v220_v2  ;;  %v221_v8 = vld [vmem:[%s184_s9 + $0x28] sm:$0xff]  ;;  %v223_v9 = vld [vmem:[%s184_s9 + $0x38] sm:$0xff]  ;;  %v227_v10 = vadd.f32 %v219_v6, %v217_v5  ;;  %v233_v11 = vmax.f32 %v218_v1, %v222_v3  ;;  %s6928_s4 = sld [smem:[#allocation6 + $0x3]]  ;;  %s7352_s30 = smov 126   ;;  %vm470_vm2 = vcmask 1046528  }
  0x65   : > { %v225_v12 = vadd.f32 %v224_v4, %v220_v2  ;;  %v235_v13 = vmax.f32 %v217_v5, %v221_v8  ;;  %v236_v14 = vmax.f32 %v219_v6, %v223_v9  ;;  %s6929_s11 = sld [smem:[#allocation6 + $0x4]]  ;;  %s7353_s17 = smov 125   ;;  %vm716_vm3 = vcmask 1045504  }
  0x66   : > { %v228_v15 = vadd.f32 %v227_v10, %v221_v8  ;;  %v234_v16 = vmax.f32 %v232_v7, %v233_v11  ;;  %s6930_s10 = sld [smem:[#allocation6 + $0x5]]  ;;  %s7354_s19 = smov 124   ;;  %vm962_vm4 = vcmask 1044480   ;;  %vm1208_vm5 = vcmask 1043456  }
  0x67   : > { %v226_v17 = vadd.f32 %v225_v12, %v222_v3  ;;  %v237_v19 = vmax.f32 %v235_v13, %v236_v14  ;;  %s6931_s20 = sld [smem:[#allocation6 + $0x6]]  ;;  %s6933_s22 = sld [smem:[#allocation6 + $0x8]]  ;;  %vm1699_vm6 = vcmask 1041408   ;;  %vm330_vm7 = vcmask 1039360  }
  0x68   : > { %v229_v18 = vadd.f32 %v228_v15, %v223_v9  ;;  %274 = vrot.lane.b32.xlu1 %v234_v16, %s7350_s23  ;;  %v313_v27 = vstv %s6926_s26  ;;  %s7355_s27 = smov 123   ;;  %s6934_s29 = sld [smem:[#allocation6 + $0x9]]  ;;  %vm355_vm8 = vcmask 1031168   ;;  %vm380_vm9 = vcmask 1022976  }
  0x69   : > { %v230_v20 = vmul.f32 0.25, %v226_v17  ;;  %v338_v41 = vstv %s6927_s7  ;;  %s7356_s6 = smov 122   ;;  %s6935_s8 = sld [smem:[#allocation6 + $0xa]]  ;;  %vm405_vm10 = vcmask 1014784   ;;  %vm430_vm11 = vcmask 1006592  }
  0x6a   : > { %v231_v21 = vmul.f32 0.25, %v229_v18  ;;  %v363_v46 = vstv %s6928_s4  ;;  %s6936_s9 = sld [smem:[#allocation6 + $0xb]]  ;;  %s6938_s26 = sld [smem:[#allocation6 + $0xd]]  ;;  %vm455_vm12 = vcmask 998400  }
  0x6b   : > { %240 = vrot.lane.b32.xlu0 %v230_v20, %s7350_s23  ;;  %v388_v51 = vstv %s6929_s11  ;;  %s6940_s7 = sld [smem:[#allocation6 + $0xf]]  ;;  %s6941_s4 = sld [smem:[#allocation6 + $0x10]] }
  0x6c   : > { %276 = vrot.lane.b32.xlu1 %v237_v19, %s7350_s23  ;;  %v413_v56 = vstv %s6930_s10  ;;  %s6942_s11 = sld [smem:[#allocation6 + $0x11]]  ;;  %s6943_s10 = sld [smem:[#allocation6 + $0x12]] }
  0x6d   : > { %v438_v61 = vstv %s6931_s20  ;;  %v481_v0 = vstv %s6933_s22  ;;  %s6944_s20 = sld [smem:[#allocation6 + $0x13]]  ;;  %s6945_s22 = sld [smem:[#allocation6 + $0x14]] }
  0x6e   : > { %v519_v15 = vstv %s6934_s29  ;;  %s6947_s29 = sld [smem:[#allocation6 + $0x16]]  ;;  %p13513_p2 = scmp.ne.s32.totalorder %s12660_s24, 0 }
  0x6f   : > { %242 = vrot.lane.b32.xlu0 %v231_v21, %s7350_s23  ;;  %s6937_s23 = sld [smem:[#allocation6 + $0xc]] }
  0xdd   : > { %v241_v22 = vpop.permute.xlu0 %240 }
  0xde   : > { %v247_v23 = vsel %vm246_vm0, 0.0, %v241_v22  ;;  %v249_v24 = vsel %vm246_vm0, %v241_v22, 0.0 }
  0xdf   : > { %v256_v25 = vrot.slane %v247_v23, 5  ;;  %v257_v26 = vrot.slane %v249_v24, 5 }
  0xe1   : > { %v7537_v28 = vsel %vm255_vm1, 0.0, %v256_v25  ;;  %v7540_v29 = vsel %vm255_vm1, 0.0, %v257_v26  ;;  %v243_v30 = vpop.permute.xlu0 %242 }
  0xe2   : > { %12672 = vst [vmem:[#allocation14_spill] sm:$0xff] %v7540_v29  ;;  %v7543_v31 = vsel %vm246_vm0, 0.0, %v243_v30  ;;  %v7546_v32 = vsel %vm246_vm0, %v243_v30, 0.0  ;;  %v315_v33 = vmul.f32 %v313_v27, %v7540_v29  ;;  %v314_v34 = vmul.f32 %v313_v27, %v7537_v28 }
  0xe3   : > { %v258_v35 = vrot.slane %v7543_v31, 5  ;;  %v260_v36 = vrot.slane %v7546_v32, 5  ;;  %v340_v42 = vmul.f32 %v338_v41, %v7540_v29  ;;  %v339_v43 = vmul.f32 %v338_v41, %v7537_v28 }
  0xe4   : > { %324 = vrot.lane.b32.xlu1 %v315_v33, %s7351_s28  ;;  %322 = vrot.lane.b32.xlu0 %v314_v34, %s7351_s28  ;;  %v365_v47 = vmul.f32 %v363_v46, %v7540_v29  ;;  %v364_v48 = vmul.f32 %v363_v46, %v7537_v28  ;;  %v390_v52 = vmul.f32 %v388_v51, %v7540_v29  ;;  %v557_v34 = vstv %s6935_s8  ;;  %s6948_s8 = sld [smem:[#allocation6 + $0x17]] }
  0xe5   : > { %v7557_v37 = vsel %vm255_vm1, %v256_v25, %v258_v35  ;;  %v7560_v38 = vsel %vm255_vm1, %v257_v26, %v260_v36  ;;  %v389_v53 = vmul.f32 %v388_v51, %v7537_v28  ;;  %v415_v57 = vmul.f32 %v413_v56, %v7540_v29 }
  0xe6   : > { %12673 = vst [vmem:[#allocation15_spill] sm:$0xff] %v7560_v38  ;;  %v317_v39 = vmul.f32 %v313_v27, %v7560_v38  ;;  %v316_v40 = vmul.f32 %v313_v27, %v7557_v37  ;;  %v342_v44 = vmul.f32 %v338_v41, %v7560_v38  ;;  %v341_v45 = vmul.f32 %v338_v41, %v7557_v37 }
  0xe7   : > { %v367_v49 = vmul.f32 %v363_v46, %v7560_v38  ;;  %v366_v50 = vmul.f32 %v363_v46, %v7557_v37  ;;  %v392_v54 = vmul.f32 %v388_v51, %v7560_v38  ;;  %v391_v55 = vmul.f32 %v388_v51, %v7557_v37 }
  0xe8   : > { %328 = vrot.lane.b32.xlu1 %v317_v39, %s7351_s28  ;;  %326 = vrot.lane.b32.xlu0 %v316_v40, %s7351_s28  ;;  %v414_v58 = vmul.f32 %v413_v56, %v7537_v28  ;;  %v417_v59 = vmul.f32 %v413_v56, %v7560_v38  ;;  %v416_v60 = vmul.f32 %v413_v56, %v7557_v37  ;;  %v7601_v1 = vsel %vm255_vm1, %v260_v36, 0.0 }
  0xe9   : > { %v440_v62 = vmul.f32 %v438_v61, %v7540_v29  ;;  %v439_v63 = vmul.f32 %v438_v61, %v7537_v28  ;;  %12674 = vst [vmem:[#allocation16_spill] sm:$0xff] %v7601_v1  ;;  %v485_v2 = vmul.f32 %v481_v0, %v7560_v38  ;;  %v484_v3 = vmul.f32 %v481_v0, %v7557_v37 }
  0xea   : > { %v7608_v4 = vsel %vm255_vm1, %v258_v35, 0.0  ;;  %v483_v5 = vmul.f32 %v481_v0, %v7540_v29  ;;  %v482_v6 = vmul.f32 %v481_v0, %v7537_v28  ;;  %v442_v7 = vmul.f32 %v438_v61, %v7560_v38 }
  0xeb   : > { %12675 = vst [vmem:[#allocation17_spill] sm:$0xff] %v7608_v4  ;;  %v441_v8 = vmul.f32 %v438_v61, %v7557_v37  ;;  %v487_v9 = vmul.f32 %v481_v0, %v7601_v1  ;;  %v498_v10 = vrot.slane %v485_v2, 1  ;;  %v495_v11 = vrot.slane %v484_v3, 1 }
  0xec   : > { %349 = vrot.lane.b32.xlu1 %v340_v42, %s7352_s30  ;;  %347 = vrot.lane.b32.xlu0 %v339_v43, %s7352_s30  ;;  %v486_v12 = vmul.f32 %v481_v0, %v7608_v4  ;;  %v497_v13 = vrot.slane %v483_v5, 1  ;;  %v494_v14 = vrot.slane %v482_v6, 1  ;;  %v523_v17 = vmul.f32 %v519_v15, %v7560_v38 }
  0xed   : > { %v502_v16 = vrot.slane %v487_v9, 1  ;;  %v522_v21 = vmul.f32 %v519_v15, %v7557_v37  ;;  %v521_v22 = vmul.f32 %v519_v15, %v7540_v29  ;;  %v520_v23 = vmul.f32 %v519_v15, %v7537_v28 }
  0xee   : > { %v499_v18 = vsel %vm470_vm2, %v497_v13, %v498_v10  ;;  %v496_v19 = vsel %vm470_vm2, %v494_v14, %v495_v11  ;;  %v500_v20 = vrot.slane %v486_v12, 1  ;;  %v536_v25 = vrot.slane %v523_v17, 1 }
  0xef   : > { %v503_v24 = vsel %vm470_vm2, %v498_v10, %v502_v16  ;;  %v533_v27 = vrot.slane %v522_v21, 1  ;;  %v525_v30 = vmul.f32 %v519_v15, %v7601_v1  ;;  %v524_v31 = vmul.f32 %v519_v15, %v7608_v4 }
  0xf0   : > { %353 = vrot.lane.b32.xlu1 %v342_v44, %s7352_s30  ;;  %351 = vrot.lane.b32.xlu0 %v341_v45, %s7352_s30  ;;  %v501_v26 = vsel %vm470_vm2, %v495_v11, %v500_v20  ;;  %v535_v32 = vrot.slane %v521_v22, 1  ;;  %v532_v33 = vrot.slane %v520_v23, 1  ;;  %v561_v36 = vmul.f32 %v557_v34, %v7560_v38 }
  0xf1   : > { %v540_v40 = vrot.slane %v525_v30, 1  ;;  %v538_v41 = vrot.slane %v524_v31, 1  ;;  %v560_v42 = vmul.f32 %v557_v34, %v7557_v37  ;;  %v559_v43 = vmul.f32 %v557_v34, %v7540_v29 }
  0xf2   : > { %v537_v35 = vsel %vm470_vm2, %v535_v32, %v536_v25  ;;  %v534_v39 = vsel %vm470_vm2, %v532_v33, %v533_v27  ;;  %v558_v44 = vmul.f32 %v557_v34, %v7537_v28  ;;  %v574_v45 = vrot.slane %v561_v36, 1 }
  0xf3   : > { %v563_v46 = vmul.f32 %v557_v34, %v7601_v1  ;;  %v573_v51 = vrot.slane %v559_v43, 1 }
  0xf4   : > { %374 = vrot.lane.b32.xlu1 %v365_v47, %s7353_s17  ;;  %372 = vrot.lane.b32.xlu0 %v364_v48, %s7353_s17  ;;  %v541_v47 = vsel %vm470_vm2, %v536_v25, %v540_v40  ;;  %v539_v48 = vsel %vm470_vm2, %v533_v27, %v538_v41  ;;  %v671_v25 = vstv %s6938_s26  ;;  %s6951_s26 = sld [smem:[#allocation6 + $0x1a]] }
  0xf5   : > { %v675_v27 = vmul.f32 %v671_v25, %v7560_v38  ;;  %v674_v33 = vmul.f32 %v671_v25, %v7557_v37  ;;  %v676_v43 = vmul.f32 %v671_v25, %v7608_v4 }
  0xf7   : > { %v688_v36 = vrot.slane %v675_v27, 1 }
  0xf8   : > { %378 = vrot.lane.b32.xlu1 %v367_v49, %s7353_s17  ;;  %376 = vrot.lane.b32.xlu0 %v366_v50, %s7353_s17  ;;  %v571_v49 = vrot.slane %v560_v42, 1  ;;  %v562_v50 = vmul.f32 %v557_v34, %v7608_v4  ;;  %v673_v34 = vmul.f32 %v671_v25, %v7540_v29  ;;  %v685_v42 = vrot.slane %v674_v33, 1 }
  0xfc   : > { %399 = vrot.lane.b32.xlu1 %v390_v52, %s7354_s19  ;;  %397 = vrot.lane.b32.xlu0 %v389_v53, %s7354_s19  ;;  %v570_v52 = vrot.slane %v558_v44, 1  ;;  %v575_v53 = vsel %vm470_vm2, %v573_v51, %v574_v45  ;;  %v687_v44 = vrot.slane %v673_v34, 1 }
  0xfe   : > { %v572_v56 = vsel %vm470_vm2, %v570_v52, %v571_v49 }
 0x100   : > { %403 = vrot.lane.b32.xlu1 %v392_v54, %s7354_s19  ;;  %401 = vrot.lane.b32.xlu0 %v391_v55, %s7354_s19  ;;  %v578_v54 = vrot.slane %v563_v46, 1  ;;  %v595_v55 = vstv %s6936_s9  ;;  %v689_v46 = vsel %vm470_vm2, %v687_v44, %v688_v36  ;;  %s6949_s9 = sld [smem:[#allocation6 + $0x18]] }
 0x101   : > { %v596_v61 = vmul.f32 %v595_v55, %v7537_v28  ;;  %v600_v5 = vmul.f32 %v595_v55, %v7608_v4 }
 0x103   : > { %v614_v13 = vrot.slane %v600_v5, 1 }
 0x104   : > { %424 = vrot.lane.b32.xlu1 %v415_v57, %s7355_s27  ;;  %422 = vrot.lane.b32.xlu0 %v414_v58, %s7355_s27  ;;  %v576_v57 = vrot.slane %v562_v50, 1  ;;  %v599_v58 = vmul.f32 %v595_v55, %v7560_v38  ;;  %v690_v50 = vrot.slane %v676_v43, 1 }
 0x106   : > { %v577_v0 = vsel %vm470_vm2, %v571_v49, %v576_v57  ;;  %v612_v2 = vrot.slane %v599_v58, 1  ;;  %v691_v57 = vsel %vm470_vm2, %v685_v42, %v690_v50 }
 0x108   : > { %428 = vrot.lane.b32.xlu1 %v417_v59, %s7355_s27  ;;  %426 = vrot.lane.b32.xlu0 %v416_v60, %s7355_s27  ;;  %v598_v59 = vmul.f32 %v595_v55, %v7557_v37  ;;  %v597_v60 = vmul.f32 %v595_v55, %v7540_v29 }
 0x10a   : > { %v609_v3 = vrot.slane %v598_v59, 1  ;;  %v611_v6 = vrot.slane %v597_v60, 1 }
 0x10c   : > { %449 = vrot.lane.b32.xlu1 %v440_v62, %s7356_s6  ;;  %447 = vrot.lane.b32.xlu0 %v439_v63, %s7356_s6  ;;  %v579_v62 = vsel %vm470_vm2, %v574_v45, %v578_v54  ;;  %v601_v63 = vmul.f32 %v595_v55, %v7601_v1  ;;  %v613_v11 = vsel %vm470_vm2, %v611_v6, %v612_v2 }
 0x10e   : > { %v616_v9 = vrot.slane %v601_v63, 1  ;;  %v765_v63 = vstv %s6941_s4  ;;  %s6954_s4 = sld [smem:[#allocation6 + $0x1d]] }
 0x110   : > { %453 = vrot.lane.b32.xlu1 %v442_v7, %s7356_s6  ;;  %451 = vrot.lane.b32.xlu0 %v441_v8, %s7356_s6  ;;  %v608_v7 = vrot.slane %v596_v61, 1  ;;  %v633_v8 = vstv %s6937_s23  ;;  %v617_v17 = vsel %vm470_vm2, %v612_v2, %v616_v9  ;;  %v769_v2 = vmul.f32 %v765_v63, %v7560_v38  ;;  %s6950_s23 = sld [smem:[#allocation6 + $0x19]] }
 0x111   : > { %v637_v10 = vmul.f32 %v633_v8, %v7560_v38  ;;  %v636_v14 = vmul.f32 %v633_v8, %v7557_v37  ;;  %v635_v15 = vmul.f32 %v633_v8, %v7540_v29  ;;  %v634_v16 = vmul.f32 %v633_v8, %v7537_v28 }
 0x112   : > { %v610_v12 = vsel %vm470_vm2, %v608_v7, %v609_v3  ;;  %v639_v21 = vmul.f32 %v633_v8, %v7601_v1  ;;  %v638_v22 = vmul.f32 %v633_v8, %v7608_v4  ;;  %v768_v7 = vmul.f32 %v765_v63, %v7557_v37 }
 0x113   : > { %v647_v20 = vrot.slane %v636_v14, 1  ;;  %v649_v23 = vrot.slane %v635_v15, 1  ;;  %v767_v8 = vmul.f32 %v765_v63, %v7540_v29  ;;  %v766_v9 = vmul.f32 %v765_v63, %v7537_v28 }
 0x114   : > { %506 = vrot.lane.b32.xlu1 %v499_v18, %s7351_s28  ;;  %504 = vrot.lane.b32.xlu0 %v496_v19, %s7351_s28  ;;  %v650_v18 = vrot.slane %v637_v10, 1  ;;  %v615_v19 = vsel %vm470_vm2, %v609_v3, %v614_v13  ;;  %v654_v31 = vrot.slane %v639_v21, 1  ;;  %v652_v32 = vrot.slane %v638_v22, 1 }
 0x115   : > { %v779_v13 = vrot.slane %v768_v7, 2  ;;  %v771_v14 = vmul.f32 %v765_v63, %v7601_v1  ;;  %v770_v15 = vmul.f32 %v765_v63, %v7608_v4 }
 0x116   : > { %v655_v40 = vsel %vm470_vm2, %v650_v18, %v654_v31  ;;  %v653_v41 = vsel %vm470_vm2, %v647_v20, %v652_v32 }
 0x117   : > { %v786_v22 = vrot.slane %v771_v14, 2 }
 0x118   : > { %510 = vrot.lane.b32.xlu1 %v503_v24, %s7351_s28  ;;  %508 = vrot.lane.b32.xlu0 %v501_v26, %s7351_s28  ;;  %v646_v24 = vrot.slane %v634_v16, 1  ;;  %v651_v26 = vsel %vm470_vm2, %v649_v23, %v650_v18  ;;  %v781_v16 = vrot.slane %v767_v8, 2  ;;  %v803_v18 = vstv %s6942_s11  ;;  %s6955_s11 = sld [smem:[#allocation6 + $0x1e]] }
 0x119   : > { %v784_v23 = vrot.slane %v770_v15, 2  ;;  %v804_v27 = vmul.f32 %v803_v18, %v7537_v28  ;;  %v809_v31 = vmul.f32 %v803_v18, %v7601_v1 }
 0x11a   : > { %v648_v30 = vsel %vm470_vm2, %v646_v24, %v647_v20  ;;  %v807_v20 = vmul.f32 %v803_v18, %v7560_v38  ;;  %v806_v24 = vmul.f32 %v803_v18, %v7557_v37 }
 0x11b   : > { %v785_v33 = vsel %vm716_vm3, %v779_v13, %v784_v23  ;;  %v917_v23 = vstv %s6945_s22  ;;  %s6958_s22 = sld [smem:[#allocation6 + $0x21]] }
 0x11c   : > { %544 = vrot.lane.b32.xlu1 %v537_v35, %s7352_s30  ;;  %542 = vrot.lane.b32.xlu0 %v534_v39, %s7352_s30  ;;  %v672_v35 = vmul.f32 %v671_v25, %v7537_v28  ;;  %v677_v39 = vmul.f32 %v671_v25, %v7601_v1  ;;  %v7722_v25 = vpop.permute.xlu1 %274  ;;  %v817_v34 = vrot.slane %v806_v24, 2 }
 0x11e   : > { %v684_v45 = vrot.slane %v672_v35, 1  ;;  %v808_v35 = vmul.f32 %v803_v18, %v7608_v4 }
 0x120   : > { %548 = vrot.lane.b32.xlu1 %v541_v47, %s7352_s30  ;;  %546 = vrot.lane.b32.xlu0 %v539_v48, %s7352_s30  ;;  %v692_v47 = vrot.slane %v677_v39, 1  ;;  %v727_v48 = vstv %s6940_s7  ;;  %v686_v49 = vsel %vm470_vm2, %v684_v45, %v685_v42  ;;  %v816_v39 = vrot.slane %v804_v27, 2  ;;  %s6952_s7 = sld [smem:[#allocation6 + $0x1b]] }
 0x121   : > { %v731_v51 = vmul.f32 %v727_v48, %v7560_v38  ;;  %v730_v52 = vmul.f32 %v727_v48, %v7557_v37  ;;  %v728_v54 = vmul.f32 %v727_v48, %v7537_v28  ;;  %v732_v60 = vmul.f32 %v727_v48, %v7608_v4 }
 0x122   : > { %v693_v55 = vsel %vm470_vm2, %v688_v36, %v692_v47  ;;  %v824_v42 = vrot.slane %v809_v31, 2  ;;  %v818_v45 = vsel %vm716_vm3, %v816_v39, %v817_v34  ;;  %v921_v27 = vmul.f32 %v917_v23, %v7560_v38 }
 0x123   : > { %v744_v58 = vrot.slane %v731_v51, 2  ;;  %v741_v59 = vrot.slane %v730_v52, 2  ;;  %v746_v6 = vrot.slane %v732_v60, 2  ;;  %v879_v60 = vstv %s6944_s20  ;;  %s6957_s20 = sld [smem:[#allocation6 + $0x20]] }
 0x124   : > { %582 = vrot.lane.b32.xlu1 %v575_v53, %s7353_s17  ;;  %580 = vrot.lane.b32.xlu0 %v572_v56, %s7353_s17  ;;  %v729_v53 = vmul.f32 %v727_v48, %v7540_v29  ;;  %v733_v56 = vmul.f32 %v727_v48, %v7601_v1  ;;  %v881_v7 = vmul.f32 %v879_v60, %v7540_v29 }
 0x125   : > { %v880_v8 = vmul.f32 %v879_v60, %v7537_v28  ;;  %v919_v31 = vmul.f32 %v917_v23, %v7540_v29 }
 0x126   : > { %v743_v61 = vrot.slane %v729_v53, 2 }
 0x128   : > { %586 = vrot.lane.b32.xlu1 %v579_v62, %s7353_s17  ;;  %584 = vrot.lane.b32.xlu0 %v577_v0, %s7353_s17  ;;  %v740_v62 = vrot.slane %v728_v54, 2  ;;  %v748_v0 = vrot.slane %v733_v56, 2  ;;  %v745_v3 = vsel %vm716_vm3, %v743_v61, %v744_v58 }
 0x12a   : > { %v742_v5 = vsel %vm716_vm3, %v740_v62, %v741_v59  ;;  %v749_v10 = vsel %vm716_vm3, %v744_v58, %v748_v0  ;;  %v883_v0 = vmul.f32 %v879_v60, %v7560_v38 }
 0x12c   : > { %620 = vrot.lane.b32.xlu1 %v613_v11, %s7354_s19  ;;  %618 = vrot.lane.b32.xlu0 %v610_v12, %s7354_s19  ;;  %v782_v11 = vrot.slane %v769_v2, 2  ;;  %v747_v12 = vsel %vm716_vm3, %v741_v59, %v746_v6  ;;  %v882_v6 = vmul.f32 %v879_v60, %v7557_v37 }
 0x12e   : > { %v787_v32 = vsel %vm716_vm3, %v782_v11, %v786_v22  ;;  %v893_v15 = vrot.slane %v882_v6, 2 }
 0x130   : > { %624 = vrot.lane.b32.xlu1 %v617_v17, %s7354_s19  ;;  %622 = vrot.lane.b32.xlu0 %v615_v19, %s7354_s19  ;;  %v778_v17 = vrot.slane %v766_v9, 2  ;;  %v783_v19 = vsel %vm716_vm3, %v781_v16, %v782_v11  ;;  %v896_v11 = vrot.slane %v883_v0, 2  ;;  %v884_v16 = vmul.f32 %v879_v60, %v7608_v4 }
 0x132   : > { %v780_v21 = vsel %vm716_vm3, %v778_v17, %v779_v13  ;;  %v895_v17 = vrot.slane %v881_v7, 2 }
 0x134   : > { %658 = vrot.lane.b32.xlu1 %v651_v26, %s7355_s27  ;;  %656 = vrot.lane.b32.xlu0 %v648_v30, %s7355_s27  ;;  %v805_v26 = vmul.f32 %v803_v18, %v7540_v29  ;;  %v820_v30 = vrot.slane %v807_v20, 2  ;;  %v892_v18 = vrot.slane %v880_v8, 2 }
 0x136   : > { %v819_v36 = vrot.slane %v805_v26, 2  ;;  %v825_v52 = vsel %vm716_vm3, %v820_v30, %v824_v42  ;;  %v894_v24 = vsel %vm716_vm3, %v892_v18, %v893_v15  ;;  %v898_v26 = vrot.slane %v884_v16, 2 }
 0x138   : > { %662 = vrot.lane.b32.xlu1 %v655_v40, %s7355_s27  ;;  %660 = vrot.lane.b32.xlu0 %v653_v41, %s7355_s27  ;;  %v841_v40 = vstv %s6943_s10  ;;  %v7734_v41 = vpop.permute.xlu1 %276  ;;  %v821_v44 = vsel %vm716_vm3, %v819_v36, %v820_v30  ;;  %v920_v30 = vmul.f32 %v917_v23, %v7557_v37  ;;  %v923_v36 = vmul.f32 %v917_v23, %v7601_v1  ;;  %s6956_s10 = sld [smem:[#allocation6 + $0x1f]] }
 0x139   : > { %v845_v43 = vmul.f32 %v841_v40, %v7560_v38  ;;  %v844_v47 = vmul.f32 %v841_v40, %v7557_v37  ;;  %v843_v48 = vmul.f32 %v841_v40, %v7540_v29  ;;  %v847_v56 = vmul.f32 %v841_v40, %v7601_v1 }
 0x13a   : > { %v899_v39 = vsel %vm716_vm3, %v893_v15, %v898_v26  ;;  %v931_v42 = vrot.slane %v920_v30, 2 }
 0x13b   : > { %v858_v53 = vrot.slane %v845_v43, 2  ;;  %v857_v58 = vrot.slane %v843_v48, 2  ;;  %v922_v43 = vmul.f32 %v917_v23, %v7608_v4 }
 0x13c   : > { %696 = vrot.lane.b32.xlu1 %v689_v46, %s7356_s6  ;;  %694 = vrot.lane.b32.xlu0 %v686_v49, %s7356_s6  ;;  %v822_v46 = vrot.slane %v808_v35, 2  ;;  %v842_v49 = vmul.f32 %v841_v40, %v7537_v28 }
 0x13d   : > { %v859_v63 = vsel %vm716_vm3, %v857_v58, %v858_v53 }
 0x13e   : > { %v823_v54 = vsel %vm716_vm3, %v817_v34, %v822_v46  ;;  %v854_v59 = vrot.slane %v842_v49, 2  ;;  %v973_v46 = vstv %s6947_s29  ;;  %v938_v49 = vrot.slane %v923_v36, 2  ;;  %s6959_s29 = sld [smem:[#allocation6 + $0x22]] }
 0x13f   : > { %v974_v58 = vmul.f32 %v973_v46, %v7537_v28  ;;  %v978_v6 = vmul.f32 %v973_v46, %v7608_v4 }
 0x140   : > { %700 = vrot.lane.b32.xlu1 %v693_v55, %s7356_s6  ;;  %698 = vrot.lane.b32.xlu0 %v691_v57, %s7356_s6  ;;  %v855_v55 = vrot.slane %v844_v47, 2  ;;  %v846_v57 = vmul.f32 %v841_v40, %v7608_v4  ;;  %v934_v40 = vrot.slane %v921_v27, 2 }
 0x141   : > { %v986_v8 = vrot.slane %v974_v58, 3  ;;  %v992_v18 = vrot.slane %v978_v6, 3 }
 0x142   : > { %v856_v2 = vsel %vm716_vm3, %v854_v59, %v855_v55 }
 0x144   : > { %752 = vrot.lane.b32.xlu1 %v745_v3, %s7351_s28  ;;  %750 = vrot.lane.b32.xlu0 %v742_v5, %s7351_s28  ;;  %v862_v3 = vrot.slane %v847_v56, 2  ;;  %v860_v5 = vrot.slane %v846_v57, 2  ;;  %v976_v56 = vmul.f32 %v973_v46, %v7557_v37  ;;  %v975_v57 = vmul.f32 %v973_v46, %v7540_v29 }
 0x146   : > { %v863_v13 = vsel %vm716_vm3, %v858_v53, %v862_v3  ;;  %v861_v14 = vsel %vm716_vm3, %v855_v55, %v860_v5  ;;  %v936_v55 = vrot.slane %v922_v43, 2  ;;  %v987_v3 = vrot.slane %v976_v56, 3 }
 0x147   : > { %v979_v5 = vmul.f32 %v973_v46, %v7601_v1  ;;  %v989_v7 = vrot.slane %v975_v57, 3 }
 0x148   : > { %756 = vrot.lane.b32.xlu1 %v749_v10, %s7351_s28  ;;  %754 = vrot.lane.b32.xlu0 %v747_v12, %s7351_s28  ;;  %v885_v12 = vmul.f32 %v879_v60, %v7601_v1  ;;  %v988_v16 = vsel %vm962_vm4, %v986_v8, %v987_v3 }
 0x14a   : > { %v900_v22 = vrot.slane %v885_v12, 2 }
 0x14c   : > { %790 = vrot.lane.b32.xlu1 %v783_v19, %s7352_s30  ;;  %788 = vrot.lane.b32.xlu0 %v780_v21, %s7352_s30  ;;  %v897_v21 = vsel %vm716_vm3, %v895_v17, %v896_v11  ;;  %v901_v35 = vsel %vm716_vm3, %v896_v11, %v900_v22  ;;  %v1011_v11 = vstv %s6948_s8  ;;  %v994_v17 = vrot.slane %v979_v5, 3  ;;  %s6961_s8 = sld [smem:[#allocation6 + $0x24]] }
 0x14d   : > { %v1015_v15 = vmul.f32 %v1011_v11, %v7560_v38  ;;  %v1013_v22 = vmul.f32 %v1011_v11, %v7540_v29  ;;  %v1017_v30 = vmul.f32 %v1011_v11, %v7601_v1  ;;  %v1016_v36 = vmul.f32 %v1011_v11, %v7608_v4 }
 0x14f   : > { %v1028_v27 = vrot.slane %v1015_v15, 3 }
 0x150   : > { %794 = vrot.lane.b32.xlu1 %v787_v32, %s7352_s30  ;;  %792 = vrot.lane.b32.xlu0 %v785_v33, %s7352_s30  ;;  %v918_v32 = vmul.f32 %v917_v23, %v7537_v28  ;;  %v1012_v23 = vmul.f32 %v1011_v11, %v7537_v28 }
 0x154   : > { %828 = vrot.lane.b32.xlu1 %v821_v44, %s7353_s17  ;;  %826 = vrot.lane.b32.xlu0 %v818_v45, %s7353_s17  ;;  %v933_v44 = vrot.slane %v919_v31, 2  ;;  %v930_v45 = vrot.slane %v918_v32, 2  ;;  %v993_v32 = vsel %vm962_vm4, %v987_v3, %v992_v18 }
 0x156   : > { %v7744_v50 = vpop.permute.xlu1 %324  ;;  %v7746_v51 = vpop.permute.xlu0 %322  ;;  %v935_v53 = vsel %vm716_vm3, %v933_v44, %v934_v40 }
 0x158   : > { %832 = vrot.lane.b32.xlu1 %v825_v52, %s7353_s17  ;;  %830 = vrot.lane.b32.xlu0 %v823_v54, %s7353_s17  ;;  %v977_v52 = vmul.f32 %v973_v46, %v7560_v38  ;;  %v932_v54 = vsel %vm716_vm3, %v930_v45, %v931_v42  ;;  %v1032_v45 = vrot.slane %v1017_v30, 3 }
 0x15a   : > { %v7754_v61 = vpop.permute.xlu1 %328  ;;  %v7756_v62 = vpop.permute.xlu0 %326  ;;  %v990_v0 = vrot.slane %v977_v52, 3 }
 0x15c   : > { %866 = vrot.lane.b32.xlu1 %v859_v63, %s7354_s19  ;;  %864 = vrot.lane.b32.xlu0 %v856_v2, %s7354_s19  ;;  %v939_v63 = vsel %vm716_vm3, %v934_v40, %v938_v49  ;;  %v937_v2 = vsel %vm716_vm3, %v931_v42, %v936_v55  ;;  %v995_v31 = vsel %vm962_vm4, %v990_v0, %v994_v17  ;;  %v1024_v40 = vrot.slane %v1012_v23, 3 }
 0x15d   : > { %v1049_v42 = vstv %s6949_s9  ;;  %s6962_s9 = sld [smem:[#allocation6 + $0x25]] }
 0x15e   : > { %v7766_v9 = vpop.permute.xlu1 %349  ;;  %v7768_v10 = vpop.permute.xlu0 %347  ;;  %v1053_v46 = vmul.f32 %v1049_v42, %v7560_v38  ;;  %v1051_v55 = vmul.f32 %v1049_v42, %v7540_v29  ;;  %v1050_v56 = vmul.f32 %v1049_v42, %v7537_v28  ;;  %v1055_v5 = vmul.f32 %v1049_v42, %v7601_v1 }
 0x15f   : > { %v1054_v6 = vmul.f32 %v1049_v42, %v7608_v4 }
 0x160   : > { %870 = vrot.lane.b32.xlu1 %v863_v13, %s7354_s19  ;;  %868 = vrot.lane.b32.xlu0 %v861_v14, %s7354_s19  ;;  %v991_v14 = vsel %vm962_vm4, %v989_v7, %v990_v0  ;;  %v1066_v0 = vrot.slane %v1053_v46, 3  ;;  %v1065_v7 = vrot.slane %v1051_v55, 3  ;;  %v1062_v8 = vrot.slane %v1050_v56, 3 }
 0x161   : > { %v1125_v56 = vstv %s6951_s26  ;;  %s6964_s26 = sld [smem:[#allocation6 + $0x27]] }
 0x162   : > { %v7776_v19 = vpop.permute.xlu1 %353  ;;  %v7778_v20 = vpop.permute.xlu0 %351 }
 0x164   : > { %904 = vrot.lane.b32.xlu1 %v897_v21, %s7355_s27  ;;  %902 = vrot.lane.b32.xlu0 %v894_v24, %s7355_s27  ;;  %v1014_v21 = vmul.f32 %v1011_v11, %v7557_v37  ;;  %v1087_v11 = vstv %s6950_s23  ;;  %s6963_s23 = sld [smem:[#allocation6 + $0x26]] }
 0x165   : > { %v1091_v17 = vmul.f32 %v1087_v11, %v7560_v38  ;;  %v1090_v23 = vmul.f32 %v1087_v11, %v7557_v37  ;;  %v1088_v30 = vmul.f32 %v1087_v11, %v7537_v28 }
 0x166   : > { %v7788_v33 = vpop.permute.xlu1 %374  ;;  %v7790_v34 = vpop.permute.xlu0 %372 }
 0x168   : > { %908 = vrot.lane.b32.xlu1 %v901_v35, %s7355_s27  ;;  %906 = vrot.lane.b32.xlu0 %v899_v39, %s7355_s27  ;;  %v1025_v35 = vrot.slane %v1014_v21, 3  ;;  %v1027_v39 = vrot.slane %v1013_v22, 3  ;;  %v1070_v21 = vrot.slane %v1055_v5, 3  ;;  %v1068_v22 = vrot.slane %v1054_v6, 3 }
 0x169   : > { %v1127_v5 = vmul.f32 %v1125_v56, %v7540_v29  ;;  %v1126_v6 = vmul.f32 %v1125_v56, %v7537_v28 }
 0x16a   : > { %v7798_v47 = vpop.permute.xlu1 %378  ;;  %v7800_v48 = vpop.permute.xlu0 %376  ;;  %v1029_v49 = vsel %vm962_vm4, %v1027_v39, %v1028_v27  ;;  %v1026_v52 = vsel %vm962_vm4, %v1024_v40, %v1025_v35  ;;  %v1071_v39 = vsel %vm962_vm4, %v1066_v0, %v1070_v21 }
 0x16c   : > { %942 = vrot.lane.b32.xlu1 %v935_v53, %s7356_s6  ;;  %940 = vrot.lane.b32.xlu0 %v932_v54, %s7356_s6  ;;  %v1030_v53 = vrot.slane %v1016_v36, 3  ;;  %v1052_v54 = vmul.f32 %v1049_v42, %v7557_v37  ;;  %v1093_v36 = vmul.f32 %v1087_v11, %v7601_v1  ;;  %v1101_v42 = vrot.slane %v1090_v23, 3 }
 0x16d   : > { %v1141_v23 = vrot.slane %v1127_v5, 3 }
 0x16e   : > { %v7810_v59 = vpop.permute.xlu1 %399  ;;  %v7812_v60 = vpop.permute.xlu0 %397  ;;  %v1063_v3 = vrot.slane %v1052_v54, 3  ;;  %v1108_v55 = vrot.slane %v1093_v36, 3 }
 0x170   : > { %946 = vrot.lane.b32.xlu1 %v939_v63, %s7356_s6  ;;  %944 = vrot.lane.b32.xlu0 %v937_v2, %s7356_s6  ;;  %v1033_v63 = vsel %vm962_vm4, %v1028_v27, %v1032_v45  ;;  %v1031_v2 = vsel %vm962_vm4, %v1025_v35, %v1030_v53  ;;  %v1064_v18 = vsel %vm962_vm4, %v1062_v8, %v1063_v3  ;;  %v1104_v35 = vrot.slane %v1091_v17, 3 }
 0x171   : > { %v1089_v27 = vmul.f32 %v1087_v11, %v7540_v29  ;;  %v1069_v40 = vsel %vm962_vm4, %v1063_v3, %v1068_v22  ;;  %v1092_v45 = vmul.f32 %v1087_v11, %v7608_v4  ;;  %v1128_v3 = vmul.f32 %v1125_v56, %v7557_v37 }
 0x172   : > { %v7820_v12 = vpop.permute.xlu1 %403  ;;  %v7822_v13 = vpop.permute.xlu0 %401  ;;  %v1109_v11 = vsel %vm962_vm4, %v1104_v35, %v1108_v55  ;;  %v1130_v22 = vmul.f32 %v1125_v56, %v7608_v4 }
 0x173   : > { %v1103_v46 = vrot.slane %v1089_v27, 3  ;;  %v1139_v21 = vrot.slane %v1128_v3, 3  ;;  %v1138_v27 = vrot.slane %v1126_v6, 3 }
 0x174   : > { %998 = vrot.lane.b32.xlu1 %v991_v14, %s7351_s28  ;;  %996 = vrot.lane.b32.xlu0 %v988_v16, %s7351_s28  ;;  %v1067_v16 = vsel %vm962_vm4, %v1065_v7, %v1066_v0  ;;  %v1106_v0 = vrot.slane %v1092_v45, 3 }
 0x175   : > { %v1105_v54 = vsel %vm962_vm4, %v1103_v46, %v1104_v35  ;;  %v1140_v45 = vsel %vm962_vm4, %v1138_v27, %v1139_v21  ;;  %v1144_v46 = vrot.slane %v1130_v22, 3  ;;  %v1219_v22 = vstv %s6954_s4  ;;  %s6966_s4 = sld [smem:[#allocation6 + $0x29]] }
 0x176   : > { %v7832_v24 = vpop.permute.xlu1 %424  ;;  %v7834_v26 = vpop.permute.xlu0 %422  ;;  %v1107_v17 = vsel %vm962_vm4, %v1101_v42, %v1106_v0 }
 0x177   : > { %v1145_v3 = vsel %vm962_vm4, %v1139_v21, %v1144_v46  ;;  %v1223_v21 = vmul.f32 %v1219_v22, %v7560_v38  ;;  %v1220_v46 = vmul.f32 %v1219_v22, %v7537_v28 }
 0x178   : > { %1002 = vrot.lane.b32.xlu1 %v995_v31, %s7351_s28  ;;  %1000 = vrot.lane.b32.xlu0 %v993_v32, %s7351_s28 }
 0x17a   : > { %v7842_v43 = vpop.permute.xlu1 %428  ;;  %v7844_v44 = vpop.permute.xlu0 %426 }
 0x17c   : > { %1036 = vrot.lane.b32.xlu1 %v1029_v49, %s7352_s30  ;;  %1034 = vrot.lane.b32.xlu0 %v1026_v52, %s7352_s30  ;;  %v1100_v49 = vrot.slane %v1088_v30, 3  ;;  %v1163_v30 = vstv %s6952_s7  ;;  %s6965_s7 = sld [smem:[#allocation6 + $0x28]] }
 0x17d   : > { %v1164_v55 = vmul.f32 %v1163_v30, %v7537_v28  ;;  %v1169_v6 = vmul.f32 %v1163_v30, %v7601_v1 }
 0x17e   : > { %v7854_v57 = vpop.permute.xlu1 %449  ;;  %v7856_v58 = vpop.permute.xlu0 %447 }
 0x180   : > { %1040 = vrot.lane.b32.xlu1 %v1033_v63, %s7352_s30  ;;  %1038 = vrot.lane.b32.xlu0 %v1031_v2, %s7352_s30  ;;  %v1102_v63 = vsel %vm962_vm4, %v1100_v49, %v1101_v42  ;;  %v1129_v2 = vmul.f32 %v1125_v56, %v7560_v38  ;;  %v1166_v49 = vmul.f32 %v1163_v30, %v7557_v37 }
 0x182   : > { %v7864_v14 = vpop.permute.xlu1 %453  ;;  %v7866_v15 = vpop.permute.xlu0 %451  ;;  %v1177_v5 = vrot.slane %v1166_v49, 3 }
 0x184   : > { %1074 = vrot.lane.b32.xlu1 %v1067_v16, %s7353_s17  ;;  %1072 = vrot.lane.b32.xlu0 %v1064_v18, %s7353_s17  ;;  %v1131_v16 = vmul.f32 %v1125_v56, %v7601_v1  ;;  %v1142_v18 = vrot.slane %v1129_v2, 3 }
 0x186   : > { %v7876_v31 = vpop.permute.xlu1 %506  ;;  %v7878_v32 = vpop.permute.xlu0 %504  ;;  %v1146_v35 = vrot.slane %v1131_v16, 3  ;;  %v1143_v42 = vsel %vm962_vm4, %v1141_v23, %v1142_v18 }
 0x188   : > { %1078 = vrot.lane.b32.xlu1 %v1071_v39, %s7353_s17  ;;  %1076 = vrot.lane.b32.xlu0 %v1069_v40, %s7353_s17  ;;  %v1167_v40 = vmul.f32 %v1163_v30, %v7560_v38  ;;  %v1147_v0 = vsel %vm962_vm4, %v1142_v18, %v1146_v35 }
 0x18a   : > { %v7886_v52 = vpop.permute.xlu1 %510  ;;  %v7888_v53 = vpop.permute.xlu0 %508  ;;  %v1180_v2 = vrot.slane %v1167_v40, 3  ;;  %v1184_v40 = vrot.slane %v1169_v6, 3 }
 0x18c   : > { %1112 = vrot.lane.b32.xlu1 %v1105_v54, %s7354_s19  ;;  %1110 = vrot.lane.b32.xlu0 %v1102_v63, %s7354_s19  ;;  %v1165_v54 = vmul.f32 %v1163_v30, %v7540_v29 }
 0x18e   : > { %v7898_v7 = vpop.permute.xlu1 %544  ;;  %v7900_v8 = vpop.permute.xlu0 %542  ;;  %v1179_v16 = vrot.slane %v1165_v54, 3 }
 0x190   : > { %1116 = vrot.lane.b32.xlu1 %v1109_v11, %s7354_s19  ;;  %1114 = vrot.lane.b32.xlu0 %v1107_v17, %s7354_s19  ;;  %v1168_v11 = vmul.f32 %v1163_v30, %v7608_v4  ;;  %v1176_v17 = vrot.slane %v1164_v55, 3  ;;  %v1181_v18 = vsel %vm962_vm4, %v1179_v16, %v1180_v2  ;;  %v1236_v55 = vrot.slane %v1223_v21, 4 }
 0x191   : > { %v1224_v16 = vmul.f32 %v1219_v22, %v7608_v4 }
 0x192   : > { %v7908_v36 = vpop.permute.xlu1 %548  ;;  %v7910_v39 = vpop.permute.xlu0 %546  ;;  %v1178_v35 = vsel %vm962_vm4, %v1176_v17, %v1177_v5  ;;  %v1182_v30 = vrot.slane %v1168_v11, 3 }
 0x194   : > { %1150 = vrot.lane.b32.xlu1 %v1143_v42, %s7355_s27  ;;  %1148 = vrot.lane.b32.xlu0 %v1140_v45, %s7355_s27  ;;  %v1222_v42 = vmul.f32 %v1219_v22, %v7557_v37  ;;  %v1221_v45 = vmul.f32 %v1219_v22, %v7540_v29  ;;  %v1183_v6 = vsel %vm962_vm4, %v1177_v5, %v1182_v30 }
 0x196   : > { %v7920_v56 = vpop.permute.xlu1 %582  ;;  %v7922_v63 = vpop.permute.xlu0 %580  ;;  %v1233_v11 = vrot.slane %v1222_v42, 4  ;;  %v1235_v17 = vrot.slane %v1221_v45, 4 }
 0x197   : > { %12676 = vst [vmem:[#allocation18_spill] sm:$0xff] %v7922_v63 }
 0x198   : > { %1154 = vrot.lane.b32.xlu1 %v1147_v0, %s7355_s27  ;;  %1152 = vrot.lane.b32.xlu0 %v1145_v3, %s7355_s27  ;;  %v1225_v0 = vmul.f32 %v1219_v22, %v7601_v1  ;;  %v1185_v3 = vsel %vm962_vm4, %v1180_v2, %v1184_v40  ;;  %v1237_v21 = vsel %vm1208_vm5, %v1235_v17, %v1236_v55  ;;  %v1257_v2 = vstv %s6955_s11  ;;  %s6968_s11 = sld [smem:[#allocation6 + $0x2b]] }
 0x199   : > { %v1238_v40 = vrot.slane %v1224_v16, 4  ;;  %v1261_v22 = vmul.f32 %v1257_v2, %v7560_v38  ;;  %v1260_v30 = vmul.f32 %v1257_v2, %v7557_v37  ;;  %v1259_v42 = vmul.f32 %v1257_v2, %v7540_v29 }
 0x19a   : > { %v7930_v23 = vpop.permute.xlu1 %586  ;;  %v7932_v27 = vpop.permute.xlu0 %584  ;;  %v1258_v45 = vmul.f32 %v1257_v2, %v7537_v28 }
 0x19b   : > { %12677 = vst [vmem:[#allocation19_spill] sm:$0xff] %v7930_v23  ;;  %12678 = vst [vmem:[#allocation20_spill] sm:$0xff] %v7932_v27  ;;  %v1239_v16 = vsel %vm1208_vm5, %v1233_v11, %v1238_v40  ;;  %v1274_v17 = vrot.slane %v1261_v22, 4 }
 0x19c   : > { %1188 = vrot.lane.b32.xlu1 %v1181_v18, %s7356_s6  ;;  %1186 = vrot.lane.b32.xlu0 %v1178_v35, %s7356_s6  ;;  %v1232_v18 = vrot.slane %v1220_v46, 4 }
 0x19e   : > { %v7942_v49 = vpop.permute.xlu1 %620  ;;  %v7944_v54 = vpop.permute.xlu0 %618  ;;  %v1234_v5 = vsel %vm1208_vm5, %v1232_v18, %v1233_v11  ;;  %v1271_v18 = vrot.slane %v1260_v30, 4 }
 0x19f   : > { %12679 = vst [vmem:[#allocation21_spill] sm:$0xff] %v7942_v49  ;;  %12680 = vst [vmem:[#allocation22_spill] sm:$0xff] %v7944_v54  ;;  %v1240_v49 = vrot.slane %v1225_v0, 4 }
 0x1a0   : > { %1192 = vrot.lane.b32.xlu1 %v1185_v3, %s7356_s6  ;;  %1190 = vrot.lane.b32.xlu0 %v1183_v6, %s7356_s6  ;;  %v1263_v6 = vmul.f32 %v1257_v2, %v7601_v1 }
 0x1a1   : > { %v1241_v0 = vsel %vm1208_vm5, %v1236_v55, %v1240_v49 }
 0x1a2   : > { %v7952_v35 = vpop.permute.xlu1 %624  ;;  %v7954_v54 = vpop.permute.xlu0 %622  ;;  %v1278_v49 = vrot.slane %v1263_v6, 4 }
 0x1a3   : > { %12681 = vst [vmem:[#allocation23_spill] sm:$0xff] %v7952_v35  ;;  %12682 = vst [vmem:[#allocation24_spill] sm:$0xff] %v7954_v54  ;;  %v1270_v54 = vrot.slane %v1258_v45, 4  ;;  %v1295_v35 = vstv %s6956_s10  ;;  %s6969_s10 = sld [smem:[#allocation6 + $0x2c]] }
 0x1a4   : > { %1244 = vrot.lane.b32.xlu1 %v1237_v21, %s7351_s28  ;;  %1242 = vrot.lane.b32.xlu0 %v1234_v5, %s7351_s28  ;;  %v1262_v21 = vmul.f32 %v1257_v2, %v7608_v4  ;;  %v1273_v5 = vrot.slane %v1259_v42, 4  ;;  %v1299_v55 = vmul.f32 %v1295_v35, %v7560_v38  ;;  %v1298_v22 = vmul.f32 %v1295_v35, %v7557_v37 }
 0x1a5   : > { %v1272_v40 = vsel %vm1208_vm5, %v1270_v54, %v1271_v18  ;;  %v1297_v30 = vmul.f32 %v1295_v35, %v7540_v29  ;;  %v1296_v42 = vmul.f32 %v1295_v35, %v7537_v28  ;;  %v1279_v6 = vsel %vm1208_vm5, %v1274_v17, %v1278_v49 }
 0x1a6   : > { %v7964_v46 = vpop.permute.xlu1 %658  ;;  %v7966_v3 = vpop.permute.xlu0 %656  ;;  %v1275_v11 = vsel %vm1208_vm5, %v1273_v5, %v1274_v17  ;;  %v1276_v2 = vrot.slane %v1262_v21, 4  ;;  %v1309_v21 = vrot.slane %v1298_v22, 4  ;;  %v1301_v5 = vmul.f32 %v1295_v35, %v7601_v1 }
 0x1a7   : > { %12683 = vst [vmem:[#allocation25_spill] sm:$0xff] %v7964_v46  ;;  %12684 = vst [vmem:[#allocation26_spill] sm:$0xff] %v7966_v3 }
 0x1a8   : > { %1248 = vrot.lane.b32.xlu1 %v1241_v0, %s7351_s28  ;;  %1246 = vrot.lane.b32.xlu0 %v1239_v16, %s7351_s28  ;;  %v1312_v16 = vrot.slane %v1299_v55, 4  ;;  %v1277_v54 = vsel %vm1208_vm5, %v1271_v18, %v1276_v2  ;;  %v1316_v55 = vrot.slane %v1301_v5, 4 }
 0x1aa   : > { %v7974_v46 = vpop.permute.xlu1 %662  ;;  %v7976_v3 = vpop.permute.xlu0 %660 }
 0x1ab   : > { %12685 = vst [vmem:[#allocation27_spill] sm:$0xff] %v7974_v46  ;;  %12686 = vst [vmem:[#allocation28_spill] sm:$0xff] %v7976_v3  ;;  %v1308_v3 = vrot.slane %v1296_v42, 4  ;;  %v1333_v46 = vstv %s6957_s20  ;;  %s6970_s20 = sld [smem:[#allocation6 + $0x2d]] }
 0x1ac   : > { %1282 = vrot.lane.b32.xlu1 %v1275_v11, %s7352_s30  ;;  %1280 = vrot.lane.b32.xlu0 %v1272_v40, %s7352_s30  ;;  %v1300_v11 = vmul.f32 %v1295_v35, %v7608_v4  ;;  %v1311_v40 = vrot.slane %v1297_v30, 4  ;;  %v1337_v18 = vmul.f32 %v1333_v46, %v7560_v38  ;;  %v1336_v2 = vmul.f32 %v1333_v46, %v7557_v37 }
 0x1ad   : > { %v1310_v49 = vsel %vm1208_vm5, %v1308_v3, %v1309_v21  ;;  %v1335_v22 = vmul.f32 %v1333_v46, %v7540_v29  ;;  %v1334_v30 = vmul.f32 %v1333_v46, %v7537_v28  ;;  %v1317_v3 = vsel %vm1208_vm5, %v1312_v16, %v1316_v55 }
 0x1ae   : > { %v7986_v45 = vpop.permute.xlu1 %696  ;;  %v7988_v0 = vpop.permute.xlu0 %694  ;;  %v1313_v17 = vsel %vm1208_vm5, %v1311_v40, %v1312_v16  ;;  %v1314_v35 = vrot.slane %v1300_v11, 4  ;;  %v1339_v40 = vmul.f32 %v1333_v46, %v7601_v1  ;;  %v1347_v11 = vrot.slane %v1336_v2, 4 }
 0x1af   : > { %12687 = vst [vmem:[#allocation29_spill] sm:$0xff] %v7986_v45  ;;  %12688 = vst [vmem:[#allocation30_spill] sm:$0xff] %v7988_v0  ;;  %v1371_v16 = vstv %s6958_s22  ;;  %s6971_s22 = sld [smem:[#allocation6 + $0x2e]] }
 0x1b0   : > { %1286 = vrot.lane.b32.xlu1 %v1279_v6, %s7352_s30  ;;  %1284 = vrot.lane.b32.xlu0 %v1277_v54, %s7352_s30  ;;  %v1350_v54 = vrot.slane %v1337_v18, 4  ;;  %v1315_v5 = vsel %vm1208_vm5, %v1309_v21, %v1314_v35  ;;  %v1374_v35 = vmul.f32 %v1371_v16, %v7557_v37  ;;  %v1373_v2 = vmul.f32 %v1371_v16, %v7540_v29 }
 0x1b2   : > { %v7996_v45 = vpop.permute.xlu1 %700  ;;  %v7998_v0 = vpop.permute.xlu0 %698 }
 0x1b3   : > { %12689 = vst [vmem:[#allocation31_spill] sm:$0xff] %v7996_v45  ;;  %12690 = vst [vmem:[#allocation32_spill] sm:$0xff] %v7998_v0  ;;  %v1346_v0 = vrot.slane %v1334_v30, 4  ;;  %v1354_v45 = vrot.slane %v1339_v40, 4 }
 0x1b4   : > { %1320 = vrot.lane.b32.xlu1 %v1313_v17, %s7353_s17  ;;  %1318 = vrot.lane.b32.xlu0 %v1310_v49, %s7353_s17  ;;  %v1338_v17 = vmul.f32 %v1333_v46, %v7608_v4  ;;  %v1349_v49 = vrot.slane %v1335_v22, 4  ;;  %v1375_v46 = vmul.f32 %v1371_v16, %v7560_v38  ;;  %v1372_v22 = vmul.f32 %v1371_v16, %v7537_v28 }
 0x1b5   : > { %v1348_v21 = vsel %vm1208_vm5, %v1346_v0, %v1347_v11  ;;  %v1355_v40 = vsel %vm1208_vm5, %v1350_v54, %v1354_v45  ;;  %v1377_v0 = vmul.f32 %v1371_v16, %v7601_v1 }
 0x1b6   : > { %v8008_v42 = vpop.permute.xlu1 %752  ;;  %v8010_v6 = vpop.permute.xlu0 %750  ;;  %v1351_v18 = vsel %vm1208_vm5, %v1349_v49, %v1350_v54  ;;  %v1352_v55 = vrot.slane %v1338_v17, 4  ;;  %v1388_v17 = vrot.slane %v1375_v46, 4  ;;  %v1385_v49 = vrot.slane %v1374_v35, 4 }
 0x1b7   : > { %12691 = vst [vmem:[#allocation33_spill] sm:$0xff] %v8008_v42  ;;  %12692 = vst [vmem:[#allocation34_spill] sm:$0xff] %v8010_v6  ;;  %v1392_v45 = vrot.slane %v1377_v0, 4 }
 0x1b8   : > { %1324 = vrot.lane.b32.xlu1 %v1317_v3, %s7353_s17  ;;  %1322 = vrot.lane.b32.xlu0 %v1315_v5, %s7353_s17  ;;  %v1353_v5 = vsel %vm1208_vm5, %v1347_v11, %v1352_v55 }
 0x1b9   : > { %v1393_v0 = vsel %vm1208_vm5, %v1388_v17, %v1392_v45 }
 0x1ba   : > { %v8018_v42 = vpop.permute.xlu1 %756  ;;  %v8020_v6 = vpop.permute.xlu0 %754 }
 0x1bb   : > { %12693 = vst [vmem:[#allocation35_spill] sm:$0xff] %v8018_v42  ;;  %12694 = vst [vmem:[#allocation36_spill] sm:$0xff] %v8020_v6  ;;  %v1384_v6 = vrot.slane %v1372_v22, 4  ;;  %v1409_v42 = vstv %s6959_s29  ;;  %s6972_s29 = sld [smem:[#allocation6 + $0x2f]] }
 0x1bc   : > { %1358 = vrot.lane.b32.xlu1 %v1351_v18, %s7354_s19  ;;  %1356 = vrot.lane.b32.xlu0 %v1348_v21, %s7354_s19  ;;  %v1376_v18 = vmul.f32 %v1371_v16, %v7608_v4  ;;  %v1387_v21 = vrot.slane %v1373_v2, 4  ;;  %v1413_v54 = vmul.f32 %v1409_v42, %v7560_v38  ;;  %v1412_v46 = vmul.f32 %v1409_v42, %v7557_v37 }
 0x1bd   : > { %v1386_v55 = vsel %vm1208_vm5, %v1384_v6, %v1385_v49  ;;  %v1411_v35 = vmul.f32 %v1409_v42, %v7540_v29  ;;  %v1410_v2 = vmul.f32 %v1409_v42, %v7537_v28 }
 0x1be   : > { %v8030_v30 = vpop.permute.xlu1 %790  ;;  %v8032_v3 = vpop.permute.xlu0 %788  ;;  %v1389_v11 = vsel %vm1208_vm5, %v1387_v21, %v1388_v17  ;;  %v1390_v16 = vrot.slane %v1376_v18, 4  ;;  %v1423_v18 = vrot.slane %v1412_v46, 4  ;;  %v1415_v21 = vmul.f32 %v1409_v42, %v7601_v1 }
 0x1bf   : > { %12695 = vst [vmem:[#allocation37_spill] sm:$0xff] %v8030_v30  ;;  %12696 = vst [vmem:[#allocation38_spill] sm:$0xff] %v8032_v3 }
 0x1c0   : > { %1362 = vrot.lane.b32.xlu1 %v1355_v40, %s7354_s19  ;;  %1360 = vrot.lane.b32.xlu0 %v1353_v5, %s7354_s19  ;;  %v1426_v5 = vrot.slane %v1413_v54, 4  ;;  %v1391_v6 = vsel %vm1208_vm5, %v1385_v49, %v1390_v16  ;;  %v1430_v54 = vrot.slane %v1415_v21, 4 }
 0x1c2   : > { %v8040_v30 = vpop.permute.xlu1 %794  ;;  %v8042_v3 = vpop.permute.xlu0 %792 }
 0x1c3   : > { %12697 = vst [vmem:[#allocation39_spill] sm:$0xff] %v8040_v30  ;;  %12698 = vst [vmem:[#allocation40_spill] sm:$0xff] %v8042_v3  ;;  %v1422_v3 = vrot.slane %v1410_v2, 4  ;;  %v1464_v30 = vstv %s6961_s8  ;;  %s6973_s8 = sld [smem:[#allocation6 + $0x30]] }
 0x1c4   : > { %1396 = vrot.lane.b32.xlu1 %v1389_v11, %s7355_s27  ;;  %1394 = vrot.lane.b32.xlu0 %v1386_v55, %s7355_s27  ;;  %v1414_v11 = vmul.f32 %v1409_v42, %v7608_v4  ;;  %v1425_v55 = vrot.slane %v1411_v35, 4  ;;  %v1468_v49 = vmul.f32 %v1464_v30, %v7560_v38  ;;  %v1467_v16 = vmul.f32 %v1464_v30, %v7557_v37 }
 0x1c5   : > { %v1424_v45 = vsel %vm1208_vm5, %v1422_v3, %v1423_v18  ;;  %v1466_v46 = vmul.f32 %v1464_v30, %v7540_v29  ;;  %v1465_v35 = vmul.f32 %v1464_v30, %v7537_v28  ;;  %v1431_v3 = vsel %vm1208_vm5, %v1426_v5, %v1430_v54 }
 0x1c6   : > { %v8052_v22 = vpop.permute.xlu1 %828  ;;  %v8054_v40 = vpop.permute.xlu0 %826  ;;  %v1427_v17 = vsel %vm1208_vm5, %v1425_v55, %v1426_v5  ;;  %v1428_v42 = vrot.slane %v1414_v11, 4  ;;  %v1470_v55 = vmul.f32 %v1464_v30, %v7601_v1  ;;  %v1478_v11 = vrot.slane %v1467_v16, 5 }
 0x1c7   : > { %12699 = vst [vmem:[#allocation41_spill] sm:$0xff] %v8052_v22  ;;  %12700 = vst [vmem:[#allocation42_spill] sm:$0xff] %v8054_v40 }
 0x1c8   : > { %1400 = vrot.lane.b32.xlu1 %v1393_v0, %s7355_s27  ;;  %1398 = vrot.lane.b32.xlu0 %v1391_v6, %s7355_s27  ;;  %v1481_v6 = vrot.slane %v1468_v49, 5  ;;  %v1429_v21 = vsel %vm1208_vm5, %v1423_v18, %v1428_v42 }
 0x1ca   : > { %v8062_v22 = vpop.permute.xlu1 %832  ;;  %v8064_v40 = vpop.permute.xlu0 %830 }
 0x1cb   : > { %12701 = vst [vmem:[#allocation43_spill] sm:$0xff] %v8062_v22  ;;  %12702 = vst [vmem:[#allocation44_spill] sm:$0xff] %v8064_v40  ;;  %v1477_v40 = vrot.slane %v1465_v35, 5  ;;  %v1502_v22 = vstv %s6962_s9  ;;  %s6975_s9 = sld [smem:[#allocation6 + $0x32]] }
 0x1cc   : > { %1434 = vrot.lane.b32.xlu1 %v1427_v17, %s7356_s6  ;;  %1432 = vrot.lane.b32.xlu0 %v1424_v45, %s7356_s6  ;;  %v1469_v17 = vmul.f32 %v1464_v30, %v7608_v4  ;;  %v1480_v45 = vrot.slane %v1466_v46, 5  ;;  %v1506_v5 = vmul.f32 %v1502_v22, %v7560_v38  ;;  %v1505_v42 = vmul.f32 %v1502_v22, %v7557_v37 }
 0x1cd   : > { %v1479_v54 = vsel %vm255_vm1, %v1477_v40, %v1478_v11  ;;  %v1504_v16 = vmul.f32 %v1502_v22, %v7540_v29  ;;  %v1503_v46 = vmul.f32 %v1502_v22, %v7537_v28 }
 0x1ce   : > { %v8074_v2 = vpop.permute.xlu1 %866  ;;  %v8076_v0 = vpop.permute.xlu0 %864  ;;  %v1482_v18 = vsel %vm255_vm1, %v1480_v45, %v1481_v6  ;;  %v1483_v30 = vrot.slane %v1469_v17, 5  ;;  %v1516_v17 = vrot.slane %v1505_v42, 5  ;;  %v1508_v45 = vmul.f32 %v1502_v22, %v7601_v1 }
 0x1cf   : > { %12703 = vst [vmem:[#allocation45_spill] sm:$0xff] %v8074_v2  ;;  %12704 = vst [vmem:[#allocation46_spill] sm:$0xff] %v8076_v0  ;;  %v1485_v0 = vrot.slane %v1470_v55, 5 }
 0x1d0   : > { %1438 = vrot.lane.b32.xlu1 %v1431_v3, %s7356_s6  ;;  %1436 = vrot.lane.b32.xlu0 %v1429_v21, %s7356_s6  ;;  %v1519_v21 = vrot.slane %v1506_v5, 5  ;;  %v1484_v40 = vsel %vm255_vm1, %v1478_v11, %v1483_v30  ;;  %v1523_v5 = vrot.slane %v1508_v45, 5 }
 0x1d1   : > { %v1486_v3 = vsel %vm255_vm1, %v1481_v6, %v1485_v0 }
 0x1d2   : > { %v8084_v2 = vpop.permute.xlu1 %870  ;;  %v8086_v49 = vpop.permute.xlu0 %868 }
 0x1d3   : > { %12705 = vst [vmem:[#allocation47_spill] sm:$0xff] %v8084_v2  ;;  %12706 = vst [vmem:[#allocation48_spill] sm:$0xff] %v8086_v49  ;;  %v1515_v49 = vrot.slane %v1503_v46, 5  ;;  %v1540_v2 = vstv %s6963_s23  ;;  %s6976_s23 = sld [smem:[#allocation6 + $0x33]] }
 0x1d4   : > { %1489 = vrot.lane.b32.xlu1 %v1482_v18, %s7351_s28  ;;  %1487 = vrot.lane.b32.xlu0 %v1479_v54, %s7351_s28  ;;  %v1507_v18 = vmul.f32 %v1502_v22, %v7608_v4  ;;  %v1518_v54 = vrot.slane %v1504_v16, 5  ;;  %v1544_v6 = vmul.f32 %v1540_v2, %v7560_v38  ;;  %v1543_v30 = vmul.f32 %v1540_v2, %v7557_v37 }
 0x1d5   : > { %v1517_v11 = vsel %vm255_vm1, %v1515_v49, %v1516_v17  ;;  %v1542_v42 = vmul.f32 %v1540_v2, %v7540_v29  ;;  %v1541_v16 = vmul.f32 %v1540_v2, %v7537_v28  ;;  %v1524_v49 = vsel %vm255_vm1, %v1519_v21, %v1523_v5 }
 0x1d6   : > { %v8096_v35 = vpop.permute.xlu1 %904  ;;  %v8098_v55 = vpop.permute.xlu0 %902  ;;  %v1520_v0 = vsel %vm255_vm1, %v1518_v54, %v1519_v21  ;;  %v1521_v22 = vrot.slane %v1507_v18, 5  ;;  %v1546_v54 = vmul.f32 %v1540_v2, %v7601_v1  ;;  %v1554_v18 = vrot.slane %v1543_v30, 5 }
 0x1d7   : > { %12707 = vst [vmem:[#allocation49_spill] sm:$0xff] %v8096_v35  ;;  %12708 = vst [vmem:[#allocation50_spill] sm:$0xff] %v8098_v55  ;;  %v1578_v21 = vstv %s6964_s26  ;;  %s6977_s26 = sld [smem:[#allocation6 + $0x34]] }
 0x1d8   : > { %1493 = vrot.lane.b32.xlu1 %v1486_v3, %s7351_s28  ;;  %1491 = vrot.lane.b32.xlu0 %v1484_v40, %s7351_s28  ;;  %v1557_v40 = vrot.slane %v1544_v6, 5  ;;  %v1522_v45 = vsel %vm255_vm1, %v1516_v17, %v1521_v22  ;;  %v1581_v22 = vmul.f32 %v1578_v21, %v7557_v37  ;;  %v1580_v30 = vmul.f32 %v1578_v21, %v7540_v29 }
 0x1da   : > { %v8106_v35 = vpop.permute.xlu1 %908  ;;  %v8108_v55 = vpop.permute.xlu0 %906 }
 0x1db   : > { %12709 = vst [vmem:[#allocation51_spill] sm:$0xff] %v8106_v35  ;;  %12710 = vst [vmem:[#allocation52_spill] sm:$0xff] %v8108_v55  ;;  %v1553_v55 = vrot.slane %v1541_v16, 5  ;;  %v1561_v35 = vrot.slane %v1546_v54, 5 }
 0x1dc   : > { %1527 = vrot.lane.b32.xlu1 %v1520_v0, %s7352_s30  ;;  %1525 = vrot.lane.b32.xlu0 %v1517_v11, %s7352_s30  ;;  %v1545_v0 = vmul.f32 %v1540_v2, %v7608_v4  ;;  %v1556_v11 = vrot.slane %v1542_v42, 5  ;;  %v1582_v2 = vmul.f32 %v1578_v21, %v7560_v38  ;;  %v1579_v42 = vmul.f32 %v1578_v21, %v7537_v28 }
 0x1dd   : > { %v1555_v17 = vsel %vm255_vm1, %v1553_v55, %v1554_v18  ;;  %v1562_v54 = vsel %vm255_vm1, %v1557_v40, %v1561_v35  ;;  %v1584_v55 = vmul.f32 %v1578_v21, %v7601_v1 }
 0x1de   : > { %v8118_v46 = vpop.permute.xlu1 %942  ;;  %v8120_v3 = vpop.permute.xlu0 %940  ;;  %v1558_v6 = vsel %vm255_vm1, %v1556_v11, %v1557_v40  ;;  %v1559_v5 = vrot.slane %v1545_v0, 5  ;;  %v1595_v0 = vrot.slane %v1582_v2, 5  ;;  %v1592_v11 = vrot.slane %v1581_v22, 5 }
 0x1df   : > { %12711 = vst [vmem:[#allocation53_spill] sm:$0xff] %v8118_v46  ;;  %12712 = vst [vmem:[#allocation54_spill] sm:$0xff] %v8120_v3  ;;  %v1599_v35 = vrot.slane %v1584_v55, 5 }
 0x1e0   : > { %1531 = vrot.lane.b32.xlu1 %v1524_v49, %s7352_s30  ;;  %1529 = vrot.lane.b32.xlu0 %v1522_v45, %s7352_s30  ;;  %v1560_v45 = vsel %vm255_vm1, %v1554_v18, %v1559_v5 }
 0x1e1   : > { %v1600_v55 = vsel %vm255_vm1, %v1595_v0, %v1599_v35 }
 0x1e2   : > { %v8128_v46 = vpop.permute.xlu1 %946  ;;  %v8130_v3 = vpop.permute.xlu0 %944 }
 0x1e3   : > { %12713 = vst [vmem:[#allocation55_spill] sm:$0xff] %v8128_v46  ;;  %12714 = vst [vmem:[#allocation56_spill] sm:$0xff] %v8130_v3  ;;  %v1591_v3 = vrot.slane %v1579_v42, 5  ;;  %v1616_v46 = vstv %s6965_s7  ;;  %s6978_s7 = sld [smem:[#allocation6 + $0x35]] }
 0x1e4   : > { %1565 = vrot.lane.b32.xlu1 %v1558_v6, %s7353_s17  ;;  %1563 = vrot.lane.b32.xlu0 %v1555_v17, %s7353_s17  ;;  %v1583_v6 = vmul.f32 %v1578_v21, %v7608_v4  ;;  %v1594_v17 = vrot.slane %v1580_v30, 5  ;;  %v1620_v40 = vmul.f32 %v1616_v46, %v7560_v38  ;;  %v1619_v2 = vmul.f32 %v1616_v46, %v7557_v37 }
 0x1e5   : > { %v1593_v5 = vsel %vm255_vm1, %v1591_v3, %v1592_v11  ;;  %v1618_v22 = vmul.f32 %v1616_v46, %v7540_v29  ;;  %v1617_v30 = vmul.f32 %v1616_v46, %v7537_v28 }
 0x1e6   : > { %v8140_v16 = vpop.permute.xlu1 %998  ;;  %v8142_v49 = vpop.permute.xlu0 %996  ;;  %v1596_v18 = vsel %vm255_vm1, %v1594_v17, %v1595_v0  ;;  %v1597_v21 = vrot.slane %v1583_v6, 5  ;;  %v1630_v6 = vrot.slane %v1619_v2, 5  ;;  %v1622_v17 = vmul.f32 %v1616_v46, %v7601_v1 }
 0x1e7   : > { %12715 = vst [vmem:[#allocation57_spill] sm:$0xff] %v8140_v16  ;;  %12716 = vst [vmem:[#allocation58_spill] sm:$0xff] %v8142_v49 }
 0x1e8   : > { %1569 = vrot.lane.b32.xlu1 %v1562_v54, %s7353_s17  ;;  %1567 = vrot.lane.b32.xlu0 %v1560_v45, %s7353_s17  ;;  %v1633_v45 = vrot.slane %v1620_v40, 5  ;;  %v1598_v3 = vsel %vm255_vm1, %v1592_v11, %v1597_v21  ;;  %v1637_v40 = vrot.slane %v1622_v17, 5 }
 0x1ea   : > { %v8150_v16 = vpop.permute.xlu1 %1002  ;;  %v8152_v49 = vpop.permute.xlu0 %1000 }
 0x1eb   : > { %12717 = vst [vmem:[#allocation59_spill] sm:$0xff] %v8150_v16  ;;  %12718 = vst [vmem:[#allocation60_spill] sm:$0xff] %v8152_v49  ;;  %v1629_v49 = vrot.slane %v1617_v30, 5  ;;  %v1654_v16 = vstv %s6966_s4  ;;  %s6979_s4 = sld [smem:[#allocation6 + $0x36]] }
 0x1ec   : > { %1603 = vrot.lane.b32.xlu1 %v1596_v18, %s7354_s19  ;;  %1601 = vrot.lane.b32.xlu0 %v1593_v5, %s7354_s19  ;;  %v1621_v18 = vmul.f32 %v1616_v46, %v7608_v4  ;;  %v1632_v5 = vrot.slane %v1618_v22, 5  ;;  %v1658_v11 = vmul.f32 %v1654_v16, %v7560_v38  ;;  %v1657_v21 = vmul.f32 %v1654_v16, %v7557_v37 }
 0x1ed   : > { %v1631_v35 = vsel %vm255_vm1, %v1629_v49, %v1630_v6  ;;  %v1656_v2 = vmul.f32 %v1654_v16, %v7540_v29  ;;  %v1655_v22 = vmul.f32 %v1654_v16, %v7537_v28  ;;  %v1638_v49 = vsel %vm255_vm1, %v1633_v45, %v1637_v40 }
 0x1ee   : > { %v8162_v42 = vpop.permute.xlu1 %1036  ;;  %v8164_v54 = vpop.permute.xlu0 %1034  ;;  %v1634_v0 = vsel %vm255_vm1, %v1632_v5, %v1633_v45  ;;  %v1635_v46 = vrot.slane %v1621_v18, 5  ;;  %v1660_v5 = vmul.f32 %v1654_v16, %v7601_v1  ;;  %v1668_v18 = vrot.slane %v1657_v21, 5 }
 0x1ef   : > { %12719 = vst [vmem:[#allocation61_spill] sm:$0xff] %v8162_v42  ;;  %12720 = vst [vmem:[#allocation62_spill] sm:$0xff] %v8164_v54  ;;  %v1710_v45 = vstv %s6968_s11  ;;  %s6980_s11 = sld [smem:[#allocation6 + $0x37]] }
 0x1f0   : > { %1607 = vrot.lane.b32.xlu1 %v1600_v55, %s7354_s19  ;;  %1605 = vrot.lane.b32.xlu0 %v1598_v3, %s7354_s19  ;;  %v1671_v3 = vrot.slane %v1658_v11, 5  ;;  %v1636_v17 = vsel %vm255_vm1, %v1630_v6, %v1635_v46  ;;  %v1713_v46 = vmul.f32 %v1710_v45, %v7557_v37  ;;  %v1712_v21 = vmul.f32 %v1710_v45, %v7540_v29 }
 0x1f2   : > { %v8172_v42 = vpop.permute.xlu1 %1040  ;;  %v8174_v54 = vpop.permute.xlu0 %1038 }
 0x1f3   : > { %12721 = vst [vmem:[#allocation63_spill] sm:$0xff] %v8172_v42  ;;  %12722 = vst [vmem:[#allocation64_spill] sm:$0xff] %v8174_v54  ;;  %v1667_v54 = vrot.slane %v1655_v22, 5  ;;  %v1675_v42 = vrot.slane %v1660_v5, 5 }
 0x1f4   : > { %1641 = vrot.lane.b32.xlu1 %v1634_v0, %s7355_s27  ;;  %1639 = vrot.lane.b32.xlu0 %v1631_v35, %s7355_s27  ;;  %v1659_v0 = vmul.f32 %v1654_v16, %v7608_v4  ;;  %v1670_v35 = vrot.slane %v1656_v2, 5  ;;  %v1714_v16 = vmul.f32 %v1710_v45, %v7560_v38  ;;  %v1711_v2 = vmul.f32 %v1710_v45, %v7537_v28 }
 0x1f5   : > { %v1669_v6 = vsel %vm255_vm1, %v1667_v54, %v1668_v18  ;;  %v1676_v5 = vsel %vm255_vm1, %v1671_v3, %v1675_v42  ;;  %v1716_v54 = vmul.f32 %v1710_v45, %v7601_v1 }
 0x1f6   : > { %v8184_v30 = vpop.permute.xlu1 %1074  ;;  %v8186_v55 = vpop.permute.xlu0 %1072  ;;  %v1672_v11 = vsel %vm255_vm1, %v1670_v35, %v1671_v3  ;;  %v1673_v40 = vrot.slane %v1659_v0, 5  ;;  %v1727_v0 = vrot.slane %v1714_v16, 6  ;;  %v1724_v35 = vrot.slane %v1713_v46, 6 }
 0x1f7   : > { %12723 = vst [vmem:[#allocation65_spill] sm:$0xff] %v8184_v30  ;;  %12724 = vst [vmem:[#allocation66_spill] sm:$0xff] %v8186_v55  ;;  %v1731_v3 = vrot.slane %v1716_v54, 6 }
 0x1f8   : > { %1645 = vrot.lane.b32.xlu1 %v1638_v49, %s7355_s27  ;;  %1643 = vrot.lane.b32.xlu0 %v1636_v17, %s7355_s27  ;;  %v1674_v17 = vsel %vm255_vm1, %v1668_v18, %v1673_v40 }
 0x1fa   : > { %v8194_v30 = vpop.permute.xlu1 %1078  ;;  %v8196_v55 = vpop.permute.xlu0 %1076 }
 0x1fb   : > { %12725 = vst [vmem:[#allocation67_spill] sm:$0xff] %v8194_v30  ;;  %12726 = vst [vmem:[#allocation68_spill] sm:$0xff] %v8196_v55  ;;  %v1723_v55 = vrot.slane %v1711_v2, 6  ;;  %v1786_v30 = vstv %s6970_s20  ;;  %s6983_s20 = sld [smem:[#allocation6 + $0x3a]] }
 0x1fc   : > { %1679 = vrot.lane.b32.xlu1 %v1672_v11, %s7356_s6  ;;  %1677 = vrot.lane.b32.xlu0 %v1669_v6, %s7356_s6  ;;  %v1715_v11 = vmul.f32 %v1710_v45, %v7608_v4  ;;  %v1726_v6 = vrot.slane %v1712_v21, 6 }
 0x1fd   : > { %v1725_v45 = vsel %vm1699_vm6, %v1723_v55, %v1724_v35 }
 0x1fe   : > { %v8206_v22 = vpop.permute.xlu1 %1112  ;;  %v8208_v49 = vpop.permute.xlu0 %1110  ;;  %v1728_v40 = vsel %vm1699_vm6, %v1726_v6, %v1727_v0  ;;  %v1729_v16 = vrot.slane %v1715_v11, 6 }
 0x1ff   : > { %12727 = vst [vmem:[#allocation69_spill] sm:$0xff] %v8206_v22  ;;  %12728 = vst [vmem:[#allocation70_spill] sm:$0xff] %v8208_v49  ;;  %v1748_v22 = vstv %s6969_s10  ;;  %s6982_s10 = sld [smem:[#allocation6 + $0x39]] }
 0x200   : > { %1683 = vrot.lane.b32.xlu1 %v1676_v5, %s7356_s6  ;;  %1681 = vrot.lane.b32.xlu0 %v1674_v17, %s7356_s6  ;;  %v1752_v18 = vmul.f32 %v1748_v22, %v7560_v38  ;;  %v1751_v46 = vmul.f32 %v1748_v22, %v7557_v37  ;;  %v1750_v21 = vmul.f32 %v1748_v22, %v7540_v29 }
 0x201   : > { %v1749_v2 = vmul.f32 %v1748_v22, %v7537_v28  ;;  %v1732_v17 = vsel %vm1699_vm6, %v1727_v0, %v1731_v3  ;;  %v1754_v6 = vmul.f32 %v1748_v22, %v7601_v1  ;;  %v1730_v55 = vsel %vm1699_vm6, %v1724_v35, %v1729_v16 }
 0x202   : > { %v8216_v49 = vpop.permute.xlu1 %1116  ;;  %v8218_v42 = vpop.permute.xlu0 %1114  ;;  %v1765_v11 = vrot.slane %v1752_v18, 6  ;;  %v1790_v3 = vmul.f32 %v1786_v30, %v7560_v38  ;;  %v1789_v16 = vmul.f32 %v1786_v30, %v7557_v37 }
 0x203   : > { %12729 = vst [vmem:[#allocation71_spill] sm:$0xff] %v8216_v49  ;;  %12730 = vst [vmem:[#allocation72_spill] sm:$0xff] %v8218_v42  ;;  %v1762_v42 = vrot.slane %v1751_v46, 6  ;;  %v1761_v49 = vrot.slane %v1749_v2, 6  ;;  %v1769_v0 = vrot.slane %v1754_v6, 6  ;;  %v1788_v46 = vmul.f32 %v1786_v30, %v7540_v29 }
 0x204   : > { %1735 = vrot.lane.b32.xlu1 %v1728_v40, %s7351_s28  ;;  %1733 = vrot.lane.b32.xlu0 %v1725_v45, %s7351_s28  ;;  %v1753_v40 = vmul.f32 %v1748_v22, %v7608_v4  ;;  %v1764_v45 = vrot.slane %v1750_v21, 6  ;;  %v1787_v21 = vmul.f32 %v1786_v30, %v7537_v28 }
 0x205   : > { %v1763_v18 = vsel %vm1699_vm6, %v1761_v49, %v1762_v42  ;;  %v1770_v6 = vsel %vm1699_vm6, %v1765_v11, %v1769_v0 }
 0x206   : > { %v8228_v5 = vpop.permute.xlu1 %1150  ;;  %v8230_v54 = vpop.permute.xlu0 %1148  ;;  %v1766_v35 = vsel %vm1699_vm6, %v1764_v45, %v1765_v11  ;;  %v1767_v22 = vrot.slane %v1753_v40, 6  ;;  %v1800_v40 = vrot.slane %v1789_v16, 6  ;;  %v1792_v45 = vmul.f32 %v1786_v30, %v7601_v1 }
 0x207   : > { %12731 = vst [vmem:[#allocation73_spill] sm:$0xff] %v8228_v5  ;;  %12732 = vst [vmem:[#allocation74_spill] sm:$0xff] %v8230_v54 }
 0x208   : > { %1739 = vrot.lane.b32.xlu1 %v1732_v17, %s7351_s28  ;;  %1737 = vrot.lane.b32.xlu0 %v1730_v55, %s7351_s28  ;;  %v1803_v55 = vrot.slane %v1790_v3, 6  ;;  %v1768_v49 = vsel %vm1699_vm6, %v1762_v42, %v1767_v22  ;;  %v1807_v3 = vrot.slane %v1792_v45, 6 }
 0x20a   : > { %v8238_v5 = vpop.permute.xlu1 %1154  ;;  %v8240_v54 = vpop.permute.xlu0 %1152 }
 0x20b   : > { %12733 = vst [vmem:[#allocation75_spill] sm:$0xff] %v8238_v5  ;;  %12734 = vst [vmem:[#allocation76_spill] sm:$0xff] %v8240_v54  ;;  %v1799_v54 = vrot.slane %v1787_v21, 6  ;;  %v1824_v5 = vstv %s6971_s22  ;;  %s6984_s22 = sld [smem:[#allocation6 + $0x3b]] }
 0x20c   : > { %1773 = vrot.lane.b32.xlu1 %v1766_v35, %s7352_s30  ;;  %1771 = vrot.lane.b32.xlu0 %v1763_v18, %s7352_s30  ;;  %v1791_v35 = vmul.f32 %v1786_v30, %v7608_v4  ;;  %v1802_v18 = vrot.slane %v1788_v46, 6  ;;  %v1828_v42 = vmul.f32 %v1824_v5, %v7560_v38  ;;  %v1827_v22 = vmul.f32 %v1824_v5, %v7557_v37 }
 0x20d   : > { %v1801_v0 = vsel %vm1699_vm6, %v1799_v54, %v1800_v40  ;;  %v1826_v16 = vmul.f32 %v1824_v5, %v7540_v29  ;;  %v1825_v46 = vmul.f32 %v1824_v5, %v7537_v28  ;;  %v1808_v54 = vsel %vm1699_vm6, %v1803_v55, %v1807_v3 }
 0x20e   : > { %v8250_v2 = vpop.permute.xlu1 %1188  ;;  %v8252_v17 = vpop.permute.xlu0 %1186  ;;  %v1804_v11 = vsel %vm1699_vm6, %v1802_v18, %v1803_v55  ;;  %v1805_v30 = vrot.slane %v1791_v35, 6  ;;  %v1830_v18 = vmul.f32 %v1824_v5, %v7601_v1  ;;  %v1838_v35 = vrot.slane %v1827_v22, 6 }
 0x20f   : > { %12735 = vst [vmem:[#allocation77_spill] sm:$0xff] %v8250_v2  ;;  %12736 = vst [vmem:[#allocation78_spill] sm:$0xff] %v8252_v17 }
 0x210   : > { %1777 = vrot.lane.b32.xlu1 %v1770_v6, %s7352_s30  ;;  %1775 = vrot.lane.b32.xlu0 %v1768_v49, %s7352_s30  ;;  %v1841_v49 = vrot.slane %v1828_v42, 6  ;;  %v1806_v45 = vsel %vm1699_vm6, %v1800_v40, %v1805_v30 }
 0x211   : > { %v2181_v63 = vstv %s6984_s22  ;;  %s6997_s22 = sld [smem:[#allocation6 + $0x48]] }
 0x212   : > { %v8260_v2 = vpop.permute.xlu1 %1192  ;;  %v8262_v17 = vpop.permute.xlu0 %1190 }
 0x213   : > { %12737 = vst [vmem:[#allocation79_spill] sm:$0xff] %v8260_v2  ;;  %12738 = vst [vmem:[#allocation80_spill] sm:$0xff] %v8262_v17  ;;  %v1837_v17 = vrot.slane %v1825_v46, 6  ;;  %v1862_v2 = vstv %s6972_s29  ;;  %s6985_s29 = sld [smem:[#allocation6 + $0x3c]] }
 0x214   : > { %1811 = vrot.lane.b32.xlu1 %v1804_v11, %s7353_s17  ;;  %1809 = vrot.lane.b32.xlu0 %v1801_v0, %s7353_s17  ;;  %v1829_v11 = vmul.f32 %v1824_v5, %v7608_v4  ;;  %v1840_v0 = vrot.slane %v1826_v16, 6  ;;  %v1866_v55 = vmul.f32 %v1862_v2, %v7560_v38  ;;  %v1865_v30 = vmul.f32 %v1862_v2, %v7557_v37 }
 0x215   : > { %v1839_v3 = vsel %vm1699_vm6, %v1837_v17, %v1838_v35  ;;  %v1864_v22 = vmul.f32 %v1862_v2, %v7540_v29  ;;  %v1863_v16 = vmul.f32 %v1862_v2, %v7537_v28 }
 0x216   : > { %v8272_v21 = vpop.permute.xlu1 %1244  ;;  %v8274_v6 = vpop.permute.xlu0 %1242  ;;  %v1842_v40 = vsel %vm1699_vm6, %v1840_v0, %v1841_v49  ;;  %v1843_v5 = vrot.slane %v1829_v11, 6  ;;  %v1876_v11 = vrot.slane %v1865_v30, 6  ;;  %v1868_v0 = vmul.f32 %v1862_v2, %v7601_v1 }
 0x217   : > { %12739 = vst [vmem:[#allocation81_spill] sm:$0xff] %v8272_v21  ;;  %12740 = vst [vmem:[#allocation82_spill] sm:$0xff] %v8274_v6  ;;  %v1845_v6 = vrot.slane %v1830_v18, 6 }
 0x218   : > { %1815 = vrot.lane.b32.xlu1 %v1808_v54, %s7353_s17  ;;  %1813 = vrot.lane.b32.xlu0 %v1806_v45, %s7353_s17  ;;  %v1879_v45 = vrot.slane %v1866_v55, 6  ;;  %v1844_v17 = vsel %vm1699_vm6, %v1838_v35, %v1843_v5  ;;  %v1883_v55 = vrot.slane %v1868_v0, 6 }
 0x219   : > { %v1846_v54 = vsel %vm1699_vm6, %v1841_v49, %v1845_v6 }
 0x21a   : > { %v8282_v21 = vpop.permute.xlu1 %1248  ;;  %v8284_v42 = vpop.permute.xlu0 %1246 }
 0x21b   : > { %12741 = vst [vmem:[#allocation83_spill] sm:$0xff] %v8282_v21  ;;  %12742 = vst [vmem:[#allocation84_spill] sm:$0xff] %v8284_v42  ;;  %v1875_v42 = vrot.slane %v1863_v16, 6  ;;  %v1900_v21 = vstv %s6973_s8  ;;  %v280_v16 = vsel %vm246_vm0, 0.0, %v7722_v25  ;;  %s6986_s8 = sld [smem:[#allocation6 + $0x3d]] }
 0x21c   : > { %1849 = vrot.lane.b32.xlu1 %v1842_v40, %s7354_s19  ;;  %1847 = vrot.lane.b32.xlu0 %v1839_v3, %s7354_s19  ;;  %v1867_v40 = vmul.f32 %v1862_v2, %v7608_v4  ;;  %v1878_v3 = vrot.slane %v1864_v22, 6  ;;  %v1904_v49 = vmul.f32 %v1900_v21, %v7560_v38  ;;  %v1903_v2 = vmul.f32 %v1900_v21, %v7557_v37 }
 0x21d   : > { %v1877_v35 = vsel %vm1699_vm6, %v1875_v42, %v1876_v11  ;;  %v1902_v30 = vmul.f32 %v1900_v21, %v7540_v29  ;;  %v1901_v22 = vmul.f32 %v1900_v21, %v7537_v28  ;;  %v1905_v38 = vmul.f32 %v1900_v21, %v7608_v4 }
 0x21e   : > { %v8294_v46 = vpop.permute.xlu1 %1282  ;;  %v8296_v18 = vpop.permute.xlu0 %1280  ;;  %v1880_v6 = vsel %vm1699_vm6, %v1878_v3, %v1879_v45  ;;  %v1881_v5 = vrot.slane %v1867_v40, 6  ;;  %v1917_v0 = vrot.slane %v1904_v49, 6  ;;  %v1906_v40 = vmul.f32 %v1900_v21, %v7601_v1 }
 0x21f   : > { %12743 = vst [vmem:[#allocation85_spill] sm:$0xff] %v8294_v46  ;;  %12744 = vst [vmem:[#allocation86_spill] sm:$0xff] %v8296_v18  ;;  %v1884_v3 = vsel %vm1699_vm6, %v1879_v45, %v1883_v55  ;;  %v1913_v29 = vrot.slane %v1901_v22, 6  ;;  %v8332_v49 = vsel %vm246_vm0, 0.0, %v7734_v41 }
 0x220   : > { %1853 = vrot.lane.b32.xlu1 %v1846_v54, %s7354_s19  ;;  %1851 = vrot.lane.b32.xlu0 %v1844_v17, %s7354_s19  ;;  %v282_v54 = vsel %vm246_vm0, %v7722_v25, 0.0  ;;  %v1916_v25 = vrot.slane %v1902_v30, 6  ;;  %v1921_v55 = vrot.slane %v1906_v40, 6 }
 0x222   : > { %v8304_v46 = vpop.permute.xlu1 %1286  ;;  %v8306_v18 = vpop.permute.xlu0 %1284 }
 0x223   : > { %12745 = vst [vmem:[#allocation87_spill] sm:$0xff] %v8304_v46  ;;  %12746 = vst [vmem:[#allocation88_spill] sm:$0xff] %v8306_v18  ;;  %v289_v18 = vrot.slane %v282_v54, 5  ;;  %v2143_v46 = vstv %s6983_s20  ;;  %s6996_s20 = sld [smem:[#allocation6 + $0x47]] }
 0x224   : > { %1887 = vrot.lane.b32.xlu1 %v1880_v6, %s7355_s27  ;;  %1885 = vrot.lane.b32.xlu0 %v1877_v35, %s7355_s27  ;;  %v1882_v6 = vsel %vm1699_vm6, %v1876_v11, %v1881_v5  ;;  %v1914_v35 = vrot.slane %v1903_v2, 6  ;;  %v1918_v11 = vsel %vm1699_vm6, %v1916_v25, %v1917_v0  ;;  %v1919_v5 = vrot.slane %v1905_v38, 6 }
 0x225   : > { %v8342_v2 = vsel %vm246_vm0, %v7734_v41, 0.0  ;;  %v8350_v22 = vsel %vm255_vm1, 0.0, %v289_v18  ;;  %v1922_v41 = vsel %vm1699_vm6, %v1917_v0, %v1921_v55 }
 0x226   : > { %v8320_v17 = vpop.permute.xlu1 %1320  ;;  %v8322_v42 = vpop.permute.xlu0 %1318  ;;  %v1915_v21 = vsel %vm1699_vm6, %v1913_v29, %v1914_v35  ;;  %12752 = vst [vmem:[#allocation94_spill] sm:$0xff] %v8350_v22  ;;  %v12643_v38 = vrot.slane %v8342_v2, 5  ;;  %v1920_v40 = vsel %vm1699_vm6, %v1914_v35, %v1919_v5 }
 0x227   : > { %12747 = vst [vmem:[#allocation89_spill] sm:$0xff] %v8320_v17  ;;  %12748 = vst [vmem:[#allocation90_spill] sm:$0xff] %v8322_v42  ;;  %v288_v17 = vrot.slane %v280_v16, 5  ;;  %v12642_v16 = vrot.slane %v8332_v49, 5 }
 0x228   : > { %1891 = vrot.lane.b32.xlu1 %v1884_v3, %s7355_s27  ;;  %1889 = vrot.lane.b32.xlu0 %v1882_v6, %s7355_s27  ;;  %v1944_v3 = vstv %s6975_s9  ;;  %v8376_v35 = vsel %vm255_vm1, %v289_v18, %v12643_v38  ;;  %v1992_v38 = vstv %s6977_s26  ;;  %s6987_s9 = sld [smem:[#allocation6 + $0x3e]]  ;;  %s6990_s26 = sld [smem:[#allocation6 + $0x41]] }
 0x229   : > { %v8347_v30 = vsel %vm255_vm1, 0.0, %v288_v17  ;;  %v8371_v0 = vsel %vm255_vm1, %v288_v17, %v12642_v16  ;;  %12758 = vst [vmem:[#allocation100_spill] sm:$0xff] %v8376_v35 }
 0x22a   : > { %v8334_v1 = vpop.permute.xlu1 %1324  ;;  %v8336_v45 = vpop.permute.xlu0 %1322  ;;  %12751 = vst [vmem:[#allocation93_spill] sm:$0xff] %v8347_v30  ;;  %12757 = vst [vmem:[#allocation99_spill] sm:$0xff] %v8371_v0 }
 0x22b   : > { %12749 = vst [vmem:[#allocation91_spill] sm:$0xff] %v8334_v1  ;;  %12750 = vst [vmem:[#allocation92_spill] sm:$0xff] %v8336_v45 }
 0x22c   : > { %1925 = vrot.lane.b32.xlu1 %v1918_v11, %s7356_s6  ;;  %1923 = vrot.lane.b32.xlu0 %v1915_v21, %s7356_s6  ;;  %v1946_v11 = vmul.f32 %v1944_v3, %v8350_v22  ;;  %v1945_v21 = vmul.f32 %v1944_v3, %v8347_v30 }
 0x22e   : > { %v8353_v54 = vpop.permute.xlu1 %1358  ;;  %v8355_v29 = vpop.permute.xlu0 %1356 }
 0x22f   : > { %12753 = vst [vmem:[#allocation95_spill] sm:$0xff] %v8353_v54  ;;  %12754 = vst [vmem:[#allocation96_spill] sm:$0xff] %v8355_v29 }
 0x230   : > { %1929 = vrot.lane.b32.xlu1 %v1922_v41, %s7356_s6  ;;  %1927 = vrot.lane.b32.xlu0 %v1920_v40, %s7356_s6  ;;  %v1948_v41 = vmul.f32 %v1944_v3, %v8376_v35  ;;  %v1947_v40 = vmul.f32 %v1944_v3, %v8371_v0 }
 0x232   : > { %v8362_v6 = vpop.permute.xlu1 %1362  ;;  %v8364_v25 = vpop.permute.xlu0 %1360 }
 0x233   : > { %12755 = vst [vmem:[#allocation97_spill] sm:$0xff] %v8362_v6  ;;  %12756 = vst [vmem:[#allocation98_spill] sm:$0xff] %v8364_v25  ;;  %v1968_v25 = vstv %s6976_s23  ;;  %s6989_s23 = sld [smem:[#allocation6 + $0x40]] }
 0x234   : > { %1955 = vrot.lane.b32.xlu1 %v1946_v11, %s7351_s28  ;;  %1953 = vrot.lane.b32.xlu0 %v1945_v21, %s7351_s28  ;;  %v1970_v11 = vmul.f32 %v1968_v25, %v8350_v22  ;;  %v1969_v21 = vmul.f32 %v1968_v25, %v8347_v30 }
 0x236   : > { %v8380_v55 = vpop.permute.xlu1 %1396  ;;  %v8382_v5 = vpop.permute.xlu0 %1394 }
 0x237   : > { %12759 = vst [vmem:[#allocation101_spill] sm:$0xff] %v8380_v55  ;;  %12760 = vst [vmem:[#allocation102_spill] sm:$0xff] %v8382_v5 }
 0x238   : > { %1959 = vrot.lane.b32.xlu1 %v1948_v41, %s7351_s28  ;;  %1957 = vrot.lane.b32.xlu0 %v1947_v40, %s7351_s28  ;;  %v1972_v41 = vmul.f32 %v1968_v25, %v8376_v35  ;;  %v1971_v40 = vmul.f32 %v1968_v25, %v8371_v0 }
 0x23a   : > { %v8388_v18 = vpop.permute.xlu1 %1400  ;;  %v8390_v17 = vpop.permute.xlu0 %1398 }
 0x23b   : > { %12761 = vst [vmem:[#allocation103_spill] sm:$0xff] %v8388_v18  ;;  %12762 = vst [vmem:[#allocation104_spill] sm:$0xff] %v8390_v17 }
 0x23c   : > { %1979 = vrot.lane.b32.xlu1 %v1970_v11, %s7352_s30  ;;  %1977 = vrot.lane.b32.xlu0 %v1969_v21, %s7352_s30  ;;  %v1994_v11 = vmul.f32 %v1992_v38, %v8350_v22  ;;  %v1993_v21 = vmul.f32 %v1992_v38, %v8347_v30 }
 0x23e   : > { %v8396_v16 = vpop.permute.xlu1 %1434  ;;  %v8398_v3 = vpop.permute.xlu0 %1432 }
 0x23f   : > { %12763 = vst [vmem:[#allocation105_spill] sm:$0xff] %v8396_v16  ;;  %12764 = vst [vmem:[#allocation106_spill] sm:$0xff] %v8398_v3  ;;  %v2016_v16 = vstv %s6978_s7  ;;  %s6991_s7 = sld [smem:[#allocation6 + $0x42]] }
 0x240   : > { %1983 = vrot.lane.b32.xlu1 %v1972_v41, %s7352_s30  ;;  %1981 = vrot.lane.b32.xlu0 %v1971_v40, %s7352_s30  ;;  %v1996_v41 = vmul.f32 %v1992_v38, %v8376_v35  ;;  %v1995_v40 = vmul.f32 %v1992_v38, %v8371_v0 }
 0x242   : > { %v8404_v17 = vpop.permute.xlu1 %1438  ;;  %v8406_v18 = vpop.permute.xlu0 %1436 }
 0x243   : > { %12765 = vst [vmem:[#allocation107_spill] sm:$0xff] %v8404_v17  ;;  %12766 = vst [vmem:[#allocation108_spill] sm:$0xff] %v8406_v18 }
 0x244   : > { %2003 = vrot.lane.b32.xlu1 %v1994_v11, %s7353_s17  ;;  %2001 = vrot.lane.b32.xlu0 %v1993_v21, %s7353_s17  ;;  %v2018_v11 = vmul.f32 %v2016_v16, %v8350_v22  ;;  %v2017_v21 = vmul.f32 %v2016_v16, %v8347_v30 }
 0x246   : > { %v8412_v3 = vpop.permute.xlu1 %1489  ;;  %v8414_v25 = vpop.permute.xlu0 %1487 }
 0x247   : > { %12767 = vst [vmem:[#allocation109_spill] sm:$0xff] %v8412_v3  ;;  %12768 = vst [vmem:[#allocation110_spill] sm:$0xff] %v8414_v25  ;;  %v2040_v3 = vstv %s6979_s4  ;;  %s6992_s4 = sld [smem:[#allocation6 + $0x43]] }
 0x248   : > { %2007 = vrot.lane.b32.xlu1 %v1996_v41, %s7353_s17  ;;  %2005 = vrot.lane.b32.xlu0 %v1995_v40, %s7353_s17  ;;  %v2020_v41 = vmul.f32 %v2016_v16, %v8376_v35  ;;  %v2019_v40 = vmul.f32 %v2016_v16, %v8371_v0 }
 0x24a   : > { %v8420_v18 = vpop.permute.xlu1 %1493  ;;  %v8422_v17 = vpop.permute.xlu0 %1491 }
 0x24b   : > { %12769 = vst [vmem:[#allocation111_spill] sm:$0xff] %v8420_v18  ;;  %12770 = vst [vmem:[#allocation112_spill] sm:$0xff] %v8422_v17  ;;  %v2064_v18 = vstv %s6980_s11  ;;  %s6993_s11 = sld [smem:[#allocation6 + $0x44]] }
 0x24c   : > { %2027 = vrot.lane.b32.xlu1 %v2018_v11, %s7354_s19  ;;  %2025 = vrot.lane.b32.xlu0 %v2017_v21, %s7354_s19  ;;  %v2042_v21 = vmul.f32 %v2040_v3, %v8350_v22  ;;  %v2068_v29 = vmul.f32 %v2064_v18, %v8376_v35  ;;  %v2067_v54 = vmul.f32 %v2064_v18, %v8371_v0 }
 0x24e   : > { %v8428_v25 = vpop.permute.xlu1 %1527  ;;  %v8430_v38 = vpop.permute.xlu0 %1525 }
 0x24f   : > { %12771 = vst [vmem:[#allocation113_spill] sm:$0xff] %v8428_v25  ;;  %12772 = vst [vmem:[#allocation114_spill] sm:$0xff] %v8430_v38  ;;  %v2041_v25 = vmul.f32 %v2040_v3, %v8347_v30 }
 0x250   : > { %2031 = vrot.lane.b32.xlu1 %v2020_v41, %s7354_s19  ;;  %2029 = vrot.lane.b32.xlu0 %v2019_v40, %s7354_s19  ;;  %v2044_v41 = vmul.f32 %v2040_v3, %v8376_v35  ;;  %v2043_v40 = vmul.f32 %v2040_v3, %v8371_v0  ;;  %v2065_v3 = vmul.f32 %v2064_v18, %v8347_v30 }
 0x252   : > { %v8436_v17 = vpop.permute.xlu1 %1531  ;;  %v8438_v11 = vpop.permute.xlu0 %1529 }
 0x253   : > { %12773 = vst [vmem:[#allocation115_spill] sm:$0xff] %v8436_v17  ;;  %12774 = vst [vmem:[#allocation116_spill] sm:$0xff] %v8438_v11  ;;  %v2105_v17 = vstv %s6982_s10  ;;  %v12777_v11 = vrot.slane %v8342_v2, 5  ;;  %v12781_v2 = vrot.slane %v8332_v49, 5  ;;  %s6994_s10 = sld [smem:[#allocation6 + $0x45]] }
 0x254   : > { %2051 = vrot.lane.b32.xlu1 %v2042_v21, %s7355_s27  ;;  %2049 = vrot.lane.b32.xlu0 %v2041_v25, %s7355_s27  ;;  %v2107_v5 = vmul.f32 %v2105_v17, %v8350_v22  ;;  %v2109_v55 = vmul.f32 %v2105_v17, %v8376_v35 }
 0x255   : > { %v8455_v21 = vsel %vm255_vm1, %v12777_v11, 0.0  ;;  %v8470_v11 = vsel %vm255_vm1, %v12781_v2, 0.0 }
 0x256   : > { %v8444_v16 = vpop.permute.xlu1 %1565  ;;  %v8446_v38 = vpop.permute.xlu0 %1563  ;;  %12778 = vst [vmem:[#allocation119_spill] sm:$0xff] %v8455_v21  ;;  %v2121_v45 = vrot.slane %v2107_v5, 1  ;;  %v2122_v1 = vrot.slane %v2109_v55, 1  ;;  %v2110_v2 = vmul.f32 %v2105_v17, %v8470_v11  ;;  %v2145_v5 = vmul.f32 %v2143_v46, %v8350_v22 }
 0x257   : > { %12775 = vst [vmem:[#allocation117_spill] sm:$0xff] %v8444_v16  ;;  %12776 = vst [vmem:[#allocation118_spill] sm:$0xff] %v8446_v38  ;;  %v2066_v38 = vmul.f32 %v2064_v18, %v8350_v22  ;;  %v2147_v55 = vmul.f32 %v2143_v46, %v8376_v35 }
 0x258   : > { %2055 = vrot.lane.b32.xlu1 %v2044_v41, %s7355_s27  ;;  %2053 = vrot.lane.b32.xlu0 %v2043_v40, %s7355_s27  ;;  %v2106_v41 = vmul.f32 %v2105_v17, %v8347_v30  ;;  %v2108_v40 = vmul.f32 %v2105_v17, %v8371_v0 }
 0x25a   : > { %v8457_v25 = vpop.permute.xlu1 %1569  ;;  %v8459_v16 = vpop.permute.xlu0 %1567  ;;  %v2118_v49 = vrot.slane %v2106_v41, 1  ;;  %v2119_v42 = vrot.slane %v2108_v40, 1  ;;  %v2144_v41 = vmul.f32 %v2143_v46, %v8347_v30  ;;  %v2159_v40 = vrot.slane %v2145_v5, 1 }
 0x25b   : > { %12779 = vst [vmem:[#allocation120_spill] sm:$0xff] %v8457_v25  ;;  %12780 = vst [vmem:[#allocation121_spill] sm:$0xff] %v8459_v16  ;;  %v2111_v16 = vmul.f32 %v2105_v17, %v8455_v21  ;;  %v2124_v17 = vrot.slane %v2110_v2, 1 }
 0x25c   : > { %2075 = vrot.lane.b32.xlu1 %v2066_v38, %s7356_s6  ;;  %2073 = vrot.lane.b32.xlu0 %v2065_v3, %s7356_s6  ;;  %v2120_v18 = vsel %vm470_vm2, %v2118_v49, %v2119_v42  ;;  %v2148_v49 = vmul.f32 %v2143_v46, %v8470_v11  ;;  %v2156_v27 = vrot.slane %v2144_v41, 1  ;;  %v2184_v41 = vmul.f32 %v2181_v63, %v8371_v0 }
 0x25d   : > { %v2126_v38 = vrot.slane %v2111_v16, 1  ;;  %v2125_v2 = vsel %vm470_vm2, %v2119_v42, %v2124_v17  ;;  %v2182_v17 = vmul.f32 %v2181_v63, %v8347_v30 }
 0x25e   : > { %v8475_v25 = vpop.permute.xlu1 %1603  ;;  %v8477_v6 = vpop.permute.xlu0 %1601 }
 0x25f   : > { %12782 = vst [vmem:[#allocation122_spill] sm:$0xff] %v8475_v25  ;;  %12783 = vst [vmem:[#allocation123_spill] sm:$0xff] %v8477_v6  ;;  %v2123_v25 = vsel %vm470_vm2, %v2121_v45, %v2122_v1 }
 0x260   : > { %2079 = vrot.lane.b32.xlu1 %v2068_v29, %s7356_s6  ;;  %2077 = vrot.lane.b32.xlu0 %v2067_v54, %s7356_s6  ;;  %v2146_v29 = vmul.f32 %v2143_v46, %v8371_v0  ;;  %v2127_v54 = vsel %vm470_vm2, %v2122_v1, %v2126_v38 }
 0x262   : > { %v8484_v3 = vpop.permute.xlu1 %1607  ;;  %v8486_v6 = vpop.permute.xlu0 %1605  ;;  %v2157_v23 = vrot.slane %v2146_v29, 1  ;;  %v2187_v29 = vmul.f32 %v2181_v63, %v8455_v21 }
 0x263   : > { %12784 = vst [vmem:[#allocation124_spill] sm:$0xff] %v8484_v3  ;;  %12785 = vst [vmem:[#allocation125_spill] sm:$0xff] %v8486_v6  ;;  %v2160_v6 = vrot.slane %v2147_v55, 1  ;;  %v2149_v3 = vmul.f32 %v2143_v46, %v8455_v21  ;;  %v2162_v55 = vrot.slane %v2148_v49, 1  ;;  %v2183_v46 = vmul.f32 %v2181_v63, %v8350_v22 }
 0x264   : > { %2130 = vrot.lane.b32.xlu1 %v2123_v25, %s7351_s28  ;;  %2128 = vrot.lane.b32.xlu0 %v2120_v18, %s7351_s28  ;;  %v2158_v42 = vsel %vm470_vm2, %v2156_v27, %v2157_v23  ;;  %v2185_v18 = vmul.f32 %v2181_v63, %v8376_v35 }
 0x265   : > { %v2161_v38 = vsel %vm470_vm2, %v2159_v40, %v2160_v6  ;;  %v2164_v5 = vrot.slane %v2149_v3, 1  ;;  %v2163_v27 = vsel %vm470_vm2, %v2157_v23, %v2162_v55  ;;  %v2197_v49 = vrot.slane %v2183_v46, 1 }
 0x266   : > { %v8497_v16 = vpop.permute.xlu1 %1641  ;;  %v8499_v45 = vpop.permute.xlu0 %1639 }
 0x267   : > { %12786 = vst [vmem:[#allocation126_spill] sm:$0xff] %v8497_v16  ;;  %12787 = vst [vmem:[#allocation127_spill] sm:$0xff] %v8499_v45  ;;  %v2165_v40 = vsel %vm470_vm2, %v2160_v6, %v2164_v5  ;;  %v2195_v45 = vrot.slane %v2184_v41, 1  ;;  %v2219_v16 = vstv %s6985_s29  ;;  %s6998_s29 = sld [smem:[#allocation6 + $0x49]] }
 0x268   : > { %2134 = vrot.lane.b32.xlu1 %v2127_v54, %s7351_s28  ;;  %2132 = vrot.lane.b32.xlu0 %v2125_v2, %s7351_s28  ;;  %v2186_v2 = vmul.f32 %v2181_v63, %v8470_v11  ;;  %v2221_v23 = vmul.f32 %v2219_v16, %v8350_v22  ;;  %v2223_v5 = vmul.f32 %v2219_v16, %v8376_v35 }
 0x269   : > { %v2220_v46 = vmul.f32 %v2219_v16, %v8347_v30 }
 0x26a   : > { %v8506_v1 = vpop.permute.xlu1 %1645  ;;  %v8508_v25 = vpop.permute.xlu0 %1643  ;;  %v2200_v6 = vrot.slane %v2186_v2, 1 }
 0x26b   : > { %12788 = vst [vmem:[#allocation128_spill] sm:$0xff] %v8506_v1  ;;  %12789 = vst [vmem:[#allocation129_spill] sm:$0xff] %v8508_v25  ;;  %v2198_v25 = vrot.slane %v2185_v18, 1  ;;  %v2194_v1 = vrot.slane %v2182_v17, 1  ;;  %v2222_v18 = vmul.f32 %v2219_v16, %v8371_v0  ;;  %v2232_v2 = vrot.slane %v2220_v46, 1 }
 0x26c   : > { %2168 = vrot.lane.b32.xlu1 %v2161_v38, %s7352_s30  ;;  %2166 = vrot.lane.b32.xlu0 %v2158_v42, %s7352_s30  ;;  %v2202_v38 = vrot.slane %v2187_v29, 1 }
 0x26d   : > { %v2199_v63 = vsel %vm470_vm2, %v2197_v49, %v2198_v25  ;;  %v2196_v55 = vsel %vm470_vm2, %v2194_v1, %v2195_v45  ;;  %v2236_v49 = vrot.slane %v2223_v5, 1  ;;  %v2225_v1 = vmul.f32 %v2219_v16, %v8455_v21 }
 0x26e   : > { %v8519_v54 = vpop.permute.xlu1 %1679  ;;  %v8521_v3 = vpop.permute.xlu0 %1677  ;;  %v2203_v17 = vsel %vm470_vm2, %v2198_v25, %v2202_v38 }
 0x26f   : > { %12790 = vst [vmem:[#allocation130_spill] sm:$0xff] %v8519_v54  ;;  %12791 = vst [vmem:[#allocation131_spill] sm:$0xff] %v8521_v3 }
 0x270   : > { %2172 = vrot.lane.b32.xlu1 %v2165_v40, %s7352_s30  ;;  %2170 = vrot.lane.b32.xlu0 %v2163_v27, %s7352_s30  ;;  %v2201_v40 = vsel %vm470_vm2, %v2195_v45, %v2200_v6  ;;  %v2235_v27 = vrot.slane %v2221_v23, 1  ;;  %v2240_v45 = vrot.slane %v2225_v1, 1 }
 0x272   : > { %v8528_v42 = vpop.permute.xlu1 %1683  ;;  %v8530_v3 = vpop.permute.xlu0 %1681 }
 0x273   : > { %12792 = vst [vmem:[#allocation132_spill] sm:$0xff] %v8528_v42  ;;  %12793 = vst [vmem:[#allocation133_spill] sm:$0xff] %v8530_v3  ;;  %v2233_v3 = vrot.slane %v2222_v18, 1  ;;  %v2224_v42 = vmul.f32 %v2219_v16, %v8470_v11 }
 0x274   : > { %2206 = vrot.lane.b32.xlu1 %v2199_v63, %s7353_s17  ;;  %2204 = vrot.lane.b32.xlu0 %v2196_v55, %s7353_s17  ;;  %v2257_v63 = vstv %s6986_s8  ;;  %v2237_v55 = vsel %vm470_vm2, %v2235_v27, %v2236_v49  ;;  %s6999_s8 = sld [smem:[#allocation6 + $0x4a]] }
 0x275   : > { %v2259_v6 = vmul.f32 %v2257_v63, %v8350_v22  ;;  %v2261_v23 = vmul.f32 %v2257_v63, %v8376_v35  ;;  %v2234_v5 = vsel %vm470_vm2, %v2232_v2, %v2233_v3  ;;  %v2238_v46 = vrot.slane %v2224_v42, 1 }
 0x276   : > { %v8541_v41 = vpop.permute.xlu1 %1735  ;;  %v8543_v29 = vpop.permute.xlu0 %1733  ;;  %v2258_v16 = vmul.f32 %v2257_v63, %v8347_v30  ;;  %v2260_v18 = vmul.f32 %v2257_v63, %v8371_v0  ;;  %v2262_v42 = vmul.f32 %v2257_v63, %v8470_v11  ;;  %v2241_v2 = vsel %vm470_vm2, %v2236_v49, %v2240_v45 }
 0x277   : > { %12794 = vst [vmem:[#allocation134_spill] sm:$0xff] %v8541_v41  ;;  %12795 = vst [vmem:[#allocation135_spill] sm:$0xff] %v8543_v29  ;;  %v2273_v1 = vrot.slane %v2259_v6, 1  ;;  %v2239_v29 = vsel %vm470_vm2, %v2233_v3, %v2238_v46 }
 0x278   : > { %2210 = vrot.lane.b32.xlu1 %v2203_v17, %s7353_s17  ;;  %2208 = vrot.lane.b32.xlu0 %v2201_v40, %s7353_s17  ;;  %v2295_v17 = vstv %s6987_s9  ;;  %v2270_v41 = vrot.slane %v2258_v16, 1  ;;  %s8782_s9 = sld [smem:[#allocation6]] }
 0x279   : > { %v2299_v3 = vmul.f32 %v2295_v17, %v8376_v35  ;;  %v2296_v45 = vmul.f32 %v2295_v17, %v8347_v30  ;;  %v2298_v46 = vmul.f32 %v2295_v17, %v8371_v0  ;;  %v2300_v54 = vmul.f32 %v2295_v17, %v8470_v11 }
 0x27a   : > { %v8550_v25 = vpop.permute.xlu1 %1739  ;;  %v8552_v38 = vpop.permute.xlu0 %1737 }
 0x27b   : > { %12796 = vst [vmem:[#allocation136_spill] sm:$0xff] %v8550_v25  ;;  %12797 = vst [vmem:[#allocation137_spill] sm:$0xff] %v8552_v38  ;;  %v2274_v38 = vrot.slane %v2261_v23, 1  ;;  %v2263_v25 = vmul.f32 %v2257_v63, %v8455_v21  ;;  %v2297_v63 = vmul.f32 %v2295_v17, %v8350_v22 }
 0x27c   : > { %2244 = vrot.lane.b32.xlu1 %v2237_v55, %s7354_s19  ;;  %2242 = vrot.lane.b32.xlu0 %v2234_v5, %s7354_s19  ;;  %v2271_v55 = vrot.slane %v2260_v18, 1 }
 0x27d   : > { %v2275_v6 = vsel %vm470_vm2, %v2273_v1, %v2274_v38  ;;  %v2278_v23 = vrot.slane %v2263_v25, 1 }
 0x27e   : > { %v8562_v40 = vpop.permute.xlu1 %1773  ;;  %v8564_v27 = vpop.permute.xlu0 %1771  ;;  %v2272_v49 = vsel %vm470_vm2, %v2270_v41, %v2271_v55  ;;  %v2311_v41 = vrot.slane %v2297_v63, 1 }
 0x27f   : > { %12798 = vst [vmem:[#allocation138_spill] sm:$0xff] %v8562_v40  ;;  %12799 = vst [vmem:[#allocation139_spill] sm:$0xff] %v8564_v27  ;;  %v2276_v27 = vrot.slane %v2262_v42, 1  ;;  %v2279_v25 = vsel %vm470_vm2, %v2274_v38, %v2278_v23  ;;  %v2301_v42 = vmul.f32 %v2295_v17, %v8455_v21 }
 0x280   : > { %2248 = vrot.lane.b32.xlu1 %v2241_v2, %s7354_s19  ;;  %2246 = vrot.lane.b32.xlu0 %v2239_v29, %s7354_s19  ;;  %v2350_v29 = vstv %s6989_s23  ;;  %v2312_v2 = vrot.slane %v2299_v3, 1  ;;  %s7000_s23 = sld [smem:[#allocation6 + $0x4b]] }
 0x281   : > { %v2277_v1 = vsel %vm470_vm2, %v2271_v55, %v2276_v27  ;;  %v2316_v27 = vrot.slane %v2301_v42, 1  ;;  %v2354_v55 = vmul.f32 %v2350_v29, %v8376_v35  ;;  %v2351_v23 = vmul.f32 %v2350_v29, %v8347_v30 }
 0x282   : > { %v8572_v5 = vpop.permute.xlu1 %1777  ;;  %v8574_v40 = vpop.permute.xlu0 %1775  ;;  %v2353_v63 = vmul.f32 %v2350_v29, %v8371_v0  ;;  %v2313_v17 = vsel %vm470_vm2, %v2311_v41, %v2312_v2 }
 0x283   : > { %12800 = vst [vmem:[#allocation140_spill] sm:$0xff] %v8572_v5  ;;  %12801 = vst [vmem:[#allocation141_spill] sm:$0xff] %v8574_v40  ;;  %v2308_v40 = vrot.slane %v2296_v45, 1  ;;  %v2309_v5 = vrot.slane %v2298_v46, 1  ;;  %v2314_v45 = vrot.slane %v2300_v54, 1  ;;  %v2317_v42 = vsel %vm470_vm2, %v2312_v2, %v2316_v27 }
 0x284   : > { %2282 = vrot.lane.b32.xlu1 %v2275_v6, %s7355_s27  ;;  %2280 = vrot.lane.b32.xlu0 %v2272_v49, %s7355_s27  ;;  %v2352_v6 = vmul.f32 %v2350_v29, %v8350_v22  ;;  %v2355_v54 = vmul.f32 %v2350_v29, %v8470_v11 }
 0x285   : > { %v2310_v3 = vsel %vm470_vm2, %v2308_v40, %v2309_v5  ;;  %v2315_v41 = vsel %vm470_vm2, %v2309_v5, %v2314_v45  ;;  %v2356_v40 = vmul.f32 %v2350_v29, %v8455_v21 }
 0x286   : > { %v8584_v16 = vpop.permute.xlu1 %1811  ;;  %v8586_v18 = vpop.permute.xlu0 %1809  ;;  %v2366_v46 = vrot.slane %v2352_v6, 2 }
 0x287   : > { %12802 = vst [vmem:[#allocation142_spill] sm:$0xff] %v8584_v16  ;;  %12803 = vst [vmem:[#allocation143_spill] sm:$0xff] %v8586_v18  ;;  %v2364_v18 = vrot.slane %v2353_v63, 2  ;;  %v2369_v63 = vrot.slane %v2355_v54, 2 }
 0x288   : > { %2286 = vrot.lane.b32.xlu1 %v2279_v25, %s7355_s27  ;;  %2284 = vrot.lane.b32.xlu0 %v2277_v1, %s7355_s27 }
 0x28a   : > { %v8595_v49 = vpop.permute.xlu1 %1815  ;;  %v8597_v38 = vpop.permute.xlu0 %1813 }
 0x28b   : > { %12804 = vst [vmem:[#allocation144_spill] sm:$0xff] %v8595_v49  ;;  %12805 = vst [vmem:[#allocation145_spill] sm:$0xff] %v8597_v38  ;;  %v2367_v38 = vrot.slane %v2354_v55, 2  ;;  %v2363_v49 = vrot.slane %v2351_v23, 2  ;;  %v2371_v23 = vrot.slane %v2356_v40, 2 }
 0x28c   : > { %2320 = vrot.lane.b32.xlu1 %v2313_v17, %s7356_s6  ;;  %2318 = vrot.lane.b32.xlu0 %v2310_v3, %s7356_s6  ;;  %v2388_v17 = vstv %s6990_s26  ;;  %s8794_s26 = sld [smem:[#allocation7]] }
 0x28d   : > { %v2368_v2 = vsel %vm716_vm3, %v2366_v46, %v2367_v38  ;;  %v2365_v27 = vsel %vm716_vm3, %v2363_v49, %v2364_v18  ;;  %v2390_v55 = vmul.f32 %v2388_v17, %v8350_v22  ;;  %v2392_v5 = vmul.f32 %v2388_v17, %v8376_v35 }
 0x28e   : > { %v8606_v25 = vpop.permute.xlu1 %1849  ;;  %v8608_v1 = vpop.permute.xlu0 %1847  ;;  %v2389_v29 = vmul.f32 %v2388_v17, %v8347_v30  ;;  %v2391_v45 = vmul.f32 %v2388_v17, %v8371_v0  ;;  %v2393_v40 = vmul.f32 %v2388_v17, %v8470_v11  ;;  %v2372_v54 = vsel %vm716_vm3, %v2367_v38, %v2371_v23 }
 0x28f   : > { %12806 = vst [vmem:[#allocation146_spill] sm:$0xff] %v8606_v25  ;;  %12807 = vst [vmem:[#allocation147_spill] sm:$0xff] %v8608_v1  ;;  %v2404_v49 = vrot.slane %v2390_v55, 2  ;;  %v2370_v1 = vsel %vm716_vm3, %v2364_v18, %v2369_v63 }
 0x290   : > { %2324 = vrot.lane.b32.xlu1 %v2317_v42, %s7356_s6  ;;  %2322 = vrot.lane.b32.xlu0 %v2315_v41, %s7356_s6  ;;  %v2426_v42 = vstv %s6991_s7  ;;  %v2401_v25 = vrot.slane %v2389_v29, 2  ;;  %s8810_s7 = sld [smem:[#allocation6 + $0x4c]] }
 0x291   : > { %v2430_v18 = vmul.f32 %v2426_v42, %v8376_v35  ;;  %v2427_v23 = vmul.f32 %v2426_v42, %v8347_v30  ;;  %v2429_v63 = vmul.f32 %v2426_v42, %v8371_v0  ;;  %v2431_v16 = vmul.f32 %v2426_v42, %v8470_v11 }
 0x292   : > { %v8616_v6 = vpop.permute.xlu1 %1853  ;;  %v8618_v3 = vpop.permute.xlu0 %1851 }
 0x293   : > { %12808 = vst [vmem:[#allocation148_spill] sm:$0xff] %v8616_v6  ;;  %12809 = vst [vmem:[#allocation149_spill] sm:$0xff] %v8618_v3  ;;  %v2405_v3 = vrot.slane %v2392_v5, 2  ;;  %v2394_v6 = vmul.f32 %v2388_v17, %v8455_v21  ;;  %v2428_v17 = vmul.f32 %v2426_v42, %v8350_v22 }
 0x294   : > { %2375 = vrot.lane.b32.xlu1 %v2368_v2, %s7351_s28  ;;  %2373 = vrot.lane.b32.xlu0 %v2365_v27, %s7351_s28  ;;  %v2402_v2 = vrot.slane %v2391_v45, 2 }
 0x295   : > { %v2406_v55 = vsel %vm716_vm3, %v2404_v49, %v2405_v3  ;;  %v2409_v5 = vrot.slane %v2394_v6, 2  ;;  %v2442_v49 = vrot.slane %v2428_v17, 2  ;;  %v2445_v17 = vrot.slane %v2431_v16, 2 }
 0x296   : > { %v8628_v41 = vpop.permute.xlu1 %1887  ;;  %v8630_v46 = vpop.permute.xlu0 %1885  ;;  %v2403_v38 = vsel %vm716_vm3, %v2401_v25, %v2402_v2 }
 0x297   : > { %12810 = vst [vmem:[#allocation150_spill] sm:$0xff] %v8628_v41  ;;  %12811 = vst [vmem:[#allocation151_spill] sm:$0xff] %v8630_v46  ;;  %v2407_v41 = vrot.slane %v2393_v40, 2  ;;  %v2410_v45 = vsel %vm716_vm3, %v2405_v3, %v2409_v5  ;;  %v2464_v40 = vstv %s6992_s4  ;;  %s8849_s4 = sld [smem:[#allocation6 + $0x4e]] }
 0x298   : > { %2379 = vrot.lane.b32.xlu1 %v2372_v54, %s7351_s28  ;;  %2377 = vrot.lane.b32.xlu0 %v2370_v1, %s7351_s28  ;;  %v2432_v1 = vmul.f32 %v2426_v42, %v8455_v21  ;;  %v2443_v54 = vrot.slane %v2430_v18, 2  ;;  %v2466_v3 = vmul.f32 %v2464_v40, %v8350_v22  ;;  %v2467_v18 = vmul.f32 %v2464_v40, %v8371_v0 }
 0x299   : > { %v2408_v25 = vsel %vm716_vm3, %v2402_v2, %v2407_v41  ;;  %v2468_v41 = vmul.f32 %v2464_v40, %v8376_v35  ;;  %v2465_v2 = vmul.f32 %v2464_v40, %v8347_v30 }
 0x29a   : > { %v8638_v27 = vpop.permute.xlu1 %1891  ;;  %v8640_v46 = vpop.permute.xlu0 %1889  ;;  %v2444_v5 = vsel %vm716_vm3, %v2442_v49, %v2443_v54  ;;  %v2470_v49 = vmul.f32 %v2464_v40, %v8455_v21 }
 0x29b   : > { %12812 = vst [vmem:[#allocation152_spill] sm:$0xff] %v8638_v27  ;;  %12813 = vst [vmem:[#allocation153_spill] sm:$0xff] %v8640_v46  ;;  %v2439_v46 = vrot.slane %v2427_v23, 2  ;;  %v2440_v27 = vrot.slane %v2429_v63, 2 }
 0x29c   : > { %2413 = vrot.lane.b32.xlu1 %v2406_v55, %s7352_s30  ;;  %2411 = vrot.lane.b32.xlu0 %v2403_v38, %s7352_s30  ;;  %v2447_v55 = vrot.slane %v2432_v1, 2 }
 0x29d   : > { %v2441_v42 = vsel %vm716_vm3, %v2439_v46, %v2440_v27  ;;  %v2446_v16 = vsel %vm716_vm3, %v2440_v27, %v2445_v17  ;;  %v2478_v46 = vrot.slane %v2467_v18, 2 }
 0x29e   : > { %v8651_v29 = vpop.permute.xlu1 %1925  ;;  %v8653_v6 = vpop.permute.xlu0 %1923  ;;  %v2448_v23 = vsel %vm716_vm3, %v2443_v54, %v2447_v55 }
 0x29f   : > { %12814 = vst [vmem:[#allocation154_spill] sm:$0xff] %v8651_v29  ;;  %12815 = vst [vmem:[#allocation155_spill] sm:$0xff] %v8653_v6 }
 0x2a0   : > { %2417 = vrot.lane.b32.xlu1 %v2410_v45, %s7352_s30  ;;  %2415 = vrot.lane.b32.xlu0 %v2408_v25, %s7352_s30  ;;  %v2480_v45 = vrot.slane %v2466_v3, 2  ;;  %v2481_v25 = vrot.slane %v2468_v41, 2  ;;  %v2485_v41 = vrot.slane %v2470_v49, 2 }
 0x2a2   : > { %v8660_v38 = vpop.permute.xlu1 %1929  ;;  %v8662_v6 = vpop.permute.xlu0 %1927  ;;  %v2482_v3 = vsel %vm716_vm3, %v2480_v45, %v2481_v25  ;;  %v2486_v49 = vsel %vm716_vm3, %v2481_v25, %v2485_v41 }
 0x2a3   : > { %12816 = vst [vmem:[#allocation156_spill] sm:$0xff] %v8660_v38  ;;  %12817 = vst [vmem:[#allocation157_spill] sm:$0xff] %v8662_v6  ;;  %v2477_v6 = vrot.slane %v2465_v2, 2  ;;  %v2469_v38 = vmul.f32 %v2464_v40, %v8470_v11 }
 0x2a4   : > { %2451 = vrot.lane.b32.xlu1 %v2444_v5, %s7353_s17  ;;  %2449 = vrot.lane.b32.xlu0 %v2441_v42, %s7353_s17  ;;  %v2502_v5 = vstv %s6993_s11  ;;  %s8871_s11 = sld [smem:[#allocation6 + $0x7]] }
 0x2a5   : > { %v2504_v2 = vmul.f32 %v2502_v5, %v8350_v22  ;;  %v2506_v42 = vmul.f32 %v2502_v5, %v8376_v35  ;;  %v2479_v27 = vsel %vm716_vm3, %v2477_v6, %v2478_v46  ;;  %v2483_v17 = vrot.slane %v2469_v38, 2 }
 0x2a6   : > { %v8673_v63 = vpop.permute.xlu1 %1955  ;;  %v8675_v1 = vpop.permute.xlu0 %1953  ;;  %v2503_v40 = vmul.f32 %v2502_v5, %v8347_v30  ;;  %v2505_v18 = vmul.f32 %v2502_v5, %v8371_v0  ;;  %v2508_v6 = vmul.f32 %v2502_v5, %v8455_v21  ;;  %v2507_v29 = vmul.f32 %v2502_v5, %v8470_v11 }
 0x2a7   : > { %12818 = vst [vmem:[#allocation158_spill] sm:$0xff] %v8673_v63  ;;  %12819 = vst [vmem:[#allocation159_spill] sm:$0xff] %v8675_v1  ;;  %v2484_v38 = vsel %vm716_vm3, %v2478_v46, %v2483_v17 }
 0x2a8   : > { %2455 = vrot.lane.b32.xlu1 %v2448_v23, %s7353_s17  ;;  %2453 = vrot.lane.b32.xlu0 %v2446_v16, %s7353_s17  ;;  %v2540_v23 = vstv %s6994_s10  ;;  %v2515_v1 = vrot.slane %v2503_v40, 2  ;;  %v2516_v63 = vrot.slane %v2505_v18, 2  ;;  %v2523_v41 = vrot.slane %v2508_v6, 2  ;;  %s8890_s10 = sld [smem:[#allocation6 + $0x4f]] }
 0x2a9   : > { %v2544_v46 = vmul.f32 %v2540_v23, %v8376_v35  ;;  %v2521_v17 = vrot.slane %v2507_v29, 2  ;;  %v2541_v5 = vmul.f32 %v2540_v23, %v8347_v30  ;;  %v2543_v40 = vmul.f32 %v2540_v23, %v8371_v0 }
 0x2aa   : > { %v8682_v54 = vpop.permute.xlu1 %1959  ;;  %v8684_v55 = vpop.permute.xlu0 %1957  ;;  %v2546_v18 = vmul.f32 %v2540_v23, %v8455_v21  ;;  %v2545_v29 = vmul.f32 %v2540_v23, %v8470_v11 }
 0x2ab   : > { %12820 = vst [vmem:[#allocation160_spill] sm:$0xff] %v8682_v54  ;;  %12821 = vst [vmem:[#allocation161_spill] sm:$0xff] %v8684_v55  ;;  %v2518_v55 = vrot.slane %v2504_v2, 2  ;;  %v2519_v54 = vrot.slane %v2506_v42, 2  ;;  %v2542_v2 = vmul.f32 %v2540_v23, %v8350_v22  ;;  %v2517_v42 = vsel %vm716_vm3, %v2515_v1, %v2516_v63 }
 0x2ac   : > { %2489 = vrot.lane.b32.xlu1 %v2482_v3, %s7354_s19  ;;  %2487 = vrot.lane.b32.xlu0 %v2479_v27, %s7354_s19  ;;  %v2522_v1 = vsel %vm716_vm3, %v2516_v63, %v2521_v17 }
 0x2ad   : > { %v2520_v25 = vsel %vm716_vm3, %v2518_v55, %v2519_v54  ;;  %v2524_v6 = vsel %vm716_vm3, %v2519_v54, %v2523_v41  ;;  %v2559_v54 = vrot.slane %v2545_v29, 2 }
 0x2ae   : > { %v8694_v16 = vpop.permute.xlu1 %1979  ;;  %v8696_v45 = vpop.permute.xlu0 %1977 }
 0x2af   : > { %12822 = vst [vmem:[#allocation162_spill] sm:$0xff] %v8694_v16  ;;  %12823 = vst [vmem:[#allocation163_spill] sm:$0xff] %v8696_v45  ;;  %v2554_v45 = vrot.slane %v2543_v40, 2 }
 0x2b0   : > { %2493 = vrot.lane.b32.xlu1 %v2486_v49, %s7354_s19  ;;  %2491 = vrot.lane.b32.xlu0 %v2484_v38, %s7354_s19  ;;  %v2556_v38 = vrot.slane %v2542_v2, 2 }
 0x2b2   : > { %v8704_v3 = vpop.permute.xlu1 %1983  ;;  %v8706_v27 = vpop.permute.xlu0 %1981 }
 0x2b3   : > { %12824 = vst [vmem:[#allocation164_spill] sm:$0xff] %v8704_v3  ;;  %12825 = vst [vmem:[#allocation165_spill] sm:$0xff] %v8706_v27  ;;  %v2557_v27 = vrot.slane %v2544_v46, 2  ;;  %v2553_v3 = vrot.slane %v2541_v5, 2 }
 0x2b4   : > { %2527 = vrot.lane.b32.xlu1 %v2520_v25, %s7355_s27  ;;  %2525 = vrot.lane.b32.xlu0 %v2517_v42, %s7355_s27  ;;  %v2595_v25 = vstv %s6996_s20  ;;  %v2561_v42 = vrot.slane %v2546_v18, 2  ;;  %s8928_s20 = sld [smem:[#allocation6 + $0x50]] }
 0x2b5   : > { %v2597_v41 = vmul.f32 %v2595_v25, %v8350_v22  ;;  %v2599_v23 = vmul.f32 %v2595_v25, %v8376_v35  ;;  %v2558_v2 = vsel %vm716_vm3, %v2556_v38, %v2557_v27  ;;  %v2555_v63 = vsel %vm716_vm3, %v2553_v3, %v2554_v45 }
 0x2b6   : > { %v8717_v49 = vpop.permute.xlu1 %2003  ;;  %v8719_v55 = vpop.permute.xlu0 %2001  ;;  %v2596_v46 = vmul.f32 %v2595_v25, %v8347_v30  ;;  %v2598_v17 = vmul.f32 %v2595_v25, %v8371_v0  ;;  %v2562_v5 = vsel %vm716_vm3, %v2557_v27, %v2561_v42  ;;  %v2600_v16 = vmul.f32 %v2595_v25, %v8470_v11 }
 0x2b7   : > { %12826 = vst [vmem:[#allocation166_spill] sm:$0xff] %v8717_v49  ;;  %12827 = vst [vmem:[#allocation167_spill] sm:$0xff] %v8719_v55  ;;  %v2611_v29 = vrot.slane %v2597_v41, 3  ;;  %v2612_v38 = vrot.slane %v2599_v23, 3 }
 0x2b8   : > { %2531 = vrot.lane.b32.xlu1 %v2524_v6, %s7355_s27  ;;  %2529 = vrot.lane.b32.xlu0 %v2522_v1, %s7355_s27  ;;  %v2560_v6 = vsel %vm716_vm3, %v2554_v45, %v2559_v54  ;;  %v2633_v1 = vstv %s6997_s22  ;;  %v2608_v3 = vrot.slane %v2596_v46, 3  ;;  %v2614_v46 = vrot.slane %v2600_v16, 3  ;;  %s8962_s22 = sld [smem:[#allocation6 + $0x51]] }
 0x2b9   : > { %v2635_v27 = vmul.f32 %v2633_v1, %v8350_v22  ;;  %v2637_v42 = vmul.f32 %v2633_v1, %v8376_v35  ;;  %v2634_v54 = vmul.f32 %v2633_v1, %v8347_v30  ;;  %v2636_v41 = vmul.f32 %v2633_v1, %v8371_v0 }
 0x2ba   : > { %v8726_v49 = vpop.permute.xlu1 %2007  ;;  %v8728_v55 = vpop.permute.xlu0 %2005  ;;  %v2613_v23 = vsel %vm962_vm4, %v2611_v29, %v2612_v38  ;;  %v2638_v29 = vmul.f32 %v2633_v1, %v8470_v11 }
 0x2bb   : > { %12828 = vst [vmem:[#allocation168_spill] sm:$0xff] %v8726_v49  ;;  %12829 = vst [vmem:[#allocation169_spill] sm:$0xff] %v8728_v55  ;;  %v2609_v55 = vrot.slane %v2598_v17, 3  ;;  %v2601_v49 = vmul.f32 %v2595_v25, %v8455_v21  ;;  %v2649_v17 = vrot.slane %v2635_v27, 3 }
 0x2bc   : > { %2565 = vrot.lane.b32.xlu1 %v2558_v2, %s7356_s6  ;;  %2563 = vrot.lane.b32.xlu0 %v2555_v63, %s7356_s6 }
 0x2bd   : > { %v2610_v25 = vsel %vm962_vm4, %v2608_v3, %v2609_v55  ;;  %v2616_v63 = vrot.slane %v2601_v49, 3  ;;  %v2615_v16 = vsel %vm962_vm4, %v2609_v55, %v2614_v46  ;;  %v2671_v3 = vstv %s6998_s29  ;;  %s8984_s29 = sld [smem:[#allocation6 + $0xe]] }
 0x2be   : > { %v8739_v40 = vpop.permute.xlu1 %2027  ;;  %v8741_v18 = vpop.permute.xlu0 %2025  ;;  %v2672_v55 = vmul.f32 %v2671_v3, %v8347_v30  ;;  %v2677_v46 = vmul.f32 %v2671_v3, %v8455_v21 }
 0x2bf   : > { %12830 = vst [vmem:[#allocation170_spill] sm:$0xff] %v8739_v40  ;;  %12831 = vst [vmem:[#allocation171_spill] sm:$0xff] %v8741_v18  ;;  %v2647_v18 = vrot.slane %v2636_v41, 3  ;;  %v2639_v40 = vmul.f32 %v2633_v1, %v8455_v21  ;;  %v2617_v49 = vsel %vm962_vm4, %v2612_v38, %v2616_v63  ;;  %v2652_v1 = vrot.slane %v2638_v29, 3 }
 0x2c0   : > { %2569 = vrot.lane.b32.xlu1 %v2562_v5, %s7356_s6  ;;  %2567 = vrot.lane.b32.xlu0 %v2560_v6, %s7356_s6  ;;  %v2650_v5 = vrot.slane %v2637_v42, 3  ;;  %v2675_v38 = vmul.f32 %v2671_v3, %v8376_v35  ;;  %v2674_v63 = vmul.f32 %v2671_v3, %v8371_v0 }
 0x2c1   : > { %v2653_v29 = vsel %vm962_vm4, %v2647_v18, %v2652_v1 }
 0x2c2   : > { %v8750_v2 = vpop.permute.xlu1 %2031  ;;  %v8752_v45 = vpop.permute.xlu0 %2029 }
 0x2c3   : > { %12832 = vst [vmem:[#allocation172_spill] sm:$0xff] %v8750_v2  ;;  %12833 = vst [vmem:[#allocation173_spill] sm:$0xff] %v8752_v45  ;;  %v2646_v45 = vrot.slane %v2634_v54, 3  ;;  %v2651_v54 = vsel %vm962_vm4, %v2649_v17, %v2650_v5 }
 0x2c4   : > { %2620 = vrot.lane.b32.xlu1 %v2613_v23, %s7351_s28  ;;  %2618 = vrot.lane.b32.xlu0 %v2610_v25, %s7351_s28  ;;  %v2654_v23 = vrot.slane %v2639_v40, 3  ;;  %v2673_v25 = vmul.f32 %v2671_v3, %v8350_v22 }
 0x2c5   : > { %v2648_v41 = vsel %vm962_vm4, %v2646_v45, %v2647_v18 }
 0x2c6   : > { %v8760_v6 = vpop.permute.xlu1 %2051  ;;  %v8762_v2 = vpop.permute.xlu0 %2049  ;;  %v2655_v45 = vsel %vm962_vm4, %v2650_v5, %v2654_v23 }
 0x2c7   : > { %12834 = vst [vmem:[#allocation174_spill] sm:$0xff] %v8760_v6  ;;  %12835 = vst [vmem:[#allocation175_spill] sm:$0xff] %v8762_v2  ;;  %v2685_v2 = vrot.slane %v2674_v63, 3  ;;  %v307_v63 = vstv %s8782_s9  ;;  %s9033_s9 = sld [smem:[#allocation6 + $0x53]] }
 0x2c8   : > { %2624 = vrot.lane.b32.xlu1 %v2617_v49, %s7351_s28  ;;  %2622 = vrot.lane.b32.xlu0 %v2615_v16, %s7351_s28  ;;  %v2676_v49 = vmul.f32 %v2671_v3, %v8470_v11  ;;  %v2709_v16 = vstv %s6999_s8  ;;  %v308_v6 = vmul.f32 %v307_v63, %v7537_v28  ;;  %s9003_s8 = sld [smem:[#allocation6 + $0x52]] }
 0x2c9   : > { %v2711_v3 = vmul.f32 %v2709_v16, %v8350_v22  ;;  %v2713_v23 = vmul.f32 %v2709_v16, %v8376_v35 }
 0x2ca   : > { %v8770_v27 = vpop.permute.xlu1 %2055  ;;  %v8772_v42 = vpop.permute.xlu0 %2053  ;;  %v2690_v18 = vrot.slane %v2676_v49, 3 }
 0x2cb   : > { %12836 = vst [vmem:[#allocation176_spill] sm:$0xff] %v8770_v27  ;;  %12837 = vst [vmem:[#allocation177_spill] sm:$0xff] %v8772_v42  ;;  %v2687_v42 = vrot.slane %v2673_v25, 3  ;;  %v2688_v27 = vrot.slane %v2675_v38, 3  ;;  %v2710_v38 = vmul.f32 %v2709_v16, %v8347_v30  ;;  %v2725_v49 = vrot.slane %v2711_v3, 3 }
 0x2cc   : > { %2658 = vrot.lane.b32.xlu1 %v2651_v54, %s7352_s30  ;;  %2656 = vrot.lane.b32.xlu0 %v2648_v41, %s7352_s30  ;;  %v2684_v54 = vrot.slane %v2672_v55, 3  ;;  %v2692_v41 = vrot.slane %v2677_v46, 3  ;;  %v2712_v55 = vmul.f32 %v2709_v16, %v8371_v0 }
 0x2cd   : > { %v2689_v1 = vsel %vm962_vm4, %v2687_v42, %v2688_v27  ;;  %v2691_v42 = vsel %vm962_vm4, %v2685_v2, %v2690_v18 }
 0x2ce   : > { %v8785_v17 = vpop.permute.xlu1 %2075  ;;  %v8787_v40 = vpop.permute.xlu0 %2073  ;;  %v2686_v25 = vsel %vm962_vm4, %v2684_v54, %v2685_v2  ;;  %v2693_v46 = vsel %vm962_vm4, %v2688_v27, %v2692_v41  ;;  %v2726_v54 = vrot.slane %v2713_v23, 3  ;;  %v305_v27 = vstv %s8794_s26  ;;  %s9097_s26 = sld [smem:[#allocation6 + $0x15]] }
 0x2cf   : > { %12838 = vst [vmem:[#allocation178_spill] sm:$0xff] %v8785_v17  ;;  %12839 = vst [vmem:[#allocation179_spill] sm:$0xff] %v8787_v40  ;;  %v2747_v17 = vstv %s7000_s23  ;;  %v309_v41 = vmul.f32 %v307_v63, %v7557_v37  ;;  %v310_v63 = vadd.f32 %v308_v6, %v305_v27  ;;  %s9081_s23 = sld [smem:[#allocation6 + $0x55]] }
 0x2d0   : > { %2662 = vrot.lane.b32.xlu1 %v2655_v45, %s7352_s30  ;;  %2660 = vrot.lane.b32.xlu0 %v2653_v29, %s7352_s30  ;;  %v2727_v3 = vsel %vm962_vm4, %v2725_v49, %v2726_v54 }
 0x2d1   : > { %v311_v49 = vadd.f32 %v309_v41, %v305_v27  ;;  %v2752_v41 = vmul.f32 %v2747_v17, %v8470_v11 }
 0x2d2   : > { %v8796_v40 = vpop.permute.xlu1 %2079  ;;  %v8798_v5 = vpop.permute.xlu0 %2077 }
 0x2d3   : > { %12840 = vst [vmem:[#allocation180_spill] sm:$0xff] %v8796_v40  ;;  %12841 = vst [vmem:[#allocation181_spill] sm:$0xff] %v8798_v5  ;;  %v2715_v5 = vmul.f32 %v2709_v16, %v8455_v21  ;;  %v2722_v40 = vrot.slane %v2710_v38, 3  ;;  %v2751_v38 = vmul.f32 %v2747_v17, %v8376_v35 }
 0x2d4   : > { %2696 = vrot.lane.b32.xlu1 %v2689_v1, %s7353_s17  ;;  %2694 = vrot.lane.b32.xlu0 %v2686_v25, %s7353_s17  ;;  %v2723_v1 = vrot.slane %v2712_v55, 3  ;;  %v2714_v25 = vmul.f32 %v2709_v16, %v8470_v11  ;;  %v2749_v16 = vmul.f32 %v2747_v17, %v8350_v22 }
 0x2d5   : > { %v2730_v23 = vrot.slane %v2715_v5, 3  ;;  %v331_v5 = vsel %vm330_vm7, %v7746_v51, %v7744_v50 }
 0x2d6   : > { %v8812_v45 = vpop.permute.xlu1 %2130  ;;  %v8814_v29 = vpop.permute.xlu0 %2128  ;;  %v2724_v55 = vsel %vm962_vm4, %v2722_v40, %v2723_v1  ;;  %v332_v40 = vsel %vm330_vm7, %v7756_v62, %v7754_v61  ;;  %v335_v61 = vadd.f32 %v331_v5, %v310_v63  ;;  %v2766_v63 = vrot.slane %v2752_v41, 3 }
 0x2d7   : > { %12842 = vst [vmem:[#allocation182_spill] sm:$0xff] %v8812_v45  ;;  %12843 = vst [vmem:[#allocation183_spill] sm:$0xff] %v8814_v29  ;;  %v2750_v29 = vmul.f32 %v2747_v17, %v8371_v0  ;;  %v2731_v6 = vsel %vm962_vm4, %v2726_v54, %v2730_v23  ;;  %v2763_v45 = vrot.slane %v2749_v16, 3  ;;  %v336_v62 = vadd.f32 %v332_v40, %v311_v49 }
 0x2d8   : > { %2700 = vrot.lane.b32.xlu1 %v2693_v46, %s7353_s17  ;;  %2698 = vrot.lane.b32.xlu0 %v2691_v42, %s7353_s17  ;;  %v2728_v46 = vrot.slane %v2714_v25, 3  ;;  %v2748_v42 = vmul.f32 %v2747_v17, %v8347_v30  ;;  %v2785_v25 = vstv %s8810_s7  ;;  %v356_v54 = vsel %vm355_vm8, %v7768_v10, %v7766_v9  ;;  %s9116_s7 = sld [smem:[#allocation6 + $0x56]] }
 0x2d9   : > { %v2761_v27 = vrot.slane %v2750_v29, 3  ;;  %v2787_v23 = vmul.f32 %v2785_v25, %v8350_v22  ;;  %v2786_v9 = vmul.f32 %v2785_v25, %v8347_v30  ;;  %v2788_v10 = vmul.f32 %v2785_v25, %v8371_v0 }
 0x2da   : > { %v8824_v2 = vpop.permute.xlu1 %2134  ;;  %v8826_v18 = vpop.permute.xlu0 %2132  ;;  %v2729_v50 = vsel %vm962_vm4, %v2723_v1, %v2728_v46  ;;  %v2760_v51 = vrot.slane %v2748_v42, 3  ;;  %v357_v1 = vsel %vm355_vm8, %v7778_v20, %v7776_v19  ;;  %v2789_v46 = vmul.f32 %v2785_v25, %v8376_v35 }
 0x2db   : > { %12844 = vst [vmem:[#allocation184_spill] sm:$0xff] %v8824_v2  ;;  %12845 = vst [vmem:[#allocation185_spill] sm:$0xff] %v8826_v18  ;;  %v360_v5 = vadd.f32 %v356_v54, %v335_v61  ;;  %v361_v19 = vadd.f32 %v357_v1, %v336_v62  ;;  %v381_v20 = vsel %vm380_vm9, %v7790_v34, %v7788_v33  ;;  %v2801_v49 = vrot.slane %v2787_v23, 3 }
 0x2dc   : > { %2734 = vrot.lane.b32.xlu1 %v2727_v3, %s7354_s19  ;;  %2732 = vrot.lane.b32.xlu0 %v2724_v55, %s7354_s19  ;;  %v2764_v3 = vrot.slane %v2751_v38, 3  ;;  %v2753_v55 = vmul.f32 %v2747_v17, %v8455_v21  ;;  %v2762_v42 = vsel %vm962_vm4, %v2760_v51, %v2761_v27  ;;  %v2790_v51 = vmul.f32 %v2785_v25, %v8470_v11 }
 0x2dd   : > { %v2840_v41 = vstv %s8849_s4  ;;  %v2767_v61 = vsel %vm962_vm4, %v2761_v27, %v2766_v63  ;;  %v2802_v62 = vrot.slane %v2789_v46, 3  ;;  %v2798_v33 = vrot.slane %v2786_v9, 3  ;;  %s9155_s4 = sld [smem:[#allocation6 + $0x57]] }
 0x2de   : > { %v8843_v18 = vpop.permute.xlu1 %2168  ;;  %v8845_v2 = vpop.permute.xlu0 %2166  ;;  %v2765_v16 = vsel %vm962_vm4, %v2763_v45, %v2764_v3  ;;  %v2768_v38 = vrot.slane %v2753_v55, 3  ;;  %v382_v45 = vsel %vm380_vm9, %v7800_v48, %v7798_v47  ;;  %v2799_v34 = vrot.slane %v2788_v10, 3 }
 0x2df   : > { %v385_v47 = vadd.f32 %v381_v20, %v360_v5  ;;  %v386_v48 = vadd.f32 %v382_v45, %v361_v19  ;;  %v407_v27 = vsel %vm405_vm10, %v7822_v13, %v7820_v12  ;;  %v2803_v46 = vsel %vm962_vm4, %v2801_v49, %v2802_v62 }
 0x2e0   : > { %2738 = vrot.lane.b32.xlu1 %v2731_v6, %s7354_s19  ;;  %2736 = vrot.lane.b32.xlu0 %v2729_v50, %s7354_s19  ;;  %v2769_v55 = vsel %vm962_vm4, %v2764_v3, %v2768_v38  ;;  %v2791_v50 = vmul.f32 %v2785_v25, %v8455_v21  ;;  %v406_v25 = vsel %vm405_vm10, %v7812_v60, %v7810_v59  ;;  %v463_v9 = vstv %s8871_s11  ;;  %s9202_s11 = sld [smem:[#allocation6 + $0x58]] }
 0x2e1   : > { %v2842_v3 = vmul.f32 %v2840_v41, %v8350_v22  ;;  %v2844_v38 = vmul.f32 %v2840_v41, %v8376_v35  ;;  %v2841_v59 = vmul.f32 %v2840_v41, %v8347_v30  ;;  %v2843_v60 = vmul.f32 %v2840_v41, %v8371_v0 }
 0x2e2   : > { %v8862_v29 = vpop.permute.xlu1 %2172  ;;  %v8864_v17 = vpop.permute.xlu0 %2170  ;;  %v2806_v1 = vrot.slane %v2791_v50, 3  ;;  %v410_v63 = vadd.f32 %v406_v25, %v385_v47  ;;  %v411_v12 = vadd.f32 %v407_v27, %v386_v48  ;;  %v431_v13 = vsel %vm430_vm11, %v7834_v26, %v7832_v24 }
 0x2e3   : > { %v432_v10 = vsel %vm430_vm11, %v7844_v44, %v7842_v43  ;;  %v2856_v5 = vrot.slane %v2842_v3, 4  ;;  %v2846_v50 = vmul.f32 %v2840_v41, %v8455_v21  ;;  %v2845_v24 = vmul.f32 %v2840_v41, %v8470_v11 }
 0x2e4   : > { %2772 = vrot.lane.b32.xlu1 %v2765_v16, %s7355_s27  ;;  %2770 = vrot.lane.b32.xlu0 %v2762_v42, %s7355_s27  ;;  %v2804_v16 = vrot.slane %v2790_v51, 3  ;;  %v2800_v42 = vsel %vm962_vm4, %v2798_v33, %v2799_v34  ;;  %v2807_v45 = vsel %vm962_vm4, %v2802_v62, %v2806_v1  ;;  %v2853_v51 = vrot.slane %v2841_v59, 4 }
 0x2e5   : > { %v2878_v26 = vstv %s8890_s10  ;;  %v464_v43 = vmul.f32 %v463_v9, %v7537_v28  ;;  %v465_v44 = vmul.f32 %v463_v9, %v7557_v37  ;;  %v466_v33 = vmul.f32 %v463_v9, %v7608_v4  ;;  %s9230_s10 = sld [smem:[#allocation6 + $0x59]] }
 0x2e6   : > { %v8881_v40 = vpop.permute.xlu1 %2206  ;;  %v8883_v6 = vpop.permute.xlu0 %2204  ;;  %v2805_v49 = vsel %vm962_vm4, %v2799_v34, %v2804_v16  ;;  %v435_v62 = vadd.f32 %v431_v13, %v410_v63  ;;  %v436_v34 = vadd.f32 %v432_v10, %v411_v12  ;;  %v456_v47 = vsel %vm455_vm12, %v7856_v58, %v7854_v57 }
 0x2e7   : > { %v457_v41 = vsel %vm455_vm12, %v7866_v15, %v7864_v14  ;;  %v2861_v27 = vrot.slane %v2846_v50, 4  ;;  %v2880_v1 = vmul.f32 %v2878_v26, %v8350_v22  ;;  %v2882_v16 = vmul.f32 %v2878_v26, %v8376_v35 }
 0x2e8   : > { %2776 = vrot.lane.b32.xlu1 %v2769_v55, %s7355_s27  ;;  %2774 = vrot.lane.b32.xlu0 %v2767_v61, %s7355_s27  ;;  %v2857_v55 = vrot.slane %v2844_v38, 4  ;;  %v2854_v61 = vrot.slane %v2843_v60, 4  ;;  %v2879_v57 = vmul.f32 %v2878_v26, %v8347_v30  ;;  %v2881_v58 = vmul.f32 %v2878_v26, %v8371_v0 }
 0x2e9   : > { %v474_v14 = vrot.slane %v466_v33, 1  ;;  %v471_v15 = vrot.slane %v464_v43, 1  ;;  %v460_v59 = vadd.f32 %v456_v47, %v435_v62  ;;  %v461_v60 = vadd.f32 %v457_v41, %v436_v34 }
 0x2ea   : > { %v8901_v54 = vpop.permute.xlu1 %2210  ;;  %v8903_v23 = vpop.permute.xlu0 %2208  ;;  %v2858_v3 = vsel %vm1208_vm5, %v2856_v5, %v2857_v55  ;;  %v2855_v38 = vsel %vm1208_vm5, %v2853_v51, %v2854_v61  ;;  %v2884_v63 = vmul.f32 %v2878_v26, %v8455_v21  ;;  %v2862_v13 = vsel %vm1208_vm5, %v2857_v55, %v2861_v27 }
 0x2eb   : > { %v2894_v10 = vrot.slane %v2880_v1, 4  ;;  %v2895_v5 = vrot.slane %v2882_v16, 4  ;;  %v2891_v50 = vrot.slane %v2879_v57, 4  ;;  %v2892_v51 = vrot.slane %v2881_v58, 4 }
 0x2ec   : > { %2810 = vrot.lane.b32.xlu1 %v2803_v46, %s7356_s6  ;;  %2808 = vrot.lane.b32.xlu0 %v2800_v42, %s7356_s6  ;;  %v2859_v46 = vrot.slane %v2845_v24, 4  ;;  %v472_v42 = vrot.slane %v465_v44, 1  ;;  %v2916_v24 = vstv %s8928_s20  ;;  %v513_v62 = vsel %vm330_vm7, %v7888_v53, %v7886_v52  ;;  %s9253_s20 = sld [smem:[#allocation6 + $0x1c]] }
 0x2ed   : > { %v2896_v41 = vsel %vm1208_vm5, %v2894_v10, %v2895_v5  ;;  %v2918_v27 = vmul.f32 %v2916_v24, %v8350_v22  ;;  %v2893_v1 = vsel %vm1208_vm5, %v2891_v50, %v2892_v51  ;;  %v2920_v16 = vmul.f32 %v2916_v24, %v8376_v35  ;;  %v12846_v10 = vld [vmem:[#allocation18_spill] sm:$0xff] }
 0x2ee   : > { %v8919_v19 = vpop.permute.xlu1 %2244  ;;  %v8921_v20 = vpop.permute.xlu0 %2242  ;;  %v473_v43 = vsel %vm470_vm2, %v471_v15, %v472_v42  ;;  %v475_v44 = vsel %vm470_vm2, %v472_v42, %v474_v14  ;;  %v550_v53 = vsel %vm355_vm8, %v7900_v8, %v7898_v7  ;;  %v2954_v8 = vstv %s8962_s22  ;;  %s9272_s22 = sld [smem:[#allocation6 + $0x5a]] }
 0x2ef   : > { %v478_v55 = vadd.f32 %v473_v43, %v460_v59  ;;  %v479_v33 = vadd.f32 %v475_v44, %v461_v60  ;;  %v2932_v15 = vrot.slane %v2918_v27, 4  ;;  %v2922_v59 = vmul.f32 %v2916_v24, %v8455_v21 }
 0x2f0   : > { %2814 = vrot.lane.b32.xlu1 %v2807_v45, %s7356_s6  ;;  %2812 = vrot.lane.b32.xlu0 %v2805_v49, %s7356_s6  ;;  %v2883_v45 = vmul.f32 %v2878_v26, %v8470_v11  ;;  %v2860_v49 = vsel %vm1208_vm5, %v2854_v61, %v2859_v46  ;;  %v512_v26 = vsel %vm330_vm7, %v7878_v32, %v7876_v31  ;;  %v2899_v61 = vrot.slane %v2884_v63, 4 }
 0x2f1   : > { %v2917_v31 = vmul.f32 %v2916_v24, %v8347_v30  ;;  %v2919_v32 = vmul.f32 %v2916_v24, %v8371_v0  ;;  %v517_v52 = vadd.f32 %v513_v62, %v479_v33  ;;  %v551_v46 = vsel %vm355_vm8, %v7910_v39, %v7908_v36 }
 0x2f2   : > { %v8941_v48 = vpop.permute.xlu1 %2248  ;;  %v8943_v25 = vpop.permute.xlu0 %2246  ;;  %v2900_v57 = vsel %vm1208_vm5, %v2895_v5, %v2899_v61  ;;  %v2921_v60 = vmul.f32 %v2916_v24, %v8470_v11  ;;  %v2933_v63 = vrot.slane %v2920_v16, 4  ;;  %v588_v5 = vsel %vm380_vm9, %v12846_v10, %v7920_v56  ;;  %v12850_v16 = vld [vmem:[#allocation22_spill] sm:$0xff] }
 0x2f3   : > { %v2930_v7 = vrot.slane %v2919_v32, 4  ;;  %v555_v39 = vadd.f32 %v551_v46, %v517_v52  ;;  %v2937_v43 = vrot.slane %v2922_v59, 4  ;;  %v2958_v33 = vmul.f32 %v2954_v8, %v8376_v35  ;;  %v12851_v32 = vld [vmem:[#allocation23_spill] sm:$0xff] }
 0x2f4   : > { %2865 = vrot.lane.b32.xlu1 %v2858_v3, %s7351_s28  ;;  %2863 = vrot.lane.b32.xlu0 %v2855_v38, %s7351_s28  ;;  %v2897_v3 = vrot.slane %v2883_v45, 4  ;;  %v516_v38 = vadd.f32 %v512_v26, %v478_v55  ;;  %v12847_v45 = vld [vmem:[#allocation19_spill] sm:$0xff]  ;;  %v2935_v44 = vrot.slane %v2921_v60, 4  ;;  %v2956_v55 = vmul.f32 %v2954_v8, %v8350_v22 }
 0x2f5   : > { %v2934_v26 = vsel %vm1208_vm5, %v2932_v15, %v2933_v63  ;;  %v2955_v56 = vmul.f32 %v2954_v8, %v8347_v30  ;;  %v2957_v62 = vmul.f32 %v2954_v8, %v8371_v0  ;;  %v2971_v60 = vrot.slane %v2958_v33, 4 }
 0x2f6   : > { %v8954_v9 = vpop.permute.xlu1 %2282  ;;  %v8956_v12 = vpop.permute.xlu0 %2280  ;;  %v2898_v14 = vsel %vm1208_vm5, %v2892_v51, %v2897_v3  ;;  %v554_v36 = vadd.f32 %v550_v53, %v516_v38  ;;  %v709_v3 = vstv %s8984_s29  ;;  %v12852_v38 = vld [vmem:[#allocation24_spill] sm:$0xff]  ;;  %v2960_v53 = vmul.f32 %v2954_v8, %v8455_v21  ;;  %s9301_s29 = sld [smem:[#allocation6 + $0x5c]] }
 0x2f7   : > { %v627_v52 = vsel %vm405_vm10, %v12852_v38, %v12851_v32  ;;  %v2936_v15 = vsel %vm1208_vm5, %v2930_v7, %v2935_v44  ;;  %v2970_v59 = vrot.slane %v2956_v55, 4  ;;  %v2992_v10 = vstv %s9003_s8  ;;  %s9336_s8 = sld [smem:[#allocation6 + $0x5d]] }
 0x2f8   : > { %2869 = vrot.lane.b32.xlu1 %v2862_v13, %s7351_s28  ;;  %2867 = vrot.lane.b32.xlu0 %v2860_v49, %s7351_s28  ;;  %v2929_v13 = vrot.slane %v2917_v31, 4  ;;  %v12848_v49 = vld [vmem:[#allocation20_spill] sm:$0xff]  ;;  %v710_v32 = vmul.f32 %v709_v3, %v7537_v28 }
 0x2f9   : > { %v589_v50 = vsel %vm380_vm9, %v12848_v49, %v12847_v45  ;;  %v2972_v33 = vsel %vm1208_vm5, %v2970_v59, %v2971_v60 }
 0x2fa   : > { %v8974_v34 = vpop.permute.xlu1 %2286  ;;  %v8976_v47 = vpop.permute.xlu0 %2284  ;;  %v2931_v61 = vsel %vm1208_vm5, %v2929_v13, %v2930_v7  ;;  %v593_v27 = vadd.f32 %v589_v50, %v555_v39  ;;  %v2967_v13 = vrot.slane %v2955_v56, 4  ;;  %v2959_v39 = vmul.f32 %v2954_v8, %v8470_v11  ;;  %v12853_v50 = vld [vmem:[#allocation25_spill] sm:$0xff]  ;;  %v12855_v7 = vld [vmem:[#allocation27_spill] sm:$0xff] }
 0x2fb   : > { %v2994_v56 = vmul.f32 %v2992_v10, %v8350_v22 }
 0x2fc   : > { %2903 = vrot.lane.b32.xlu1 %v2896_v41, %s7352_s30  ;;  %2901 = vrot.lane.b32.xlu0 %v2893_v1, %s7352_s30  ;;  %v592_v41 = vadd.f32 %v588_v5, %v554_v36  ;;  %v12849_v1 = vld [vmem:[#allocation21_spill] sm:$0xff]  ;;  %v2968_v36 = vrot.slane %v2957_v62, 4  ;;  %v711_v5 = vmul.f32 %v709_v3, %v7557_v37  ;;  %v631_v49 = vadd.f32 %v627_v52, %v593_v27 }
 0x2fd   : > { %v626_v31 = vsel %vm405_vm10, %v12850_v16, %v12849_v1  ;;  %v2996_v62 = vmul.f32 %v2992_v10, %v8376_v35  ;;  %v2973_v27 = vrot.slane %v2959_v39, 4  ;;  %v2993_v1 = vmul.f32 %v2992_v10, %v8347_v30  ;;  %v12862_v39 = vld [vmem:[#allocation32_spill] sm:$0xff] }
 0x2fe   : > { %v8995_v58 = vpop.permute.xlu1 %2320  ;;  %v8997_v42 = vpop.permute.xlu0 %2318  ;;  %v630_v45 = vadd.f32 %v626_v31, %v592_v41  ;;  %v2969_v41 = vsel %vm1208_vm5, %v2967_v13, %v2968_v36  ;;  %v2995_v16 = vmul.f32 %v2992_v10, %v8371_v0  ;;  %v718_v38 = vrot.slane %v711_v5, 2  ;;  %v12861_v13 = vld [vmem:[#allocation31_spill] sm:$0xff] }
 0x2ff   : > { %v712_v52 = vmul.f32 %v709_v3, %v7608_v4  ;;  %v3008_v5 = vrot.slane %v2994_v56, 4  ;;  %v3009_v3 = vrot.slane %v2996_v62, 4 }
 0x300   : > { %2907 = vrot.lane.b32.xlu1 %v2900_v57, %s7352_s30  ;;  %2905 = vrot.lane.b32.xlu0 %v2898_v14, %s7352_s30  ;;  %v2938_v14 = vsel %vm1208_vm5, %v2933_v63, %v2937_v43  ;;  %v12856_v43 = vld [vmem:[#allocation28_spill] sm:$0xff] }
 0x301   : > { %v665_v44 = vsel %vm430_vm11, %v12856_v43, %v12855_v7  ;;  %v2998_v7 = vmul.f32 %v2992_v10, %v8455_v21  ;;  %v2997_v43 = vmul.f32 %v2992_v10, %v8470_v11 }
 0x302   : > { %v9013_v51 = vpop.permute.xlu1 %2324  ;;  %v9015_v24 = vpop.permute.xlu0 %2322 }
 0x304   : > { %2941 = vrot.lane.b32.xlu1 %v2934_v26, %s7353_s17  ;;  %2939 = vrot.lane.b32.xlu0 %v2931_v61, %s7353_s17  ;;  %v12854_v26 = vld [vmem:[#allocation26_spill] sm:$0xff]  ;;  %v2975_v61 = vrot.slane %v2960_v53, 4  ;;  %v669_v53 = vadd.f32 %v665_v44, %v631_v49  ;;  %v2974_v44 = vsel %vm1208_vm5, %v2968_v36, %v2973_v27  ;;  %v3010_v36 = vsel %vm1208_vm5, %v3008_v5, %v3009_v3 }
 0x305   : > { %v664_v63 = vsel %vm430_vm11, %v12854_v26, %v12853_v50  ;;  %v703_v50 = vsel %vm455_vm12, %v12862_v39, %v12861_v13  ;;  %v3030_v26 = vstv %s9033_s9  ;;  %v720_v13 = vrot.slane %v712_v52, 2  ;;  %v12867_v5 = vld [vmem:[#allocation34_spill] sm:$0xff]  ;;  %s9348_s9 = sld [smem:[#allocation6 + $0x23]] }
 0x306   : > { %v9035_v46 = vpop.permute.xlu1 %2375  ;;  %v9037_v57 = vpop.permute.xlu0 %2373  ;;  %v668_v31 = vadd.f32 %v664_v63, %v630_v45  ;;  %v2976_v49 = vsel %vm1208_vm5, %v2971_v60, %v2975_v61  ;;  %v707_v56 = vadd.f32 %v703_v50, %v669_v53  ;;  %v3032_v62 = vmul.f32 %v3030_v26, %v8350_v22  ;;  %v12866_v50 = vld [vmem:[#allocation33_spill] sm:$0xff] }
 0x307   : > { %v3013_v61 = vrot.slane %v2998_v7, 4  ;;  %v3011_v27 = vrot.slane %v2997_v43, 4  ;;  %v721_v53 = vsel %vm716_vm3, %v718_v38, %v720_v13  ;;  %v758_v7 = vsel %vm330_vm7, %v12867_v5, %v12866_v50  ;;  %v12868_v43 = vld [vmem:[#allocation35_spill] sm:$0xff] }
 0x308   : > { %2945 = vrot.lane.b32.xlu1 %v2938_v14, %s7353_s17  ;;  %2943 = vrot.lane.b32.xlu0 %v2936_v15, %s7353_s17  ;;  %v12859_v14 = vld [vmem:[#allocation29_spill] sm:$0xff]  ;;  %v12860_v15 = vld [vmem:[#allocation30_spill] sm:$0xff]  ;;  %v3085_v50 = vstv %s9081_s23  ;;  %s9385_s23 = sld [smem:[#allocation6 + $0x5e]] }
 0x309   : > { %v702_v59 = vsel %vm455_vm12, %v12860_v15, %v12859_v14  ;;  %v717_v14 = vrot.slane %v710_v32, 2  ;;  %v3033_v32 = vmul.f32 %v3030_v26, %v8371_v0 }
 0x30a   : > { %v9052_v55 = vpop.permute.xlu1 %2379  ;;  %v9054_v8 = vpop.permute.xlu0 %2377  ;;  %v706_v15 = vadd.f32 %v702_v59, %v668_v31  ;;  %v3031_v31 = vmul.f32 %v3030_v26, %v8347_v30  ;;  %v725_v59 = vadd.f32 %v721_v53, %v707_v56  ;;  %v3035_v56 = vmul.f32 %v3030_v26, %v8470_v11 }
 0x30b   : > { %12857 = vst [vmem:[#allocation18_spill] sm:$0xff] %v9052_v55  ;;  %12858 = vst [vmem:[#allocation19_spill] sm:$0xff] %v9054_v8  ;;  %v719_v10 = vsel %vm716_vm3, %v717_v14, %v718_v38  ;;  %v3044_v53 = vrot.slane %v3033_v32, 4 }
 0x30c   : > { %2979 = vrot.lane.b32.xlu1 %v2972_v33, %s7354_s19  ;;  %2977 = vrot.lane.b32.xlu0 %v2969_v41, %s7354_s19  ;;  %v3005_v33 = vrot.slane %v2993_v1, 4  ;;  %v3006_v41 = vrot.slane %v2995_v16, 4  ;;  %v3034_v16 = vmul.f32 %v3030_v26, %v8376_v35  ;;  %v724_v52 = vadd.f32 %v719_v10, %v706_v15 }
 0x30d   : > { %v3014_v15 = vsel %vm1208_vm5, %v3009_v3, %v3013_v61  ;;  %v3036_v10 = vmul.f32 %v3030_v26, %v8455_v21  ;;  %v12872_v3 = vld [vmem:[#allocation37_spill] sm:$0xff]  ;;  %v12873_v61 = vld [vmem:[#allocation38_spill] sm:$0xff] }
 0x30e   : > { %v9073_v45 = vpop.permute.xlu1 %2413  ;;  %v9075_v63 = vpop.permute.xlu0 %2411  ;;  %v3007_v1 = vsel %vm1208_vm5, %v3005_v33, %v3006_v41  ;;  %v3046_v33 = vrot.slane %v3032_v62, 4  ;;  %v3012_v13 = vsel %vm1208_vm5, %v3006_v41, %v3011_v27  ;;  %v762_v62 = vadd.f32 %v758_v7, %v724_v52  ;;  %v12874_v27 = vld [vmem:[#allocation39_spill] sm:$0xff] }
 0x30f   : > { %12863 = vst [vmem:[#allocation20_spill] sm:$0xff] %v9075_v63  ;;  %v796_v41 = vsel %vm355_vm8, %v12873_v61, %v12872_v3  ;;  %v3051_v32 = vrot.slane %v3036_v10, 4  ;;  %v3089_v52 = vmul.f32 %v3085_v50, %v8376_v35  ;;  %v12878_v10 = vld [vmem:[#allocation41_spill] sm:$0xff] }
 0x310   : > { %2983 = vrot.lane.b32.xlu1 %v2976_v49, %s7354_s19  ;;  %2981 = vrot.lane.b32.xlu0 %v2974_v44, %s7354_s19  ;;  %v12869_v49 = vld [vmem:[#allocation36_spill] sm:$0xff]  ;;  %v800_v3 = vadd.f32 %v796_v41, %v762_v62  ;;  %v3091_v62 = vmul.f32 %v3085_v50, %v8455_v21 }
 0x311   : > { %v759_v44 = vsel %vm330_vm7, %v12869_v49, %v12868_v43  ;;  %v12875_v43 = vld [vmem:[#allocation40_spill] sm:$0xff]  ;;  %v3049_v49 = vrot.slane %v3035_v56, 4  ;;  %v12879_v56 = vld [vmem:[#allocation42_spill] sm:$0xff] }
 0x312   : > { %v9087_v39 = vpop.permute.xlu1 %2417  ;;  %v9089_v60 = vpop.permute.xlu0 %2415  ;;  %v763_v5 = vadd.f32 %v759_v44, %v725_v59  ;;  %v797_v26 = vsel %vm355_vm8, %v12875_v43, %v12874_v27  ;;  %v3086_v44 = vmul.f32 %v3085_v50, %v8347_v30  ;;  %v955_v27 = vstv %s9097_s26  ;;  %s9408_s26 = sld [smem:[#allocation6 + $0x2a]] }
 0x313   : > { %12864 = vst [vmem:[#allocation21_spill] sm:$0xff] %v9087_v39  ;;  %12865 = vst [vmem:[#allocation22_spill] sm:$0xff] %v9089_v60  ;;  %v834_v43 = vsel %vm380_vm9, %v12879_v56, %v12878_v10  ;;  %v12883_v60 = vld [vmem:[#allocation46_spill] sm:$0xff]  ;;  %v3102_v10 = vrot.slane %v3089_v52, 5 }
 0x314   : > { %3017 = vrot.lane.b32.xlu1 %v3010_v36, %s7355_s27  ;;  %3015 = vrot.lane.b32.xlu0 %v3007_v1, %s7355_s27  ;;  %v3047_v36 = vrot.slane %v3034_v16, 4  ;;  %v3043_v1 = vrot.slane %v3031_v31, 4  ;;  %v801_v61 = vadd.f32 %v797_v26, %v763_v5  ;;  %v3098_v56 = vrot.slane %v3086_v44, 5  ;;  %v12889_v52 = vld [vmem:[#allocation50_spill] sm:$0xff] }
 0x316   : > { %v9107_v14 = vpop.permute.xlu1 %2451  ;;  %v9109_v38 = vpop.permute.xlu0 %2449  ;;  %v3048_v59 = vsel %vm1208_vm5, %v3046_v33, %v3047_v36  ;;  %v3045_v7 = vsel %vm1208_vm5, %v3043_v1, %v3044_v53  ;;  %v12881_v33 = vld [vmem:[#allocation44_spill] sm:$0xff]  ;;  %v3052_v26 = vsel %vm1208_vm5, %v3047_v36, %v3051_v32 }
 0x317   : > { %12870 = vst [vmem:[#allocation23_spill] sm:$0xff] %v9107_v14  ;;  %12871 = vst [vmem:[#allocation24_spill] sm:$0xff] %v9109_v38  ;;  %v3123_v38 = vstv %s9116_s7  ;;  %v12887_v32 = vld [vmem:[#allocation48_spill] sm:$0xff]  ;;  %s9427_s7 = sld [smem:[#allocation6 + $0x5f]] }
 0x318   : > { %3021 = vrot.lane.b32.xlu1 %v3014_v15, %s7355_s27  ;;  %3019 = vrot.lane.b32.xlu0 %v3012_v13, %s7355_s27  ;;  %v3087_v15 = vmul.f32 %v3085_v50, %v8350_v22  ;;  %v3088_v13 = vmul.f32 %v3085_v50, %v8371_v0  ;;  %v12897_v14 = vld [vmem:[#allocation56_spill] sm:$0xff] }
 0x31a   : > { %v9126_v16 = vpop.permute.xlu1 %2455  ;;  %v9128_v31 = vpop.permute.xlu0 %2453 }
 0x31b   : > { %12876 = vst [vmem:[#allocation25_spill] sm:$0xff] %v9126_v16  ;;  %12877 = vst [vmem:[#allocation26_spill] sm:$0xff] %v9128_v31  ;;  %v12880_v31 = vld [vmem:[#allocation43_spill] sm:$0xff]  ;;  %v12882_v16 = vld [vmem:[#allocation45_spill] sm:$0xff] }
 0x31c   : > { %3055 = vrot.lane.b32.xlu1 %v3048_v59, %s7356_s6  ;;  %3053 = vrot.lane.b32.xlu0 %v3045_v7, %s7356_s6  ;;  %v835_v1 = vsel %vm380_vm9, %v12881_v33, %v12880_v31  ;;  %v872_v39 = vsel %vm405_vm10, %v12883_v60, %v12882_v16  ;;  %v3050_v59 = vsel %vm1208_vm5, %v3044_v53, %v3049_v49  ;;  %v3101_v7 = vrot.slane %v3087_v15, 5  ;;  %v12886_v53 = vld [vmem:[#allocation47_spill] sm:$0xff]  ;;  %v12888_v15 = vld [vmem:[#allocation49_spill] sm:$0xff] }
 0x31d   : > { %v3099_v31 = vrot.slane %v3088_v13, 5  ;;  %v3090_v33 = vmul.f32 %v3085_v50, %v8470_v11  ;;  %v838_v60 = vadd.f32 %v834_v43, %v800_v3  ;;  %v956_v16 = vmul.f32 %v955_v27, %v7537_v28 }
 0x31e   : > { %v9149_v5 = vpop.permute.xlu1 %2489  ;;  %v9151_v41 = vpop.permute.xlu0 %2487  ;;  %v839_v36 = vadd.f32 %v835_v1, %v801_v61  ;;  %v873_v49 = vsel %vm405_vm10, %v12887_v32, %v12886_v53  ;;  %v910_v44 = vsel %vm430_vm11, %v12889_v52, %v12888_v15  ;;  %v3106_v50 = vrot.slane %v3091_v62, 5  ;;  %v12893_v15 = vld [vmem:[#allocation52_spill] sm:$0xff] }
 0x31f   : > { %12884 = vst [vmem:[#allocation27_spill] sm:$0xff] %v9149_v5  ;;  %12885 = vst [vmem:[#allocation28_spill] sm:$0xff] %v9151_v41  ;;  %v957_v5 = vmul.f32 %v955_v27, %v7557_v37  ;;  %v876_v13 = vadd.f32 %v872_v39, %v838_v60  ;;  %v3103_v41 = vsel %vm255_vm1, %v3101_v7, %v3102_v10  ;;  %v12892_v7 = vld [vmem:[#allocation51_spill] sm:$0xff] }
 0x320   : > { %3059 = vrot.lane.b32.xlu1 %v3052_v26, %s7356_s6  ;;  %3057 = vrot.lane.b32.xlu0 %v3050_v59, %s7356_s6  ;;  %v3125_v26 = vmul.f32 %v3123_v38, %v8350_v22  ;;  %v3127_v61 = vmul.f32 %v3123_v38, %v8376_v35  ;;  %v3100_v1 = vsel %vm255_vm1, %v3098_v56, %v3099_v31  ;;  %v3104_v59 = vrot.slane %v3090_v33, 5  ;;  %v12895_v56 = vld [vmem:[#allocation54_spill] sm:$0xff] }
 0x321   : > { %v3124_v53 = vmul.f32 %v3123_v38, %v8347_v30  ;;  %v3126_v32 = vmul.f32 %v3123_v38, %v8371_v0  ;;  %v877_v62 = vadd.f32 %v873_v49, %v839_v36  ;;  %v914_v39 = vadd.f32 %v910_v44, %v876_v13 }
 0x322   : > { %v9169_v3 = vpop.permute.xlu1 %2493  ;;  %v9171_v43 = vpop.permute.xlu0 %2491  ;;  %v958_v60 = vmul.f32 %v955_v27, %v7608_v4  ;;  %v911_v52 = vsel %vm430_vm11, %v12893_v15, %v12892_v7  ;;  %v3107_v36 = vsel %vm255_vm1, %v3102_v10, %v3106_v50  ;;  %v3140_v44 = vrot.slane %v3127_v61, 5 }
 0x323   : > { %12890 = vst [vmem:[#allocation29_spill] sm:$0xff] %v9169_v3  ;;  %12891 = vst [vmem:[#allocation30_spill] sm:$0xff] %v9171_v43  ;;  %v12894_v43 = vld [vmem:[#allocation53_spill] sm:$0xff]  ;;  %v12896_v3 = vld [vmem:[#allocation55_spill] sm:$0xff]  ;;  %v3129_v13 = vmul.f32 %v3123_v38, %v8455_v21  ;;  %v3105_v7 = vsel %vm255_vm1, %v3099_v31, %v3104_v59  ;;  %v3136_v15 = vrot.slane %v3124_v53, 5  ;;  %v3137_v55 = vrot.slane %v3126_v32, 5 }
 0x324   : > { %3110 = vrot.lane.b32.xlu1 %v3103_v41, %s7351_s28  ;;  %3108 = vrot.lane.b32.xlu0 %v3100_v1, %s7351_s28  ;;  %v948_v33 = vsel %vm455_vm12, %v12895_v56, %v12894_v43  ;;  %v949_v8 = vsel %vm455_vm12, %v12897_v14, %v12896_v3  ;;  %v3139_v41 = vrot.slane %v3125_v26, 5  ;;  %v3161_v1 = vstv %s9155_s4  ;;  %s9460_s4 = sld [smem:[#allocation6 + $0x60]] }
 0x325   : > { %v3128_v43 = vmul.f32 %v3123_v38, %v8470_v11  ;;  %v915_v56 = vadd.f32 %v911_v52, %v877_v62  ;;  %v964_v63 = vrot.slane %v957_v5, 3  ;;  %v966_v14 = vrot.slane %v958_v60, 3  ;;  %v12901_v60 = vld [vmem:[#allocation57_spill] sm:$0xff]  ;;  %v12902_v52 = vld [vmem:[#allocation58_spill] sm:$0xff] }
 0x326   : > { %v9192_v49 = vpop.permute.xlu1 %2527  ;;  %v9194_v27 = vpop.permute.xlu0 %2525  ;;  %v963_v10 = vrot.slane %v956_v16, 3  ;;  %v952_v50 = vadd.f32 %v948_v33, %v914_v39  ;;  %v3163_v3 = vmul.f32 %v3161_v1, %v8350_v22  ;;  %v3165_v38 = vmul.f32 %v3161_v1, %v8376_v35 }
 0x327   : > { %12898 = vst [vmem:[#allocation31_spill] sm:$0xff] %v9194_v27  ;;  %v953_v26 = vadd.f32 %v949_v8, %v915_v56  ;;  %v3162_v5 = vmul.f32 %v3161_v1, %v8347_v30  ;;  %v3164_v59 = vmul.f32 %v3161_v1, %v8371_v0  ;;  %v3141_v53 = vsel %vm255_vm1, %v3139_v41, %v3140_v44  ;;  %v13000_v27 = vld [vmem:[#allocation131_spill] sm:$0xff] }
 0x328   : > { %3114 = vrot.lane.b32.xlu1 %v3107_v36, %s7351_s28  ;;  %3112 = vrot.lane.b32.xlu0 %v3105_v7, %s7351_s28  ;;  %v3138_v32 = vsel %vm255_vm1, %v3136_v15, %v3137_v55  ;;  %v3144_v62 = vrot.slane %v3129_v13, 5  ;;  %v3142_v16 = vrot.slane %v3128_v43, 5  ;;  %v965_v39 = vsel %vm962_vm4, %v963_v10, %v964_v63  ;;  %v12903_v36 = vld [vmem:[#allocation59_spill] sm:$0xff]  ;;  %v12904_v7 = vld [vmem:[#allocation60_spill] sm:$0xff] }
 0x329   : > { %v967_v8 = vsel %vm962_vm4, %v964_v63, %v966_v14  ;;  %v1004_v33 = vsel %vm330_vm7, %v12902_v52, %v12901_v60  ;;  %v1005_v41 = vsel %vm330_vm7, %v12904_v7, %v12903_v36  ;;  %v3177_v15 = vrot.slane %v3163_v3, 5 }
 0x32a   : > { %v9205_v61 = vpop.permute.xlu1 %2531  ;;  %v9207_v31 = vpop.permute.xlu0 %2529  ;;  %v3167_v13 = vmul.f32 %v3161_v1, %v8455_v21  ;;  %v3178_v63 = vrot.slane %v3165_v38, 5  ;;  %v3174_v14 = vrot.slane %v3162_v5, 5  ;;  %v3175_v10 = vrot.slane %v3164_v59, 5  ;;  %v12907_v38 = vld [vmem:[#allocation61_spill] sm:$0xff]  ;;  %v12908_v5 = vld [vmem:[#allocation62_spill] sm:$0xff] }
 0x32b   : > { %12899 = vst [vmem:[#allocation32_spill] sm:$0xff] %v9205_v61  ;;  %12900 = vst [vmem:[#allocation33_spill] sm:$0xff] %v9207_v31  ;;  %v971_v60 = vadd.f32 %v967_v8, %v953_v26  ;;  %v3145_v52 = vsel %vm255_vm1, %v3140_v44, %v3144_v62  ;;  %v3143_v36 = vsel %vm255_vm1, %v3137_v55, %v3142_v16  ;;  %v3199_v3 = vstv %s9202_s11  ;;  %v12909_v61 = vld [vmem:[#allocation63_spill] sm:$0xff]  ;;  %s9514_s11 = sld [smem:[#allocation6 + $0x61]] }
 0x32c   : > { %3148 = vrot.lane.b32.xlu1 %v3141_v53, %s7352_s30  ;;  %3146 = vrot.lane.b32.xlu0 %v3138_v32, %s7352_s30  ;;  %v3166_v53 = vmul.f32 %v3161_v1, %v8470_v11  ;;  %v970_v32 = vadd.f32 %v965_v39, %v952_v50  ;;  %v1042_v59 = vsel %vm355_vm8, %v12908_v5, %v12907_v38  ;;  %v3182_v1 = vrot.slane %v3167_v13, 5 }
 0x32d   : > { %v1009_v31 = vadd.f32 %v1005_v41, %v971_v60  ;;  %v3179_v55 = vsel %vm255_vm1, %v3177_v15, %v3178_v63  ;;  %v3176_v62 = vsel %vm255_vm1, %v3174_v14, %v3175_v10  ;;  %v3201_v39 = vmul.f32 %v3199_v3, %v8350_v22  ;;  %v12913_v15 = vld [vmem:[#allocation65_spill] sm:$0xff] }
 0x32e   : > { %v9225_v43 = vpop.permute.xlu1 %2565  ;;  %v9227_v56 = vpop.permute.xlu0 %2563  ;;  %v1008_v7 = vadd.f32 %v1004_v33, %v970_v32  ;;  %v3180_v16 = vrot.slane %v3166_v53, 5  ;;  %v3203_v8 = vmul.f32 %v3199_v3, %v8376_v35  ;;  %v3200_v33 = vmul.f32 %v3199_v3, %v8347_v30  ;;  %v12915_v53 = vld [vmem:[#allocation67_spill] sm:$0xff]  ;;  %v12916_v32 = vld [vmem:[#allocation68_spill] sm:$0xff] }
 0x32f   : > { %12905 = vst [vmem:[#allocation34_spill] sm:$0xff] %v9225_v43  ;;  %12906 = vst [vmem:[#allocation35_spill] sm:$0xff] %v9227_v56  ;;  %v12910_v56 = vld [vmem:[#allocation64_spill] sm:$0xff]  ;;  %v3202_v41 = vmul.f32 %v3199_v3, %v8371_v0  ;;  %v1081_v60 = vsel %vm380_vm9, %v12916_v32, %v12915_v53  ;;  %v3205_v5 = vmul.f32 %v3199_v3, %v8455_v21  ;;  %v12921_v53 = vld [vmem:[#allocation71_spill] sm:$0xff] }
 0x330   : > { %3152 = vrot.lane.b32.xlu1 %v3145_v52, %s7352_s30  ;;  %3150 = vrot.lane.b32.xlu0 %v3143_v36, %s7352_s30  ;;  %v1043_v50 = vsel %vm355_vm8, %v12910_v56, %v12909_v61  ;;  %v1046_v13 = vadd.f32 %v1042_v59, %v1008_v7  ;;  %v12914_v56 = vld [vmem:[#allocation66_spill] sm:$0xff]  ;;  %v3183_v52 = vsel %vm255_vm1, %v3178_v63, %v3182_v1  ;;  %v3237_v59 = vstv %s9230_s10  ;;  %s9598_s10 = sld [smem:[#allocation6 + $0x31]] }
 0x331   : > { %v1047_v61 = vadd.f32 %v1043_v50, %v1009_v31  ;;  %v1080_v14 = vsel %vm380_vm9, %v12914_v56, %v12913_v15  ;;  %v3181_v38 = vsel %vm255_vm1, %v3175_v10, %v3180_v16  ;;  %v3204_v31 = vmul.f32 %v3199_v3, %v8470_v11  ;;  %v12919_v56 = vld [vmem:[#allocation69_spill] sm:$0xff]  ;;  %v12920_v10 = vld [vmem:[#allocation70_spill] sm:$0xff] }
 0x332   : > { %v9243_v26 = vpop.permute.xlu1 %2569  ;;  %v9245_v44 = vpop.permute.xlu0 %2567  ;;  %v3215_v50 = vrot.slane %v3201_v39, 5  ;;  %v3213_v15 = vrot.slane %v3202_v41, 5  ;;  %v1084_v63 = vadd.f32 %v1080_v14, %v1046_v13  ;;  %v1118_v16 = vsel %vm405_vm10, %v12920_v10, %v12919_v56  ;;  %v12922_v39 = vld [vmem:[#allocation72_spill] sm:$0xff]  ;;  %v12964_v43 = vld [vmem:[#allocation102_spill] sm:$0xff] }
 0x333   : > { %12911 = vst [vmem:[#allocation36_spill] sm:$0xff] %v9243_v26  ;;  %12912 = vst [vmem:[#allocation37_spill] sm:$0xff] %v9245_v44  ;;  %v1085_v1 = vadd.f32 %v1081_v60, %v1047_v61  ;;  %v3239_v3 = vmul.f32 %v3237_v59, %v8350_v22  ;;  %v3220_v32 = vrot.slane %v3205_v5, 5  ;;  %v3238_v14 = vmul.f32 %v3237_v59, %v8347_v30  ;;  %v12925_v5 = vld [vmem:[#allocation73_spill] sm:$0xff] }
 0x334   : > { %3186 = vrot.lane.b32.xlu1 %v3179_v55, %s7353_s17  ;;  %3184 = vrot.lane.b32.xlu0 %v3176_v62, %s7353_s17  ;;  %v3216_v55 = vrot.slane %v3203_v8, 5  ;;  %v3212_v62 = vrot.slane %v3200_v33, 5  ;;  %v1119_v8 = vsel %vm405_vm10, %v12922_v39, %v12921_v53  ;;  %v3240_v60 = vmul.f32 %v3237_v59, %v8371_v0 }
 0x335   : > { %v1122_v56 = vadd.f32 %v1118_v16, %v1084_v63  ;;  %v1201_v10 = vstv %s9253_s20  ;;  %v1123_v53 = vadd.f32 %v1119_v8, %v1085_v1  ;;  %v3243_v8 = vmul.f32 %v3237_v59, %v8455_v21  ;;  %s9613_s20 = sld [smem:[#allocation6 + $0x63]] }
 0x336   : > { %v9264_v36 = vpop.permute.xlu1 %2620  ;;  %v9266_v7 = vpop.permute.xlu0 %2618  ;;  %v3217_v13 = vsel %vm255_vm1, %v3215_v50, %v3216_v55  ;;  %v3214_v61 = vsel %vm255_vm1, %v3212_v62, %v3213_v15  ;;  %v12928_v50 = vld [vmem:[#allocation76_spill] sm:$0xff]  ;;  %v3221_v16 = vsel %vm255_vm1, %v3216_v55, %v3220_v32  ;;  %v12931_v32 = vld [vmem:[#allocation77_spill] sm:$0xff] }
 0x337   : > { %12917 = vst [vmem:[#allocation38_spill] sm:$0xff] %v9264_v36  ;;  %12918 = vst [vmem:[#allocation39_spill] sm:$0xff] %v9266_v7  ;;  %v3275_v36 = vstv %s9272_s22  ;;  %s7026_s22 = sld [smem:[#allocation6 + $0x64]] }
 0x338   : > { %3190 = vrot.lane.b32.xlu1 %v3183_v52, %s7353_s17  ;;  %3188 = vrot.lane.b32.xlu0 %v3181_v38, %s7353_s17  ;;  %v3218_v52 = vrot.slane %v3204_v31, 5  ;;  %v3241_v38 = vmul.f32 %v3237_v59, %v8376_v35  ;;  %v12926_v31 = vld [vmem:[#allocation74_spill] sm:$0xff] }
 0x339   : > { %v1156_v39 = vsel %vm430_vm11, %v12926_v31, %v12925_v5  ;;  %v3251_v5 = vrot.slane %v3240_v60, 5  ;;  %v3242_v31 = vmul.f32 %v3237_v59, %v8470_v11  ;;  %v12934_v60 = vld [vmem:[#allocation80_spill] sm:$0xff] }
 0x33a   : > { %v9283_v33 = vpop.permute.xlu1 %2624  ;;  %v9285_v41 = vpop.permute.xlu0 %2622  ;;  %v3254_v1 = vrot.slane %v3241_v38, 5  ;;  %v1160_v55 = vadd.f32 %v1156_v39, %v1122_v56  ;;  %v3279_v56 = vmul.f32 %v3275_v36, %v8376_v35 }
 0x33b   : > { %12923 = vst [vmem:[#allocation40_spill] sm:$0xff] %v9283_v33  ;;  %12924 = vst [vmem:[#allocation41_spill] sm:$0xff] %v9285_v41  ;;  %v12927_v41 = vld [vmem:[#allocation75_spill] sm:$0xff]  ;;  %v3253_v33 = vrot.slane %v3239_v3, 5  ;;  %v1202_v3 = vmul.f32 %v1201_v10, %v7537_v28  ;;  %v3256_v39 = vrot.slane %v3242_v31, 5 }
 0x33c   : > { %3224 = vrot.lane.b32.xlu1 %v3217_v13, %s7354_s19  ;;  %3222 = vrot.lane.b32.xlu0 %v3214_v61, %s7354_s19  ;;  %v1157_v62 = vsel %vm430_vm11, %v12928_v50, %v12927_v41  ;;  %v3219_v13 = vsel %vm255_vm1, %v3213_v15, %v3218_v52  ;;  %v3250_v61 = vrot.slane %v3238_v14, 5  ;;  %v1203_v41 = vmul.f32 %v1201_v10, %v7557_v37  ;;  %v12932_v52 = vld [vmem:[#allocation78_spill] sm:$0xff]  ;;  %v12933_v14 = vld [vmem:[#allocation79_spill] sm:$0xff] }
 0x33d   : > { %v1204_v50 = vmul.f32 %v1201_v10, %v7608_v4  ;;  %v1161_v15 = vadd.f32 %v1157_v62, %v1123_v53  ;;  %v1194_v38 = vsel %vm455_vm12, %v12932_v52, %v12931_v32  ;;  %v1195_v59 = vsel %vm455_vm12, %v12934_v60, %v12933_v14 }
 0x33e   : > { %v9303_v7 = vpop.permute.xlu1 %2658  ;;  %v9305_v63 = vpop.permute.xlu0 %2656  ;;  %v3255_v10 = vsel %vm255_vm1, %v3253_v33, %v3254_v1  ;;  %v3252_v53 = vsel %vm255_vm1, %v3250_v61, %v3251_v5  ;;  %v3276_v62 = vmul.f32 %v3275_v36, %v8347_v30  ;;  %v3278_v32 = vmul.f32 %v3275_v36, %v8371_v0 }
 0x33f   : > { %12929 = vst [vmem:[#allocation42_spill] sm:$0xff] %v9303_v7  ;;  %12930 = vst [vmem:[#allocation43_spill] sm:$0xff] %v9305_v63  ;;  %v1210_v52 = vrot.slane %v1203_v41, 4  ;;  %v1212_v14 = vrot.slane %v1204_v50, 4  ;;  %v1209_v60 = vrot.slane %v1202_v3, 4  ;;  %v1198_v33 = vadd.f32 %v1194_v38, %v1160_v55 }
 0x340   : > { %3228 = vrot.lane.b32.xlu1 %v3221_v16, %s7354_s19  ;;  %3226 = vrot.lane.b32.xlu0 %v3219_v13, %s7354_s19  ;;  %v3258_v16 = vrot.slane %v3243_v8, 5  ;;  %v3277_v13 = vmul.f32 %v3275_v36, %v8350_v22  ;;  %v1199_v8 = vadd.f32 %v1195_v59, %v1161_v15  ;;  %v3292_v26 = vrot.slane %v3279_v56, 5  ;;  %v12939_v59 = vld [vmem:[#allocation81_spill] sm:$0xff]  ;;  %v12942_v56 = vld [vmem:[#allocation84_spill] sm:$0xff] }
 0x341   : > { %v3281_v41 = vmul.f32 %v3275_v36, %v8455_v21  ;;  %v3257_v50 = vsel %vm255_vm1, %v3251_v5, %v3256_v39  ;;  %v3280_v3 = vmul.f32 %v3275_v36, %v8470_v11  ;;  %v1211_v55 = vsel %vm1208_vm5, %v1209_v60, %v1210_v52 }
 0x342   : > { %v9323_v63 = vpop.permute.xlu1 %2662  ;;  %v9325_v7 = vpop.permute.xlu0 %2660  ;;  %v3259_v31 = vsel %vm255_vm1, %v3254_v1, %v3258_v16  ;;  %v3291_v44 = vrot.slane %v3277_v13, 5  ;;  %v1213_v15 = vsel %vm1208_vm5, %v1210_v52, %v1212_v14  ;;  %v1216_v1 = vadd.f32 %v1211_v55, %v1198_v33  ;;  %v12940_v16 = vld [vmem:[#allocation82_spill] sm:$0xff]  ;;  %v12941_v13 = vld [vmem:[#allocation83_spill] sm:$0xff] }
 0x343   : > { %12935 = vst [vmem:[#allocation44_spill] sm:$0xff] %v9323_v63  ;;  %12936 = vst [vmem:[#allocation45_spill] sm:$0xff] %v9325_v7  ;;  %v3330_v7 = vstv %s9301_s29  ;;  %v1217_v38 = vadd.f32 %v1213_v15, %v1199_v8  ;;  %v1250_v5 = vsel %vm330_vm7, %v12940_v16, %v12939_v59  ;;  %v1251_v36 = vsel %vm330_vm7, %v12942_v56, %v12941_v13  ;;  %v12947_v16 = vld [vmem:[#allocation87_spill] sm:$0xff]  ;;  %v12948_v13 = vld [vmem:[#allocation88_spill] sm:$0xff]  ;;  %s6981_s29 = sld [smem:[#allocation6 + $0x38]] }
 0x344   : > { %3262 = vrot.lane.b32.xlu1 %v3255_v10, %s7355_s27  ;;  %3260 = vrot.lane.b32.xlu0 %v3252_v53, %s7355_s27  ;;  %v3288_v10 = vrot.slane %v3276_v62, 5  ;;  %v3289_v53 = vrot.slane %v3278_v32, 5  ;;  %v3293_v32 = vsel %vm255_vm1, %v3291_v44, %v3292_v26  ;;  %v3296_v52 = vrot.slane %v3281_v41, 5  ;;  %v12945_v44 = vld [vmem:[#allocation85_spill] sm:$0xff]  ;;  %v12946_v41 = vld [vmem:[#allocation86_spill] sm:$0xff] }
 0x345   : > { %v3332_v14 = vmul.f32 %v3330_v7, %v8350_v22  ;;  %v3334_v60 = vmul.f32 %v3330_v7, %v8376_v35  ;;  %v3294_v8 = vrot.slane %v3280_v3, 5  ;;  %v1254_v55 = vadd.f32 %v1250_v5, %v1216_v1 }
 0x346   : > { %v9338_v63 = vpop.permute.xlu1 %2696  ;;  %v9340_v61 = vpop.permute.xlu0 %2694  ;;  %v3290_v33 = vsel %vm255_vm1, %v3288_v10, %v3289_v53  ;;  %v1255_v15 = vadd.f32 %v1251_v36, %v1217_v38  ;;  %v1288_v59 = vsel %vm355_vm8, %v12946_v41, %v12945_v44  ;;  %v1289_v10 = vsel %vm355_vm8, %v12948_v13, %v12947_v16 }
 0x347   : > { %12937 = vst [vmem:[#allocation46_spill] sm:$0xff] %v9338_v63  ;;  %12938 = vst [vmem:[#allocation47_spill] sm:$0xff] %v9340_v61  ;;  %v3368_v3 = vstv %s9336_s8  ;;  %v3297_v1 = vsel %vm255_vm1, %v3292_v26, %v3296_v52  ;;  %v3346_v5 = vrot.slane %v3332_v14, 6  ;;  %v3295_v38 = vsel %vm255_vm1, %v3289_v53, %v3294_v8  ;;  %v12951_v26 = vld [vmem:[#allocation89_spill] sm:$0xff]  ;;  %v12952_v52 = vld [vmem:[#allocation90_spill] sm:$0xff]  ;;  %s9687_s8 = sld [smem:[#allocation6 + $0x65]] }
 0x348   : > { %3266 = vrot.lane.b32.xlu1 %v3259_v31, %s7355_s27  ;;  %3264 = vrot.lane.b32.xlu0 %v3257_v50, %s7355_s27  ;;  %v3331_v31 = vmul.f32 %v3330_v7, %v8347_v30  ;;  %v3333_v50 = vmul.f32 %v3330_v7, %v8371_v0  ;;  %v3335_v44 = vmul.f32 %v3330_v7, %v8470_v11  ;;  %v1447_v41 = vstv %s9348_s9  ;;  %s9697_s9 = sld [smem:[#allocation6 + $0x3f]] }
 0x349   : > { %v1292_v16 = vadd.f32 %v1288_v59, %v1254_v55  ;;  %v1293_v13 = vadd.f32 %v1289_v10, %v1255_v15  ;;  %v1326_v14 = vsel %vm380_vm9, %v12952_v52, %v12951_v26  ;;  %v3372_v55 = vmul.f32 %v3368_v3, %v8376_v35 }
 0x34a   : > { %v9358_v39 = vpop.permute.xlu1 %2700  ;;  %v9360_v62 = vpop.permute.xlu0 %2698  ;;  %v3343_v36 = vrot.slane %v3331_v31, 6  ;;  %v3349_v59 = vrot.slane %v3335_v44, 6  ;;  %v3369_v10 = vmul.f32 %v3368_v3, %v8347_v30  ;;  %v1449_v52 = vmul.f32 %v1447_v41, %v7557_v37 }
 0x34b   : > { %12943 = vst [vmem:[#allocation48_spill] sm:$0xff] %v9358_v39  ;;  %12944 = vst [vmem:[#allocation49_spill] sm:$0xff] %v9360_v62  ;;  %v3344_v39 = vrot.slane %v3333_v50, 6  ;;  %v1330_v26 = vadd.f32 %v1326_v14, %v1292_v16  ;;  %v3374_v14 = vmul.f32 %v3368_v3, %v8455_v21  ;;  %v3385_v63 = vrot.slane %v3372_v55, 6  ;;  %v12968_v55 = vld [vmem:[#allocation106_spill] sm:$0xff] }
 0x34c   : > { %3300 = vrot.lane.b32.xlu1 %v3293_v32, %s7356_s6  ;;  %3298 = vrot.lane.b32.xlu0 %v3290_v33, %s7356_s6  ;;  %v3347_v32 = vrot.slane %v3334_v60, 6  ;;  %v3336_v33 = vmul.f32 %v3330_v7, %v8455_v21  ;;  %v12953_v60 = vld [vmem:[#allocation91_spill] sm:$0xff] }
 0x34d   : > { %v3345_v15 = vsel %vm1699_vm6, %v3343_v36, %v3344_v39  ;;  %v12958_v36 = vld [vmem:[#allocation96_spill] sm:$0xff] }
 0x34e   : > { %v9377_v56 = vpop.permute.xlu1 %2734  ;;  %v9379_v62 = vpop.permute.xlu0 %2732  ;;  %v3348_v31 = vsel %vm1699_vm6, %v3346_v5, %v3347_v32  ;;  %v3351_v50 = vrot.slane %v3336_v33, 6  ;;  %v12957_v33 = vld [vmem:[#allocation95_spill] sm:$0xff] }
 0x34f   : > { %12949 = vst [vmem:[#allocation50_spill] sm:$0xff] %v9377_v56  ;;  %12950 = vst [vmem:[#allocation51_spill] sm:$0xff] %v9379_v62  ;;  %v12954_v62 = vld [vmem:[#allocation92_spill] sm:$0xff]  ;;  %v1364_v44 = vsel %vm405_vm10, %v12958_v36, %v12957_v33  ;;  %v3406_v36 = vstv %s9385_s23  ;;  %s9732_s23 = sld [smem:[#allocation6 + $0x66]] }
 0x350   : > { %3304 = vrot.lane.b32.xlu1 %v3297_v1, %s7356_s6  ;;  %3302 = vrot.lane.b32.xlu0 %v3295_v38, %s7356_s6  ;;  %v1327_v53 = vsel %vm380_vm9, %v12954_v62, %v12953_v60  ;;  %v3370_v1 = vmul.f32 %v3368_v3, %v8350_v22  ;;  %v3371_v38 = vmul.f32 %v3368_v3, %v8371_v0  ;;  %v12959_v60 = vld [vmem:[#allocation97_spill] sm:$0xff] }
 0x351   : > { %v1448_v62 = vmul.f32 %v1447_v41, %v7537_v28  ;;  %v1331_v5 = vadd.f32 %v1327_v53, %v1293_v13  ;;  %v3352_v61 = vsel %vm1699_vm6, %v3347_v32, %v3351_v50  ;;  %v3373_v13 = vmul.f32 %v3368_v3, %v8470_v11  ;;  %v12965_v3 = vld [vmem:[#allocation103_spill] sm:$0xff]  ;;  %v12966_v50 = vld [vmem:[#allocation104_spill] sm:$0xff] }
 0x352   : > { %v9396_v8 = vpop.permute.xlu1 %2738  ;;  %v9398_v7 = vpop.permute.xlu0 %2736  ;;  %v3350_v53 = vsel %vm1699_vm6, %v3344_v39, %v3349_v59  ;;  %v3382_v33 = vrot.slane %v3371_v38, 6  ;;  %v1403_v39 = vsel %vm430_vm11, %v12966_v50, %v12965_v3  ;;  %v1455_v3 = vrot.slane %v1449_v52, 5 }
 0x353   : > { %12955 = vst [vmem:[#allocation52_spill] sm:$0xff] %v9396_v8  ;;  %12956 = vst [vmem:[#allocation53_spill] sm:$0xff] %v9398_v7  ;;  %v12960_v7 = vld [vmem:[#allocation98_spill] sm:$0xff] }
 0x354   : > { %3355 = vrot.lane.b32.xlu1 %v3348_v31, %s7351_s28  ;;  %3353 = vrot.lane.b32.xlu0 %v3345_v15, %s7351_s28  ;;  %v1365_v16 = vsel %vm405_vm10, %v12960_v7, %v12959_v60  ;;  %v3384_v31 = vrot.slane %v3370_v1, 6  ;;  %v3381_v15 = vrot.slane %v3369_v10, 6  ;;  %v1368_v7 = vadd.f32 %v1364_v44, %v1330_v26  ;;  %v12963_v60 = vld [vmem:[#allocation101_spill] sm:$0xff] }
 0x355   : > { %v1369_v32 = vadd.f32 %v1365_v16, %v1331_v5  ;;  %v12967_v1 = vld [vmem:[#allocation105_spill] sm:$0xff]  ;;  %v3389_v10 = vrot.slane %v3374_v14, 6  ;;  %v9447_v26 = vmul.f32 %v3406_v36, %v8376_v35  ;;  %v3407_v5 = vmul.f32 %v3406_v36, %v8347_v30 }
 0x356   : > { %v9419_v8 = vpop.permute.xlu1 %2772  ;;  %v9421_v56 = vpop.permute.xlu0 %2770  ;;  %v1440_v59 = vsel %vm455_vm12, %v12968_v55, %v12967_v1  ;;  %v3386_v16 = vsel %vm1699_vm6, %v3384_v31, %v3385_v63  ;;  %v1454_v14 = vrot.slane %v1448_v62, 5  ;;  %v1692_v1 = vstv %s9408_s26  ;;  %s9734_s26 = sld [smem:[#allocation6 + $0x46]] }
 0x357   : > { %12961 = vst [vmem:[#allocation54_spill] sm:$0xff] %v9419_v8  ;;  %12962 = vst [vmem:[#allocation55_spill] sm:$0xff] %v9421_v56  ;;  %v1402_v8 = vsel %vm430_vm11, %v12964_v43, %v12963_v60  ;;  %v1450_v56 = vmul.f32 %v1447_v41, %v7608_v4  ;;  %v3387_v41 = vrot.slane %v3373_v13, 6  ;;  %v3409_v60 = vmul.f32 %v3406_v36, %v8371_v0 }
 0x358   : > { %3359 = vrot.lane.b32.xlu1 %v3352_v61, %s7351_s28  ;;  %3357 = vrot.lane.b32.xlu0 %v3350_v53, %s7351_s28  ;;  %v3408_v61 = vmul.f32 %v3406_v36, %v8350_v22  ;;  %v1406_v44 = vadd.f32 %v1402_v8, %v1368_v7  ;;  %v3383_v53 = vsel %vm1699_vm6, %v3381_v15, %v3382_v33  ;;  %v3423_v7 = vrot.slane %v9447_v26, 6 }
 0x359   : > { %v1457_v50 = vrot.slane %v1450_v56, 5  ;;  %v1407_v13 = vadd.f32 %v1403_v39, %v1369_v32  ;;  %v3390_v31 = vsel %vm1699_vm6, %v3385_v63, %v3389_v10  ;;  %v3388_v56 = vsel %vm1699_vm6, %v3382_v33, %v3387_v41  ;;  %v12975_v41 = vld [vmem:[#allocation109_spill] sm:$0xff] }
 0x35a   : > { %v9441_v38 = vpop.permute.xlu1 %2776  ;;  %v9443_v43 = vpop.permute.xlu0 %2774  ;;  %v1444_v55 = vadd.f32 %v1440_v59, %v1406_v44  ;;  %v3422_v52 = vrot.slane %v3408_v61, 6  ;;  %v3420_v32 = vrot.slane %v3409_v60, 6  ;;  %v3412_v39 = vmul.f32 %v3406_v36, %v8455_v21  ;;  %v12976_v61 = vld [vmem:[#allocation110_spill] sm:$0xff] }
 0x35b   : > { %12969 = vst [vmem:[#allocation56_spill] sm:$0xff] %v9441_v38  ;;  %12970 = vst [vmem:[#allocation57_spill] sm:$0xff] %v9443_v43  ;;  %v12971_v43 = vld [vmem:[#allocation107_spill] sm:$0xff]  ;;  %v12972_v38 = vld [vmem:[#allocation108_spill] sm:$0xff]  ;;  %v3411_v59 = vmul.f32 %v3406_v36, %v8470_v11  ;;  %v1456_v63 = vsel %vm255_vm1, %v1454_v14, %v1455_v3  ;;  %v1458_v10 = vsel %vm255_vm1, %v1455_v3, %v1457_v50 }
 0x35c   : > { %3393 = vrot.lane.b32.xlu1 %v3386_v16, %s7352_s30  ;;  %3391 = vrot.lane.b32.xlu0 %v3383_v53, %s7352_s30  ;;  %v1441_v8 = vsel %vm455_vm12, %v12972_v38, %v12971_v43  ;;  %v3419_v16 = vrot.slane %v3407_v5, 6  ;;  %v3444_v38 = vstv %s9427_s7  ;;  %v1461_v33 = vadd.f32 %v1456_v63, %v1444_v55  ;;  %s9742_s7 = sld [smem:[#allocation6 + $0x4d]] }
 0x35d   : > { %v1445_v43 = vadd.f32 %v1441_v8, %v1407_v13  ;;  %v1495_v26 = vsel %vm330_vm7, %v12976_v61, %v12975_v41  ;;  %v9479_v5 = vmul.f32 %v1692_v1, %v7537_v28  ;;  %v9482_v36 = vmul.f32 %v1692_v1, %v7557_v37  ;;  %v12979_v61 = vld [vmem:[#allocation111_spill] sm:$0xff] }
 0x35e   : > { %v9462_v15 = vpop.permute.xlu1 %2810  ;;  %v9464_v62 = vpop.permute.xlu0 %2808  ;;  %v3446_v60 = vmul.f32 %v3444_v38, %v8350_v22  ;;  %v3448_v14 = vmul.f32 %v3444_v38, %v8376_v35  ;;  %v3445_v3 = vmul.f32 %v3444_v38, %v8347_v30  ;;  %v9492_v50 = vmul.f32 %v3444_v38, %v8371_v0 }
 0x35f   : > { %12973 = vst [vmem:[#allocation58_spill] sm:$0xff] %v9462_v15  ;;  %12974 = vst [vmem:[#allocation59_spill] sm:$0xff] %v9464_v62  ;;  %v3424_v13 = vsel %vm1699_vm6, %v3422_v52, %v3423_v7  ;;  %v3421_v55 = vsel %vm1699_vm6, %v3419_v16, %v3420_v32  ;;  %v3427_v8 = vrot.slane %v3412_v39, 6  ;;  %v1499_v63 = vadd.f32 %v1495_v26, %v1461_v33  ;;  %v12981_v62 = vld [vmem:[#allocation113_spill] sm:$0xff]  ;;  %v12982_v15 = vld [vmem:[#allocation114_spill] sm:$0xff] }
 0x360   : > { %3397 = vrot.lane.b32.xlu1 %v3390_v31, %s7352_s30  ;;  %3395 = vrot.lane.b32.xlu0 %v3388_v56, %s7352_s30  ;;  %v3425_v31 = vrot.slane %v3411_v59, 6  ;;  %v1462_v56 = vadd.f32 %v1458_v10, %v1445_v43  ;;  %v9497_v41 = vmul.f32 %v1692_v1, %v7608_v4  ;;  %v1533_v52 = vsel %vm355_vm8, %v12982_v15, %v12981_v62  ;;  %v12996_v4 = vld [vmem:[#allocation127_spill] sm:$0xff] }
 0x361   : > { %v3450_v16 = vmul.f32 %v3444_v38, %v8455_v21  ;;  %v3482_v39 = vstv %s9460_s4  ;;  %v3460_v1 = vrot.slane %v3446_v60, 6  ;;  %v3461_v43 = vrot.slane %v3448_v14, 6  ;;  %s9779_s4 = sld [smem:[#allocation6 + $0x67]] }
 0x362   : > { %v9484_v44 = vpop.permute.xlu1 %2814  ;;  %v9486_v53 = vpop.permute.xlu0 %2812  ;;  %v3457_v33 = vrot.slane %v3445_v3, 6  ;;  %v3458_v26 = vrot.slane %v9492_v50, 6  ;;  %v3428_v15 = vsel %vm1699_vm6, %v3423_v7, %v3427_v8  ;;  %v3426_v62 = vsel %vm1699_vm6, %v3420_v32, %v3425_v31  ;;  %v12987_v50 = vld [vmem:[#allocation115_spill] sm:$0xff]  ;;  %v12989_v32 = vld [vmem:[#allocation122_spill] sm:$0xff] }
 0x363   : > { %12977 = vst [vmem:[#allocation60_spill] sm:$0xff] %v9484_v44  ;;  %12978 = vst [vmem:[#allocation61_spill] sm:$0xff] %v9486_v53  ;;  %v12980_v53 = vld [vmem:[#allocation112_spill] sm:$0xff]  ;;  %v3484_v60 = vmul.f32 %v3482_v39, %v8350_v22  ;;  %v9527_v14 = vmul.f32 %v3482_v39, %v8376_v35  ;;  %v12990_v8 = vld [vmem:[#allocation123_spill] sm:$0xff]  ;;  %v3465_v31 = vrot.slane %v3450_v16, 6 }
 0x364   : > { %3431 = vrot.lane.b32.xlu1 %v3424_v13, %s7353_s17  ;;  %3429 = vrot.lane.b32.xlu0 %v3421_v55, %s7353_s17  ;;  %v1496_v44 = vsel %vm330_vm7, %v12980_v53, %v12979_v61  ;;  %v12985_v13 = vld [vmem:[#allocation117_spill] sm:$0xff]  ;;  %v12986_v53 = vld [vmem:[#allocation118_spill] sm:$0xff]  ;;  %v3449_v61 = vmul.f32 %v3444_v38, %v8470_v11  ;;  %v1609_v38 = vsel %vm405_vm10, %v12990_v8, %v12989_v32 }
 0x365   : > { %v1571_v55 = vsel %vm380_vm9, %v12986_v53, %v12985_v13  ;;  %v1500_v3 = vadd.f32 %v1496_v44, %v1462_v56  ;;  %v12988_v13 = vld [vmem:[#allocation116_spill] sm:$0xff]  ;;  %v3462_v53 = vsel %vm1699_vm6, %v3460_v1, %v3461_v43  ;;  %v3483_v44 = vmul.f32 %v3482_v39, %v8347_v30 }
 0x366   : > { %v9509_v59 = vpop.permute.xlu1 %2865  ;;  %v9511_v10 = vpop.permute.xlu0 %2863  ;;  %v1534_v7 = vsel %vm355_vm8, %v12988_v13, %v12987_v50  ;;  %v12993_v56 = vld [vmem:[#allocation120_spill] sm:$0xff]  ;;  %v12995_v13 = vld [vmem:[#allocation126_spill] sm:$0xff]  ;;  %v3463_v16 = vrot.slane %v3449_v61, 6  ;;  %v3498_v1 = vrot.slane %v3484_v60, 6  ;;  %v3466_v61 = vsel %vm1699_vm6, %v3461_v43, %v3465_v31 }
 0x367   : > { %12983 = vst [vmem:[#allocation62_spill] sm:$0xff] %v9509_v59  ;;  %12984 = vst [vmem:[#allocation63_spill] sm:$0xff] %v9511_v10  ;;  %v1537_v59 = vadd.f32 %v1533_v52, %v1499_v63  ;;  %v1701_v10 = vrot.slane %v9482_v36, 6  ;;  %v1647_v32 = vsel %vm430_vm11, %v12996_v4, %v12995_v13  ;;  %v3487_v60 = vmul.f32 %v3482_v39, %v8470_v11  ;;  %v13003_v13 = vld [vmem:[#allocation129_spill] sm:$0xff] }
 0x368   : > { %3435 = vrot.lane.b32.xlu1 %v3428_v15, %s7353_s17  ;;  %3433 = vrot.lane.b32.xlu0 %v3426_v62, %s7353_s17  ;;  %v3459_v15 = vsel %vm1699_vm6, %v3457_v33, %v3458_v26  ;;  %v12994_v62 = vld [vmem:[#allocation121_spill] sm:$0xff]  ;;  %v3499_v33 = vrot.slane %v9527_v14, 6  ;;  %v3520_v14 = vstv %s9514_s11  ;;  %v1700_v31 = vrot.slane %v9479_v5, 6  ;;  %s9809_s11 = sld [smem:[#allocation6 + $0x54]] }
 0x369   : > { %v1575_v36 = vadd.f32 %v1571_v55, %v1537_v59  ;;  %v1572_v50 = vsel %vm380_vm9, %v12994_v62, %v12993_v56  ;;  %v3485_v59 = vmul.f32 %v3482_v39, %v8371_v0  ;;  %v1538_v55 = vadd.f32 %v1534_v7, %v1500_v3  ;;  %v12999_v62 = vld [vmem:[#allocation130_spill] sm:$0xff] }
 0x36a   : > { %v9535_v63 = vpop.permute.xlu1 %2869  ;;  %v9537_v52 = vpop.permute.xlu0 %2867  ;;  %v1685_v4 = vsel %vm455_vm12, %v13000_v27, %v12999_v62  ;;  %v3488_v3 = vmul.f32 %v3482_v39, %v8455_v21  ;;  %v3495_v27 = vrot.slane %v3483_v44, 6  ;;  %v13004_v39 = vld [vmem:[#allocation132_spill] sm:$0xff] }
 0x36b   : > { %12991 = vst [vmem:[#allocation64_spill] sm:$0xff] %v9535_v63  ;;  %12992 = vst [vmem:[#allocation65_spill] sm:$0xff] %v9537_v52  ;;  %v1613_v8 = vadd.f32 %v1609_v38, %v1575_v36  ;;  %v12997_v52 = vld [vmem:[#allocation124_spill] sm:$0xff]  ;;  %v12998_v63 = vld [vmem:[#allocation125_spill] sm:$0xff]  ;;  %v1576_v7 = vadd.f32 %v1572_v50, %v1538_v55  ;;  %v3496_v62 = vrot.slane %v3485_v59, 6 }
 0x36c   : > { %3469 = vrot.lane.b32.xlu1 %v3462_v53, %s7354_s19  ;;  %3467 = vrot.lane.b32.xlu0 %v3459_v15, %s7354_s19  ;;  %v1610_v56 = vsel %vm405_vm10, %v12998_v63, %v12997_v52  ;;  %v13002_v15 = vld [vmem:[#allocation128_spill] sm:$0xff]  ;;  %v3464_v52 = vsel %vm1699_vm6, %v3458_v26, %v3463_v16  ;;  %v13005_v55 = vld [vmem:[#allocation133_spill] sm:$0xff]  ;;  %v3524_v26 = vmul.f32 %v3520_v14, %v8376_v35 }
 0x36d   : > { %v1651_v38 = vadd.f32 %v1647_v32, %v1613_v8  ;;  %v1648_v63 = vsel %vm430_vm11, %v13003_v13, %v13002_v15  ;;  %v1614_v43 = vadd.f32 %v1610_v56, %v1576_v7  ;;  %v1703_v32 = vrot.slane %v9497_v41, 6 }
 0x36e   : > { %v9560_v36 = vpop.permute.xlu1 %2903  ;;  %v9562_v53 = vpop.permute.xlu0 %2901  ;;  %v1686_v8 = vsel %vm455_vm12, %v13005_v55, %v13004_v39  ;;  %v3522_v15 = vmul.f32 %v3520_v14, %v8350_v22  ;;  %v1702_v16 = vsel %vm1699_vm6, %v1700_v31, %v1701_v10  ;;  %v3501_v41 = vrot.slane %v3487_v60, 6  ;;  %v13008_v60 = vld [vmem:[#allocation138_spill] sm:$0xff]  ;;  %v13009_v31 = vld [vmem:[#allocation139_spill] sm:$0xff] }
 0x36f   : > { %13001 = vst [vmem:[#allocation66_spill] sm:$0xff] %v9562_v53  ;;  %v1689_v50 = vadd.f32 %v1685_v4, %v1651_v38  ;;  %v3503_v53 = vrot.slane %v3488_v3, 6  ;;  %v1652_v44 = vadd.f32 %v1648_v63, %v1614_v43  ;;  %v3521_v56 = vmul.f32 %v3520_v14, %v8347_v30  ;;  %v13006_v4 = vld [vmem:[#allocation134_spill] sm:$0xff] }
 0x370   : > { %3473 = vrot.lane.b32.xlu1 %v3466_v61, %s7354_s19  ;;  %3471 = vrot.lane.b32.xlu0 %v3464_v52, %s7354_s19  ;;  %v13007_v61 = vld [vmem:[#allocation135_spill] sm:$0xff]  ;;  %v3500_v3 = vsel %vm1699_vm6, %v3498_v1, %v3499_v33  ;;  %v3497_v38 = vsel %vm1699_vm6, %v3495_v27, %v3496_v62  ;;  %v3523_v13 = vmul.f32 %v3520_v14, %v8371_v0  ;;  %v3537_v1 = vrot.slane %v3524_v26, 6  ;;  %v13046_v22 = vld [vmem:[#allocation170_spill] sm:$0xff] }
 0x371   : > { %v1741_v7 = vsel %vm330_vm7, %v13007_v61, %v13006_v4  ;;  %v1707_v63 = vadd.f32 %v1702_v16, %v1689_v50  ;;  %v1704_v52 = vsel %vm1699_vm6, %v1701_v10, %v1703_v32  ;;  %v1690_v43 = vadd.f32 %v1686_v8, %v1652_v44  ;;  %v13010_v44 = vld [vmem:[#allocation136_spill] sm:$0xff]  ;;  %v13011_v16 = vld [vmem:[#allocation137_spill] sm:$0xff] }
 0x372   : > { %v9580_v5 = vpop.permute.xlu1 %2907  ;;  %v9582_v59 = vpop.permute.xlu0 %2905  ;;  %v1779_v39 = vsel %vm355_vm8, %v13009_v31, %v13008_v60  ;;  %v3504_v55 = vsel %vm1699_vm6, %v3499_v33, %v3503_v53  ;;  %v3536_v4 = vrot.slane %v3522_v15, 6  ;;  %v3502_v10 = vsel %vm1699_vm6, %v3496_v62, %v3501_v41  ;;  %v13013_v33 = vld [vmem:[#allocation143_spill] sm:$0xff]  ;;  %v13014_v62 = vld [vmem:[#allocation140_spill] sm:$0xff]  ;;  %v13015_v41 = vld [vmem:[#allocation141_spill] sm:$0xff] }
 0x373   : > { %v1745_v61 = vadd.f32 %v1741_v7, %v1707_v63  ;;  %v3533_v32 = vrot.slane %v3521_v56, 6  ;;  %v3526_v8 = vmul.f32 %v3520_v14, %v8455_v21  ;;  %v3534_v15 = vrot.slane %v3523_v13, 6  ;;  %v13016_v60 = vld [vmem:[#allocation146_spill] sm:$0xff]  ;;  %v13017_v31 = vld [vmem:[#allocation147_spill] sm:$0xff] }
 0x374   : > { %3507 = vrot.lane.b32.xlu1 %v3500_v3, %s7355_s27  ;;  %3505 = vrot.lane.b32.xlu0 %v3497_v38, %s7355_s27  ;;  %v1742_v3 = vsel %vm330_vm7, %v13011_v16, %v13010_v44  ;;  %v13012_v38 = vld [vmem:[#allocation142_spill] sm:$0xff]  ;;  %v3525_v26 = vmul.f32 %v3520_v14, %v8470_v11  ;;  %v1708_v7 = vadd.f32 %v1704_v52, %v1690_v43  ;;  %v13039_v21 = vld [vmem:[#allocation15_spill] sm:$0xff] }
 0x375   : > { %v1817_v53 = vsel %vm380_vm9, %v13013_v33, %v13012_v38  ;;  %v1783_v63 = vadd.f32 %v1779_v39, %v1745_v61  ;;  %v1780_v56 = vsel %vm355_vm8, %v13015_v41, %v13014_v62  ;;  %v1855_v44 = vsel %vm405_vm10, %v13017_v31, %v13016_v60  ;;  %v13018_v39 = vld [vmem:[#allocation144_spill] sm:$0xff]  ;;  %v13021_v33 = vld [vmem:[#allocation151_spill] sm:$0xff]  ;;  %v13024_v60 = vld [vmem:[#allocation154_spill] sm:$0xff] }
 0x376   : > { %v9600_v27 = vpop.permute.xlu1 %2941  ;;  %v9602_v50 = vpop.permute.xlu0 %2939  ;;  %v1746_v16 = vadd.f32 %v1742_v3, %v1708_v7  ;;  %v3538_v52 = vsel %vm1699_vm6, %v3536_v4, %v3537_v1  ;;  %v3541_v43 = vrot.slane %v3526_v8, 6  ;;  %v3535_v41 = vsel %vm1699_vm6, %v3533_v32, %v3534_v15  ;;  %v13022_v4 = vld [vmem:[#allocation148_spill] sm:$0xff]  ;;  %v13023_v8 = vld [vmem:[#allocation149_spill] sm:$0xff]  ;;  %v13025_v31 = vld [vmem:[#allocation155_spill] sm:$0xff] }
 0x377   : > { %v1821_v13 = vadd.f32 %v1817_v53, %v1783_v63  ;;  %v3539_v3 = vrot.slane %v3525_v26, 6  ;;  %v1856_v63 = vsel %vm405_vm10, %v13023_v8, %v13022_v4 }
 0x378   : > { %3511 = vrot.lane.b32.xlu1 %v3504_v55, %s7355_s27  ;;  %3509 = vrot.lane.b32.xlu0 %v3502_v10, %s7355_s27  ;;  %v13019_v55 = vld [vmem:[#allocation145_spill] sm:$0xff]  ;;  %v13020_v10 = vld [vmem:[#allocation150_spill] sm:$0xff]  ;;  %v1784_v53 = vadd.f32 %v1780_v56, %v1746_v16  ;;  %v13026_v56 = vld [vmem:[#allocation152_spill] sm:$0xff] }
 0x379   : > { %v1818_v61 = vsel %vm380_vm9, %v13019_v55, %v13018_v39  ;;  %v1893_v62 = vsel %vm430_vm11, %v13021_v33, %v13020_v10  ;;  %v1859_v7 = vadd.f32 %v1855_v44, %v1821_v13  ;;  %v1931_v39 = vsel %vm455_vm12, %v13025_v31, %v13024_v60  ;;  %v13027_v44 = vld [vmem:[#allocation153_spill] sm:$0xff] }
 0x37a   : > { %v9623_v38 = vpop.permute.xlu1 %2945  ;;  %v9625_v14 = vpop.permute.xlu0 %2943  ;;  %v1822_v55 = vadd.f32 %v1818_v61, %v1784_v53  ;;  %v1938_v33 = vstv %s9598_s10  ;;  %v1894_v16 = vsel %vm430_vm11, %v13027_v44, %v13026_v56  ;;  %v3542_v13 = vsel %vm1699_vm6, %v3537_v1, %v3541_v43  ;;  %v13028_v61 = vld [vmem:[#allocation156_spill] sm:$0xff]  ;;  %v13035_v44 = vld [vmem:[#allocation162_spill] sm:$0xff]  ;;  %s9827_s10 = sld [smem:[#allocation6 + $0x68]] }
 0x37b   : > { %v1897_v10 = vadd.f32 %v1893_v62, %v1859_v7  ;;  %v13029_v62 = vld [vmem:[#allocation157_spill] sm:$0xff]  ;;  %v1939_v60 = vmul.f32 %v1938_v33, %v8347_v30 }
 0x37c   : > { %3545 = vrot.lane.b32.xlu1 %v3538_v52, %s7356_s6  ;;  %3543 = vrot.lane.b32.xlu0 %v3535_v41, %s7356_s6  ;;  %v3540_v52 = vsel %vm1699_vm6, %v3534_v15, %v3539_v3  ;;  %v3568_v41 = vstv %s9613_s20  ;;  %v1860_v4 = vadd.f32 %v1856_v63, %v1822_v55  ;;  %v1932_v53 = vsel %vm455_vm12, %v13029_v62, %v13028_v61  ;;  %v13032_v15 = vld [vmem:[#allocation14_spill] sm:$0xff]  ;;  %s9845_s20 = sld [smem:[#allocation6 + $0x6a]] }
 0x37d   : > { %v1935_v8 = vadd.f32 %v1931_v39, %v1897_v10  ;;  %v3570_v43 = vmul.f32 %v3568_v41, %v13032_v15  ;;  %v3569_v3 = vmul.f32 %v3568_v41, %v7537_v28  ;;  %v13033_v63 = vld [vmem:[#allocation158_spill] sm:$0xff]  ;;  %v13034_v39 = vld [vmem:[#allocation159_spill] sm:$0xff]  ;;  %v3572_v35 = vmul.f32 %v3568_v41, %v13039_v21 }
 0x37e   : > { %v9644_v32 = vpop.permute.xlu1 %2979  ;;  %v9646_v26 = vpop.permute.xlu0 %2977  ;;  %v1898_v7 = vadd.f32 %v1894_v16, %v1860_v4  ;;  %v1961_v55 = vsel %vm330_vm7, %v13034_v39, %v13033_v63  ;;  %v13036_v16 = vld [vmem:[#allocation163_spill] sm:$0xff]  ;;  %v3592_v39 = vstv %s7026_s22  ;;  %s9857_s22 = sld [smem:[#allocation6 + $0x6b]] }
 0x37f   : > { %v1941_v10 = vadd.f32 %v1939_v60, %v1935_v8  ;;  %v3571_v8 = vmul.f32 %v3568_v41, %v7557_v37  ;;  %v13045_v41 = vld [vmem:[#allocation165_spill] sm:$0xff] }
 0x380   : > { %3549 = vrot.lane.b32.xlu1 %v3542_v13, %s7356_s6  ;;  %3547 = vrot.lane.b32.xlu0 %v3540_v52, %s7356_s6  ;;  %v1936_v56 = vadd.f32 %v1932_v53, %v1898_v7  ;;  %v1985_v13 = vsel %vm355_vm8, %v13036_v16, %v13035_v44  ;;  %v1940_v52 = vmul.f32 %v1938_v33, %v8371_v0  ;;  %v13040_v53 = vld [vmem:[#allocation160_spill] sm:$0xff]  ;;  %v13041_v7 = vld [vmem:[#allocation161_spill] sm:$0xff] }
 0x381   : > { %v1965_v4 = vadd.f32 %v1961_v55, %v1941_v10  ;;  %v1962_v60 = vsel %vm330_vm7, %v13041_v7, %v13040_v53  ;;  %v2088_v10 = vstv %s6981_s29  ;;  %v13044_v44 = vld [vmem:[#allocation164_spill] sm:$0xff]  ;;  %v13047_v53 = vld [vmem:[#allocation171_spill] sm:$0xff]  ;;  %s9941_s29 = sld [smem:[#allocation6 + $0x6c]] }
 0x382   : > { %v9660_v31 = vpop.permute.xlu1 %2983  ;;  %v9662_v1 = vpop.permute.xlu0 %2981  ;;  %v1942_v33 = vadd.f32 %v1940_v52, %v1936_v56  ;;  %v1986_v16 = vsel %vm355_vm8, %v13045_v41, %v13044_v44  ;;  %v2033_v7 = vsel %vm405_vm10, %v13047_v53, %v13046_v22  ;;  %v13050_v52 = vld [vmem:[#allocation168_spill] sm:$0xff]  ;;  %v13052_v44 = vld [vmem:[#allocation174_spill] sm:$0xff]  ;;  %v13053_v41 = vld [vmem:[#allocation175_spill] sm:$0xff]  ;;  %v2089_v53 = vmul.f32 %v2088_v10, %v8347_v30 }
 0x383   : > { %13030 = vst [vmem:[#allocation67_spill] sm:$0xff] %v9660_v31  ;;  %13031 = vst [vmem:[#allocation68_spill] sm:$0xff] %v9662_v1  ;;  %v1989_v55 = vadd.f32 %v1985_v13, %v1965_v4  ;;  %v3593_v13 = vmul.f32 %v3592_v39, %v7537_v28  ;;  %v13051_v4 = vld [vmem:[#allocation169_spill] sm:$0xff]  ;;  %v2057_v22 = vsel %vm430_vm11, %v13053_v41, %v13052_v44 }
 0x384   : > { %3579 = vrot.lane.b32.xlu1 %v3570_v43, %s7351_s28  ;;  %3577 = vrot.lane.b32.xlu0 %v3569_v3, %s7351_s28  ;;  %v13042_v43 = vld [vmem:[#allocation166_spill] sm:$0xff]  ;;  %v13043_v3 = vld [vmem:[#allocation167_spill] sm:$0xff]  ;;  %v2091_v44 = vmul.f32 %v2088_v10, %v8470_v11 }
 0x385   : > { %v2009_v63 = vsel %vm380_vm9, %v13043_v3, %v13042_v43  ;;  %v1966_v43 = vadd.f32 %v1962_v60, %v1942_v33  ;;  %v2090_v60 = vmul.f32 %v2088_v10, %v8371_v0 }
 0x386   : > { %v9675_v61 = vpop.permute.xlu1 %3017  ;;  %v9677_v62 = vpop.permute.xlu0 %3015  ;;  %v2013_v3 = vadd.f32 %v2009_v63, %v1989_v55  ;;  %v13054_v55 = vld [vmem:[#allocation172_spill] sm:$0xff] }
 0x387   : > { %13037 = vst [vmem:[#allocation69_spill] sm:$0xff] %v9675_v61  ;;  %13038 = vst [vmem:[#allocation70_spill] sm:$0xff] %v9677_v62  ;;  %v1990_v63 = vadd.f32 %v1986_v16, %v1966_v43  ;;  %v3596_v43 = vmul.f32 %v3592_v39, %v13039_v21  ;;  %v2096_v61 = vrot.slane %v2090_v60, 1  ;;  %v2098_v60 = vrot.slane %v2091_v44, 1 }
 0x388   : > { %3583 = vrot.lane.b32.xlu1 %v3572_v35, %s7351_s28  ;;  %3581 = vrot.lane.b32.xlu0 %v3571_v8, %s7351_s28  ;;  %v3594_v35 = vmul.f32 %v3592_v39, %v13032_v15  ;;  %v2010_v8 = vsel %vm380_vm9, %v13051_v4, %v13050_v52  ;;  %v2037_v33 = vadd.f32 %v2033_v7, %v2013_v3  ;;  %v13056_v52 = vld [vmem:[#allocation178_spill] sm:$0xff]  ;;  %v13057_v4 = vld [vmem:[#allocation179_spill] sm:$0xff] }
 0x389   : > { %v2081_v31 = vsel %vm455_vm12, %v13057_v4, %v13056_v52  ;;  %v2014_v41 = vadd.f32 %v2010_v8, %v1990_v63  ;;  %v3595_v3 = vmul.f32 %v3592_v39, %v7557_v37  ;;  %v3616_v52 = vstv %s9687_s8  ;;  %v13061_v63 = vld [vmem:[#allocation181_spill] sm:$0xff]  ;;  %s9995_s8 = sld [smem:[#allocation6 + $0x6d]] }
 0x38a   : > { %v9699_v1 = vpop.permute.xlu1 %3021  ;;  %v9701_v56 = vpop.permute.xlu0 %3019  ;;  %v2061_v62 = vadd.f32 %v2057_v22, %v2037_v33  ;;  %v13060_v22 = vld [vmem:[#allocation180_spill] sm:$0xff]  ;;  %v2333_v33 = vstv %s9697_s9  ;;  %v2174_v44 = vsel %vm355_vm8, %v8845_v2, %v8843_v18  ;;  %v2212_v2 = vsel %vm380_vm9, %v8883_v6, %v8881_v40  ;;  %s10010_s9 = sld [smem:[#allocation6 + $0x5b]] }
 0x38b   : > { %13048 = vst [vmem:[#allocation71_spill] sm:$0xff] %v9699_v1  ;;  %13049 = vst [vmem:[#allocation72_spill] sm:$0xff] %v9701_v56  ;;  %v13055_v56 = vld [vmem:[#allocation173_spill] sm:$0xff]  ;;  %v2082_v39 = vsel %vm455_vm12, %v13061_v63, %v13060_v22  ;;  %v9776_v18 = vmul.f32 %v2333_v33, %v8371_v0  ;;  %v2250_v40 = vsel %vm405_vm10, %v8921_v20, %v8919_v19 }
 0x38c   : > { %3603 = vrot.lane.b32.xlu1 %v3594_v35, %s7352_s30  ;;  %3601 = vrot.lane.b32.xlu0 %v3593_v13, %s7352_s30  ;;  %v2034_v1 = vsel %vm405_vm10, %v13055_v56, %v13054_v55  ;;  %v13058_v35 = vld [vmem:[#allocation176_spill] sm:$0xff]  ;;  %v13059_v13 = vld [vmem:[#allocation177_spill] sm:$0xff]  ;;  %v2095_v55 = vrot.slane %v2089_v53, 1  ;;  %v2085_v8 = vadd.f32 %v2081_v31, %v2061_v62  ;;  %v3618_v31 = vmul.f32 %v3616_v52, %v13032_v15 }
 0x38d   : > { %v2058_v56 = vsel %vm430_vm11, %v13059_v13, %v13058_v35  ;;  %v2038_v10 = vadd.f32 %v2034_v1, %v2014_v41  ;;  %v3617_v1 = vmul.f32 %v3616_v52, %v7537_v28  ;;  %v13062_v41 = vld [vmem:[#allocation182_spill] sm:$0xff]  ;;  %v2336_v6 = vmul.f32 %v2333_v33, %v8470_v11 }
 0x38e   : > { %v9722_v16 = vpop.permute.xlu1 %3055  ;;  %v9724_v7 = vpop.permute.xlu0 %3053  ;;  %v2097_v62 = vsel %vm470_vm2, %v2095_v55, %v2096_v61  ;;  %v2099_v55 = vsel %vm470_vm2, %v2096_v61, %v2098_v60  ;;  %v3640_v61 = vstv %s9732_s23  ;;  %s10067_s23 = sld [smem:[#allocation6 + $0x6e]] }
 0x38f   : > { %v2062_v53 = vadd.f32 %v2058_v56, %v2038_v10  ;;  %v2102_v13 = vadd.f32 %v2097_v62, %v2085_v8  ;;  %v9755_v56 = vmul.f32 %v2333_v33, %v8347_v30  ;;  %v3620_v8 = vmul.f32 %v3616_v52, %v13039_v21 }
 0x390   : > { %3607 = vrot.lane.b32.xlu1 %v3596_v43, %s7352_s30  ;;  %3605 = vrot.lane.b32.xlu0 %v3595_v3, %s7352_s30  ;;  %v13063_v43 = vld [vmem:[#allocation183_spill] sm:$0xff] }
 0x391   : > { %v2136_v3 = vsel %vm330_vm7, %v13063_v43, %v13062_v41  ;;  %v2086_v22 = vadd.f32 %v2082_v39, %v2062_v53  ;;  %v3619_v39 = vmul.f32 %v3616_v52, %v7557_v37  ;;  %v13064_v53 = vld [vmem:[#allocation184_spill] sm:$0xff]  ;;  %v2340_v43 = vrot.slane %v9755_v56, 2 }
 0x392   : > { %v9744_v4 = vpop.permute.xlu1 %3059  ;;  %v9746_v35 = vpop.permute.xlu0 %3057  ;;  %v2140_v10 = vadd.f32 %v2136_v3, %v2102_v13  ;;  %v2578_v3 = vstv %s9734_s26  ;;  %v2175_v52 = vsel %vm355_vm8, %v8864_v17, %v8862_v29  ;;  %v2823_v13 = vstv %s9742_s7  ;;  %s10085_s26 = sld [smem:[#allocation6 + $0x6f]]  ;;  %s10153_s7 = sld [smem:[#allocation6 + $0x71]] }
 0x393   : > { %v2103_v60 = vadd.f32 %v2099_v55, %v2086_v22  ;;  %v2213_v29 = vsel %vm380_vm9, %v8903_v23, %v8901_v54  ;;  %v2288_v17 = vsel %vm430_vm11, %v8956_v12, %v8954_v9  ;;  %v2579_v19 = vmul.f32 %v2578_v3, %v8347_v30 }
 0x394   : > { %3627 = vrot.lane.b32.xlu1 %v3618_v31, %s7353_s17  ;;  %3625 = vrot.lane.b32.xlu0 %v3617_v1, %s7353_s17  ;;  %v13065_v31 = vld [vmem:[#allocation185_spill] sm:$0xff]  ;;  %v2178_v62 = vadd.f32 %v2174_v44, %v2140_v10  ;;  %v3642_v10 = vmul.f32 %v3640_v61, %v13032_v15  ;;  %v2580_v20 = vmul.f32 %v2578_v3, %v8371_v0 }
 0x395   : > { %v2137_v1 = vsel %vm330_vm7, %v13065_v31, %v13064_v53  ;;  %v2341_v53 = vrot.slane %v9776_v18, 2  ;;  %v2581_v31 = vmul.f32 %v2578_v3, %v8470_v11  ;;  %v2251_v54 = vsel %vm405_vm10, %v8943_v25, %v8941_v48 }
 0x396   : > { %v9763_v63 = vpop.permute.xlu1 %3110  ;;  %v9765_v41 = vpop.permute.xlu0 %3108  ;;  %v2141_v22 = vadd.f32 %v2137_v1, %v2103_v60  ;;  %v2216_v44 = vadd.f32 %v2212_v2, %v2178_v62  ;;  %v2326_v23 = vsel %vm455_vm12, %v8997_v42, %v8995_v58  ;;  %v2824_v9 = vmul.f32 %v2823_v13, %v8347_v30 }
 0x397   : > { %v2825_v12 = vmul.f32 %v2823_v13, %v8371_v0  ;;  %v3644_v62 = vmul.f32 %v3640_v61, %v13039_v21  ;;  %v3643_v3 = vmul.f32 %v3640_v61, %v7557_v37  ;;  %v2289_v48 = vsel %vm430_vm11, %v8976_v47, %v8974_v34 }
 0x398   : > { %3631 = vrot.lane.b32.xlu1 %v3620_v8, %s7353_s17  ;;  %3629 = vrot.lane.b32.xlu0 %v3619_v39, %s7353_s17  ;;  %v3641_v8 = vmul.f32 %v3640_v61, %v7537_v28  ;;  %v2179_v33 = vadd.f32 %v2175_v52, %v2141_v22  ;;  %v2254_v39 = vadd.f32 %v2250_v40, %v2216_v44  ;;  %v2343_v25 = vrot.slane %v2336_v6, 2 }
 0x399   : > { %v2826_v58 = vmul.f32 %v2823_v13, %v8470_v11  ;;  %v3664_v42 = vstv %s9779_s4  ;;  %v2585_v22 = vrot.slane %v2579_v19, 3  ;;  %v2586_v44 = vrot.slane %v2580_v20, 3  ;;  %s10208_s4 = sld [smem:[#allocation6 + $0x72]] }
 0x39a   : > { %v9793_v55 = vpop.permute.xlu1 %3114  ;;  %v9795_v56 = vpop.permute.xlu0 %3112  ;;  %v2217_v1 = vadd.f32 %v2213_v29, %v2179_v33  ;;  %v2292_v2 = vadd.f32 %v2288_v17, %v2254_v39  ;;  %v2327_v61 = vsel %vm455_vm12, %v9015_v24, %v9013_v51  ;;  %v2831_v34 = vrot.slane %v2825_v12, 4 }
 0x39b   : > { %v3666_v29 = vmul.f32 %v3664_v42, %v13032_v15  ;;  %v3665_v17 = vmul.f32 %v3664_v42, %v7537_v28  ;;  %v2342_v19 = vsel %vm716_vm3, %v2340_v43, %v2341_v53  ;;  %v2381_v51 = vsel %vm330_vm7, %v9037_v57, %v9035_v46  ;;  %v13067_v43 = vld [vmem:[#allocation20_spill] sm:$0xff] }
 0x39c   : > { %3651 = vrot.lane.b32.xlu1 %v3642_v10, %s7354_s19  ;;  %3649 = vrot.lane.b32.xlu0 %v3641_v8, %s7354_s19  ;;  %v2255_v52 = vadd.f32 %v2251_v54, %v2217_v1  ;;  %v2330_v40 = vadd.f32 %v2326_v23, %v2292_v2  ;;  %v2588_v10 = vrot.slane %v2581_v31, 3  ;;  %v2830_v8 = vrot.slane %v2824_v9, 4 }
 0x39d   : > { %v2833_v24 = vrot.slane %v2826_v58, 4  ;;  %v2344_v33 = vsel %vm716_vm3, %v2341_v53, %v2343_v25  ;;  %v9853_v31 = vstv %s9809_s11  ;;  %v2419_v54 = vsel %vm355_vm8, %v13067_v43, %v9073_v45  ;;  %v13068_v45 = vld [vmem:[#allocation18_spill] sm:$0xff]  ;;  %v13070_v25 = vld [vmem:[#allocation23_spill] sm:$0xff]  ;;  %v13071_v58 = vld [vmem:[#allocation24_spill] sm:$0xff]  ;;  %s10259_s11 = sld [smem:[#allocation6 + $0x73]] }
 0x39e   : > { %v9821_v18 = vpop.permute.xlu1 %3148  ;;  %v9823_v60 = vpop.permute.xlu0 %3146  ;;  %v2293_v47 = vadd.f32 %v2289_v48, %v2255_v52  ;;  %v2347_v20 = vadd.f32 %v2342_v19, %v2330_v40  ;;  %v9863_v46 = vsel %vm962_vm4, %v2585_v22, %v2586_v44  ;;  %v9866_v57 = vsel %vm962_vm4, %v2586_v44, %v2588_v10  ;;  %v13072_v10 = vld [vmem:[#allocation21_spill] sm:$0xff] }
 0x39f   : > { %v9869_v53 = vsel %vm1208_vm5, %v2830_v8, %v2831_v34  ;;  %v3668_v1 = vmul.f32 %v3664_v42, %v13039_v21  ;;  %v3667_v2 = vmul.f32 %v3664_v42, %v7557_v37  ;;  %v2457_v52 = vsel %vm380_vm9, %v13071_v58, %v13070_v25  ;;  %v13073_v8 = vld [vmem:[#allocation22_spill] sm:$0xff] }
 0x3a0   : > { %3655 = vrot.lane.b32.xlu1 %v3644_v62, %s7354_s19  ;;  %3653 = vrot.lane.b32.xlu0 %v3643_v3, %s7354_s19  ;;  %v2331_v39 = vadd.f32 %v2327_v61, %v2293_v47  ;;  %v2385_v23 = vadd.f32 %v2381_v51, %v2347_v20  ;;  %v3688_v62 = vstv %s9827_s10  ;;  %v13069_v3 = vld [vmem:[#allocation19_spill] sm:$0xff]  ;;  %v9885_v40 = vsel %vm1208_vm5, %v2831_v34, %v2833_v24  ;;  %s10305_s10 = sld [smem:[#allocation6 + $0x74]] }
 0x3a1   : > { %v2382_v48 = vsel %vm330_vm7, %v13069_v3, %v13068_v45  ;;  %v9889_v22 = vmul.f32 %v9853_v31, %v8347_v30  ;;  %v9893_v42 = vmul.f32 %v9853_v31, %v8371_v0  ;;  %v2420_v34 = vsel %vm355_vm8, %v13073_v8, %v13072_v10  ;;  %v13074_v47 = vld [vmem:[#allocation27_spill] sm:$0xff]  ;;  %v13081_v10 = vld [vmem:[#allocation29_spill] sm:$0xff]  ;;  %v13082_v8 = vld [vmem:[#allocation30_spill] sm:$0xff] }
 0x3a2   : > { %v9839_v6 = vpop.permute.xlu1 %3152  ;;  %v9841_v13 = vpop.permute.xlu0 %3150  ;;  %v2348_v44 = vadd.f32 %v2344_v33, %v2331_v39  ;;  %v2423_v61 = vadd.f32 %v2419_v54, %v2385_v23  ;;  %v3690_v19 = vmul.f32 %v3688_v62, %v13032_v15  ;;  %v3689_v51 = vmul.f32 %v3688_v62, %v7537_v28  ;;  %v13078_v23 = vld [vmem:[#allocation25_spill] sm:$0xff]  ;;  %v13080_v45 = vld [vmem:[#allocation31_spill] sm:$0xff] }
 0x3a3   : > { %13066 = vst [vmem:[#allocation73_spill] sm:$0xff] %v9841_v13  ;;  %v3692_v43 = vmul.f32 %v3688_v62, %v13039_v21  ;;  %v3729_v54 = vstv %s9845_s20  ;;  %v2533_v3 = vsel %vm430_vm11, %v13080_v45, %v9192_v49  ;;  %v13088_v45 = vld [vmem:[#allocation17_spill] sm:$0xff]  ;;  %s6925_s20 = sshll.u32 %s7518_s5, 5 }
 0x3a4   : > { %3675 = vrot.lane.b32.xlu1 %v3666_v29, %s7355_s27  ;;  %3673 = vrot.lane.b32.xlu0 %v3665_v17, %s7355_s27  ;;  %v13075_v29 = vld [vmem:[#allocation28_spill] sm:$0xff]  ;;  %v2386_v24 = vadd.f32 %v2382_v48, %v2348_v44  ;;  %v2461_v20 = vadd.f32 %v2457_v52, %v2423_v61  ;;  %v3733_v25 = vmul.f32 %v3729_v54, %v13039_v21  ;;  %v3767_v61 = vstv %s9857_s22  ;;  %s10329_s22 = scalar_lea.vmem [#allocation9], %s6925_s20  ;;  %s7054_s20 = sld [smem:[#allocation6 + $0x80]] }
 0x3a5   : > { %v2495_v17 = vsel %vm405_vm10, %v13075_v29, %v13074_v47  ;;  %v3732_v48 = vmul.f32 %v3729_v54, %v7557_v37  ;;  %v3691_v44 = vmul.f32 %v3688_v62, %v7557_v37  ;;  %v2496_v47 = vsel %vm405_vm10, %v13082_v8, %v13081_v10  ;;  %v13083_v29 = vld [vmem:[#allocation34_spill] sm:$0xff]  ;;  %v13087_v62 = vld [vmem:[#allocation16_spill] sm:$0xff]  ;;  %v13090_v10 = vld [vmem:[#allocation33_spill] sm:$0xff] }
 0x3a6   : > { %v9871_v9 = vpop.permute.xlu1 %3186  ;;  %v9873_v12 = vpop.permute.xlu0 %3184  ;;  %v2424_v58 = vadd.f32 %v2420_v34, %v2386_v24  ;;  %v2499_v52 = vadd.f32 %v2495_v17, %v2461_v20  ;;  %v3730_v34 = vmul.f32 %v3729_v54, %v7537_v28  ;;  %v3735_v20 = vmul.f32 %v3729_v54, %v13087_v62 }
 0x3a7   : > { %v3743_v13 = vrot.slane %v3732_v48, 1  ;;  %v3769_v48 = vmul.f32 %v3767_v61, %v13032_v15 }
 0x3a8   : > { %3679 = vrot.lane.b32.xlu1 %v3668_v1, %s7355_s27  ;;  %3677 = vrot.lane.b32.xlu0 %v3667_v2, %s7355_s27  ;;  %v13079_v1 = vld [vmem:[#allocation26_spill] sm:$0xff]  ;;  %v2537_v24 = vadd.f32 %v2533_v3, %v2499_v52  ;;  %v13091_v52 = vld [vmem:[#allocation36_spill] sm:$0xff] }
 0x3a9   : > { %v2458_v2 = vsel %vm380_vm9, %v13079_v1, %v13078_v23  ;;  %v13084_v23 = vld [vmem:[#allocation35_spill] sm:$0xff]  ;;  %v3731_v1 = vmul.f32 %v3729_v54, %v13032_v15 }
 0x3aa   : > { %v9905_v33 = vpop.permute.xlu1 %3190  ;;  %v9907_v39 = vpop.permute.xlu0 %3188  ;;  %v2571_v49 = vsel %vm455_vm12, %v13084_v23, %v13083_v29  ;;  %v2462_v17 = vadd.f32 %v2458_v2, %v2424_v58  ;;  %v3075_v29 = vrot.slane %v9889_v22, 5  ;;  %v3746_v23 = vrot.slane %v3733_v25, 1  ;;  %v13096_v58 = vld [vmem:[#allocation39_spill] sm:$0xff] }
 0x3ab   : > { %13076 = vst [vmem:[#allocation74_spill] sm:$0xff] %v9905_v33  ;;  %13077 = vst [vmem:[#allocation75_spill] sm:$0xff] %v9907_v39  ;;  %v3734_v39 = vmul.f32 %v3729_v54, %v13088_v45  ;;  %v13089_v33 = vld [vmem:[#allocation32_spill] sm:$0xff]  ;;  %v2575_v3 = vadd.f32 %v2571_v49, %v2537_v24  ;;  %v9947_v54 = vmul.f32 %v3767_v61, %v13039_v21  ;;  %v3745_v22 = vrot.slane %v3731_v1, 1  ;;  %v13095_v24 = vld [vmem:[#allocation38_spill] sm:$0xff] }
 0x3ac   : > { %3699 = vrot.lane.b32.xlu1 %v3690_v19, %s7356_s6  ;;  %3697 = vrot.lane.b32.xlu0 %v3689_v51, %s7356_s6  ;;  %v2534_v8 = vsel %vm430_vm11, %v13090_v10, %v13089_v33  ;;  %v2500_v2 = vadd.f32 %v2496_v47, %v2462_v17  ;;  %v3742_v25 = vrot.slane %v3730_v34, 1  ;;  %v9955_v47 = vmul.f32 %v9853_v31, %v8470_v11 }
 0x3ad   : > { %v3748_v17 = vrot.slane %v3734_v39, 1  ;;  %v3747_v1 = vsel %vm470_vm2, %v3745_v22, %v3746_v23  ;;  %v2592_v31 = vadd.f32 %v9863_v46, %v2575_v3  ;;  %v3784_v39 = vrot.slane %v9947_v54, 1 }
 0x3ae   : > { %v9931_v19 = vpop.permute.xlu1 %3224  ;;  %v9933_v51 = vpop.permute.xlu0 %3222  ;;  %v2538_v10 = vadd.f32 %v2534_v8, %v2500_v2  ;;  %v3744_v34 = vsel %vm470_vm2, %v3742_v25, %v3743_v13  ;;  %v13097_v2 = vld [vmem:[#allocation42_spill] sm:$0xff]  ;;  %v13099_v22 = vrot.slane %v9893_v42, 5  ;;  %v3773_v46 = vmul.f32 %v3767_v61, %v13087_v62 }
 0x3af   : > { %13085 = vst [vmem:[#allocation76_spill] sm:$0xff] %v9931_v19  ;;  %13086 = vst [vmem:[#allocation77_spill] sm:$0xff] %v9933_v51  ;;  %v13092_v51 = vld [vmem:[#allocation37_spill] sm:$0xff]  ;;  %v2626_v19 = vsel %vm330_vm7, %v13096_v58, %v13095_v24  ;;  %v13098_v58 = vld [vmem:[#allocation43_spill] sm:$0xff] }
 0x3b0   : > { %3703 = vrot.lane.b32.xlu1 %v3692_v43, %s7356_s6  ;;  %3701 = vrot.lane.b32.xlu0 %v3691_v44, %s7356_s6  ;;  %v2572_v33 = vsel %vm455_vm12, %v13092_v51, %v13091_v52  ;;  %v3750_v44 = vrot.slane %v3735_v20, 1  ;;  %v3770_v51 = vmul.f32 %v3767_v61, %v7557_v37  ;;  %v3768_v20 = vmul.f32 %v3767_v61, %v7537_v28 }
 0x3b1   : > { %v2576_v8 = vadd.f32 %v2572_v33, %v2538_v10  ;;  %v2664_v52 = vsel %vm355_vm8, %v13098_v58, %v13097_v2  ;;  %v9978_v25 = vsel %vm255_vm1, %v3075_v29, %v13099_v22  ;;  %v3783_v33 = vrot.slane %v3769_v48, 1  ;;  %v13102_v2 = vld [vmem:[#allocation40_spill] sm:$0xff]  ;;  %v13103_v58 = vld [vmem:[#allocation41_spill] sm:$0xff]  ;;  %v13104_v29 = vld [vmem:[#allocation46_spill] sm:$0xff] }
 0x3b2   : > { %v9957_v49 = vpop.permute.xlu1 %3228  ;;  %v9959_v43 = vpop.permute.xlu0 %3226  ;;  %v2630_v3 = vadd.f32 %v2626_v19, %v2592_v31  ;;  %v3751_v54 = vsel %vm470_vm2, %v3746_v23, %v3750_v44  ;;  %v13105_v22 = vld [vmem:[#allocation47_spill] sm:$0xff]  ;;  %v3805_v19 = vstv %s9941_s29  ;;  %v13106_v23 = vld [vmem:[#allocation44_spill] sm:$0xff]  ;;  %v13107_v44 = vld [vmem:[#allocation45_spill] sm:$0xff]  ;;  %s7043_s29 = sld [smem:[#allocation6 + $0x75]] }
 0x3b3   : > { %13093 = vst [vmem:[#allocation78_spill] sm:$0xff] %v9957_v49  ;;  %13094 = vst [vmem:[#allocation79_spill] sm:$0xff] %v9959_v43  ;;  %v2627_v43 = vsel %vm330_vm7, %v13103_v58, %v13102_v2  ;;  %v2702_v48 = vsel %vm380_vm9, %v13105_v22, %v13104_v29  ;;  %v3781_v49 = vrot.slane %v3770_v51, 1  ;;  %v2593_v31 = vadd.f32 %v9866_v57, %v2576_v8  ;;  %v13108_v2 = vld [vmem:[#allocation50_spill] sm:$0xff]  ;;  %v13109_v58 = vld [vmem:[#allocation51_spill] sm:$0xff] }
 0x3b4   : > { %3754 = vrot.lane.b32.xlu1 %v3747_v1, %s7351_s28  ;;  %3752 = vrot.lane.b32.xlu0 %v3744_v34, %s7351_s28  ;;  %v3749_v1 = vsel %vm470_vm2, %v3743_v13, %v3748_v17  ;;  %v3772_v34 = vmul.f32 %v3767_v61, %v13088_v45  ;;  %v3785_v13 = vsel %vm470_vm2, %v3783_v33, %v3784_v39  ;;  %v3780_v61 = vrot.slane %v3768_v20, 1 }
 0x3b5   : > { %v2665_v17 = vsel %vm355_vm8, %v13107_v44, %v13106_v23  ;;  %v2740_v51 = vsel %vm405_vm10, %v13109_v58, %v13108_v2  ;;  %v3788_v29 = vrot.slane %v3773_v46, 1  ;;  %v10008_v22 = vmul.f32 %v3805_v19, %v13039_v21  ;;  %v13114_v44 = vld [vmem:[#allocation54_spill] sm:$0xff]  ;;  %v13115_v46 = vld [vmem:[#allocation55_spill] sm:$0xff] }
 0x3b6   : > { %v9981_v10 = vpop.permute.xlu1 %3262  ;;  %v9983_v24 = vpop.permute.xlu0 %3260  ;;  %v2631_v57 = vadd.f32 %v2627_v43, %v2593_v31  ;;  %v3786_v20 = vrot.slane %v3772_v34, 1  ;;  %v2778_v2 = vsel %vm430_vm11, %v13115_v46, %v13114_v44  ;;  %v3782_v58 = vsel %vm470_vm2, %v3780_v61, %v3781_v49  ;;  %v13118_v46 = vld [vmem:[#allocation58_spill] sm:$0xff]  ;;  %v13119_v61 = vld [vmem:[#allocation59_spill] sm:$0xff] }
 0x3b7   : > { %13100 = vst [vmem:[#allocation80_spill] sm:$0xff] %v9981_v10  ;;  %13101 = vst [vmem:[#allocation81_spill] sm:$0xff] %v9983_v24  ;;  %v2668_v24 = vadd.f32 %v2664_v52, %v2630_v3  ;;  %v3807_v3 = vmul.f32 %v3805_v19, %v13032_v15  ;;  %v10025_v43 = vmul.f32 %v3805_v19, %v7557_v37  ;;  %v3078_v31 = vrot.slane %v9955_v47, 5 }
 0x3b8   : > { %3758 = vrot.lane.b32.xlu1 %v3751_v54, %s7351_s28  ;;  %3756 = vrot.lane.b32.xlu0 %v3749_v1, %s7351_s28  ;;  %v13112_v54 = vld [vmem:[#allocation48_spill] sm:$0xff]  ;;  %v13113_v1 = vld [vmem:[#allocation49_spill] sm:$0xff]  ;;  %v3806_v34 = vmul.f32 %v3805_v19, %v7537_v28 }
 0x3b9   : > { %v2706_v8 = vadd.f32 %v2702_v48, %v2668_v24  ;;  %v2703_v23 = vsel %vm380_vm9, %v13113_v1, %v13112_v54  ;;  %v2669_v24 = vadd.f32 %v2665_v17, %v2631_v57  ;;  %v13116_v54 = vld [vmem:[#allocation52_spill] sm:$0xff]  ;;  %v13117_v1 = vld [vmem:[#allocation53_spill] sm:$0xff]  ;;  %v3789_v17 = vsel %vm470_vm2, %v3784_v39, %v3788_v29 }
 0x3ba   : > { %v10012_v52 = vpop.permute.xlu1 %3266  ;;  %v10014_v33 = vpop.permute.xlu0 %3264  ;;  %v2741_v44 = vsel %vm405_vm10, %v13117_v1, %v13116_v54  ;;  %v13120_v54 = vld [vmem:[#allocation56_spill] sm:$0xff]  ;;  %v13121_v1 = vld [vmem:[#allocation57_spill] sm:$0xff]  ;;  %v3810_v39 = vmul.f32 %v3805_v19, %v13088_v45  ;;  %v3843_v29 = vstv %s9995_s8  ;;  %s7044_s8 = sld [smem:[#allocation6 + $0x76]] }
 0x3bb   : > { %13110 = vst [vmem:[#allocation82_spill] sm:$0xff] %v10012_v52  ;;  %13111 = vst [vmem:[#allocation83_spill] sm:$0xff] %v10014_v33  ;;  %v2744_v48 = vadd.f32 %v2740_v51, %v2706_v8  ;;  %v2816_v33 = vsel %vm455_vm12, %v13119_v61, %v13118_v46  ;;  %v3822_v51 = vrot.slane %v10008_v22, 1  ;;  %v2707_v47 = vadd.f32 %v2703_v23, %v2669_v24  ;;  %v13123_v24 = vld [vmem:[#allocation61_spill] sm:$0xff] }
 0x3bc   : > { %3792 = vrot.lane.b32.xlu1 %v3785_v13, %s7352_s30  ;;  %3790 = vrot.lane.b32.xlu0 %v3782_v58, %s7352_s30  ;;  %v3787_v58 = vsel %vm470_vm2, %v3781_v49, %v3786_v20  ;;  %v3811_v52 = vmul.f32 %v3805_v19, %v13087_v62  ;;  %v2779_v10 = vsel %vm430_vm11, %v13121_v1, %v13120_v54  ;;  %v3819_v46 = vrot.slane %v10025_v43, 1  ;;  %v13122_v20 = vld [vmem:[#allocation60_spill] sm:$0xff]  ;;  %v13125_v54 = vld [vmem:[#allocation62_spill] sm:$0xff] }
 0x3bd   : > { %v2782_v57 = vadd.f32 %v2778_v2, %v2744_v48  ;;  %v2745_v22 = vadd.f32 %v2741_v44, %v2707_v47  ;;  %v3821_v2 = vrot.slane %v3807_v3, 1  ;;  %v10054_v49 = vmul.f32 %v3843_v29, %v13039_v21 }
 0x3be   : > { %v10039_v13 = vpop.permute.xlu1 %3300  ;;  %v10041_v8 = vpop.permute.xlu0 %3298  ;;  %v2817_v48 = vsel %vm455_vm12, %v13123_v24, %v13122_v20  ;;  %v13124_v61 = vrot.slane %v9893_v42, 5  ;;  %v3818_v19 = vrot.slane %v3806_v34, 1  ;;  %v10065_v44 = vstv %s10010_s9  ;;  %v13126_v42 = vld [vmem:[#allocation63_spill] sm:$0xff]  ;;  %s7046_s9 = sld [smem:[#allocation6 + $0x78]] }
 0x3bf   : > { %v2820_v23 = vadd.f32 %v2816_v33, %v2782_v57  ;;  %v2783_v33 = vadd.f32 %v2779_v10, %v2745_v22  ;;  %v3823_v47 = vsel %vm470_vm2, %v3821_v2, %v3822_v51  ;;  %v3826_v57 = vrot.slane %v3811_v52, 1  ;;  %v13127_v2 = vld [vmem:[#allocation66_spill] sm:$0xff] }
 0x3c0   : > { %3796 = vrot.lane.b32.xlu1 %v3789_v17, %s7352_s30  ;;  %3794 = vrot.lane.b32.xlu0 %v3787_v58, %s7352_s30  ;;  %v10062_v43 = vsel %vm255_vm1, %v13124_v61, %v3078_v31  ;;  %v3845_v58 = vmul.f32 %v3843_v29, %v13032_v15  ;;  %v2871_v31 = vsel %vm330_vm7, %v13126_v42, %v13125_v54  ;;  %v3824_v1 = vrot.slane %v3810_v39, 1  ;;  %v13128_v54 = vld [vmem:[#allocation64_spill] sm:$0xff]  ;;  %v13129_v42 = vld [vmem:[#allocation65_spill] sm:$0xff] }
 0x3c1   : > { %v3820_v34 = vsel %vm470_vm2, %v3818_v19, %v3819_v46  ;;  %v3846_v20 = vmul.f32 %v3843_v29, %v7557_v37  ;;  %v2821_v24 = vadd.f32 %v2817_v48, %v2783_v33  ;;  %v2837_v10 = vadd.f32 %v9869_v53, %v2820_v23 }
 0x3c2   : > { %v10069_v17 = vpop.permute.xlu1 %3304  ;;  %v10071_v3 = vpop.permute.xlu0 %3302  ;;  %v3860_v52 = vrot.slane %v10054_v49, 1  ;;  %v3844_v22 = vmul.f32 %v3843_v29, %v7537_v28  ;;  %v2909_v61 = vsel %vm355_vm8, %v13127_v2, %v9560_v36  ;;  %v10092_v39 = vmul.f32 %v10065_v44, %v8347_v30 }
 0x3c3   : > { %v10096_v53 = vmul.f32 %v10065_v44, %v8371_v0  ;;  %v3849_v23 = vmul.f32 %v3843_v29, %v13087_v62  ;;  %v2875_v48 = vadd.f32 %v2871_v31, %v2837_v10  ;;  %v3827_v33 = vsel %vm470_vm2, %v3822_v51, %v3826_v57 }
 0x3c4   : > { %3830 = vrot.lane.b32.xlu1 %v3823_v47, %s7353_s17  ;;  %3828 = vrot.lane.b32.xlu0 %v3820_v34, %s7353_s17  ;;  %v3859_v47 = vrot.slane %v3845_v58, 1  ;;  %v3848_v36 = vmul.f32 %v3843_v29, %v13088_v45  ;;  %v2872_v34 = vsel %vm330_vm7, %v13129_v42, %v13128_v54  ;;  %v2947_v2 = vsel %vm380_vm9, %v9602_v50, %v9600_v27 }
 0x3c5   : > { %v3825_v31 = vsel %vm470_vm2, %v3819_v46, %v3824_v1  ;;  %v3857_v10 = vrot.slane %v3846_v20, 1  ;;  %v2838_v0 = vadd.f32 %v9885_v40, %v2821_v24  ;;  %v2913_v30 = vadd.f32 %v2909_v61, %v2875_v48  ;;  %v13131_v61 = vld [vmem:[#allocation70_spill] sm:$0xff] }
 0x3c6   : > { %v10099_v49 = vpop.permute.xlu1 %3355  ;;  %v10101_v19 = vpop.permute.xlu0 %3353  ;;  %v3861_v51 = vsel %vm470_vm2, %v3859_v47, %v3860_v52  ;;  %v3856_v29 = vrot.slane %v3844_v22, 1  ;;  %v2910_v57 = vsel %vm355_vm8, %v9582_v59, %v9580_v5  ;;  %v2985_v27 = vsel %vm405_vm10, %v9646_v26, %v9644_v32  ;;  %v13130_v59 = vld [vmem:[#allocation69_spill] sm:$0xff]  ;;  %v13132_v47 = vld [vmem:[#allocation67_spill] sm:$0xff] }
 0x3c7   : > { %v3864_v50 = vrot.slane %v3849_v23, 1  ;;  %v3881_v46 = vstv %s10067_s23  ;;  %v2876_v40 = vadd.f32 %v2872_v34, %v2838_v0  ;;  %v2951_v58 = vadd.f32 %v2947_v2, %v2913_v30  ;;  %s7047_s23 = sld [smem:[#allocation6 + $0x79]] }
 0x3c8   : > { %3834 = vrot.lane.b32.xlu1 %v3827_v33, %s7353_s17  ;;  %3832 = vrot.lane.b32.xlu0 %v3825_v31, %s7353_s17  ;;  %v3862_v24 = vrot.slane %v3848_v36, 1  ;;  %v3885_v22 = vmul.f32 %v3881_v46, %v13039_v21  ;;  %v2948_v5 = vsel %vm380_vm9, %v9625_v14, %v9623_v38  ;;  %v3023_v32 = vsel %vm430_vm11, %v13131_v61, %v13130_v59  ;;  %v13133_v36 = vld [vmem:[#allocation68_spill] sm:$0xff] }
 0x3c9   : > { %v3858_v26 = vsel %vm470_vm2, %v3856_v29, %v3857_v10  ;;  %v3884_v0 = vmul.f32 %v3881_v46, %v7557_v37  ;;  %v2914_v30 = vadd.f32 %v2910_v57, %v2876_v40  ;;  %v2989_v23 = vadd.f32 %v2985_v27, %v2951_v58  ;;  %v13134_v27 = vld [vmem:[#allocation71_spill] sm:$0xff]  ;;  %v13135_v40 = vld [vmem:[#allocation72_spill] sm:$0xff] }
 0x3ca   : > { %v10123_v1 = vpop.permute.xlu1 %3359  ;;  %v10125_v20 = vpop.permute.xlu0 %3357  ;;  %v3883_v48 = vmul.f32 %v3881_v46, %v13032_v15  ;;  %v3919_v33 = vstv %s10085_s26  ;;  %v2986_v38 = vsel %vm405_vm10, %v13133_v36, %v13132_v47  ;;  %v3061_v14 = vsel %vm455_vm12, %v9724_v7, %v9722_v16  ;;  %s7048_s26 = sld [smem:[#allocation6 + $0x7a]] }
 0x3cb   : > { %v3865_v54 = vsel %vm470_vm2, %v3860_v52, %v3864_v50  ;;  %v3882_v42 = vmul.f32 %v3881_v46, %v7537_v28  ;;  %v2952_v34 = vadd.f32 %v2948_v5, %v2914_v30  ;;  %v3027_v2 = vadd.f32 %v3023_v32, %v2989_v23 }
 0x3cc   : > { %3868 = vrot.lane.b32.xlu1 %v3861_v51, %s7354_s19  ;;  %3866 = vrot.lane.b32.xlu0 %v3858_v26, %s7354_s19  ;;  %v3898_v29 = vrot.slane %v3885_v22, 1  ;;  %v3887_v57 = vmul.f32 %v3881_v46, %v13087_v62  ;;  %v3024_v58 = vsel %vm430_vm11, %v13135_v40, %v13134_v27  ;;  %v3863_v16 = vsel %vm470_vm2, %v3857_v10, %v3862_v24 }
 0x3cd   : > { %v3895_v7 = vrot.slane %v3884_v0, 1  ;;  %v3886_v52 = vmul.f32 %v3881_v46, %v13088_v45  ;;  %v2990_v50 = vadd.f32 %v2986_v38, %v2952_v34  ;;  %v3065_v5 = vadd.f32 %v3061_v14, %v3027_v2 }
 0x3ce   : > { %v10148_v31 = vpop.permute.xlu1 %3393  ;;  %v10150_v51 = vpop.permute.xlu0 %3391  ;;  %v3897_v22 = vrot.slane %v3883_v48, 1  ;;  %v10163_v59 = vmul.f32 %v3919_v33, %v13039_v21  ;;  %v3062_v61 = vsel %vm455_vm12, %v9746_v35, %v9744_v4  ;;  %v10170_v10 = vmul.f32 %v10065_v44, %v8470_v11 }
 0x3cf   : > { %v3894_v24 = vrot.slane %v3882_v42, 1  ;;  %v3921_v46 = vmul.f32 %v3919_v33, %v13032_v15  ;;  %v3028_v32 = vadd.f32 %v3024_v58, %v2990_v50  ;;  %v3320_v26 = vrot.slane %v10092_v39, 6 }
 0x3d0   : > { %3872 = vrot.lane.b32.xlu1 %v3865_v54, %s7354_s19  ;;  %3870 = vrot.lane.b32.xlu0 %v3863_v16, %s7354_s19  ;;  %v3899_v23 = vsel %vm470_vm2, %v3897_v22, %v3898_v29  ;;  %v3902_v48 = vrot.slane %v3887_v57, 1  ;;  %v3116_v4 = vsel %vm330_vm7, %v9765_v41, %v9763_v63  ;;  %v3900_v44 = vrot.slane %v3886_v52, 1 }
 0x3d1   : > { %v3896_v35 = vsel %vm470_vm2, %v3894_v24, %v3895_v7  ;;  %v3922_v47 = vmul.f32 %v3919_v33, %v7557_v37  ;;  %v3066_v36 = vadd.f32 %v3062_v61, %v3028_v32  ;;  %v3082_v38 = vadd.f32 %v9978_v25, %v3065_v5 }
 0x3d2   : > { %v10174_v0 = vpop.permute.xlu1 %3397  ;;  %v10176_v30 = vpop.permute.xlu0 %3395  ;;  %v3936_v14 = vrot.slane %v10163_v59, 1  ;;  %v3920_v54 = vmul.f32 %v3919_v33, %v7537_v28  ;;  %v3154_v63 = vsel %vm355_vm8, %v9823_v60, %v9821_v18  ;;  %v3321_v41 = vrot.slane %v10096_v53, 6 }
 0x3d3   : > { %v3935_v42 = vrot.slane %v3921_v46, 1  ;;  %v3925_v34 = vmul.f32 %v3919_v33, %v13087_v62  ;;  %v3120_v2 = vadd.f32 %v3116_v4, %v3082_v38  ;;  %v3903_v27 = vsel %vm470_vm2, %v3898_v29, %v3902_v48  ;;  %v13139_v48 = vld [vmem:[#allocation74_spill] sm:$0xff]  ;;  %v13140_v4 = vld [vmem:[#allocation75_spill] sm:$0xff] }
 0x3d4   : > { %3906 = vrot.lane.b32.xlu1 %v3899_v23, %s7355_s27  ;;  %3904 = vrot.lane.b32.xlu0 %v3896_v35, %s7355_s27  ;;  %v3924_v40 = vmul.f32 %v3919_v33, %v13088_v45  ;;  %v3974_v58 = vstv %s10153_s7  ;;  %v3117_v16 = vsel %vm330_vm7, %v9795_v56, %v9793_v55  ;;  %v3192_v18 = vsel %vm380_vm9, %v9873_v12, %v9871_v9  ;;  %v13136_v55 = vld [vmem:[#allocation73_spill] sm:$0xff]  ;;  %v13137_v9 = vld [vmem:[#allocation76_spill] sm:$0xff]  ;;  %s7049_s7 = sld [smem:[#allocation6 + $0x7b]] }
 0x3d5   : > { %v3901_v60 = vsel %vm470_vm2, %v3895_v7, %v3900_v44  ;;  %v3933_v52 = vrot.slane %v3922_v47, 1  ;;  %v3083_v50 = vadd.f32 %v10062_v43, %v3066_v36  ;;  %v3158_v5 = vadd.f32 %v3154_v63, %v3120_v2  ;;  %v13138_v12 = vld [vmem:[#allocation77_spill] sm:$0xff]  ;;  %v13141_v35 = vld [vmem:[#allocation80_spill] sm:$0xff]  ;;  %v13143_v2 = vld [vmem:[#allocation78_spill] sm:$0xff] }
 0x3d6   : > { %v10194_v57 = vpop.permute.xlu1 %3431  ;;  %v10196_v25 = vpop.permute.xlu0 %3429  ;;  %v3937_v33 = vsel %vm470_vm2, %v3935_v42, %v3936_v14  ;;  %v3932_v29 = vrot.slane %v3920_v54, 1  ;;  %v3155_v56 = vsel %vm355_vm8, %v13136_v55, %v9839_v6  ;;  %v3230_v7 = vsel %vm405_vm10, %v13138_v12, %v13137_v9  ;;  %v13142_v44 = vld [vmem:[#allocation81_spill] sm:$0xff]  ;;  %v13146_v9 = vld [vmem:[#allocation83_spill] sm:$0xff] }
 0x3d7   : > { %v3940_v22 = vrot.slane %v3925_v34, 1  ;;  %v3976_v59 = vmul.f32 %v3974_v58, %v13032_v15  ;;  %v3121_v43 = vadd.f32 %v3117_v16, %v3083_v50  ;;  %v3196_v61 = vadd.f32 %v3192_v18, %v3158_v5 }
 0x3d8   : > { %3910 = vrot.lane.b32.xlu1 %v3903_v27, %s7355_s27  ;;  %3908 = vrot.lane.b32.xlu0 %v3901_v60, %s7355_s27  ;;  %v3938_v32 = vrot.slane %v3924_v40, 1  ;;  %v3978_v23 = vmul.f32 %v3974_v58, %v13039_v21  ;;  %v3193_v6 = vsel %vm380_vm9, %v13140_v4, %v13139_v48  ;;  %v3268_v47 = vsel %vm430_vm11, %v13142_v44, %v13141_v35  ;;  %v13144_v27 = vld [vmem:[#allocation79_spill] sm:$0xff] }
 0x3d9   : > { %v3934_v36 = vsel %vm470_vm2, %v3932_v29, %v3933_v52  ;;  %v3977_v38 = vmul.f32 %v3974_v58, %v7557_v37  ;;  %v3159_v54 = vadd.f32 %v3155_v56, %v3121_v43  ;;  %v3234_v63 = vadd.f32 %v3230_v7, %v3196_v61  ;;  %v13145_v56 = vld [vmem:[#allocation82_spill] sm:$0xff] }
 0x3da   : > { %v10221_v24 = vpop.permute.xlu1 %3435  ;;  %v10223_v46 = vpop.permute.xlu0 %3433  ;;  %v3323_v42 = vrot.slane %v10170_v10, 6  ;;  %v3975_v34 = vmul.f32 %v3974_v58, %v7537_v28  ;;  %v3231_v40 = vsel %vm405_vm10, %v13144_v27, %v13143_v2  ;;  %v3306_v16 = vsel %vm455_vm12, %v10041_v8, %v10039_v13 }
 0x3db   : > { %v3941_v18 = vsel %vm470_vm2, %v3936_v14, %v3940_v22  ;;  %v3980_v60 = vmul.f32 %v3974_v58, %v13087_v62  ;;  %v3197_v10 = vadd.f32 %v3193_v6, %v3159_v54  ;;  %v3272_v50 = vadd.f32 %v3268_v47, %v3234_v63 }
 0x3dc   : > { %3944 = vrot.lane.b32.xlu1 %v3937_v33, %s7356_s6  ;;  %3942 = vrot.lane.b32.xlu0 %v3934_v36, %s7356_s6  ;;  %v3939_v29 = vsel %vm470_vm2, %v3933_v52, %v3938_v32  ;;  %v3979_v55 = vmul.f32 %v3974_v58, %v13088_v45  ;;  %v3269_v12 = vsel %vm430_vm11, %v13146_v9, %v13145_v56  ;;  %v3991_v7 = vrot.slane %v3978_v23, 2 }
 0x3dd   : > { %v3988_v43 = vrot.slane %v3977_v38, 2  ;;  %v4012_v61 = vstv %s10208_s4  ;;  %v3235_v13 = vadd.f32 %v3231_v40, %v3197_v10  ;;  %v3310_v8 = vadd.f32 %v3306_v16, %v3272_v50  ;;  %s7050_s4 = sld [smem:[#allocation6 + $0x7c]] }
 0x3de   : > { %v3470_v5 = vpop.permute.xlu1 %3469  ;;  %v3468_v33 = vpop.permute.xlu0 %3467  ;;  %v3322_v14 = vsel %vm1699_vm6, %v3320_v26, %v3321_v41  ;;  %v3990_v58 = vrot.slane %v3976_v59, 2  ;;  %v3307_v52 = vsel %vm455_vm12, %v10071_v3, %v10069_v17  ;;  %v3987_v22 = vrot.slane %v3975_v34, 2 }
 0x3df   : > { %v3995_v32 = vrot.slane %v3980_v60, 2  ;;  %v4016_v23 = vmul.f32 %v4012_v61, %v13039_v21  ;;  %v3273_v48 = vadd.f32 %v3269_v12, %v3235_v13  ;;  %v3993_v6 = vrot.slane %v3979_v55, 2 }
 0x3e0   : > { %3948 = vrot.lane.b32.xlu1 %v3941_v18, %s7356_s6  ;;  %3946 = vrot.lane.b32.xlu0 %v3939_v29, %s7356_s6  ;;  %v4014_v26 = vmul.f32 %v4012_v61, %v13032_v15  ;;  %v10267_v35 = vmul.f32 %v4012_v61, %v7557_v37  ;;  %v3361_v59 = vsel %vm330_vm7, %v10101_v19, %v10099_v49  ;;  %v4050_v50 = vstv %s10259_s11  ;;  %s7051_s11 = sld [smem:[#allocation6 + $0x7d]] }
 0x3e1   : > { %v3992_v44 = vsel %vm716_vm3, %v3990_v58, %v3991_v7  ;;  %v3989_v17 = vsel %vm716_vm3, %v3987_v22, %v3988_v43  ;;  %v4013_v3 = vmul.f32 %v4012_v61, %v7537_v28  ;;  %v3311_v47 = vadd.f32 %v3307_v52, %v3273_v48 }
 0x3e2   : > { %v3474_v4 = vpop.permute.xlu1 %3473  ;;  %v3472_v39 = vpop.permute.xlu0 %3471  ;;  %v3327_v36 = vadd.f32 %v3322_v14, %v3310_v8  ;;  %v4018_v38 = vmul.f32 %v4012_v61, %v13087_v62  ;;  %v3324_v54 = vsel %vm1699_vm6, %v3321_v41, %v3323_v42  ;;  %v3399_v49 = vsel %vm355_vm8, %v10150_v51, %v10148_v31 }
 0x3e3   : > { %v3996_v19 = vsel %vm716_vm3, %v3991_v7, %v3995_v32  ;;  %v4029_v63 = vrot.slane %v4016_v23, 2  ;;  %v3994_v40 = vsel %vm716_vm3, %v3988_v43, %v3993_v6  ;;  %v4028_v16 = vrot.slane %v4014_v26, 2 }
 0x3e4   : > { %3999 = vrot.lane.b32.xlu1 %v3992_v44, %s7351_s28  ;;  %3997 = vrot.lane.b32.xlu0 %v3989_v17, %s7351_s28  ;;  %v3365_v34 = vadd.f32 %v3361_v59, %v3327_v36  ;;  %v4026_v18 = vrot.slane %v10267_v35, 2  ;;  %v3362_v53 = vsel %vm330_vm7, %v10125_v20, %v10123_v1  ;;  %v3437_v31 = vsel %vm380_vm9, %v10196_v25, %v10194_v57 }
 0x3e5   : > { %v4025_v51 = vrot.slane %v4013_v3, 2  ;;  %v4017_v41 = vmul.f32 %v4012_v61, %v13088_v45  ;;  %v3328_v42 = vadd.f32 %v3324_v54, %v3311_v47  ;;  %v4033_v10 = vrot.slane %v4018_v38, 2 }
 0x3e6   : > { %v3508_v2 = vpop.permute.xlu1 %3507  ;;  %v3506_v27 = vpop.permute.xlu0 %3505  ;;  %v3403_v60 = vadd.f32 %v3399_v49, %v3365_v34  ;;  %v3400_v29 = vsel %vm355_vm8, %v10176_v30, %v10174_v0  ;;  %v3475_v1 = vsel %vm405_vm10, %v3468_v33, %v3470_v5  ;;  %v4030_v20 = vsel %vm716_vm3, %v4028_v16, %v4029_v63 }
 0x3e7   : > { %v10303_v57 = vmul.f32 %v4050_v50, %v13039_v21  ;;  %v3366_v25 = vadd.f32 %v3362_v53, %v3328_v42  ;;  %v4027_v12 = vsel %vm716_vm3, %v4025_v51, %v4026_v18  ;;  %v4053_v7 = vmul.f32 %v4050_v50, %v7557_v37 }
 0x3e8   : > { %4003 = vrot.lane.b32.xlu1 %v3996_v19, %s7351_s28  ;;  %4001 = vrot.lane.b32.xlu0 %v3994_v40, %s7351_s28  ;;  %v3441_v55 = vadd.f32 %v3437_v31, %v3403_v60  ;;  %v3438_v0 = vsel %vm380_vm9, %v10223_v46, %v10221_v24  ;;  %v3513_v30 = vsel %vm430_vm11, %v3506_v27, %v3508_v2  ;;  %v4031_v5 = vrot.slane %v4017_v41, 2 }
 0x3e9   : > { %v4052_v33 = vmul.f32 %v4050_v50, %v13032_v15  ;;  %v3404_v43 = vadd.f32 %v3400_v29, %v3366_v25  ;;  %v4051_v13 = vmul.f32 %v4050_v50, %v7537_v28  ;;  %v3476_v8 = vsel %vm405_vm10, %v3472_v39, %v3474_v4 }
 0x3ea   : > { %v3512_v56 = vpop.permute.xlu1 %3511  ;;  %v3510_v9 = vpop.permute.xlu0 %3509  ;;  %v3479_v61 = vadd.f32 %v3475_v1, %v3441_v55  ;;  %v4034_v14 = vsel %vm716_vm3, %v4029_v63, %v4033_v10  ;;  %v4067_v24 = vrot.slane %v10303_v57, 2  ;;  %v4064_v32 = vrot.slane %v4053_v7, 2 }
 0x3eb   : > { %v3442_v46 = vadd.f32 %v3438_v0, %v3404_v43  ;;  %v4056_v23 = vmul.f32 %v4050_v50, %v13087_v62  ;;  %v3514_v48 = vsel %vm430_vm11, %v3510_v9, %v3512_v56  ;;  %v4032_v26 = vsel %vm716_vm3, %v4026_v18, %v4031_v5 }
 0x3ec   : > { %4037 = vrot.lane.b32.xlu1 %v4030_v20, %s7352_s30  ;;  %4035 = vrot.lane.b32.xlu0 %v4027_v12, %s7352_s30  ;;  %v3517_v58 = vadd.f32 %v3513_v30, %v3479_v61  ;;  %v4055_v4 = vmul.f32 %v4050_v50, %v13088_v45  ;;  %v4066_v59 = vrot.slane %v4052_v33, 2  ;;  %v4063_v44 = vrot.slane %v4051_v13, 2 }
 0x3ed   : > { %v3480_v39 = vadd.f32 %v3476_v8, %v3442_v46  ;;  %v4088_v17 = vstv %s10305_s10  ;;  %v4071_v49 = vrot.slane %v4056_v23, 2  ;;  %v4126_v55 = vstv %s7043_s29  ;;  %s7053_s10 = sld [smem:[#allocation6 + $0x7f]]  ;;  %s7055_s29 = sld [smem:[#allocation6 + $0x81]] }
 0x3ee   : > { %v3546_v52 = vpop.permute.xlu1 %3545  ;;  %v3544_v22 = vpop.permute.xlu0 %3543  ;;  %v4068_v38 = vsel %vm716_vm3, %v4066_v59, %v4067_v24  ;;  %v4065_v54 = vsel %vm716_vm3, %v4063_v44, %v4064_v32  ;;  %v4069_v63 = vrot.slane %v4055_v4, 2  ;;  %v4092_v34 = vmul.f32 %v4088_v17, %v13039_v21 }
 0x3ef   : > { %v3551_v6 = vsel %vm455_vm12, %v3544_v22, %v3546_v52  ;;  %v3518_v3 = vadd.f32 %v3514_v48, %v3480_v39  ;;  %v4091_v2 = vmul.f32 %v4088_v17, %v7557_v37  ;;  %v4090_v40 = vmul.f32 %v4088_v17, %v13032_v15 }
 0x3f0   : > { %v3555_v35 = vadd.f32 %v3551_v6, %v3517_v58  ;;  %4041 = vrot.lane.b32.xlu1 %v4034_v14, %s7352_s30  ;;  %4039 = vrot.lane.b32.xlu0 %v4032_v26, %s7352_s30  ;;  %v4089_v16 = vmul.f32 %v4088_v17, %v7537_v28  ;;  %v4094_v31 = vmul.f32 %v4088_v17, %v13087_v62  ;;  %v4105_v60 = vrot.slane %v4092_v34, 2 }
 0x3f1   : > { %v4093_v51 = vmul.f32 %v4088_v17, %v13088_v45  ;;  %v4072_v41 = vsel %vm716_vm3, %v4067_v24, %v4071_v49  ;;  %v4070_v42 = vsel %vm716_vm3, %v4064_v32, %v4069_v63  ;;  %v4102_v10 = vrot.slane %v4091_v2, 2 }
 0x3f2   : > { %3557 = vst [vmem:[%s10329_s22] sm:$0xff] %v3555_v35  ;;  %v3550_v47 = vpop.permute.xlu1 %3549  ;;  %v3548_v36 = vpop.permute.xlu0 %3547  ;;  %v4104_v50 = vrot.slane %v4090_v40, 2  ;;  %v4101_v29 = vrot.slane %v4089_v16, 2  ;;  %v4109_v57 = vrot.slane %v4094_v31, 2  ;;  %v4130_v12 = vmul.f32 %v4126_v55, %v13039_v21 }
 0x3f3   : > { %v3552_v19 = vsel %vm455_vm12, %v3548_v36, %v3550_v47  ;;  %v4107_v25 = vrot.slane %v4093_v51, 2  ;;  %v4129_v7 = vmul.f32 %v4126_v55, %v7557_v37  ;;  %v4128_v0 = vmul.f32 %v4126_v55, %v13032_v15 }
 0x3f4   : > { %v3556_v27 = vadd.f32 %v3552_v19, %v3518_v3  ;;  %4075 = vrot.lane.b32.xlu1 %v4068_v38, %s7353_s17  ;;  %4073 = vrot.lane.b32.xlu0 %v4065_v54, %s7353_s17  ;;  %v4106_v56 = vsel %vm716_vm3, %v4104_v50, %v4105_v60  ;;  %v4103_v9 = vsel %vm716_vm3, %v4101_v29, %v4102_v10  ;;  %v4143_v8 = vrot.slane %v4130_v12, 2 }
 0x3f5   : > { %v4127_v30 = vmul.f32 %v4126_v55, %v7537_v28  ;;  %v4110_v43 = vsel %vm716_vm3, %v4105_v60, %v4109_v57  ;;  %v4132_v61 = vmul.f32 %v4126_v55, %v13087_v62  ;;  %v4108_v13 = vsel %vm716_vm3, %v4102_v10, %v4107_v25 }
 0x3f6   : > { %3558 = vst [vmem:[%s10329_s22 + $0x8] sm:$0xff] %v3556_v27  ;;  %v10342_v18 = vpop.permute.xlu1 %3579  ;;  %v10344_v53 = vpop.permute.xlu0 %3577  ;;  %v4140_v14 = vrot.slane %v4129_v7, 2  ;;  %v4131_v24 = vmul.f32 %v4126_v55, %v13088_v45  ;;  %v4142_v46 = vrot.slane %v4128_v0, 2  ;;  %v4164_v52 = vstv %s7044_s8  ;;  %s7056_s8 = sld [smem:[#allocation6 + $0x82]] }
 0x3f7   : > { %v4139_v58 = vrot.slane %v4127_v30, 2  ;;  %v4147_v23 = vrot.slane %v4132_v61, 2  ;;  %v4168_v48 = vmul.f32 %v4164_v52, %v13039_v21  ;;  %v4167_v39 = vmul.f32 %v4164_v52, %v7557_v37 }
 0x3f8   : > { %4079 = vrot.lane.b32.xlu1 %v4072_v41, %s7353_s17  ;;  %4077 = vrot.lane.b32.xlu0 %v4070_v42, %s7353_s17  ;;  %v4144_v6 = vsel %vm716_vm3, %v4142_v46, %v4143_v8  ;;  %v4145_v4 = vrot.slane %v4131_v24, 2  ;;  %v4166_v35 = vmul.f32 %v4164_v52, %v13032_v15  ;;  %v4165_v59 = vmul.f32 %v4164_v52, %v7537_v28 }
 0x3f9   : > { %v4141_v26 = vsel %vm716_vm3, %v4139_v58, %v4140_v14  ;;  %v4148_v3 = vsel %vm716_vm3, %v4143_v8, %v4147_v23  ;;  %v4181_v47 = vrot.slane %v4168_v48, 2  ;;  %v4178_v38 = vrot.slane %v4167_v39, 2 }
 0x3fa   : > { %v10352_v1 = vpop.permute.xlu1 %3583  ;;  %v10354_v20 = vpop.permute.xlu0 %3581  ;;  %v4146_v36 = vsel %vm716_vm3, %v4140_v14, %v4145_v4  ;;  %v4170_v54 = vmul.f32 %v4164_v52, %v13087_v62  ;;  %v4169_v49 = vmul.f32 %v4164_v52, %v13088_v45  ;;  %v4180_v19 = vrot.slane %v4166_v35, 2 }
 0x3fb   : > { %v4177_v63 = vrot.slane %v4165_v59, 2  ;;  %v4219_v34 = vstv %s7046_s9  ;;  %v4257_v30 = vstv %s7047_s23  ;;  %s7057_s9 = sld [smem:[#allocation6 + $0x83]]  ;;  %s7058_s23 = sld [smem:[#allocation6 + $0x84]] }
 0x3fc   : > { %4113 = vrot.lane.b32.xlu1 %v4106_v56, %s7354_s19  ;;  %4111 = vrot.lane.b32.xlu0 %v4103_v9, %s7354_s19  ;;  %v4182_v40 = vsel %vm716_vm3, %v4180_v19, %v4181_v47  ;;  %v4223_v16 = vmul.f32 %v4219_v34, %v13039_v21  ;;  %v4185_v51 = vrot.slane %v4170_v54, 2  ;;  %v4183_v41 = vrot.slane %v4169_v49, 2 }
 0x3fd   : > { %v4179_v31 = vsel %vm716_vm3, %v4177_v63, %v4178_v38  ;;  %v4222_v42 = vmul.f32 %v4219_v34, %v7557_v37  ;;  %v4221_v60 = vmul.f32 %v4219_v34, %v13032_v15  ;;  %v4220_v10 = vmul.f32 %v4219_v34, %v7537_v28 }
 0x3fe   : > { %v10364_v5 = vpop.permute.xlu1 %3603  ;;  %v10366_v33 = vpop.permute.xlu0 %3601  ;;  %v4236_v57 = vrot.slane %v4223_v16, 3  ;;  %v4225_v25 = vmul.f32 %v4219_v34, %v13087_v62  ;;  %v4186_v55 = vsel %vm716_vm3, %v4181_v47, %v4185_v51  ;;  %v4184_v56 = vsel %vm716_vm3, %v4178_v38, %v4183_v41 }
 0x3ff   : > { %v4233_v9 = vrot.slane %v4222_v42, 3  ;;  %v4224_v12 = vmul.f32 %v4219_v34, %v13088_v45  ;;  %v4235_v7 = vrot.slane %v4221_v60, 3  ;;  %v4232_v0 = vrot.slane %v4220_v10, 3 }
 0x400   : > { %4117 = vrot.lane.b32.xlu1 %v4110_v43, %s7354_s19  ;;  %4115 = vrot.lane.b32.xlu0 %v4108_v13, %s7354_s19  ;;  %v4240_v13 = vrot.slane %v4225_v25, 3  ;;  %v4261_v8 = vmul.f32 %v4257_v30, %v13039_v21  ;;  %v4260_v58 = vmul.f32 %v4257_v30, %v7557_v37  ;;  %v4259_v52 = vmul.f32 %v4257_v30, %v13032_v15 }
 0x401   : > { %v4237_v14 = vsel %vm962_vm4, %v4235_v7, %v4236_v57  ;;  %v4234_v24 = vsel %vm962_vm4, %v4232_v0, %v4233_v9  ;;  %v4238_v46 = vrot.slane %v4224_v12, 3  ;;  %v4258_v23 = vmul.f32 %v4257_v30, %v7537_v28 }
 0x402   : > { %v10374_v22 = vpop.permute.xlu1 %3607  ;;  %v10376_v32 = vpop.permute.xlu0 %3605  ;;  %v4274_v4 = vrot.slane %v4261_v8, 3  ;;  %v4271_v35 = vrot.slane %v4260_v58, 3  ;;  %v4263_v59 = vmul.f32 %v4257_v30, %v13087_v62  ;;  %v4273_v47 = vrot.slane %v4259_v52, 3 }
 0x403   : > { %v4239_v39 = vsel %vm962_vm4, %v4233_v9, %v4238_v46  ;;  %v4295_v38 = vstv %s7048_s26  ;;  %s7060_s26 = sld [smem:[#allocation6 + $0x86]] }
 0x404   : > { %4151 = vrot.lane.b32.xlu1 %v4144_v6, %s7355_s27  ;;  %4149 = vrot.lane.b32.xlu0 %v4141_v26, %s7355_s27  ;;  %v4241_v26 = vsel %vm962_vm4, %v4236_v57, %v4240_v13  ;;  %v4275_v19 = vsel %vm962_vm4, %v4273_v47, %v4274_v4  ;;  %v4299_v63 = vmul.f32 %v4295_v38, %v13039_v21 }
 0x405   : > { %v4297_v51 = vmul.f32 %v4295_v38, %v13032_v15  ;;  %v4296_v41 = vmul.f32 %v4295_v38, %v7537_v28  ;;  %v4301_v57 = vmul.f32 %v4295_v38, %v13087_v62  ;;  %v4300_v9 = vmul.f32 %v4295_v38, %v13088_v45 }
 0x406   : > { %v10386_v44 = vpop.permute.xlu1 %3627  ;;  %v10388_v17 = vpop.permute.xlu0 %3625  ;;  %v4312_v10 = vrot.slane %v4299_v63, 3 }
 0x407   : > { %v4311_v12 = vrot.slane %v4297_v51, 3  ;;  %v4308_v7 = vrot.slane %v4296_v41, 3  ;;  %v4316_v8 = vrot.slane %v4301_v57, 3  ;;  %v4314_v46 = vrot.slane %v4300_v9, 3 }
 0x408   : > { %4155 = vrot.lane.b32.xlu1 %v4148_v3, %s7355_s27  ;;  %4153 = vrot.lane.b32.xlu0 %v4146_v36, %s7355_s27  ;;  %v4262_v3 = vmul.f32 %v4257_v30, %v13088_v45  ;;  %v4270_v36 = vrot.slane %v4258_v23, 3 }
 0x409   : > { %v4313_v13 = vsel %vm962_vm4, %v4311_v12, %v4312_v10 }
 0x40a   : > { %v10396_v2 = vpop.permute.xlu1 %3631  ;;  %v10398_v27 = vpop.permute.xlu0 %3629  ;;  %v4272_v34 = vsel %vm962_vm4, %v4270_v36, %v4271_v35  ;;  %v4276_v16 = vrot.slane %v4262_v3, 3 }
 0x40c   : > { %4189 = vrot.lane.b32.xlu1 %v4182_v40, %s7356_s6  ;;  %4187 = vrot.lane.b32.xlu0 %v4179_v31, %s7356_s6  ;;  %v4278_v40 = vrot.slane %v4263_v59, 3  ;;  %v4298_v31 = vmul.f32 %v4295_v38, %v7557_v37 }
 0x40e   : > { %v10408_v50 = vpop.permute.xlu1 %3651  ;;  %v10410_v29 = vpop.permute.xlu0 %3649  ;;  %v4279_v25 = vsel %vm962_vm4, %v4274_v4, %v4278_v40 }
 0x410   : > { %4193 = vrot.lane.b32.xlu1 %v4186_v55, %s7356_s6  ;;  %4191 = vrot.lane.b32.xlu0 %v4184_v56, %s7356_s6  ;;  %v4277_v55 = vsel %vm962_vm4, %v4271_v35, %v4276_v16  ;;  %v4309_v56 = vrot.slane %v4298_v31, 3  ;;  %v4317_v35 = vsel %vm962_vm4, %v4312_v10, %v4316_v8 }
 0x412   : > { %v10418_v43 = vpop.permute.xlu1 %3655  ;;  %v10420_v61 = vpop.permute.xlu0 %3653  ;;  %v4315_v3 = vsel %vm962_vm4, %v4309_v56, %v4314_v46 }
 0x414   : > { %4244 = vrot.lane.b32.xlu1 %v4237_v14, %s7351_s28  ;;  %4242 = vrot.lane.b32.xlu0 %v4234_v24, %s7351_s28  ;;  %v4333_v14 = vstv %s7049_s7  ;;  %v4310_v24 = vsel %vm962_vm4, %v4308_v7, %v4309_v56  ;;  %s7061_s7 = sld [smem:[#allocation6 + $0x87]] }
 0x415   : > { %v4337_v58 = vmul.f32 %v4333_v14, %v13039_v21  ;;  %v4336_v52 = vmul.f32 %v4333_v14, %v7557_v37  ;;  %v4335_v23 = vmul.f32 %v4333_v14, %v13032_v15  ;;  %v4339_v59 = vmul.f32 %v4333_v14, %v13087_v62 }
 0x416   : > { %v10430_v48 = vpop.permute.xlu1 %3675  ;;  %v10432_v6 = vpop.permute.xlu0 %3673  ;;  %v4338_v38 = vmul.f32 %v4333_v14, %v13088_v45 }
 0x417   : > { %v4350_v47 = vrot.slane %v4337_v58, 3  ;;  %v4347_v36 = vrot.slane %v4336_v52, 3  ;;  %v4354_v31 = vrot.slane %v4339_v59, 3 }
 0x418   : > { %4248 = vrot.lane.b32.xlu1 %v4241_v26, %s7351_s28  ;;  %4246 = vrot.lane.b32.xlu0 %v4239_v39, %s7351_s28  ;;  %v4334_v26 = vmul.f32 %v4333_v14, %v7537_v28  ;;  %v4352_v57 = vrot.slane %v4338_v38, 3 }
 0x419   : > { %v4355_v8 = vsel %vm962_vm4, %v4350_v47, %v4354_v31 }
 0x41a   : > { %v10440_v54 = vpop.permute.xlu1 %3679  ;;  %v10442_v49 = vpop.permute.xlu0 %3677  ;;  %v4346_v63 = vrot.slane %v4334_v26, 3  ;;  %v4353_v14 = vsel %vm962_vm4, %v4347_v36, %v4352_v57 }
 0x41c   : > { %4282 = vrot.lane.b32.xlu1 %v4275_v19, %s7352_s30  ;;  %4280 = vrot.lane.b32.xlu0 %v4272_v34, %s7352_s30  ;;  %v4349_v19 = vrot.slane %v4335_v23, 3  ;;  %v4371_v34 = vstv %s7050_s4  ;;  %v4348_v10 = vsel %vm962_vm4, %v4346_v63, %v4347_v36  ;;  %s7062_s4 = sld [smem:[#allocation6 + $0x88]] }
 0x41d   : > { %v4375_v51 = vmul.f32 %v4371_v34, %v13039_v21  ;;  %v4372_v56 = vmul.f32 %v4371_v34, %v7537_v28  ;;  %v4376_v46 = vmul.f32 %v4371_v34, %v13088_v45 }
 0x41e   : > { %v10452_v42 = vpop.permute.xlu1 %3699  ;;  %v10454_v60 = vpop.permute.xlu0 %3697  ;;  %v4351_v41 = vsel %vm962_vm4, %v4349_v19, %v4350_v47 }
 0x41f   : > { %13147 = vst [vmem:[#allocation84_spill] sm:$0xff] %v10454_v60  ;;  %v4388_v7 = vrot.slane %v4375_v51, 3  ;;  %v4384_v52 = vrot.slane %v4372_v56, 3  ;;  %v4390_v36 = vrot.slane %v4376_v46, 3 }
 0x420   : > { %4286 = vrot.lane.b32.xlu1 %v4279_v25, %s7352_s30  ;;  %4284 = vrot.lane.b32.xlu0 %v4277_v55, %s7352_s30  ;;  %v4374_v25 = vmul.f32 %v4371_v34, %v7557_v37  ;;  %v4373_v55 = vmul.f32 %v4371_v34, %v13032_v15 }
 0x422   : > { %v10462_v0 = vpop.permute.xlu1 %3703  ;;  %v10464_v30 = vpop.permute.xlu0 %3701  ;;  %v4387_v58 = vrot.slane %v4373_v55, 3 }
 0x424   : > { %4320 = vrot.lane.b32.xlu1 %v4313_v13, %s7353_s17  ;;  %4318 = vrot.lane.b32.xlu0 %v4310_v24, %s7353_s17  ;;  %v4377_v13 = vmul.f32 %v4371_v34, %v13087_v62  ;;  %v4385_v24 = vrot.slane %v4374_v25, 3 }
 0x426   : > { %v10474_v4 = vpop.permute.xlu1 %3754  ;;  %v10476_v39 = vpop.permute.xlu0 %3752  ;;  %v4392_v59 = vrot.slane %v4377_v13, 3  ;;  %v4386_v47 = vsel %vm962_vm4, %v4384_v52, %v4385_v24  ;;  %v4391_v57 = vsel %vm962_vm4, %v4385_v24, %v4390_v36 }
 0x427   : > { %13148 = vst [vmem:[#allocation85_spill] sm:$0xff] %v10474_v4  ;;  %13149 = vst [vmem:[#allocation86_spill] sm:$0xff] %v10476_v39 }
 0x428   : > { %4324 = vrot.lane.b32.xlu1 %v4317_v35, %s7353_s17  ;;  %4322 = vrot.lane.b32.xlu0 %v4315_v3, %s7353_s17  ;;  %v4389_v35 = vsel %vm962_vm4, %v4387_v58, %v4388_v7  ;;  %v4409_v3 = vstv %s7051_s11  ;;  %s7063_s11 = sld [smem:[#allocation6 + $0x89]] }
 0x429   : > { %v4413_v38 = vmul.f32 %v4409_v3, %v13039_v21  ;;  %v4412_v19 = vmul.f32 %v4409_v3, %v7557_v37  ;;  %v4411_v63 = vmul.f32 %v4409_v3, %v13032_v15  ;;  %v4410_v34 = vmul.f32 %v4409_v3, %v7537_v28 }
 0x42a   : > { %v10484_v40 = vpop.permute.xlu1 %3758  ;;  %v10486_v16 = vpop.permute.xlu0 %3756  ;;  %v4414_v56 = vmul.f32 %v4409_v3, %v13088_v45 }
 0x42b   : > { %13150 = vst [vmem:[#allocation87_spill] sm:$0xff] %v10484_v40  ;;  %13151 = vst [vmem:[#allocation88_spill] sm:$0xff] %v10486_v16  ;;  %v4426_v25 = vrot.slane %v4413_v38, 3  ;;  %v4423_v55 = vrot.slane %v4412_v19, 3  ;;  %v4425_v13 = vrot.slane %v4411_v63, 3 }
 0x42c   : > { %4358 = vrot.lane.b32.xlu1 %v4351_v41, %s7354_s19  ;;  %4356 = vrot.lane.b32.xlu0 %v4348_v10, %s7354_s19  ;;  %v4393_v41 = vsel %vm962_vm4, %v4388_v7, %v4392_v59  ;;  %v4415_v10 = vmul.f32 %v4409_v3, %v13087_v62  ;;  %v4428_v59 = vrot.slane %v4414_v56, 3 }
 0x42d   : > { %v4427_v24 = vsel %vm962_vm4, %v4425_v13, %v4426_v25 }
 0x42e   : > { %v10496_v9 = vpop.permute.xlu1 %3792  ;;  %v10498_v12 = vpop.permute.xlu0 %3790  ;;  %v4430_v7 = vrot.slane %v4415_v10, 3 }
 0x42f   : > { %13152 = vst [vmem:[#allocation89_spill] sm:$0xff] %v10496_v9  ;;  %13153 = vst [vmem:[#allocation90_spill] sm:$0xff] %v10498_v12 }
 0x430   : > { %4362 = vrot.lane.b32.xlu1 %v4355_v8, %s7354_s19  ;;  %4360 = vrot.lane.b32.xlu0 %v4353_v14, %s7354_s19  ;;  %v4422_v8 = vrot.slane %v4410_v34, 3  ;;  %v4464_v14 = vstv %s7053_s10  ;;  %v4431_v63 = vsel %vm962_vm4, %v4426_v25, %v4430_v7  ;;  %s7064_s10 = sld [smem:[#allocation6 + $0x8a]] }
 0x431   : > { %v4468_v52 = vmul.f32 %v4464_v14, %v13039_v21  ;;  %v4467_v3 = vmul.f32 %v4464_v14, %v7557_v37  ;;  %v4465_v36 = vmul.f32 %v4464_v14, %v7537_v28  ;;  %v4469_v56 = vmul.f32 %v4464_v14, %v13088_v45 }
 0x432   : > { %v10506_v23 = vpop.permute.xlu1 %3796  ;;  %v10508_v26 = vpop.permute.xlu0 %3794 }
 0x433   : > { %13154 = vst [vmem:[#allocation91_spill] sm:$0xff] %v10506_v23  ;;  %13155 = vst [vmem:[#allocation92_spill] sm:$0xff] %v10508_v26  ;;  %v4481_v34 = vrot.slane %v4468_v52, 4  ;;  %v4478_v10 = vrot.slane %v4467_v3, 4 }
 0x434   : > { %4396 = vrot.lane.b32.xlu1 %v4389_v35, %s7355_s27  ;;  %4394 = vrot.lane.b32.xlu0 %v4386_v47, %s7355_s27  ;;  %v4424_v35 = vsel %vm962_vm4, %v4422_v8, %v4423_v55  ;;  %v4466_v47 = vmul.f32 %v4464_v14, %v13032_v15  ;;  %v4477_v8 = vrot.slane %v4465_v36, 4 }
 0x436   : > { %v10518_v31 = vpop.permute.xlu1 %3830  ;;  %v10520_v51 = vpop.permute.xlu0 %3828  ;;  %v4480_v13 = vrot.slane %v4466_v47, 4  ;;  %v4479_v7 = vsel %vm1208_vm5, %v4477_v8, %v4478_v10 }
 0x437   : > { %13156 = vst [vmem:[#allocation95_spill] sm:$0xff] %v10518_v31  ;;  %13157 = vst [vmem:[#allocation96_spill] sm:$0xff] %v10520_v51 }
 0x438   : > { %4400 = vrot.lane.b32.xlu1 %v4393_v41, %s7355_s27  ;;  %4398 = vrot.lane.b32.xlu0 %v4391_v57, %s7355_s27  ;;  %v4429_v41 = vsel %vm962_vm4, %v4423_v55, %v4428_v59  ;;  %v4470_v57 = vmul.f32 %v4464_v14, %v13087_v62  ;;  %v4482_v25 = vsel %vm1208_vm5, %v4480_v13, %v4481_v34  ;;  %v4483_v14 = vrot.slane %v4469_v56, 4 }
 0x43a   : > { %v10528_v46 = vpop.permute.xlu1 %3834  ;;  %v10530_v58 = vpop.permute.xlu0 %3832  ;;  %v4485_v52 = vrot.slane %v4470_v57, 4  ;;  %v4484_v56 = vsel %vm1208_vm5, %v4478_v10, %v4483_v14 }
 0x43b   : > { %13158 = vst [vmem:[#allocation97_spill] sm:$0xff] %v10528_v46  ;;  %13159 = vst [vmem:[#allocation98_spill] sm:$0xff] %v10530_v58 }
 0x43c   : > { %4434 = vrot.lane.b32.xlu1 %v4427_v24, %s7356_s6  ;;  %4432 = vrot.lane.b32.xlu0 %v4424_v35, %s7356_s6  ;;  %v4502_v24 = vstv %s7054_s20  ;;  %v4486_v57 = vsel %vm1208_vm5, %v4481_v34, %v4485_v52  ;;  %v4540_v34 = vstv %s7055_s29  ;;  %s7065_s20 = sld [smem:[#allocation6 + $0x8b]]  ;;  %s7067_s29 = sld [smem:[#allocation6 + $0x8d]] }
 0x43d   : > { %v4506_v55 = vmul.f32 %v4502_v24, %v13039_v21  ;;  %v4505_v59 = vmul.f32 %v4502_v24, %v7557_v37  ;;  %v4504_v3 = vmul.f32 %v4502_v24, %v13032_v15  ;;  %v4503_v47 = vmul.f32 %v4502_v24, %v7537_v28 }
 0x43e   : > { %v10540_v38 = vpop.permute.xlu1 %3868  ;;  %v10542_v19 = vpop.permute.xlu0 %3866  ;;  %v4508_v13 = vmul.f32 %v4502_v24, %v13087_v62  ;;  %v4543_v14 = vmul.f32 %v4540_v34, %v7557_v37 }
 0x43f   : > { %13160 = vst [vmem:[#allocation101_spill] sm:$0xff] %v10540_v38  ;;  %13161 = vst [vmem:[#allocation102_spill] sm:$0xff] %v10542_v19  ;;  %v4516_v8 = vrot.slane %v4505_v59, 4  ;;  %v4515_v38 = vrot.slane %v4503_v47, 4  ;;  %v4542_v59 = vmul.f32 %v4540_v34, %v13032_v15 }
 0x440   : > { %4438 = vrot.lane.b32.xlu1 %v4431_v63, %s7356_s6  ;;  %4436 = vrot.lane.b32.xlu0 %v4429_v41, %s7356_s6  ;;  %v4519_v41 = vrot.slane %v4506_v55, 4 }
 0x441   : > { %v4517_v10 = vsel %vm1208_vm5, %v4515_v38, %v4516_v8  ;;  %v4546_v38 = vmul.f32 %v4540_v34, %v13087_v62 }
 0x442   : > { %v10550_v35 = vpop.permute.xlu1 %3872  ;;  %v10552_v19 = vpop.permute.xlu0 %3870 }
 0x443   : > { %13162 = vst [vmem:[#allocation103_spill] sm:$0xff] %v10550_v35  ;;  %13163 = vst [vmem:[#allocation104_spill] sm:$0xff] %v10552_v19  ;;  %v4523_v19 = vrot.slane %v4508_v13, 4 }
 0x444   : > { %4489 = vrot.lane.b32.xlu1 %v4482_v25, %s7351_s28  ;;  %4487 = vrot.lane.b32.xlu0 %v4479_v7, %s7351_s28  ;;  %v4507_v25 = vmul.f32 %v4502_v24, %v13088_v45  ;;  %v4518_v7 = vrot.slane %v4504_v3, 4  ;;  %v4544_v24 = vmul.f32 %v4540_v34, %v13039_v21  ;;  %v4541_v3 = vmul.f32 %v4540_v34, %v7537_v28 }
 0x445   : > { %v4524_v13 = vsel %vm1208_vm5, %v4519_v41, %v4523_v19  ;;  %v4561_v19 = vrot.slane %v4546_v38, 4 }
 0x446   : > { %v10562_v36 = vpop.permute.xlu1 %3906  ;;  %v10564_v63 = vpop.permute.xlu0 %3904  ;;  %v4520_v55 = vsel %vm1208_vm5, %v4518_v7, %v4519_v41  ;;  %v4521_v52 = vrot.slane %v4507_v25, 4  ;;  %v4557_v25 = vrot.slane %v4544_v24, 4  ;;  %v4554_v7 = vrot.slane %v4543_v14, 4 }
 0x447   : > { %13164 = vst [vmem:[#allocation105_spill] sm:$0xff] %v10562_v36  ;;  %13165 = vst [vmem:[#allocation106_spill] sm:$0xff] %v10564_v63 }
 0x448   : > { %4493 = vrot.lane.b32.xlu1 %v4486_v57, %s7351_s28  ;;  %4491 = vrot.lane.b32.xlu0 %v4484_v56, %s7351_s28  ;;  %v4522_v56 = vsel %vm1208_vm5, %v4516_v8, %v4521_v52  ;;  %v4562_v38 = vsel %vm1208_vm5, %v4557_v25, %v4561_v19 }
 0x44a   : > { %v10572_v36 = vpop.permute.xlu1 %3910  ;;  %v10574_v63 = vpop.permute.xlu0 %3908 }
 0x44b   : > { %13166 = vst [vmem:[#allocation107_spill] sm:$0xff] %v10572_v36  ;;  %13167 = vst [vmem:[#allocation108_spill] sm:$0xff] %v10574_v63  ;;  %v4553_v63 = vrot.slane %v4541_v3, 4  ;;  %v4578_v36 = vstv %s7056_s8  ;;  %s7068_s8 = sld [smem:[#allocation6 + $0x8e]] }
 0x44c   : > { %4527 = vrot.lane.b32.xlu1 %v4520_v55, %s7352_s30  ;;  %4525 = vrot.lane.b32.xlu0 %v4517_v10, %s7352_s30  ;;  %v4545_v55 = vmul.f32 %v4540_v34, %v13088_v45  ;;  %v4556_v10 = vrot.slane %v4542_v59, 4  ;;  %v4582_v41 = vmul.f32 %v4578_v36, %v13039_v21  ;;  %v4581_v24 = vmul.f32 %v4578_v36, %v7557_v37 }
 0x44d   : > { %v4555_v52 = vsel %vm1208_vm5, %v4553_v63, %v4554_v7  ;;  %v4580_v14 = vmul.f32 %v4578_v36, %v13032_v15  ;;  %v4579_v59 = vmul.f32 %v4578_v36, %v7537_v28 }
 0x44e   : > { %v10584_v47 = vpop.permute.xlu1 %3944  ;;  %v10586_v57 = vpop.permute.xlu0 %3942  ;;  %v4558_v8 = vsel %vm1208_vm5, %v4556_v10, %v4557_v25  ;;  %v4559_v34 = vrot.slane %v4545_v55, 4  ;;  %v4592_v55 = vrot.slane %v4581_v24, 4  ;;  %v4584_v10 = vmul.f32 %v4578_v36, %v13087_v62 }
 0x44f   : > { %13168 = vst [vmem:[#allocation109_spill] sm:$0xff] %v10584_v47  ;;  %13169 = vst [vmem:[#allocation110_spill] sm:$0xff] %v10586_v57 }
 0x450   : > { %4531 = vrot.lane.b32.xlu1 %v4524_v13, %s7352_s30  ;;  %4529 = vrot.lane.b32.xlu0 %v4522_v56, %s7352_s30  ;;  %v4595_v56 = vrot.slane %v4582_v41, 4  ;;  %v4560_v63 = vsel %vm1208_vm5, %v4554_v7, %v4559_v34  ;;  %v4599_v41 = vrot.slane %v4584_v10, 4 }
 0x452   : > { %v10594_v47 = vpop.permute.xlu1 %3948  ;;  %v10596_v57 = vpop.permute.xlu0 %3946 }
 0x453   : > { %13170 = vst [vmem:[#allocation111_spill] sm:$0xff] %v10594_v47  ;;  %13171 = vst [vmem:[#allocation112_spill] sm:$0xff] %v10596_v57  ;;  %v4591_v57 = vrot.slane %v4579_v59, 4  ;;  %v4616_v47 = vstv %s7057_s9  ;;  %s7069_s9 = sld [smem:[#allocation6 + $0x8f]] }
 0x454   : > { %4565 = vrot.lane.b32.xlu1 %v4558_v8, %s7353_s17  ;;  %4563 = vrot.lane.b32.xlu0 %v4555_v52, %s7353_s17  ;;  %v4583_v8 = vmul.f32 %v4578_v36, %v13088_v45  ;;  %v4594_v52 = vrot.slane %v4580_v14, 4  ;;  %v4620_v7 = vmul.f32 %v4616_v47, %v13039_v21  ;;  %v4619_v34 = vmul.f32 %v4616_v47, %v7557_v37 }
 0x455   : > { %v4593_v19 = vsel %vm1208_vm5, %v4591_v57, %v4592_v55  ;;  %v4618_v24 = vmul.f32 %v4616_v47, %v13032_v15  ;;  %v4617_v14 = vmul.f32 %v4616_v47, %v7537_v28  ;;  %v4600_v57 = vsel %vm1208_vm5, %v4595_v56, %v4599_v41 }
 0x456   : > { %v10606_v3 = vpop.permute.xlu1 %3999  ;;  %v10608_v13 = vpop.permute.xlu0 %3997  ;;  %v4596_v25 = vsel %vm1208_vm5, %v4594_v52, %v4595_v56  ;;  %v4597_v36 = vrot.slane %v4583_v8, 4  ;;  %v4622_v52 = vmul.f32 %v4616_v47, %v13087_v62  ;;  %v4630_v8 = vrot.slane %v4619_v34, 4 }
 0x457   : > { %13172 = vst [vmem:[#allocation113_spill] sm:$0xff] %v10606_v3  ;;  %13173 = vst [vmem:[#allocation114_spill] sm:$0xff] %v10608_v13  ;;  %v4654_v56 = vstv %s7058_s23  ;;  %s7070_s23 = sld [smem:[#allocation6 + $0x90]] }
 0x458   : > { %4569 = vrot.lane.b32.xlu1 %v4562_v38, %s7353_s17  ;;  %4567 = vrot.lane.b32.xlu0 %v4560_v63, %s7353_s17  ;;  %v4633_v63 = vrot.slane %v4620_v7, 4  ;;  %v4598_v10 = vsel %vm1208_vm5, %v4592_v55, %v4597_v36  ;;  %v4657_v36 = vmul.f32 %v4654_v56, %v7557_v37  ;;  %v4656_v34 = vmul.f32 %v4654_v56, %v13032_v15 }
 0x45a   : > { %v10616_v3 = vpop.permute.xlu1 %4003  ;;  %v10618_v13 = vpop.permute.xlu0 %4001 }
 0x45b   : > { %13174 = vst [vmem:[#allocation117_spill] sm:$0xff] %v10616_v3  ;;  %13175 = vst [vmem:[#allocation118_spill] sm:$0xff] %v10618_v13  ;;  %v4629_v13 = vrot.slane %v4617_v14, 4  ;;  %v4637_v3 = vrot.slane %v4622_v52, 4 }
 0x45c   : > { %4603 = vrot.lane.b32.xlu1 %v4596_v25, %s7354_s19  ;;  %4601 = vrot.lane.b32.xlu0 %v4593_v19, %s7354_s19  ;;  %v4621_v25 = vmul.f32 %v4616_v47, %v13088_v45  ;;  %v4632_v19 = vrot.slane %v4618_v24, 4  ;;  %v4658_v47 = vmul.f32 %v4654_v56, %v13039_v21  ;;  %v4655_v24 = vmul.f32 %v4654_v56, %v7537_v28 }
 0x45d   : > { %v4631_v55 = vsel %vm1208_vm5, %v4629_v13, %v4630_v8  ;;  %v4638_v52 = vsel %vm1208_vm5, %v4633_v63, %v4637_v3  ;;  %v4660_v13 = vmul.f32 %v4654_v56, %v13087_v62 }
 0x45e   : > { %v10628_v59 = vpop.permute.xlu1 %4037  ;;  %v10630_v38 = vpop.permute.xlu0 %4035  ;;  %v4634_v7 = vsel %vm1208_vm5, %v4632_v19, %v4633_v63  ;;  %v4635_v41 = vrot.slane %v4621_v25, 4  ;;  %v4671_v25 = vrot.slane %v4658_v47, 4  ;;  %v4668_v19 = vrot.slane %v4657_v36, 4 }
 0x45f   : > { %13176 = vst [vmem:[#allocation115_spill] sm:$0xff] %v10628_v59  ;;  %13177 = vst [vmem:[#allocation116_spill] sm:$0xff] %v10630_v38  ;;  %v4675_v3 = vrot.slane %v4660_v13, 4 }
 0x460   : > { %4607 = vrot.lane.b32.xlu1 %v4600_v57, %s7354_s19  ;;  %4605 = vrot.lane.b32.xlu0 %v4598_v10, %s7354_s19  ;;  %v4636_v10 = vsel %vm1208_vm5, %v4630_v8, %v4635_v41 }
 0x462   : > { %v10638_v59 = vpop.permute.xlu1 %4041  ;;  %v10640_v38 = vpop.permute.xlu0 %4039 }
 0x463   : > { %13178 = vst [vmem:[#allocation122_spill] sm:$0xff] %v10638_v59  ;;  %13179 = vst [vmem:[#allocation123_spill] sm:$0xff] %v10640_v38  ;;  %v4667_v38 = vrot.slane %v4655_v24, 4  ;;  %v4709_v59 = vstv %s7060_s26  ;;  %s7071_s26 = sld [smem:[#allocation6 + $0x91]] }
 0x464   : > { %4641 = vrot.lane.b32.xlu1 %v4634_v7, %s7355_s27  ;;  %4639 = vrot.lane.b32.xlu0 %v4631_v55, %s7355_s27  ;;  %v4659_v7 = vmul.f32 %v4654_v56, %v13088_v45  ;;  %v4670_v55 = vrot.slane %v4656_v34, 4  ;;  %v4713_v63 = vmul.f32 %v4709_v59, %v13039_v21  ;;  %v4712_v47 = vmul.f32 %v4709_v59, %v7557_v37 }
 0x465   : > { %v4669_v41 = vsel %vm1208_vm5, %v4667_v38, %v4668_v19  ;;  %v4711_v36 = vmul.f32 %v4709_v59, %v13032_v15  ;;  %v4710_v34 = vmul.f32 %v4709_v59, %v7537_v28  ;;  %v4676_v38 = vsel %vm1208_vm5, %v4671_v25, %v4675_v3 }
 0x466   : > { %v10650_v14 = vpop.permute.xlu1 %4075  ;;  %v10652_v57 = vpop.permute.xlu0 %4073  ;;  %v4672_v8 = vsel %vm1208_vm5, %v4670_v55, %v4671_v25  ;;  %v4673_v56 = vrot.slane %v4659_v7, 4  ;;  %v4726_v13 = vrot.slane %v4713_v63, 5  ;;  %v4723_v55 = vrot.slane %v4712_v47, 5 }
 0x467   : > { %13180 = vst [vmem:[#allocation120_spill] sm:$0xff] %v10650_v14  ;;  %13181 = vst [vmem:[#allocation121_spill] sm:$0xff] %v10652_v57  ;;  %v4747_v25 = vstv %s7061_s7  ;;  %s7072_s7 = sld [smem:[#allocation6 + $0x92]] }
 0x468   : > { %4645 = vrot.lane.b32.xlu1 %v4638_v52, %s7355_s27  ;;  %4643 = vrot.lane.b32.xlu0 %v4636_v10, %s7355_s27  ;;  %v4715_v10 = vmul.f32 %v4709_v59, %v13087_v62  ;;  %v4674_v7 = vsel %vm1208_vm5, %v4668_v19, %v4673_v56  ;;  %v4750_v56 = vmul.f32 %v4747_v25, %v7557_v37 }
 0x469   : > { %v4749_v47 = vmul.f32 %v4747_v25, %v13032_v15 }
 0x46a   : > { %v10660_v14 = vpop.permute.xlu1 %4079  ;;  %v10662_v57 = vpop.permute.xlu0 %4077 }
 0x46b   : > { %13182 = vst [vmem:[#allocation126_spill] sm:$0xff] %v10660_v14  ;;  %13183 = vst [vmem:[#allocation127_spill] sm:$0xff] %v10662_v57  ;;  %v4722_v57 = vrot.slane %v4710_v34, 5  ;;  %v4730_v14 = vrot.slane %v4715_v10, 5 }
 0x46c   : > { %4679 = vrot.lane.b32.xlu1 %v4672_v8, %s7356_s6  ;;  %4677 = vrot.lane.b32.xlu0 %v4669_v41, %s7356_s6  ;;  %v4714_v8 = vmul.f32 %v4709_v59, %v13088_v45  ;;  %v4725_v41 = vrot.slane %v4711_v36, 5  ;;  %v4751_v59 = vmul.f32 %v4747_v25, %v13039_v21  ;;  %v4748_v36 = vmul.f32 %v4747_v25, %v7537_v28 }
 0x46d   : > { %v4724_v19 = vsel %vm255_vm1, %v4722_v57, %v4723_v55  ;;  %v4731_v10 = vsel %vm255_vm1, %v4726_v13, %v4730_v14  ;;  %v4753_v57 = vmul.f32 %v4747_v25, %v13087_v62 }
 0x46e   : > { %v10672_v24 = vpop.permute.xlu1 %4113  ;;  %v10674_v52 = vpop.permute.xlu0 %4111  ;;  %v4727_v63 = vsel %vm255_vm1, %v4725_v41, %v4726_v13  ;;  %v4728_v3 = vrot.slane %v4714_v8, 5  ;;  %v4764_v8 = vrot.slane %v4751_v59, 5  ;;  %v4761_v41 = vrot.slane %v4750_v56, 5 }
 0x46f   : > { %13184 = vst [vmem:[#allocation124_spill] sm:$0xff] %v10672_v24  ;;  %13185 = vst [vmem:[#allocation125_spill] sm:$0xff] %v10674_v52  ;;  %v4768_v14 = vrot.slane %v4753_v57, 5 }
 0x470   : > { %4683 = vrot.lane.b32.xlu1 %v4676_v38, %s7356_s6  ;;  %4681 = vrot.lane.b32.xlu0 %v4674_v7, %s7356_s6  ;;  %v4729_v7 = vsel %vm255_vm1, %v4723_v55, %v4728_v3 }
 0x471   : > { %v4769_v57 = vsel %vm255_vm1, %v4764_v8, %v4768_v14 }
 0x472   : > { %v10682_v24 = vpop.permute.xlu1 %4117  ;;  %v10684_v52 = vpop.permute.xlu0 %4115 }
 0x473   : > { %13186 = vst [vmem:[#allocation130_spill] sm:$0xff] %v10682_v24  ;;  %13187 = vst [vmem:[#allocation131_spill] sm:$0xff] %v10684_v52  ;;  %v4760_v52 = vrot.slane %v4748_v36, 5  ;;  %v4785_v24 = vstv %s7062_s4  ;;  %s7074_s4 = sld [smem:[#allocation6 + $0x94]] }
 0x474   : > { %4734 = vrot.lane.b32.xlu1 %v4727_v63, %s7351_s28  ;;  %4732 = vrot.lane.b32.xlu0 %v4724_v19, %s7351_s28  ;;  %v4752_v63 = vmul.f32 %v4747_v25, %v13088_v45  ;;  %v4763_v19 = vrot.slane %v4749_v47, 5  ;;  %v4789_v13 = vmul.f32 %v4785_v24, %v13039_v21  ;;  %v4788_v59 = vmul.f32 %v4785_v24, %v7557_v37 }
 0x475   : > { %v4762_v3 = vsel %vm255_vm1, %v4760_v52, %v4761_v41  ;;  %v4787_v56 = vmul.f32 %v4785_v24, %v13032_v15  ;;  %v4786_v47 = vmul.f32 %v4785_v24, %v7537_v28 }
 0x476   : > { %v10694_v34 = vpop.permute.xlu1 %4151  ;;  %v10696_v38 = vpop.permute.xlu0 %4149  ;;  %v4765_v55 = vsel %vm255_vm1, %v4763_v19, %v4764_v8  ;;  %v4766_v25 = vrot.slane %v4752_v63, 5  ;;  %v4799_v63 = vrot.slane %v4788_v59, 5  ;;  %v4791_v19 = vmul.f32 %v4785_v24, %v13087_v62 }
 0x477   : > { %13188 = vst [vmem:[#allocation128_spill] sm:$0xff] %v10694_v34  ;;  %13189 = vst [vmem:[#allocation129_spill] sm:$0xff] %v10696_v38 }
 0x478   : > { %4738 = vrot.lane.b32.xlu1 %v4731_v10, %s7351_s28  ;;  %4736 = vrot.lane.b32.xlu0 %v4729_v7, %s7351_s28  ;;  %v4802_v7 = vrot.slane %v4789_v13, 5  ;;  %v4767_v52 = vsel %vm255_vm1, %v4761_v41, %v4766_v25  ;;  %v4806_v13 = vrot.slane %v4791_v19, 5 }
 0x47a   : > { %v10704_v34 = vpop.permute.xlu1 %4155  ;;  %v10706_v38 = vpop.permute.xlu0 %4153 }
 0x47b   : > { %13190 = vst [vmem:[#allocation132_spill] sm:$0xff] %v10704_v34  ;;  %13191 = vst [vmem:[#allocation133_spill] sm:$0xff] %v10706_v38  ;;  %v4798_v38 = vrot.slane %v4786_v47, 5  ;;  %v4823_v34 = vstv %s7063_s11  ;;  %s7075_s11 = sld [smem:[#allocation6 + $0x95]] }
 0x47c   : > { %4772 = vrot.lane.b32.xlu1 %v4765_v55, %s7352_s30  ;;  %4770 = vrot.lane.b32.xlu0 %v4762_v3, %s7352_s30  ;;  %v4790_v55 = vmul.f32 %v4785_v24, %v13088_v45  ;;  %v4801_v3 = vrot.slane %v4787_v56, 5  ;;  %v4827_v41 = vmul.f32 %v4823_v34, %v13039_v21  ;;  %v4826_v25 = vmul.f32 %v4823_v34, %v7557_v37 }
 0x47d   : > { %v4800_v14 = vsel %vm255_vm1, %v4798_v38, %v4799_v63  ;;  %v4825_v59 = vmul.f32 %v4823_v34, %v13032_v15  ;;  %v4824_v56 = vmul.f32 %v4823_v34, %v7537_v28  ;;  %v4807_v38 = vsel %vm255_vm1, %v4802_v7, %v4806_v13 }
 0x47e   : > { %v10716_v36 = vpop.permute.xlu1 %4189  ;;  %v10718_v10 = vpop.permute.xlu0 %4187  ;;  %v4803_v8 = vsel %vm255_vm1, %v4801_v3, %v4802_v7  ;;  %v4804_v24 = vrot.slane %v4790_v55, 5  ;;  %v4829_v3 = vmul.f32 %v4823_v34, %v13087_v62  ;;  %v4837_v55 = vrot.slane %v4826_v25, 5 }
 0x47f   : > { %13192 = vst [vmem:[#allocation134_spill] sm:$0xff] %v10716_v36  ;;  %13193 = vst [vmem:[#allocation135_spill] sm:$0xff] %v10718_v10  ;;  %v4861_v7 = vstv %s7064_s10  ;;  %s7076_s10 = sld [smem:[#allocation6 + $0x96]] }
 0x480   : > { %4776 = vrot.lane.b32.xlu1 %v4769_v57, %s7352_s30  ;;  %4774 = vrot.lane.b32.xlu0 %v4767_v52, %s7352_s30  ;;  %v4840_v52 = vrot.slane %v4827_v41, 5  ;;  %v4805_v19 = vsel %vm255_vm1, %v4799_v63, %v4804_v24  ;;  %v4864_v24 = vmul.f32 %v4861_v7, %v7557_v37  ;;  %v4863_v25 = vmul.f32 %v4861_v7, %v13032_v15 }
 0x482   : > { %v10726_v36 = vpop.permute.xlu1 %4193  ;;  %v10728_v10 = vpop.permute.xlu0 %4191 }
 0x483   : > { %13194 = vst [vmem:[#allocation138_spill] sm:$0xff] %v10726_v36  ;;  %13195 = vst [vmem:[#allocation139_spill] sm:$0xff] %v10728_v10  ;;  %v4836_v10 = vrot.slane %v4824_v56, 5  ;;  %v4844_v36 = vrot.slane %v4829_v3, 5 }
 0x484   : > { %4810 = vrot.lane.b32.xlu1 %v4803_v8, %s7353_s17  ;;  %4808 = vrot.lane.b32.xlu0 %v4800_v14, %s7353_s17  ;;  %v4828_v8 = vmul.f32 %v4823_v34, %v13088_v45  ;;  %v4839_v14 = vrot.slane %v4825_v59, 5  ;;  %v4865_v34 = vmul.f32 %v4861_v7, %v13039_v21  ;;  %v4862_v59 = vmul.f32 %v4861_v7, %v7537_v28 }
 0x485   : > { %v4838_v63 = vsel %vm255_vm1, %v4836_v10, %v4837_v55  ;;  %v4845_v3 = vsel %vm255_vm1, %v4840_v52, %v4844_v36  ;;  %v4867_v10 = vmul.f32 %v4861_v7, %v13087_v62 }
 0x486   : > { %v10738_v47 = vpop.permute.xlu1 %4244  ;;  %v10740_v57 = vpop.permute.xlu0 %4242  ;;  %v4841_v41 = vsel %vm255_vm1, %v4839_v14, %v4840_v52  ;;  %v4842_v13 = vrot.slane %v4828_v8, 5  ;;  %v4878_v8 = vrot.slane %v4865_v34, 5  ;;  %v4875_v14 = vrot.slane %v4864_v24, 5 }
 0x487   : > { %13196 = vst [vmem:[#allocation136_spill] sm:$0xff] %v10738_v47  ;;  %13197 = vst [vmem:[#allocation137_spill] sm:$0xff] %v10740_v57  ;;  %v4882_v36 = vrot.slane %v4867_v10, 5 }
 0x488   : > { %4814 = vrot.lane.b32.xlu1 %v4807_v38, %s7353_s17  ;;  %4812 = vrot.lane.b32.xlu0 %v4805_v19, %s7353_s17  ;;  %v4843_v19 = vsel %vm255_vm1, %v4837_v55, %v4842_v13 }
 0x489   : > { %v4883_v10 = vsel %vm255_vm1, %v4878_v8, %v4882_v36 }
 0x48a   : > { %v10748_v47 = vpop.permute.xlu1 %4248  ;;  %v10750_v57 = vpop.permute.xlu0 %4246 }
 0x48b   : > { %13198 = vst [vmem:[#allocation142_spill] sm:$0xff] %v10748_v47  ;;  %13199 = vst [vmem:[#allocation143_spill] sm:$0xff] %v10750_v57  ;;  %v4874_v57 = vrot.slane %v4862_v59, 5  ;;  %v4899_v47 = vstv %s7065_s20  ;;  %s7077_s20 = sld [smem:[#allocation6 + $0x97]] }
 0x48c   : > { %4848 = vrot.lane.b32.xlu1 %v4841_v41, %s7354_s19  ;;  %4846 = vrot.lane.b32.xlu0 %v4838_v63, %s7354_s19  ;;  %v4866_v41 = vmul.f32 %v4861_v7, %v13088_v45  ;;  %v4877_v63 = vrot.slane %v4863_v25, 5  ;;  %v4903_v52 = vmul.f32 %v4899_v47, %v13039_v21  ;;  %v4902_v34 = vmul.f32 %v4899_v47, %v7557_v37 }
 0x48d   : > { %v4876_v13 = vsel %vm255_vm1, %v4874_v57, %v4875_v14  ;;  %v4901_v24 = vmul.f32 %v4899_v47, %v13032_v15  ;;  %v4900_v25 = vmul.f32 %v4899_v47, %v7537_v28 }
 0x48e   : > { %v10760_v56 = vpop.permute.xlu1 %4282  ;;  %v10762_v38 = vpop.permute.xlu0 %4280  ;;  %v4879_v55 = vsel %vm255_vm1, %v4877_v63, %v4878_v8  ;;  %v4880_v7 = vrot.slane %v4866_v41, 5  ;;  %v4913_v41 = vrot.slane %v4902_v34, 5  ;;  %v4905_v63 = vmul.f32 %v4899_v47, %v13087_v62 }
 0x48f   : > { %13200 = vst [vmem:[#allocation140_spill] sm:$0xff] %v10760_v56  ;;  %13201 = vst [vmem:[#allocation141_spill] sm:$0xff] %v10762_v38 }
 0x490   : > { %4852 = vrot.lane.b32.xlu1 %v4845_v3, %s7354_s19  ;;  %4850 = vrot.lane.b32.xlu0 %v4843_v19, %s7354_s19  ;;  %v4916_v19 = vrot.slane %v4903_v52, 5  ;;  %v4881_v57 = vsel %vm255_vm1, %v4875_v14, %v4880_v7  ;;  %v4920_v52 = vrot.slane %v4905_v63, 5 }
 0x492   : > { %v10770_v56 = vpop.permute.xlu1 %4286  ;;  %v10772_v38 = vpop.permute.xlu0 %4284 }
 0x493   : > { %13202 = vst [vmem:[#allocation146_spill] sm:$0xff] %v10770_v56  ;;  %13203 = vst [vmem:[#allocation147_spill] sm:$0xff] %v10772_v38  ;;  %v4912_v38 = vrot.slane %v4900_v25, 5  ;;  %v4954_v56 = vstv %s7067_s29  ;;  %s7078_s29 = sld [smem:[#allocation6 + $0x98]] }
 0x494   : > { %4886 = vrot.lane.b32.xlu1 %v4879_v55, %s7355_s27  ;;  %4884 = vrot.lane.b32.xlu0 %v4876_v13, %s7355_s27  ;;  %v4904_v55 = vmul.f32 %v4899_v47, %v13088_v45  ;;  %v4915_v13 = vrot.slane %v4901_v24, 5  ;;  %v4958_v14 = vmul.f32 %v4954_v56, %v13039_v21  ;;  %v4957_v7 = vmul.f32 %v4954_v56, %v7557_v37 }
 0x495   : > { %v4914_v36 = vsel %vm255_vm1, %v4912_v38, %v4913_v41  ;;  %v4956_v34 = vmul.f32 %v4954_v56, %v13032_v15  ;;  %v4955_v24 = vmul.f32 %v4954_v56, %v7537_v28  ;;  %v4921_v38 = vsel %vm255_vm1, %v4916_v19, %v4920_v52 }
 0x496   : > { %v10782_v59 = vpop.permute.xlu1 %4320  ;;  %v10784_v3 = vpop.permute.xlu0 %4318  ;;  %v4917_v8 = vsel %vm255_vm1, %v4915_v13, %v4916_v19  ;;  %v4918_v47 = vrot.slane %v4904_v55, 5  ;;  %v4960_v13 = vmul.f32 %v4954_v56, %v13087_v62  ;;  %v4968_v55 = vrot.slane %v4957_v7, 6 }
 0x497   : > { %13204 = vst [vmem:[#allocation144_spill] sm:$0xff] %v10782_v59  ;;  %13205 = vst [vmem:[#allocation145_spill] sm:$0xff] %v10784_v3  ;;  %v4992_v19 = vstv %s7068_s8  ;;  %s7079_s8 = sld [smem:[#allocation6 + $0x99]] }
 0x498   : > { %4890 = vrot.lane.b32.xlu1 %v4883_v10, %s7355_s27  ;;  %4888 = vrot.lane.b32.xlu0 %v4881_v57, %s7355_s27  ;;  %v4971_v57 = vrot.slane %v4958_v14, 6  ;;  %v4919_v63 = vsel %vm255_vm1, %v4913_v41, %v4918_v47  ;;  %v4995_v47 = vmul.f32 %v4992_v19, %v7557_v37  ;;  %v4994_v7 = vmul.f32 %v4992_v19, %v13032_v15 }
 0x49a   : > { %v10792_v59 = vpop.permute.xlu1 %4324  ;;  %v10794_v3 = vpop.permute.xlu0 %4322 }
 0x49b   : > { %13206 = vst [vmem:[#allocation150_spill] sm:$0xff] %v10792_v59  ;;  %13207 = vst [vmem:[#allocation151_spill] sm:$0xff] %v10794_v3  ;;  %v4967_v3 = vrot.slane %v4955_v24, 6  ;;  %v4975_v59 = vrot.slane %v4960_v13, 6 }
 0x49c   : > { %4924 = vrot.lane.b32.xlu1 %v4917_v8, %s7356_s6  ;;  %4922 = vrot.lane.b32.xlu0 %v4914_v36, %s7356_s6  ;;  %v4959_v8 = vmul.f32 %v4954_v56, %v13088_v45  ;;  %v4970_v36 = vrot.slane %v4956_v34, 6  ;;  %v4996_v56 = vmul.f32 %v4992_v19, %v13039_v21  ;;  %v4993_v34 = vmul.f32 %v4992_v19, %v7537_v28 }
 0x49d   : > { %v4969_v41 = vsel %vm1699_vm6, %v4967_v3, %v4968_v55  ;;  %v4976_v13 = vsel %vm1699_vm6, %v4971_v57, %v4975_v59  ;;  %v4998_v3 = vmul.f32 %v4992_v19, %v13087_v62 }
 0x49e   : > { %v10804_v25 = vpop.permute.xlu1 %4358  ;;  %v10806_v10 = vpop.permute.xlu0 %4356  ;;  %v4972_v14 = vsel %vm1699_vm6, %v4970_v36, %v4971_v57  ;;  %v4973_v52 = vrot.slane %v4959_v8, 6  ;;  %v5009_v8 = vrot.slane %v4996_v56, 6  ;;  %v5006_v36 = vrot.slane %v4995_v47, 6 }
 0x49f   : > { %13208 = vst [vmem:[#allocation148_spill] sm:$0xff] %v10804_v25  ;;  %13209 = vst [vmem:[#allocation149_spill] sm:$0xff] %v10806_v10  ;;  %v5013_v59 = vrot.slane %v4998_v3, 6 }
 0x4a0   : > { %4928 = vrot.lane.b32.xlu1 %v4921_v38, %s7356_s6  ;;  %4926 = vrot.lane.b32.xlu0 %v4919_v63, %s7356_s6  ;;  %v4974_v63 = vsel %vm1699_vm6, %v4968_v55, %v4973_v52 }
 0x4a1   : > { %v5014_v3 = vsel %vm1699_vm6, %v5009_v8, %v5013_v59 }
 0x4a2   : > { %v10814_v25 = vpop.permute.xlu1 %4362  ;;  %v10816_v10 = vpop.permute.xlu0 %4360 }
 0x4a3   : > { %13210 = vst [vmem:[#allocation154_spill] sm:$0xff] %v10814_v25  ;;  %13211 = vst [vmem:[#allocation155_spill] sm:$0xff] %v10816_v10  ;;  %v5005_v10 = vrot.slane %v4993_v34, 6  ;;  %v5030_v25 = vstv %s7069_s9  ;;  %s7081_s9 = sld [smem:[#allocation6 + $0x9b]] }
 0x4a4   : > { %4979 = vrot.lane.b32.xlu1 %v4972_v14, %s7351_s28  ;;  %4977 = vrot.lane.b32.xlu0 %v4969_v41, %s7351_s28  ;;  %v4997_v14 = vmul.f32 %v4992_v19, %v13088_v45  ;;  %v5008_v41 = vrot.slane %v4994_v7, 6  ;;  %v5034_v57 = vmul.f32 %v5030_v25, %v13039_v21  ;;  %v5033_v56 = vmul.f32 %v5030_v25, %v7557_v37 }
 0x4a5   : > { %v5007_v52 = vsel %vm1699_vm6, %v5005_v10, %v5006_v36  ;;  %v5032_v47 = vmul.f32 %v5030_v25, %v13032_v15  ;;  %v5031_v7 = vmul.f32 %v5030_v25, %v7537_v28 }
 0x4a6   : > { %v10826_v24 = vpop.permute.xlu1 %4396  ;;  %v10828_v38 = vpop.permute.xlu0 %4394  ;;  %v5010_v55 = vsel %vm1699_vm6, %v5008_v41, %v5009_v8  ;;  %v5011_v19 = vrot.slane %v4997_v14, 6  ;;  %v5044_v14 = vrot.slane %v5033_v56, 6  ;;  %v5036_v41 = vmul.f32 %v5030_v25, %v13087_v62 }
 0x4a7   : > { %13212 = vst [vmem:[#allocation152_spill] sm:$0xff] %v10826_v24  ;;  %13213 = vst [vmem:[#allocation153_spill] sm:$0xff] %v10828_v38 }
 0x4a8   : > { %4983 = vrot.lane.b32.xlu1 %v4976_v13, %s7351_s28  ;;  %4981 = vrot.lane.b32.xlu0 %v4974_v63, %s7351_s28  ;;  %v5047_v63 = vrot.slane %v5034_v57, 6  ;;  %v5012_v10 = vsel %vm1699_vm6, %v5006_v36, %v5011_v19  ;;  %v5051_v57 = vrot.slane %v5036_v41, 6 }
 0x4aa   : > { %v10836_v24 = vpop.permute.xlu1 %4400  ;;  %v10838_v38 = vpop.permute.xlu0 %4398 }
 0x4ab   : > { %13214 = vst [vmem:[#allocation156_spill] sm:$0xff] %v10836_v24  ;;  %13215 = vst [vmem:[#allocation157_spill] sm:$0xff] %v10838_v38  ;;  %v5043_v38 = vrot.slane %v5031_v7, 6  ;;  %v5068_v24 = vstv %s7070_s23  ;;  %s7082_s23 = sld [smem:[#allocation6 + $0x9c]] }
 0x4ac   : > { %5017 = vrot.lane.b32.xlu1 %v5010_v55, %s7352_s30  ;;  %5015 = vrot.lane.b32.xlu0 %v5007_v52, %s7352_s30  ;;  %v5035_v55 = vmul.f32 %v5030_v25, %v13088_v45  ;;  %v5046_v52 = vrot.slane %v5032_v47, 6  ;;  %v5072_v36 = vmul.f32 %v5068_v24, %v13039_v21  ;;  %v5071_v19 = vmul.f32 %v5068_v24, %v7557_v37 }
 0x4ad   : > { %v5045_v59 = vsel %vm1699_vm6, %v5043_v38, %v5044_v14  ;;  %v5070_v56 = vmul.f32 %v5068_v24, %v13032_v15  ;;  %v5069_v47 = vmul.f32 %v5068_v24, %v7537_v28  ;;  %v5052_v38 = vsel %vm1699_vm6, %v5047_v63, %v5051_v57 }
 0x4ae   : > { %v10848_v34 = vpop.permute.xlu1 %4434  ;;  %v10850_v13 = vpop.permute.xlu0 %4432  ;;  %v5048_v8 = vsel %vm1699_vm6, %v5046_v52, %v5047_v63  ;;  %v5049_v25 = vrot.slane %v5035_v55, 6  ;;  %v5074_v52 = vmul.f32 %v5068_v24, %v13087_v62  ;;  %v5082_v55 = vrot.slane %v5071_v19, 6 }
 0x4af   : > { %13216 = vst [vmem:[#allocation14_spill] sm:$0xff] %v10848_v34  ;;  %13217 = vst [vmem:[#allocation158_spill] sm:$0xff] %v10850_v13  ;;  %v5106_v63 = vstv %s7071_s26  ;;  %s7083_s26 = sld [smem:[#allocation6 + $0x9d]] }
 0x4b0   : > { %5021 = vrot.lane.b32.xlu1 %v5014_v3, %s7352_s30  ;;  %5019 = vrot.lane.b32.xlu0 %v5012_v10, %s7352_s30  ;;  %v5085_v10 = vrot.slane %v5072_v36, 6  ;;  %v5050_v41 = vsel %vm1699_vm6, %v5044_v14, %v5049_v25  ;;  %v5109_v25 = vmul.f32 %v5106_v63, %v7557_v37  ;;  %v5108_v19 = vmul.f32 %v5106_v63, %v13032_v15 }
 0x4b2   : > { %v10858_v34 = vpop.permute.xlu1 %4438  ;;  %v10860_v13 = vpop.permute.xlu0 %4436 }
 0x4b3   : > { %13218 = vst [vmem:[#allocation159_spill] sm:$0xff] %v10858_v34  ;;  %13219 = vst [vmem:[#allocation162_spill] sm:$0xff] %v10860_v13  ;;  %v5081_v13 = vrot.slane %v5069_v47, 6  ;;  %v5089_v34 = vrot.slane %v5074_v52, 6 }
 0x4b4   : > { %5055 = vrot.lane.b32.xlu1 %v5048_v8, %s7353_s17  ;;  %5053 = vrot.lane.b32.xlu0 %v5045_v59, %s7353_s17  ;;  %v5073_v8 = vmul.f32 %v5068_v24, %v13088_v45  ;;  %v5084_v59 = vrot.slane %v5070_v56, 6  ;;  %v5110_v24 = vmul.f32 %v5106_v63, %v13039_v21  ;;  %v5107_v56 = vmul.f32 %v5106_v63, %v7537_v28 }
 0x4b5   : > { %v5083_v14 = vsel %vm1699_vm6, %v5081_v13, %v5082_v55  ;;  %v5090_v52 = vsel %vm1699_vm6, %v5085_v10, %v5089_v34  ;;  %v5112_v13 = vmul.f32 %v5106_v63, %v13087_v62 }
 0x4b6   : > { %v10870_v7 = vpop.permute.xlu1 %4489  ;;  %v10872_v3 = vpop.permute.xlu0 %4487  ;;  %v5086_v36 = vsel %vm1699_vm6, %v5084_v59, %v5085_v10  ;;  %v5087_v57 = vrot.slane %v5073_v8, 6  ;;  %v5123_v8 = vrot.slane %v5110_v24, 6  ;;  %v5120_v59 = vrot.slane %v5109_v25, 6 }
 0x4b7   : > { %13220 = vst [vmem:[#allocation163_spill] sm:$0xff] %v10870_v7  ;;  %13221 = vst [vmem:[#allocation15_spill] sm:$0xff] %v10872_v3  ;;  %v5127_v34 = vrot.slane %v5112_v13, 6 }
 0x4b8   : > { %5059 = vrot.lane.b32.xlu1 %v5052_v38, %s7353_s17  ;;  %5057 = vrot.lane.b32.xlu0 %v5050_v41, %s7353_s17  ;;  %v5088_v41 = vsel %vm1699_vm6, %v5082_v55, %v5087_v57 }
 0x4ba   : > { %v10880_v7 = vpop.permute.xlu1 %4493  ;;  %v10882_v3 = vpop.permute.xlu0 %4491 }
 0x4bb   : > { %13222 = vst [vmem:[#allocation160_spill] sm:$0xff] %v10880_v7  ;;  %13223 = vst [vmem:[#allocation161_spill] sm:$0xff] %v10882_v3  ;;  %v5119_v3 = vrot.slane %v5107_v56, 6  ;;  %v5144_v7 = vstv %s7072_s7  ;;  %s7084_s7 = sld [smem:[#allocation6 + $0x9e]] }
 0x4bc   : > { %5093 = vrot.lane.b32.xlu1 %v5086_v36, %s7354_s19  ;;  %5091 = vrot.lane.b32.xlu0 %v5083_v14, %s7354_s19  ;;  %v5111_v36 = vmul.f32 %v5106_v63, %v13088_v45  ;;  %v5122_v14 = vrot.slane %v5108_v19, 6  ;;  %v5148_v10 = vmul.f32 %v5144_v7, %v13039_v21  ;;  %v5147_v63 = vmul.f32 %v5144_v7, %v7557_v37 }
 0x4bd   : > { %v5121_v57 = vsel %vm1699_vm6, %v5119_v3, %v5120_v59  ;;  %v5146_v25 = vmul.f32 %v5144_v7, %v13032_v15  ;;  %v5145_v19 = vmul.f32 %v5144_v7, %v7537_v28  ;;  %v5128_v21 = vsel %vm1699_vm6, %v5123_v8, %v5127_v34 }
 0x4be   : > { %v10892_v47 = vpop.permute.xlu1 %4527  ;;  %v10894_v38 = vpop.permute.xlu0 %4525  ;;  %v5124_v55 = vsel %vm1699_vm6, %v5122_v14, %v5123_v8  ;;  %v5125_v24 = vrot.slane %v5111_v36, 6  ;;  %v5161_v13 = vrot.slane %v5148_v10, 6  ;;  %v5150_v36 = vmul.f32 %v5144_v7, %v13087_v62 }
 0x4bf   : > { %13224 = vst [vmem:[#allocation166_spill] sm:$0xff] %v10892_v47  ;;  %13225 = vst [vmem:[#allocation167_spill] sm:$0xff] %v10894_v38  ;;  %v5149_v14 = vmul.f32 %v5144_v7, %v13088_v45  ;;  %v5160_v15 = vrot.slane %v5146_v25, 6  ;;  %v5188_v25 = vstv %s7074_s4  ;;  %s7031_s4 = sld [smem:[#allocation6 + $0x69]] }
 0x4c0   : > { %5097 = vrot.lane.b32.xlu1 %v5090_v52, %s7354_s19  ;;  %5095 = vrot.lane.b32.xlu0 %v5088_v41, %s7354_s19  ;;  %v5126_v3 = vsel %vm1699_vm6, %v5120_v59, %v5125_v24  ;;  %v5158_v41 = vrot.slane %v5147_v63, 6  ;;  %v5165_v34 = vrot.slane %v5150_v36, 6 }
 0x4c1   : > { %v5162_v8 = vsel %vm1699_vm6, %v5160_v15, %v5161_v13  ;;  %v5163_v10 = vrot.slane %v5149_v14, 6  ;;  %v13237_v14 = vld [vmem:[#allocation93_spill] sm:$0xff] }
 0x4c2   : > { %v10902_v47 = vpop.permute.xlu1 %4531  ;;  %v10904_v38 = vpop.permute.xlu0 %4529  ;;  %v5166_v24 = vsel %vm1699_vm6, %v5161_v13, %v5165_v34  ;;  %v5189_v15 = vmul.f32 %v5188_v25, %v13237_v14 }
 0x4c3   : > { %13226 = vst [vmem:[#allocation164_spill] sm:$0xff] %v10902_v47  ;;  %13227 = vst [vmem:[#allocation165_spill] sm:$0xff] %v10904_v38  ;;  %v5164_v63 = vsel %vm1699_vm6, %v5158_v41, %v5163_v10  ;;  %v5212_v10 = vstv %s7075_s11  ;;  %s7085_s11 = sld [smem:[#allocation6 + $0x9f]] }
 0x4c4   : > { %5131 = vrot.lane.b32.xlu1 %v5124_v55, %s7355_s27  ;;  %5129 = vrot.lane.b32.xlu0 %v5121_v57, %s7355_s27  ;;  %v5157_v55 = vrot.slane %v5145_v19, 6 }
 0x4c6   : > { %v10914_v56 = vpop.permute.xlu1 %4565  ;;  %v10916_v52 = vpop.permute.xlu0 %4563  ;;  %v5159_v59 = vsel %vm1699_vm6, %v5157_v55, %v5158_v41  ;;  %v13240_v55 = vld [vmem:[#allocation100_spill] sm:$0xff] }
 0x4c7   : > { %13228 = vst [vmem:[#allocation170_spill] sm:$0xff] %v10914_v56  ;;  %13229 = vst [vmem:[#allocation171_spill] sm:$0xff] %v10916_v52  ;;  %v13262_v56 = vld [vmem:[#allocation119_spill] sm:$0xff] }
 0x4c8   : > { %5135 = vrot.lane.b32.xlu1 %v5128_v21, %s7355_s27  ;;  %5133 = vrot.lane.b32.xlu0 %v5126_v3, %s7355_s27  ;;  %v13236_v3 = vld [vmem:[#allocation94_spill] sm:$0xff] }
 0x4c9   : > { %v5190_v36 = vmul.f32 %v5188_v25, %v13236_v3 }
 0x4ca   : > { %v10924_v57 = vpop.permute.xlu1 %4569  ;;  %v10926_v52 = vpop.permute.xlu0 %4567 }
 0x4cb   : > { %13230 = vst [vmem:[#allocation168_spill] sm:$0xff] %v10924_v57  ;;  %13231 = vst [vmem:[#allocation169_spill] sm:$0xff] %v10926_v52 }
 0x4cc   : > { %5169 = vrot.lane.b32.xlu1 %v5162_v8, %s7356_s6  ;;  %5167 = vrot.lane.b32.xlu0 %v5159_v59, %s7356_s6  ;;  %v5192_v8 = vmul.f32 %v5188_v25, %v13240_v55  ;;  %v13241_v59 = vld [vmem:[#allocation99_spill] sm:$0xff] }
 0x4cd   : > { %v5191_v34 = vmul.f32 %v5188_v25, %v13241_v59 }
 0x4ce   : > { %v10932_v62 = vpop.permute.xlu1 %4603  ;;  %v10934_v7 = vpop.permute.xlu0 %4601 }
 0x4cf   : > { %13232 = vst [vmem:[#allocation174_spill] sm:$0xff] %v10932_v62  ;;  %13233 = vst [vmem:[#allocation175_spill] sm:$0xff] %v10934_v7 }
 0x4d0   : > { %5173 = vrot.lane.b32.xlu1 %v5166_v24, %s7356_s6  ;;  %5171 = vrot.lane.b32.xlu0 %v5164_v63, %s7356_s6 }
 0x4d2   : > { %v10940_v19 = vpop.permute.xlu1 %4607  ;;  %v10942_v21 = vpop.permute.xlu0 %4605 }
 0x4d3   : > { %13234 = vst [vmem:[#allocation172_spill] sm:$0xff] %v10940_v19  ;;  %13235 = vst [vmem:[#allocation173_spill] sm:$0xff] %v10942_v21 }
 0x4d4   : > { %5199 = vrot.lane.b32.xlu1 %v5190_v36, %s7351_s28  ;;  %5197 = vrot.lane.b32.xlu0 %v5189_v15, %s7351_s28  ;;  %v5214_v36 = vmul.f32 %v5212_v10, %v13236_v3  ;;  %v5213_v15 = vmul.f32 %v5212_v10, %v13237_v14 }
 0x4d6   : > { %v10948_v13 = vpop.permute.xlu1 %4641  ;;  %v10950_v41 = vpop.permute.xlu0 %4639 }
 0x4d7   : > { %13238 = vst [vmem:[#allocation178_spill] sm:$0xff] %v10948_v13  ;;  %13239 = vst [vmem:[#allocation179_spill] sm:$0xff] %v10950_v41  ;;  %v5236_v13 = vstv %s7076_s10  ;;  %s11086_s10 = sld [smem:[#allocation6 + $0x62]] }
 0x4d8   : > { %5203 = vrot.lane.b32.xlu1 %v5192_v8, %s7351_s28  ;;  %5201 = vrot.lane.b32.xlu0 %v5191_v34, %s7351_s28  ;;  %v5216_v8 = vmul.f32 %v5212_v10, %v13240_v55  ;;  %v5215_v34 = vmul.f32 %v5212_v10, %v13241_v59 }
 0x4da   : > { %v10956_v24 = vpop.permute.xlu1 %4645  ;;  %v10958_v63 = vpop.permute.xlu0 %4643 }
 0x4db   : > { %13242 = vst [vmem:[#allocation176_spill] sm:$0xff] %v10956_v24  ;;  %13243 = vst [vmem:[#allocation177_spill] sm:$0xff] %v10958_v63 }
 0x4dc   : > { %5223 = vrot.lane.b32.xlu1 %v5214_v36, %s7352_s30  ;;  %5221 = vrot.lane.b32.xlu0 %v5213_v15, %s7352_s30  ;;  %v5238_v36 = vmul.f32 %v5236_v13, %v13236_v3  ;;  %v5237_v15 = vmul.f32 %v5236_v13, %v13237_v14 }
 0x4de   : > { %v10964_v41 = vpop.permute.xlu1 %4679  ;;  %v10966_v25 = vpop.permute.xlu0 %4677 }
 0x4df   : > { %13244 = vst [vmem:[#allocation180_spill] sm:$0xff] %v10964_v41  ;;  %13245 = vst [vmem:[#allocation181_spill] sm:$0xff] %v10966_v25  ;;  %v5260_v41 = vstv %s7077_s20  ;;  %s11098_s20 = sld [smem:[#allocation7 + $0x1]] }
 0x4e0   : > { %5227 = vrot.lane.b32.xlu1 %v5216_v8, %s7352_s30  ;;  %5225 = vrot.lane.b32.xlu0 %v5215_v34, %s7352_s30  ;;  %v5240_v8 = vmul.f32 %v5236_v13, %v13240_v55  ;;  %v5239_v34 = vmul.f32 %v5236_v13, %v13241_v59 }
 0x4e2   : > { %v10972_v63 = vpop.permute.xlu1 %4683  ;;  %v10974_v24 = vpop.permute.xlu0 %4681 }
 0x4e3   : > { %13246 = vst [vmem:[#allocation182_spill] sm:$0xff] %v10972_v63  ;;  %13247 = vst [vmem:[#allocation183_spill] sm:$0xff] %v10974_v24 }
 0x4e4   : > { %5247 = vrot.lane.b32.xlu1 %v5238_v36, %s7353_s17  ;;  %5245 = vrot.lane.b32.xlu0 %v5237_v15, %s7353_s17  ;;  %v5262_v36 = vmul.f32 %v5260_v41, %v13236_v3  ;;  %v5261_v15 = vmul.f32 %v5260_v41, %v13237_v14 }
 0x4e6   : > { %v10980_v25 = vpop.permute.xlu1 %4734  ;;  %v10982_v10 = vpop.permute.xlu0 %4732 }
 0x4e7   : > { %13248 = vst [vmem:[#allocation184_spill] sm:$0xff] %v10980_v25  ;;  %13249 = vst [vmem:[#allocation185_spill] sm:$0xff] %v10982_v10  ;;  %v5284_v25 = vstv %s7078_s29  ;;  %s11102_s29 = sld [smem:[#allocation6 + $0x70]] }
 0x4e8   : > { %5251 = vrot.lane.b32.xlu1 %v5240_v8, %s7353_s17  ;;  %5249 = vrot.lane.b32.xlu0 %v5239_v34, %s7353_s17  ;;  %v5264_v8 = vmul.f32 %v5260_v41, %v13240_v55  ;;  %v5263_v34 = vmul.f32 %v5260_v41, %v13241_v59 }
 0x4ea   : > { %v10988_v24 = vpop.permute.xlu1 %4738  ;;  %v10990_v63 = vpop.permute.xlu0 %4736 }
 0x4eb   : > { %13250 = vst [vmem:[#allocation20_spill] sm:$0xff] %v10988_v24  ;;  %13251 = vst [vmem:[#allocation18_spill] sm:$0xff] %v10990_v63  ;;  %v5349_v24 = vstv %s7081_s9  ;;  %s11121_s9 = sld [smem:[#allocation6 + $0x77]] }
 0x4ec   : > { %5271 = vrot.lane.b32.xlu1 %v5262_v36, %s7354_s19  ;;  %5269 = vrot.lane.b32.xlu0 %v5261_v15, %s7354_s19  ;;  %v5286_v15 = vmul.f32 %v5284_v25, %v13236_v3  ;;  %v5353_v7 = vmul.f32 %v5349_v24, %v13240_v55  ;;  %v5352_v62 = vmul.f32 %v5349_v24, %v13241_v59 }
 0x4ed   : > { %v5355_v52 = vmul.f32 %v5349_v24, %v13262_v56 }
 0x4ee   : > { %v10996_v10 = vpop.permute.xlu1 %4772  ;;  %v10998_v13 = vpop.permute.xlu0 %4770  ;;  %v5366_v57 = vrot.slane %v5353_v7, 1  ;;  %v5363_v47 = vrot.slane %v5352_v62, 1 }
 0x4ef   : > { %13252 = vst [vmem:[#allocation19_spill] sm:$0xff] %v10996_v10  ;;  %13253 = vst [vmem:[#allocation23_spill] sm:$0xff] %v10998_v13  ;;  %v5285_v10 = vmul.f32 %v5284_v25, %v13237_v14 }
 0x4f0   : > { %5275 = vrot.lane.b32.xlu1 %v5264_v8, %s7354_s19  ;;  %5273 = vrot.lane.b32.xlu0 %v5263_v34, %s7354_s19  ;;  %v5288_v8 = vmul.f32 %v5284_v25, %v13240_v55  ;;  %v5287_v34 = vmul.f32 %v5284_v25, %v13241_v59  ;;  %v5350_v25 = vmul.f32 %v5349_v24, %v13237_v14 }
 0x4f2   : > { %v11004_v63 = vpop.permute.xlu1 %4776  ;;  %v11006_v36 = vpop.permute.xlu0 %4774  ;;  %v5362_v38 = vrot.slane %v5350_v25, 1  ;;  %v5370_v25 = vrot.slane %v5355_v52, 1 }
 0x4f3   : > { %13254 = vst [vmem:[#allocation24_spill] sm:$0xff] %v11004_v63  ;;  %13255 = vst [vmem:[#allocation21_spill] sm:$0xff] %v11006_v36  ;;  %v5308_v63 = vstv %s7079_s8  ;;  %s11112_s8 = sld [smem:[#allocation6 + $0xa0]] }
 0x4f4   : > { %5295 = vrot.lane.b32.xlu1 %v5286_v15, %s7355_s27  ;;  %5293 = vrot.lane.b32.xlu0 %v5285_v10, %s7355_s27  ;;  %v5310_v10 = vmul.f32 %v5308_v63, %v13236_v3  ;;  %v5311_v21 = vmul.f32 %v5308_v63, %v13241_v59 }
 0x4f6   : > { %v11012_v41 = vpop.permute.xlu1 %4810  ;;  %v11014_v13 = vpop.permute.xlu0 %4808 }
 0x4f7   : > { %13256 = vst [vmem:[#allocation22_spill] sm:$0xff] %v11012_v41  ;;  %13257 = vst [vmem:[#allocation27_spill] sm:$0xff] %v11014_v13  ;;  %v5309_v41 = vmul.f32 %v5308_v63, %v13237_v14  ;;  %v5351_v13 = vmul.f32 %v5349_v24, %v13236_v3 }
 0x4f8   : > { %5299 = vrot.lane.b32.xlu1 %v5288_v8, %s7355_s27  ;;  %5297 = vrot.lane.b32.xlu0 %v5287_v34, %s7355_s27  ;;  %v5387_v8 = vstv %s7082_s23  ;;  %s11140_s23 = sld [smem:[#allocation6 + $0x7e]] }
 0x4f9   : > { %v5365_v19 = vrot.slane %v5351_v13, 1  ;;  %v5388_v13 = vmul.f32 %v5387_v8, %v13237_v14  ;;  %v5390_v7 = vmul.f32 %v5387_v8, %v13241_v59  ;;  %v5393_v52 = vmul.f32 %v5387_v8, %v13262_v56 }
 0x4fa   : > { %v11020_v36 = vpop.permute.xlu1 %4814  ;;  %v11022_v15 = vpop.permute.xlu0 %4812  ;;  %v5539_v23 = vstv %s11112_s8  ;;  %s11398_s8 = sld [smem:[#allocation6 + $0xa7]] }
 0x4fb   : > { %13258 = vst [vmem:[#allocation28_spill] sm:$0xff] %v11020_v36  ;;  %13259 = vst [vmem:[#allocation25_spill] sm:$0xff] %v11022_v15  ;;  %v5312_v36 = vmul.f32 %v5308_v63, %v13240_v55  ;;  %v5391_v63 = vmul.f32 %v5387_v8, %v13240_v55  ;;  %v5367_v62 = vsel %vm470_vm2, %v5365_v19, %v5366_v57  ;;  %v5400_v31 = vrot.slane %v5388_v13, 1 }
 0x4fc   : > { %5319 = vrot.lane.b32.xlu1 %v5310_v10, %s7356_s6  ;;  %5317 = vrot.lane.b32.xlu0 %v5309_v41, %s7356_s6  ;;  %v5354_v10 = vmul.f32 %v5349_v24, %v8470_v11  ;;  %v5364_v24 = vsel %vm470_vm2, %v5362_v38, %v5363_v47  ;;  %v5401_v58 = vrot.slane %v5390_v7, 1  ;;  %v5371_v19 = vsel %vm470_vm2, %v5366_v57, %v5370_v25 }
 0x4fd   : > { %v5404_v51 = vrot.slane %v5391_v63, 1  ;;  %v5408_v13 = vrot.slane %v5393_v52, 1 }
 0x4fe   : > { %v11032_v34 = vpop.permute.xlu1 %4848  ;;  %v11034_v15 = vpop.permute.xlu0 %4846  ;;  %v5402_v63 = vsel %vm470_vm2, %v5400_v31, %v5401_v58 }
 0x4ff   : > { %13260 = vst [vmem:[#allocation26_spill] sm:$0xff] %v11032_v34  ;;  %13261 = vst [vmem:[#allocation31_spill] sm:$0xff] %v11034_v15  ;;  %v5389_v15 = vmul.f32 %v5387_v8, %v13236_v3 }
 0x500   : > { %5323 = vrot.lane.b32.xlu1 %v5312_v36, %s7356_s6  ;;  %5321 = vrot.lane.b32.xlu0 %v5311_v21, %s7356_s6  ;;  %v5368_v36 = vrot.slane %v5354_v10, 1  ;;  %v5425_v21 = vstv %s7083_s26  ;;  %v5392_v10 = vmul.f32 %v5387_v8, %v8470_v11  ;;  %s11151_s26 = sld [smem:[#allocation6 + $0xa2]] }
 0x501   : > { %v5403_v35 = vrot.slane %v5389_v15, 1  ;;  %v5427_v57 = vmul.f32 %v5425_v21, %v13236_v3  ;;  %v5426_v8 = vmul.f32 %v5425_v21, %v13237_v14  ;;  %v5428_v25 = vmul.f32 %v5425_v21, %v13241_v59 }
 0x502   : > { %v11042_v41 = vpop.permute.xlu1 %4852  ;;  %v11044_v34 = vpop.permute.xlu0 %4850  ;;  %v5369_v38 = vsel %vm470_vm2, %v5363_v47, %v5368_v36  ;;  %v5429_v47 = vmul.f32 %v5425_v21, %v13240_v55  ;;  %v5406_v7 = vrot.slane %v5392_v10, 1  ;;  %v5463_v36 = vstv %s7084_s7  ;;  %s11188_s7 = sld [smem:[#allocation6 + $0x85]] }
 0x503   : > { %13263 = vst [vmem:[#allocation29_spill] sm:$0xff] %v11042_v41  ;;  %13264 = vst [vmem:[#allocation30_spill] sm:$0xff] %v11044_v34  ;;  %v5405_v15 = vsel %vm470_vm2, %v5403_v35, %v5404_v51  ;;  %v5441_v31 = vrot.slane %v5427_v57, 1  ;;  %v5430_v52 = vmul.f32 %v5425_v21, %v8470_v11  ;;  %v5409_v10 = vsel %vm470_vm2, %v5404_v51, %v5408_v13 }
 0x504   : > { %5374 = vrot.lane.b32.xlu1 %v5367_v62, %s7351_s28  ;;  %5372 = vrot.lane.b32.xlu0 %v5364_v24, %s7351_s28 }
 0x505   : > { %v5444_v13 = vrot.slane %v5430_v52, 1 }
 0x506   : > { %v11054_v34 = vpop.permute.xlu1 %4886  ;;  %v11056_v41 = vpop.permute.xlu0 %4884  ;;  %v5594_v40 = vstv %s11151_s26  ;;  %s11504_s26 = sld [smem:[#allocation6 + $0xaa]] }
 0x507   : > { %13265 = vst [vmem:[#allocation34_spill] sm:$0xff] %v11054_v34  ;;  %13266 = vst [vmem:[#allocation35_spill] sm:$0xff] %v11056_v41  ;;  %v5431_v41 = vmul.f32 %v5425_v21, %v13262_v56  ;;  %v5407_v34 = vsel %vm470_vm2, %v5401_v58, %v5406_v7  ;;  %v5467_v7 = vmul.f32 %v5463_v36, %v13240_v55 }
 0x508   : > { %5378 = vrot.lane.b32.xlu1 %v5371_v19, %s7351_s28  ;;  %5376 = vrot.lane.b32.xlu0 %v5369_v38, %s7351_s28  ;;  %v5442_v38 = vrot.slane %v5429_v47, 1 }
 0x509   : > { %v5446_v51 = vrot.slane %v5431_v41, 1 }
 0x50a   : > { %v11064_v62 = vpop.permute.xlu1 %4890  ;;  %v11066_v24 = vpop.permute.xlu0 %4888  ;;  %v5443_v21 = vsel %vm470_vm2, %v5441_v31, %v5442_v38 }
 0x50b   : > { %13267 = vst [vmem:[#allocation16_spill] sm:$0xff] %v11064_v62  ;;  %13268 = vst [vmem:[#allocation17_spill] sm:$0xff] %v11066_v24  ;;  %v5438_v24 = vrot.slane %v5426_v8, 1  ;;  %v5464_v8 = vmul.f32 %v5463_v36, %v13237_v14  ;;  %v5447_v52 = vsel %vm470_vm2, %v5442_v38, %v5446_v51  ;;  %v3560_v62 = vstv %s11098_s20  ;;  %s11284_s20 = sld [smem:[#allocation6 + $0xa5]] }
 0x50c   : > { %5412 = vrot.lane.b32.xlu1 %v5405_v15, %s7352_s30  ;;  %5410 = vrot.lane.b32.xlu0 %v5402_v63, %s7352_s30  ;;  %v5439_v15 = vrot.slane %v5428_v25, 1  ;;  %v5465_v63 = vmul.f32 %v5463_v36, %v13236_v3  ;;  %v3712_v25 = vstv %s7031_s4  ;;  %s11191_s4 = sld [smem:[#allocation6 + $0xa3]] }
 0x50d   : > { %v3713_v38 = vmul.f32 %v3712_v25, %v7537_v28 }
 0x50e   : > { %v11076_v19 = vpop.permute.xlu1 %4924  ;;  %v11078_v35 = vpop.permute.xlu0 %4922  ;;  %v5440_v58 = vsel %vm470_vm2, %v5438_v24, %v5439_v15  ;;  %v5479_v41 = vrot.slane %v5465_v63, 1  ;;  %v3562_v63 = vstv %s11086_s10  ;;  %s11243_s10 = sld [smem:[#allocation6 + $0x8c]] }
 0x50f   : > { %13269 = vst [vmem:[#allocation32_spill] sm:$0xff] %v11076_v19  ;;  %13270 = vst [vmem:[#allocation33_spill] sm:$0xff] %v11078_v35  ;;  %v5469_v35 = vmul.f32 %v5463_v36, %v13262_v56  ;;  %v5468_v19 = vmul.f32 %v5463_v36, %v8470_v11 }
 0x510   : > { %5416 = vrot.lane.b32.xlu1 %v5409_v10, %s7352_s30  ;;  %5414 = vrot.lane.b32.xlu0 %v5407_v34, %s7352_s30  ;;  %v5466_v34 = vmul.f32 %v5463_v36, %v13241_v59  ;;  %v5445_v10 = vsel %vm470_vm2, %v5439_v15, %v5444_v13  ;;  %v11119_v15 = vmul.f32 %v3712_v25, %v7557_v37 }
 0x511   : > { %v5484_v13 = vrot.slane %v5469_v35, 1 }
 0x512   : > { %v11089_v57 = vpop.permute.xlu1 %4928  ;;  %v11091_v47 = vpop.permute.xlu0 %4926 }
 0x513   : > { %13271 = vst [vmem:[#allocation36_spill] sm:$0xff] %v11089_v57  ;;  %13272 = vst [vmem:[#allocation37_spill] sm:$0xff] %v11091_v47  ;;  %v5476_v47 = vrot.slane %v5464_v8, 1  ;;  %v5501_v57 = vstv %s7085_s11  ;;  %s11226_s11 = sld [smem:[#allocation6 + $0xa4]] }
 0x514   : > { %5450 = vrot.lane.b32.xlu1 %v5443_v21, %s7353_s17  ;;  %5448 = vrot.lane.b32.xlu0 %v5440_v58, %s7353_s17  ;;  %v5480_v21 = vrot.slane %v5467_v7, 1  ;;  %v5477_v58 = vrot.slane %v5466_v34, 1  ;;  %v5482_v7 = vrot.slane %v5468_v19, 1  ;;  %v5503_v8 = vmul.f32 %v5501_v57, %v13236_v3 }
 0x515   : > { %v5505_v34 = vmul.f32 %v5501_v57, %v13240_v55  ;;  %v3719_v19 = vrot.slane %v3713_v38, 1  ;;  %v5506_v35 = vmul.f32 %v5501_v57, %v8470_v11 }
 0x516   : > { %v11104_v31 = vpop.permute.xlu1 %4979  ;;  %v11106_v24 = vpop.permute.xlu0 %4977  ;;  %v5485_v9 = vsel %vm470_vm2, %v5480_v21, %v5484_v13 }
 0x517   : > { %13273 = vst [vmem:[#allocation38_spill] sm:$0xff] %v11104_v31  ;;  %13274 = vst [vmem:[#allocation39_spill] sm:$0xff] %v11106_v24  ;;  %v5502_v24 = vmul.f32 %v5501_v57, %v13237_v14  ;;  %v5504_v31 = vmul.f32 %v5501_v57, %v13241_v59  ;;  %v5518_v26 = vrot.slane %v5505_v34, 1  ;;  %v5540_v34 = vmul.f32 %v5539_v23, %v13237_v14 }
 0x518   : > { %5454 = vrot.lane.b32.xlu1 %v5447_v52, %s7353_s17  ;;  %5452 = vrot.lane.b32.xlu0 %v5445_v10, %s7353_s17  ;;  %v5481_v52 = vsel %vm470_vm2, %v5479_v41, %v5480_v21  ;;  %v5478_v10 = vsel %vm470_vm2, %v5476_v47, %v5477_v58  ;;  %v3957_v41 = vstv %s11102_s29  ;;  %v5507_v47 = vmul.f32 %v5501_v57, %v13262_v56  ;;  %s11345_s29 = sld [smem:[#allocation6 + $0xa6]] }
 0x519   : > { %v5515_v38 = vrot.slane %v5504_v31, 1  ;;  %v3959_v57 = vmul.f32 %v3957_v41, %v7557_v37  ;;  %v5552_v4 = vrot.slane %v5540_v34, 1 }
 0x51a   : > { %v11123_v36 = vpop.permute.xlu1 %4983  ;;  %v11125_v51 = vpop.permute.xlu0 %4981 }
 0x51b   : > { %13275 = vst [vmem:[#allocation42_spill] sm:$0xff] %v11123_v36  ;;  %13276 = vst [vmem:[#allocation43_spill] sm:$0xff] %v11125_v51  ;;  %v3563_v36 = vmul.f32 %v3562_v63, %v7537_v28  ;;  %v3564_v51 = vmul.f32 %v3562_v63, %v7557_v37  ;;  %v5483_v63 = vsel %vm470_vm2, %v5477_v58, %v5482_v7  ;;  %v5522_v58 = vrot.slane %v5507_v47, 1 }
 0x51c   : > { %5488 = vrot.lane.b32.xlu1 %v5481_v52, %s7354_s19  ;;  %5486 = vrot.lane.b32.xlu0 %v5478_v10, %s7354_s19  ;;  %v5517_v52 = vrot.slane %v5503_v8, 1  ;;  %v5514_v10 = vrot.slane %v5502_v24, 1  ;;  %v13279_v24 = vrot.slane %v11119_v15, 1  ;;  %v5541_v7 = vmul.f32 %v5539_v23, %v13236_v3 }
 0x51d   : > { %v11153_v39 = vadd.f32 %v3563_v36, %v3560_v62  ;;  %v11159_v21 = vadd.f32 %v3564_v51, %v3560_v62  ;;  %v4202_v36 = vstv %s11121_s9  ;;  %v11175_v62 = vmul.f32 %v5539_v23, %v13240_v55  ;;  %s11434_s9 = sld [smem:[#allocation6 + $0xa9]] }
 0x51e   : > { %v11143_v46 = vpop.permute.xlu1 %5017  ;;  %v11145_v12 = vpop.permute.xlu0 %5015  ;;  %v11164_v31 = vsel %vm470_vm2, %v3719_v19, %v13279_v24  ;;  %v5516_v51 = vsel %vm470_vm2, %v5514_v10, %v5515_v38  ;;  %v5520_v8 = vrot.slane %v5506_v35, 1  ;;  %v5542_v19 = vmul.f32 %v5539_v23, %v13241_v59 }
 0x51f   : > { %13277 = vst [vmem:[#allocation40_spill] sm:$0xff] %v11143_v46  ;;  %13278 = vst [vmem:[#allocation41_spill] sm:$0xff] %v11145_v12  ;;  %v3715_v46 = vmul.f32 %v3712_v25, %v13088_v45  ;;  %v3958_v12 = vmul.f32 %v3957_v41, %v7537_v28  ;;  %v3960_v24 = vmul.f32 %v3957_v41, %v13088_v45  ;;  %v4447_v35 = vstv %s11140_s23  ;;  %s11469_s23 = sld [smem:[#allocation6 + $0x93]] }
 0x520   : > { %5492 = vrot.lane.b32.xlu1 %v5485_v9, %s7354_s19  ;;  %5490 = vrot.lane.b32.xlu0 %v5483_v63, %s7354_s19  ;;  %13280 = vst [vmem:[#allocation46_spill] sm:$0xff] %v11164_v31  ;;  %v5519_v9 = vsel %vm470_vm2, %v5517_v52, %v5518_v26  ;;  %v3965_v52 = vrot.slane %v3959_v57, 2  ;;  %v4203_v10 = vmul.f32 %v4202_v36, %v7537_v28  ;;  %v5555_v41 = vrot.slane %v5541_v7, 1 }
 0x521   : > { %v3722_v47 = vrot.slane %v3715_v46, 1  ;;  %v3964_v63 = vrot.slane %v3958_v12, 2  ;;  %v5544_v57 = vmul.f32 %v5539_v23, %v8470_v11  ;;  %v5521_v31 = vsel %vm470_vm2, %v5515_v38, %v5520_v8 }
 0x522   : > { %v11168_v13 = vpop.permute.xlu1 %5021  ;;  %v11170_v25 = vpop.permute.xlu0 %5019  ;;  %v5553_v16 = vrot.slane %v5542_v19, 1  ;;  %v3967_v60 = vrot.slane %v3960_v24, 2  ;;  %v13285_v7 = vrot.slane %v11119_v15, 1  ;;  %v11216_v8 = vmul.f32 %v4447_v35, %v7557_v37 }
 0x523   : > { %13281 = vst [vmem:[#allocation47_spill] sm:$0xff] %v11168_v13  ;;  %13282 = vst [vmem:[#allocation44_spill] sm:$0xff] %v11170_v25  ;;  %v11182_v25 = vmul.f32 %v4202_v36, %v7557_v37  ;;  %v5523_v13 = vsel %vm470_vm2, %v5518_v26, %v5522_v58  ;;  %v4205_v58 = vmul.f32 %v4202_v36, %v13088_v45 }
 0x524   : > { %5526 = vrot.lane.b32.xlu1 %v5519_v9, %s7355_s27  ;;  %5524 = vrot.lane.b32.xlu0 %v5516_v51, %s7355_s27  ;;  %v5556_v9 = vrot.slane %v11175_v62, 1  ;;  %v5545_v51 = vmul.f32 %v5539_v23, %v13262_v56  ;;  %v11210_v23 = vsel %vm470_vm2, %v13285_v7, %v3722_v47  ;;  %v11213_v38 = vsel %vm716_vm3, %v3964_v63, %v3965_v52 }
 0x525   : > { %v4210_v26 = vrot.slane %v11182_v25, 3  ;;  %13286 = vst [vmem:[#allocation51_spill] sm:$0xff] %v11213_v38  ;;  %v4209_v62 = vrot.slane %v4203_v10, 3  ;;  %v11224_v15 = vmul.f32 %v5594_v40, %v13240_v55  ;;  %v5554_v47 = vsel %vm470_vm2, %v5552_v4, %v5553_v16 }
 0x526   : > { %v11193_v12 = vpop.permute.xlu1 %5055  ;;  %v11195_v46 = vpop.permute.xlu0 %5053  ;;  %v5560_v34 = vrot.slane %v5545_v51, 1  ;;  %v5557_v19 = vsel %vm470_vm2, %v5555_v41, %v5556_v9  ;;  %v5595_v63 = vmul.f32 %v5594_v40, %v13237_v14  ;;  %v5597_v24 = vmul.f32 %v5594_v40, %v13241_v59 }
 0x527   : > { %13283 = vst [vmem:[#allocation45_spill] sm:$0xff] %v11193_v12  ;;  %13284 = vst [vmem:[#allocation50_spill] sm:$0xff] %v11195_v46  ;;  %v4448_v12 = vmul.f32 %v4447_v35, %v7537_v28  ;;  %v11233_v10 = vsel %vm716_vm3, %v3965_v52, %v3967_v60  ;;  %v11236_v51 = vsel %vm962_vm4, %v4209_v62, %v4210_v26  ;;  %v4455_v41 = vrot.slane %v11216_v8, 4 }
 0x528   : > { %5530 = vrot.lane.b32.xlu1 %v5523_v13, %s7355_s27  ;;  %5528 = vrot.lane.b32.xlu0 %v5521_v31, %s7355_s27  ;;  %v5558_v13 = vrot.slane %v5544_v57, 1  ;;  %v5596_v31 = vmul.f32 %v5594_v40, %v13236_v3  ;;  %13289 = vst [vmem:[#allocation54_spill] sm:$0xff] %v11233_v10  ;;  %13290 = vst [vmem:[#allocation55_spill] sm:$0xff] %v11236_v51  ;;  %v4212_v57 = vrot.slane %v4205_v58, 3  ;;  %v4692_v46 = vstv %s11188_s7  ;;  %s11564_s7 = sld [smem:[#allocation6 + $0xab]] }
 0x529   : > { %v4454_v7 = vrot.slane %v4448_v12, 4  ;;  %v4450_v4 = vmul.f32 %v4447_v35, %v13088_v45  ;;  %v5561_v52 = vsel %vm470_vm2, %v5556_v9, %v5560_v34  ;;  %v5611_v62 = vrot.slane %v11224_v15, 2 }
 0x52a   : > { %v11218_v25 = vpop.permute.xlu1 %5059  ;;  %v11220_v36 = vpop.permute.xlu0 %5057  ;;  %v5559_v12 = vsel %vm470_vm2, %v5553_v16, %v5558_v13  ;;  %v5610_v58 = vrot.slane %v5596_v31, 2  ;;  %v5600_v8 = vmul.f32 %v5594_v40, %v13262_v56  ;;  %v5599_v35 = vmul.f32 %v5594_v40, %v8470_v11 }
 0x52b   : > { %13287 = vst [vmem:[#allocation48_spill] sm:$0xff] %v11218_v25  ;;  %13288 = vst [vmem:[#allocation49_spill] sm:$0xff] %v11220_v36  ;;  %v5632_v36 = vstv %s11191_s4  ;;  %v4693_v51 = vmul.f32 %v4692_v46, %v7537_v28  ;;  %v11261_v16 = vsel %vm962_vm4, %v4210_v26, %v4212_v57  ;;  %v11264_v9 = vsel %vm1208_vm5, %v4454_v7, %v4455_v41  ;;  %s11580_s4 = sld [smem:[#allocation6 + $0x9a]] }
 0x52c   : > { %5564 = vrot.lane.b32.xlu1 %v5557_v19, %s7356_s6  ;;  %5562 = vrot.lane.b32.xlu0 %v5554_v47, %s7356_s6  ;;  %v5607_v19 = vrot.slane %v5595_v63, 2  ;;  %v5608_v47 = vrot.slane %v5597_v24, 2  ;;  %13293 = vst [vmem:[#allocation58_spill] sm:$0xff] %v11261_v16  ;;  %13294 = vst [vmem:[#allocation59_spill] sm:$0xff] %v11264_v9  ;;  %v5634_v34 = vmul.f32 %v5632_v36, %v13236_v3  ;;  %v4457_v13 = vrot.slane %v4450_v4, 4 }
 0x52d   : > { %v5636_v40 = vmul.f32 %v5632_v36, %v13240_v55  ;;  %v5635_v63 = vmul.f32 %v5632_v36, %v13241_v59  ;;  %v11275_v24 = vstv %s11226_s11  ;;  %v5612_v26 = vsel %vm716_vm3, %v5610_v58, %v5611_v62  ;;  %s11617_s11 = sld [smem:[#allocation6 + $0xac]] }
 0x52e   : > { %v11246_v25 = vpop.permute.xlu1 %5093  ;;  %v11248_v60 = vpop.permute.xlu0 %5091  ;;  %v5609_v57 = vsel %vm716_vm3, %v5607_v19, %v5608_v47  ;;  %v5615_v7 = vrot.slane %v5600_v8, 2  ;;  %v5648_v16 = vrot.slane %v5634_v34, 2  ;;  %v5637_v10 = vmul.f32 %v5632_v36, %v8470_v11 }
 0x52f   : > { %13291 = vst [vmem:[#allocation52_spill] sm:$0xff] %v11246_v25  ;;  %13292 = vst [vmem:[#allocation53_spill] sm:$0xff] %v11248_v60  ;;  %v4694_v25 = vmul.f32 %v4692_v46, %v7557_v37  ;;  %v4695_v60 = vmul.f32 %v4692_v46, %v13088_v45  ;;  %v5633_v46 = vmul.f32 %v5632_v36, %v13237_v14  ;;  %v5649_v38 = vrot.slane %v5636_v40, 2 }
 0x530   : > { %5568 = vrot.lane.b32.xlu1 %v5561_v52, %s7356_s6  ;;  %5566 = vrot.lane.b32.xlu0 %v5559_v12, %s7356_s6  ;;  %v5613_v52 = vrot.slane %v5599_v35, 2  ;;  %v4699_v12 = vrot.slane %v4693_v51, 5  ;;  %v11294_v8 = vmul.f32 %v11275_v24, %v13240_v55  ;;  %v5616_v35 = vsel %vm716_vm3, %v5611_v62, %v5615_v7 }
 0x531   : > { %v4700_v9 = vrot.slane %v4694_v25, 5  ;;  %v4702_v4 = vrot.slane %v4695_v60, 5  ;;  %v5645_v51 = vrot.slane %v5633_v46, 2  ;;  %v5646_v25 = vrot.slane %v5635_v63, 2 }
 0x532   : > { %v11268_v31 = vpop.permute.xlu1 %5097  ;;  %v11270_v15 = vpop.permute.xlu0 %5095  ;;  %v5672_v60 = vmul.f32 %v11275_v24, %v13236_v3  ;;  %v5614_v34 = vsel %vm716_vm3, %v5608_v47, %v5613_v52  ;;  %v11302_v40 = vmul.f32 %v11275_v24, %v13241_v59  ;;  %v11305_v46 = vsel %vm1208_vm5, %v4455_v41, %v4457_v13 }
 0x533   : > { %13295 = vst [vmem:[#allocation56_spill] sm:$0xff] %v11268_v31  ;;  %13296 = vst [vmem:[#allocation57_spill] sm:$0xff] %v11270_v15  ;;  %v5638_v15 = vmul.f32 %v5632_v36, %v13262_v56  ;;  %v4937_v31 = vstv %s11243_s10  ;;  %v5671_v36 = vmul.f32 %v11275_v24, %v13237_v14  ;;  %v11308_v63 = vsel %vm255_vm1, %v4699_v12, %v4700_v9  ;;  %s11689_s10 = sld [smem:[#allocation6 + $0xad]] }
 0x534   : > { %5619 = vrot.lane.b32.xlu1 %v5612_v26, %s7351_s28  ;;  %5617 = vrot.lane.b32.xlu0 %v5609_v57, %s7351_s28  ;;  %v11311_v26 = vsel %vm255_vm1, %v4700_v9, %v4702_v4  ;;  %v3586_v47 = vsel %vm330_vm7, %v10354_v20, %v10352_v1  ;;  %v11319_v57 = vmul.f32 %v4937_v31, %v7537_v28  ;;  %v5651_v13 = vrot.slane %v5637_v10, 2 }
 0x535   : > { %v5653_v62 = vrot.slane %v5638_v15, 2  ;;  %v11322_v41 = vmul.f32 %v4937_v31, %v7557_v37  ;;  %v5650_v52 = vsel %vm716_vm3, %v5648_v16, %v5649_v38  ;;  %v5647_v12 = vsel %vm716_vm3, %v5645_v51, %v5646_v25 }
 0x536   : > { %v11286_v58 = vpop.permute.xlu1 %5131  ;;  %v11288_v19 = vpop.permute.xlu0 %5129  ;;  %v5686_v15 = vrot.slane %v5672_v60, 2  ;;  %v5687_v4 = vrot.slane %v11294_v8, 2  ;;  %v3585_v28 = vsel %vm330_vm7, %v10344_v53, %v10342_v18  ;;  %v3610_v37 = vsel %vm355_vm8, %v10376_v32, %v10374_v22 }
 0x537   : > { %v5683_v1 = vrot.slane %v5671_v36, 2  ;;  %v5684_v20 = vrot.slane %v11302_v40, 2  ;;  %v3590_v10 = vadd.f32 %v3586_v47, %v11159_v21  ;;  %v11340_v16 = vmul.f32 %v4937_v31, %v13088_v45 }
 0x538   : > { %5623 = vrot.lane.b32.xlu1 %v5616_v35, %s7351_s28  ;;  %5621 = vrot.lane.b32.xlu0 %v5614_v34, %s7351_s28  ;;  %v5654_v51 = vsel %vm716_vm3, %v5649_v38, %v5653_v62  ;;  %v3609_v18 = vsel %vm355_vm8, %v10366_v33, %v10364_v5  ;;  %v3634_v53 = vsel %vm380_vm9, %v10398_v27, %v10396_v2  ;;  %v5708_v45 = vstv %s11284_s20  ;;  %s11737_s20 = sld [smem:[#allocation6 + $0xae]] }
 0x539   : > { %v5652_v22 = vsel %vm716_vm3, %v5646_v25, %v5651_v13  ;;  %v3589_v32 = vadd.f32 %v3585_v28, %v11153_v39  ;;  %v3614_v21 = vadd.f32 %v3610_v37, %v3590_v10  ;;  %v5688_v38 = vsel %vm716_vm3, %v5686_v15, %v5687_v4  ;;  %v13297_v28 = vld [vmem:[#allocation84_spill] sm:$0xff] }
 0x53a   : > { %v11324_v7 = vpop.permute.xlu1 %5135  ;;  %v11326_v9 = vpop.permute.xlu0 %5133  ;;  %v5676_v8 = vmul.f32 %v11275_v24, %v13262_v56  ;;  %v3633_v5 = vsel %vm380_vm9, %v10388_v17, %v10386_v44  ;;  %v3658_v33 = vsel %vm405_vm10, %v10420_v61, %v10418_v43  ;;  %v5685_v2 = vsel %vm716_vm3, %v5683_v1, %v5684_v20 }
 0x53b   : > { %v5675_v27 = vmul.f32 %v11275_v24, %v8470_v11  ;;  %v3613_v39 = vadd.f32 %v3609_v18, %v3589_v32  ;;  %v3638_v25 = vadd.f32 %v3634_v53, %v3614_v21  ;;  %v5710_v35 = vmul.f32 %v5708_v45, %v13236_v3 }
 0x53c   : > { %5657 = vrot.lane.b32.xlu1 %v5650_v52, %s7352_s30  ;;  %5655 = vrot.lane.b32.xlu0 %v5647_v12, %s7352_s30  ;;  %v3657_v44 = vsel %vm405_vm10, %v10410_v29, %v10408_v50  ;;  %v3682_v17 = vsel %vm430_vm11, %v10442_v49, %v10440_v54  ;;  %v5712_v43 = vmul.f32 %v5708_v45, %v13240_v55  ;;  %v5691_v54 = vrot.slane %v5676_v8, 2 }
 0x53d   : > { %v5709_v61 = vmul.f32 %v5708_v45, %v13237_v14  ;;  %v3637_v24 = vadd.f32 %v3633_v5, %v3613_v39  ;;  %v3662_v34 = vadd.f32 %v3658_v33, %v3638_v25  ;;  %v5711_v62 = vmul.f32 %v5708_v45, %v13241_v59  ;;  %v13298_v33 = vld [vmem:[#allocation87_spill] sm:$0xff] }
 0x53e   : > { %v11356_v31 = vpop.permute.xlu1 %5169  ;;  %v11358_v60 = vpop.permute.xlu0 %5167  ;;  %v5714_v47 = vmul.f32 %v5708_v45, %v13262_v56  ;;  %v3681_v50 = vsel %vm430_vm11, %v10432_v6, %v10430_v48  ;;  %v3706_v29 = vsel %vm455_vm12, %v10464_v30, %v10462_v0  ;;  %v5689_v49 = vrot.slane %v5675_v27, 2 }
 0x53f   : > { %v3661_v13 = vadd.f32 %v3657_v44, %v3637_v24  ;;  %v3686_v52 = vadd.f32 %v3682_v17, %v3662_v34  ;;  %v5724_v12 = vrot.slane %v5710_v35, 2  ;;  %v5746_v15 = vstv %s11345_s29  ;;  %v13300_v24 = vld [vmem:[#allocation85_spill] sm:$0xff]  ;;  %v13301_v34 = vld [vmem:[#allocation86_spill] sm:$0xff]  ;;  %s11784_s29 = sld [smem:[#allocation6 + $0xb0]] }
 0x540   : > { %5661 = vrot.lane.b32.xlu1 %v5654_v51, %s7352_s30  ;;  %5659 = vrot.lane.b32.xlu0 %v5652_v22, %s7352_s30  ;;  %v3705_v48 = vsel %vm455_vm12, %v13297_v28, %v10452_v42  ;;  %v5725_v6 = vrot.slane %v5712_v43, 2  ;;  %v5721_v37 = vrot.slane %v5709_v61, 2  ;;  %v5713_v0 = vmul.f32 %v5708_v45, %v8470_v11 }
 0x541   : > { %v3685_v30 = vadd.f32 %v3681_v50, %v3661_v13  ;;  %v3710_v1 = vadd.f32 %v3706_v29, %v3686_v52  ;;  %v5722_v18 = vrot.slane %v5711_v62, 2  ;;  %v5729_v53 = vrot.slane %v5714_v47, 2  ;;  %v13302_v47 = vld [vmem:[#allocation91_spill] sm:$0xff] }
 0x542   : > { %v11383_v36 = vpop.permute.xlu1 %5173  ;;  %v11385_v40 = vpop.permute.xlu0 %5171  ;;  %v5692_v22 = vsel %vm716_vm3, %v5687_v4, %v5691_v54  ;;  %v5690_v32 = vsel %vm716_vm3, %v5684_v20, %v5689_v49  ;;  %v5748_v21 = vmul.f32 %v5746_v15, %v13236_v3  ;;  %v11412_v42 = vmul.f32 %v5746_v15, %v13240_v55  ;;  %v13299_v4 = vld [vmem:[#allocation88_spill] sm:$0xff]  ;;  %v13304_v49 = vld [vmem:[#allocation46_spill] sm:$0xff] }
 0x543   : > { %v4944_v45 = vrot.slane %v11319_v57, 6  ;;  %v4945_v8 = vrot.slane %v11322_v41, 6  ;;  %v4947_v5 = vrot.slane %v11340_v16, 6  ;;  %v3761_v20 = vsel %vm330_vm7, %v13299_v4, %v13298_v33 }
 0x544   : > { %5695 = vrot.lane.b32.xlu1 %v5688_v38, %s7353_s17  ;;  %5693 = vrot.lane.b32.xlu0 %v5685_v2, %s7353_s17  ;;  %v3709_v38 = vadd.f32 %v3705_v48, %v3685_v30  ;;  %v5726_v2 = vsel %vm716_vm3, %v5724_v12, %v5725_v6  ;;  %v5727_v27 = vrot.slane %v5713_v0, 2  ;;  %v5747_v39 = vmul.f32 %v5746_v15, %v13237_v14  ;;  %v13305_v48 = vld [vmem:[#allocation89_spill] sm:$0xff]  ;;  %v13308_v30 = vld [vmem:[#allocation98_spill] sm:$0xff] }
 0x545   : > { %v3727_v25 = vadd.f32 %v11210_v23, %v3710_v1  ;;  %v5723_v17 = vsel %vm716_vm3, %v5721_v37, %v5722_v18  ;;  %v5730_v43 = vsel %vm716_vm3, %v5725_v6, %v5729_v53  ;;  %v11432_v61 = vmul.f32 %v5746_v15, %v13241_v59  ;;  %v13303_v23 = vld [vmem:[#allocation92_spill] sm:$0xff]  ;;  %v13306_v6 = vld [vmem:[#allocation90_spill] sm:$0xff]  ;;  %v13307_v0 = vld [vmem:[#allocation97_spill] sm:$0xff] }
 0x546   : > { %v11404_v10 = vpop.permute.xlu1 %5199  ;;  %v11406_v51 = vpop.permute.xlu0 %5197  ;;  %v3760_v62 = vsel %vm330_vm7, %v13301_v34, %v13300_v24  ;;  %v3799_v50 = vsel %vm355_vm8, %v13303_v23, %v13302_v47  ;;  %v5762_v29 = vrot.slane %v5748_v21, 2  ;;  %v5763_v54 = vrot.slane %v11412_v42, 2  ;;  %v13312_v24 = vld [vmem:[#allocation104_spill] sm:$0xff]  ;;  %v13313_v47 = vld [vmem:[#allocation101_spill] sm:$0xff]  ;;  %v13314_v23 = vld [vmem:[#allocation102_spill] sm:$0xff] }
 0x547   : > { %v3726_v13 = vadd.f32 %v13304_v49, %v3709_v38  ;;  %v3765_v52 = vadd.f32 %v3761_v20, %v3727_v25  ;;  %v5752_v12 = vmul.f32 %v5746_v15, %v13262_v56  ;;  %v5784_v28 = vstv %s11398_s8  ;;  %v13309_v20 = vld [vmem:[#allocation95_spill] sm:$0xff]  ;;  %v13316_v49 = vld [vmem:[#allocation108_spill] sm:$0xff]  ;;  %s11839_s8 = sld [smem:[#allocation6 + $0xb1]] }
 0x548   : > { %5699 = vrot.lane.b32.xlu1 %v5692_v22, %s7353_s17  ;;  %5697 = vrot.lane.b32.xlu0 %v5690_v32, %s7353_s17  ;;  %v3798_v37 = vsel %vm355_vm8, %v13306_v6, %v13305_v48  ;;  %v3837_v1 = vsel %vm380_vm9, %v13308_v30, %v13307_v0  ;;  %v5728_v53 = vsel %vm716_vm3, %v5722_v18, %v5727_v27  ;;  %v5759_v22 = vrot.slane %v5747_v39, 2 }
 0x549   : > { %v3764_v32 = vadd.f32 %v3760_v62, %v3726_v13  ;;  %v3803_v21 = vadd.f32 %v3799_v50, %v3765_v52  ;;  %v5760_v33 = vrot.slane %v11432_v61, 2  ;;  %v5751_v4 = vmul.f32 %v5746_v15, %v8470_v11 }
 0x54a   : > { %v11425_v35 = vpop.permute.xlu1 %5203  ;;  %v11427_v44 = vpop.permute.xlu0 %5201  ;;  %v5764_v18 = vsel %vm716_vm3, %v5762_v29, %v5763_v54  ;;  %v5786_v27 = vmul.f32 %v5784_v28, %v13236_v3  ;;  %v5767_v15 = vrot.slane %v5752_v12, 2  ;;  %v11474_v61 = vmul.f32 %v5784_v28, %v13240_v55  ;;  %v13315_v29 = vld [vmem:[#allocation107_spill] sm:$0xff] }
 0x54b   : > { %v3802_v39 = vadd.f32 %v3798_v37, %v3764_v32  ;;  %v3841_v62 = vadd.f32 %v3837_v1, %v3803_v21  ;;  %v3874_v50 = vsel %vm405_vm10, %v13314_v23, %v13313_v47  ;;  %v3913_v13 = vsel %vm430_vm11, %v13316_v49, %v13315_v29  ;;  %v13317_v1 = vld [vmem:[#allocation105_spill] sm:$0xff]  ;;  %v13319_v21 = vld [vmem:[#allocation111_spill] sm:$0xff]  ;;  %v13322_v47 = vld [vmem:[#allocation110_spill] sm:$0xff] }
 0x54c   : > { %5733 = vrot.lane.b32.xlu1 %v5726_v2, %s7354_s19  ;;  %5731 = vrot.lane.b32.xlu0 %v5723_v17, %s7354_s19  ;;  %v13310_v2 = vld [vmem:[#allocation96_spill] sm:$0xff]  ;;  %v13311_v17 = vld [vmem:[#allocation103_spill] sm:$0xff]  ;;  %v5785_v52 = vmul.f32 %v5784_v28, %v13237_v14  ;;  %v11484_v48 = vmul.f32 %v5784_v28, %v13241_v59  ;;  %v5761_v0 = vsel %vm716_vm3, %v5759_v22, %v5760_v33  ;;  %v11492_v30 = vstv %s11434_s9  ;;  %s11896_s9 = sld [smem:[#allocation6 + $0xa1]] }
 0x54d   : > { %v3836_v25 = vsel %vm380_vm9, %v13310_v2, %v13309_v20  ;;  %v3875_v34 = vsel %vm405_vm10, %v13312_v24, %v13311_v17  ;;  %v13320_v20 = vld [vmem:[#allocation112_spill] sm:$0xff]  ;;  %v5765_v17 = vrot.slane %v5751_v4, 2  ;;  %v5800_v22 = vrot.slane %v5786_v27, 2 }
 0x54e   : > { %v11455_v42 = vpop.permute.xlu1 %5223  ;;  %v11457_v38 = vpop.permute.xlu0 %5221  ;;  %v3879_v6 = vadd.f32 %v3875_v34, %v3841_v62  ;;  %v3951_v2 = vsel %vm455_vm12, %v13320_v20, %v13319_v21  ;;  %v13321_v62 = vld [vmem:[#allocation109_spill] sm:$0xff]  ;;  %v5801_v29 = vrot.slane %v11474_v61, 2  ;;  %v5797_v4 = vrot.slane %v5785_v52, 2  ;;  %v13327_v20 = vld [vmem:[#allocation54_spill] sm:$0xff] }
 0x54f   : > { %v3950_v23 = vsel %vm455_vm12, %v13322_v47, %v13321_v62  ;;  %v11519_v27 = vmul.f32 %v11492_v30, %v13240_v55  ;;  %v5766_v61 = vsel %vm716_vm3, %v5760_v33, %v5765_v17  ;;  %v5840_v52 = vmul.f32 %v11492_v30, %v13237_v14  ;;  %v13330_v47 = vld [vmem:[#allocation122_spill] sm:$0xff] }
 0x550   : > { %5737 = vrot.lane.b32.xlu1 %v5730_v43, %s7354_s19  ;;  %5735 = vrot.lane.b32.xlu0 %v5728_v53, %s7354_s19  ;;  %v3840_v43 = vadd.f32 %v3836_v25, %v3802_v39  ;;  %v13318_v53 = vld [vmem:[#allocation106_spill] sm:$0xff]  ;;  %v5790_v25 = vmul.f32 %v5784_v28, %v13262_v56  ;;  %v3917_v34 = vadd.f32 %v3913_v13, %v3879_v6 }
 0x551   : > { %v3912_v32 = vsel %vm430_vm11, %v13318_v53, %v13317_v1  ;;  %v5789_v39 = vmul.f32 %v5784_v28, %v8470_v11  ;;  %v5841_v28 = vmul.f32 %v11492_v30, %v13236_v3  ;;  %v5768_v6 = vsel %vm716_vm3, %v5763_v54, %v5767_v15  ;;  %v13325_v15 = vld [vmem:[#allocation117_spill] sm:$0xff]  ;;  %v13326_v53 = vld [vmem:[#allocation118_spill] sm:$0xff] }
 0x552   : > { %v11486_v37 = vpop.permute.xlu1 %5227  ;;  %v11488_v12 = vpop.permute.xlu0 %5225  ;;  %v3878_v24 = vadd.f32 %v3874_v50, %v3840_v43  ;;  %v5798_v50 = vrot.slane %v11484_v48, 2  ;;  %v3955_v13 = vadd.f32 %v3951_v2, %v3917_v34  ;;  %v11527_v48 = vmul.f32 %v11492_v30, %v13241_v59  ;;  %v13329_v34 = vld [vmem:[#allocation114_spill] sm:$0xff] }
 0x553   : > { %v11534_v1 = vsel %vm1699_vm6, %v4944_v45, %v4945_v8  ;;  %v11541_v54 = vsel %vm1699_vm6, %v4945_v8, %v4947_v5  ;;  %v5802_v57 = vsel %vm716_vm3, %v5800_v22, %v5801_v29  ;;  %v5805_v45 = vrot.slane %v5790_v25, 2  ;;  %v13331_v22 = vld [vmem:[#allocation123_spill] sm:$0xff]  ;;  %v13353_v33 = vld [vmem:[#allocation134_spill] sm:$0xff] }
 0x554   : > { %5771 = vrot.lane.b32.xlu1 %v5764_v18, %s7355_s27  ;;  %5769 = vrot.lane.b32.xlu0 %v5761_v0, %s7355_s27  ;;  %v3916_v49 = vadd.f32 %v3912_v32, %v3878_v24  ;;  %v4006_v32 = vsel %vm330_vm7, %v13326_v53, %v13325_v15  ;;  %v5803_v21 = vrot.slane %v5789_v39, 2  ;;  %v3972_v16 = vadd.f32 %v13327_v20, %v3955_v13  ;;  %v13328_v24 = vld [vmem:[#allocation113_spill] sm:$0xff]  ;;  %v13334_v15 = vld [vmem:[#allocation116_spill] sm:$0xff]  ;;  %v13336_v20 = vld [vmem:[#allocation127_spill] sm:$0xff] }
 0x555   : > { %v5799_v5 = vsel %vm716_vm3, %v5797_v4, %v5798_v50  ;;  %v5855_v2 = vrot.slane %v5841_v28, 3  ;;  %v12657_v17 = vrot.slane %v11519_v27, 3  ;;  %v4005_v62 = vsel %vm330_vm7, %v13329_v34, %v13328_v24 }
 0x556   : > { %v11511_v18 = vpop.permute.xlu1 %5247  ;;  %v11513_v43 = vpop.permute.xlu0 %5245  ;;  %v3954_v0 = vadd.f32 %v3950_v23, %v3916_v49  ;;  %v4044_v25 = vsel %vm355_vm8, %v13331_v22, %v13330_v47  ;;  %v5852_v39 = vrot.slane %v5840_v52, 3  ;;  %v12656_v23 = vrot.slane %v11527_v48, 3  ;;  %v13332_v49 = vld [vmem:[#allocation51_spill] sm:$0xff]  ;;  %v13335_v52 = vld [vmem:[#allocation126_spill] sm:$0xff] }
 0x557   : > { %13323 = vst [vmem:[#allocation60_spill] sm:$0xff] %v11511_v18  ;;  %13324 = vst [vmem:[#allocation61_spill] sm:$0xff] %v11513_v43  ;;  %v5845_v4 = vmul.f32 %v11492_v30, %v13262_v56  ;;  %v5877_v28 = vstv %s11504_s26  ;;  %v4082_v24 = vsel %vm380_vm9, %v13336_v20, %v13335_v52  ;;  %v5806_v34 = vsel %vm716_vm3, %v5801_v29, %v5805_v45  ;;  %v13342_v45 = vld [vmem:[#allocation131_spill] sm:$0xff]  ;;  %v13344_v52 = vld [vmem:[#allocation125_spill] sm:$0xff]  ;;  %s11970_s26 = sld [smem:[#allocation6 + $0xb3]] }
 0x558   : > { %5775 = vrot.lane.b32.xlu1 %v5768_v6, %s7355_s27  ;;  %5773 = vrot.lane.b32.xlu0 %v5766_v61, %s7355_s27  ;;  %v3971_v13 = vadd.f32 %v13332_v49, %v3954_v0  ;;  %v4010_v6 = vadd.f32 %v4006_v32, %v3972_v16  ;;  %v13333_v61 = vld [vmem:[#allocation115_spill] sm:$0xff]  ;;  %v5804_v0 = vsel %vm716_vm3, %v5798_v50, %v5803_v21  ;;  %v13339_v49 = vld [vmem:[#allocation120_spill] sm:$0xff]  ;;  %v13341_v50 = vld [vmem:[#allocation130_spill] sm:$0xff] }
 0x559   : > { %v4043_v53 = vsel %vm355_vm8, %v13334_v15, %v13333_v61  ;;  %v5857_v47 = vsel %vm962_vm4, %v5855_v2, %v12657_v17  ;;  %v5844_v22 = vmul.f32 %v11492_v30, %v8470_v11  ;;  %v13340_v61 = vld [vmem:[#allocation121_spill] sm:$0xff]  ;;  %v4120_v21 = vsel %vm405_vm10, %v13342_v45, %v13341_v50  ;;  %v13343_v15 = vld [vmem:[#allocation124_spill] sm:$0xff]  ;;  %v13391_v43 = vld [vmem:[#allocation158_spill] sm:$0xff] }
 0x55a   : > { %v11551_v41 = vpop.permute.xlu1 %5251  ;;  %v11553_v8 = vpop.permute.xlu0 %5249  ;;  %v4009_v32 = vadd.f32 %v4005_v62, %v3971_v13  ;;  %v4081_v29 = vsel %vm380_vm9, %v13340_v61, %v13339_v49  ;;  %v5854_v62 = vsel %vm962_vm4, %v5852_v39, %v12656_v23  ;;  %v5860_v30 = vrot.slane %v5845_v4, 3  ;;  %v13345_v49 = vld [vmem:[#allocation132_spill] sm:$0xff]  ;;  %v13346_v61 = vld [vmem:[#allocation133_spill] sm:$0xff] }
 0x55b   : > { %v5881_v2 = vmul.f32 %v5877_v28, %v13240_v55  ;;  %v4119_v20 = vsel %vm405_vm10, %v13344_v52, %v13343_v15  ;;  %v4158_v39 = vsel %vm430_vm11, %v13346_v61, %v13345_v49  ;;  %v5878_v50 = vmul.f32 %v5877_v28, %v13237_v14  ;;  %v13349_v45 = vld [vmem:[#allocation128_spill] sm:$0xff]  ;;  %v13350_v15 = vld [vmem:[#allocation129_spill] sm:$0xff]  ;;  %v13351_v49 = vld [vmem:[#allocation138_spill] sm:$0xff] }
 0x55c   : > { %5809 = vrot.lane.b32.xlu1 %v5802_v57, %s7356_s6  ;;  %5807 = vrot.lane.b32.xlu0 %v5799_v5, %s7356_s6  ;;  %v4048_v57 = vadd.f32 %v4044_v25, %v4010_v6  ;;  %v5879_v25 = vmul.f32 %v5877_v28, %v13236_v3  ;;  %v4047_v13 = vadd.f32 %v4043_v53, %v4009_v32  ;;  %v13352_v61 = vld [vmem:[#allocation139_spill] sm:$0xff]  ;;  %v13413_v18 = vld [vmem:[#allocation173_spill] sm:$0xff] }
 0x55d   : > { %v5880_v53 = vmul.f32 %v5877_v28, %v13241_v59  ;;  %v4157_v52 = vsel %vm430_vm11, %v13350_v15, %v13349_v45  ;;  %v4196_v23 = vsel %vm455_vm12, %v13352_v61, %v13351_v49  ;;  %v5882_v17 = vmul.f32 %v5877_v28, %v8470_v11 }
 0x55e   : > { %v11582_v16 = vpop.permute.xlu1 %5271  ;;  %v11584_v5 = vpop.permute.xlu0 %5269  ;;  %v4086_v6 = vadd.f32 %v4082_v24, %v4048_v57  ;;  %v4085_v24 = vadd.f32 %v4081_v29, %v4047_v13  ;;  %v5883_v57 = vmul.f32 %v5877_v28, %v13262_v56  ;;  %v5893_v29 = vrot.slane %v5879_v25, 3 }
 0x55f   : > { %13337 = vst [vmem:[#allocation62_spill] sm:$0xff] %v11582_v16  ;;  %13338 = vst [vmem:[#allocation63_spill] sm:$0xff] %v11584_v5  ;;  %v13354_v5 = vld [vmem:[#allocation135_spill] sm:$0xff]  ;;  %v5890_v15 = vrot.slane %v5878_v50, 3  ;;  %v5891_v16 = vrot.slane %v5880_v53, 3 }
 0x560   : > { %5813 = vrot.lane.b32.xlu1 %v5806_v34, %s7356_s6  ;;  %5811 = vrot.lane.b32.xlu0 %v5804_v0, %s7356_s6  ;;  %v4124_v34 = vadd.f32 %v4120_v21, %v4086_v6  ;;  %v5858_v0 = vrot.slane %v5844_v22, 3  ;;  %v5915_v21 = vstv %s11564_s7  ;;  %v4123_v13 = vadd.f32 %v4119_v20, %v4085_v24  ;;  %s12012_s7 = sld [smem:[#allocation6 + $0xb4]] }
 0x561   : > { %v5894_v22 = vrot.slane %v5881_v2, 3  ;;  %v4195_v45 = vsel %vm455_vm12, %v13354_v5, %v13353_v33  ;;  %v13357_v2 = vstv %s11469_s23  ;;  %v13358_v24 = vrot.slane %v11519_v27, 3 }
 0x562   : > { %v11612_v32 = vpop.permute.xlu1 %5275  ;;  %v11614_v4 = vpop.permute.xlu0 %5273  ;;  %v4162_v6 = vadd.f32 %v4158_v39, %v4124_v34  ;;  %v4161_v25 = vadd.f32 %v4157_v52, %v4123_v13  ;;  %v11643_v28 = vmul.f32 %v13357_v2, %v13237_v14  ;;  %v13359_v5 = vrot.slane %v11527_v48, 3  ;;  %v13361_v48 = vld [vmem:[#allocation143_spill] sm:$0xff] }
 0x563   : > { %13347 = vst [vmem:[#allocation66_spill] sm:$0xff] %v11612_v32  ;;  %13348 = vst [vmem:[#allocation64_spill] sm:$0xff] %v11614_v4  ;;  %v11633_v4 = vstv %s11580_s4  ;;  %v5861_v33 = vsel %vm962_vm4, %v13358_v24, %v5860_v30  ;;  %v5895_v34 = vsel %vm962_vm4, %v5893_v29, %v5894_v22  ;;  %v5896_v30 = vrot.slane %v5882_v17, 3  ;;  %v13379_v32 = vld [vmem:[#allocation155_spill] sm:$0xff]  ;;  %s12040_s4 = sld [smem:[#allocation6 + $0xb5]] }
 0x564   : > { %5864 = vrot.lane.b32.xlu1 %v5857_v47, %s7351_s28  ;;  %5862 = vrot.lane.b32.xlu0 %v5854_v62, %s7351_s28  ;;  %v4200_v49 = vadd.f32 %v4196_v23, %v4162_v6  ;;  %v5898_v47 = vrot.slane %v5883_v57, 3  ;;  %v5917_v62 = vmul.f32 %v5915_v21, %v13236_v3  ;;  %v5859_v50 = vsel %vm962_vm4, %v13359_v5, %v5858_v0  ;;  %v13360_v57 = vld [vmem:[#allocation142_spill] sm:$0xff]  ;;  %v13366_v5 = vld [vmem:[#allocation137_spill] sm:$0xff] }
 0x565   : > { %v11652_v23 = vmul.f32 %v5915_v21, %v13240_v55  ;;  %v4199_v53 = vadd.f32 %v4195_v45, %v4161_v25  ;;  %v11659_v27 = vmul.f32 %v11633_v4, %v13237_v14  ;;  %v4251_v0 = vsel %vm330_vm7, %v13361_v48, %v13360_v57  ;;  %v13362_v6 = vld [vmem:[#allocation58_spill] sm:$0xff]  ;;  %v13368_v57 = vld [vmem:[#allocation147_spill] sm:$0xff] }
 0x566   : > { %v11635_v20 = vpop.permute.xlu1 %5295  ;;  %v11637_v39 = vpop.permute.xlu0 %5293  ;;  %v5892_v52 = vsel %vm962_vm4, %v5890_v15, %v5891_v16  ;;  %v11667_v61 = vmul.f32 %v11633_v4, %v13241_v59  ;;  %v5916_v13 = vmul.f32 %v5915_v21, %v13237_v14  ;;  %v4217_v45 = vadd.f32 %v13362_v6, %v4200_v49  ;;  %v13369_v6 = vld [vmem:[#allocation55_spill] sm:$0xff] }
 0x567   : > { %13355 = vst [vmem:[#allocation65_spill] sm:$0xff] %v11635_v20  ;;  %13356 = vst [vmem:[#allocation69_spill] sm:$0xff] %v11637_v39  ;;  %v5899_v17 = vsel %vm962_vm4, %v5894_v22, %v5898_v47  ;;  %v5931_v2 = vrot.slane %v5917_v62, 3  ;;  %v5953_v24 = vstv %s11617_s11  ;;  %v5932_v39 = vrot.slane %v11652_v23, 3  ;;  %v13370_v47 = vld [vmem:[#allocation140_spill] sm:$0xff]  ;;  %v13371_v62 = vld [vmem:[#allocation141_spill] sm:$0xff] }
 0x568   : > { %5868 = vrot.lane.b32.xlu1 %v5861_v33, %s7351_s28  ;;  %5866 = vrot.lane.b32.xlu0 %v5859_v50, %s7351_s28  ;;  %v13365_v33 = vld [vmem:[#allocation136_spill] sm:$0xff]  ;;  %v13367_v50 = vld [vmem:[#allocation146_spill] sm:$0xff]  ;;  %v5918_v49 = vmul.f32 %v5915_v21, %v13241_v59  ;;  %v4216_v20 = vadd.f32 %v13369_v6, %v4199_v53  ;;  %v5897_v22 = vsel %vm962_vm4, %v5891_v16, %v5896_v30  ;;  %s12042_s11 = sld [smem:[#allocation6 + $0xb7]] }
 0x569   : > { %v4250_v15 = vsel %vm330_vm7, %v13366_v5, %v13365_v33  ;;  %v4289_v48 = vsel %vm355_vm8, %v13368_v57, %v13367_v50  ;;  %v4288_v33 = vsel %vm355_vm8, %v13371_v62, %v13370_v47  ;;  %v13372_v5 = vld [vmem:[#allocation150_spill] sm:$0xff]  ;;  %v13373_v50 = vld [vmem:[#allocation151_spill] sm:$0xff]  ;;  %v5928_v57 = vrot.slane %v5916_v13, 3  ;;  %v13376_v6 = vld [vmem:[#allocation144_spill] sm:$0xff] }
 0x56a   : > { %v11671_v29 = vpop.permute.xlu1 %5299  ;;  %v11673_v25 = vpop.permute.xlu0 %5297  ;;  %v4327_v23 = vsel %vm380_vm9, %v13373_v50, %v13372_v5  ;;  %v5921_v53 = vmul.f32 %v5915_v21, %v13262_v56  ;;  %v5920_v16 = vmul.f32 %v5915_v21, %v8470_v11  ;;  %v5955_v30 = vmul.f32 %v5953_v24, %v13236_v3  ;;  %v13378_v62 = vld [vmem:[#allocation154_spill] sm:$0xff]  ;;  %v13381_v50 = vld [vmem:[#allocation149_spill] sm:$0xff] }
 0x56b   : > { %13363 = vst [vmem:[#allocation70_spill] sm:$0xff] %v11671_v29  ;;  %13364 = vst [vmem:[#allocation67_spill] sm:$0xff] %v11673_v25  ;;  %v4255_v29 = vadd.f32 %v4251_v0, %v4217_v45  ;;  %v4254_v0 = vadd.f32 %v4250_v15, %v4216_v20  ;;  %v13377_v25 = vld [vmem:[#allocation145_spill] sm:$0xff]  ;;  %v4365_v13 = vsel %vm405_vm10, %v13379_v32, %v13378_v62  ;;  %v5929_v20 = vrot.slane %v5918_v49, 3 }
 0x56c   : > { %5902 = vrot.lane.b32.xlu1 %v5895_v34, %s7352_s30  ;;  %5900 = vrot.lane.b32.xlu0 %v5892_v52, %s7352_s30  ;;  %v4326_v47 = vsel %vm380_vm9, %v13377_v25, %v13376_v6  ;;  %v5933_v5 = vsel %vm962_vm4, %v5931_v2, %v5932_v39  ;;  %v5957_v21 = vmul.f32 %v5953_v24, %v13240_v55  ;;  %v13382_v25 = vld [vmem:[#allocation156_spill] sm:$0xff]  ;;  %v13383_v6 = vld [vmem:[#allocation157_spill] sm:$0xff]  ;;  %v5936_v32 = vrot.slane %v5921_v53, 3 }
 0x56d   : > { %v4293_v45 = vadd.f32 %v4289_v48, %v4255_v29  ;;  %v4292_v29 = vadd.f32 %v4288_v33, %v4254_v0  ;;  %v13380_v48 = vld [vmem:[#allocation148_spill] sm:$0xff]  ;;  %v5954_v2 = vmul.f32 %v5953_v24, %v13237_v14  ;;  %v5959_v0 = vmul.f32 %v5953_v24, %v13262_v56  ;;  %v13387_v62 = vld [vmem:[#allocation153_spill] sm:$0xff] }
 0x56e   : > { %v11698_v34 = vpop.permute.xlu1 %5319  ;;  %v11700_v52 = vpop.permute.xlu0 %5317 }
 0x56f   : > { %13374 = vst [vmem:[#allocation68_spill] sm:$0xff] %v11698_v34  ;;  %13375 = vst [vmem:[#allocation71_spill] sm:$0xff] %v11700_v52  ;;  %v4331_v15 = vadd.f32 %v4327_v23, %v4293_v45  ;;  %v4364_v52 = vsel %vm405_vm10, %v13381_v50, %v13380_v48  ;;  %v4403_v34 = vsel %vm430_vm11, %v13383_v6, %v13382_v25  ;;  %v13386_v45 = vld [vmem:[#allocation152_spill] sm:$0xff]  ;;  %v13388_v50 = vld [vmem:[#allocation159_spill] sm:$0xff] }
 0x570   : > { %5906 = vrot.lane.b32.xlu1 %v5899_v17, %s7352_s30  ;;  %5904 = vrot.lane.b32.xlu0 %v5897_v22, %s7352_s30  ;;  %v4330_v49 = vadd.f32 %v4326_v47, %v4292_v29  ;;  %v5956_v22 = vmul.f32 %v5953_v24, %v13241_v59  ;;  %v4402_v48 = vsel %vm430_vm11, %v13387_v62, %v13386_v45  ;;  %v13389_v25 = vld [vmem:[#allocation162_spill] sm:$0xff]  ;;  %v5934_v47 = vrot.slane %v5920_v16, 3 }
 0x571   : > { %v4369_v33 = vadd.f32 %v4365_v13, %v4331_v15  ;;  %v4441_v53 = vsel %vm455_vm12, %v13389_v25, %v13388_v50  ;;  %v5930_v6 = vsel %vm962_vm4, %v5928_v57, %v5929_v20  ;;  %v5969_v15 = vrot.slane %v5955_v30, 3 }
 0x572   : > { %v11721_v23 = vpop.permute.xlu1 %5323  ;;  %v11723_v17 = vpop.permute.xlu0 %5321  ;;  %v4368_v13 = vadd.f32 %v4364_v52, %v4330_v49  ;;  %v5970_v62 = vrot.slane %v5957_v21, 3  ;;  %v5966_v50 = vrot.slane %v5954_v2, 3  ;;  %v5958_v57 = vmul.f32 %v5953_v24, %v8470_v11 }
 0x573   : > { %13384 = vst [vmem:[#allocation72_spill] sm:$0xff] %v11721_v23  ;;  %13385 = vst [vmem:[#allocation73_spill] sm:$0xff] %v11723_v17  ;;  %v4407_v29 = vadd.f32 %v4403_v34, %v4369_v33  ;;  %v5991_v17 = vstv %s11689_s10  ;;  %v13390_v23 = vld [vmem:[#allocation14_spill] sm:$0xff]  ;;  %v5967_v49 = vrot.slane %v5956_v22, 3  ;;  %v5974_v30 = vrot.slane %v5959_v0, 3  ;;  %s12160_s10 = sld [smem:[#allocation6 + $0xb8]] }
 0x574   : > { %5940 = vrot.lane.b32.xlu1 %v5933_v5, %s7353_s17  ;;  %5938 = vrot.lane.b32.xlu0 %v5930_v6, %s7353_s17  ;;  %v4440_v45 = vsel %vm455_vm12, %v13391_v43, %v13390_v23  ;;  %v4406_v16 = vadd.f32 %v4402_v48, %v4368_v13  ;;  %v5937_v33 = vsel %vm962_vm4, %v5932_v39, %v5936_v32  ;;  %v13394_v24 = vstv %s11469_s23  ;;  %v13395_v39 = vld [vmem:[#allocation160_spill] sm:$0xff]  ;;  %v13403_v23 = vld [vmem:[#allocation59_spill] sm:$0xff]  ;;  %s11902_s23 = sld [smem:[#allocation6 + $0xb2]] }
 0x575   : > { %v4445_v52 = vadd.f32 %v4441_v53, %v4407_v29  ;;  %v5935_v25 = vsel %vm962_vm4, %v5929_v20, %v5934_v47  ;;  %v5993_v6 = vmul.f32 %v5991_v17, %v13236_v3  ;;  %v11751_v43 = vmul.f32 %v5991_v17, %v13240_v55  ;;  %v13396_v20 = vld [vmem:[#allocation161_spill] sm:$0xff] }
 0x576   : > { %v11743_v34 = vpop.permute.xlu1 %5374  ;;  %v11745_v5 = vpop.permute.xlu0 %5372  ;;  %v4444_v21 = vadd.f32 %v4440_v45, %v4406_v16  ;;  %v11756_v2 = vmul.f32 %v13394_v24, %v13241_v59  ;;  %v4496_v32 = vsel %vm330_vm7, %v13396_v20, %v13395_v39  ;;  %v5971_v22 = vsel %vm962_vm4, %v5969_v15, %v5970_v62  ;;  %v13400_v24 = vld [vmem:[#allocation15_spill] sm:$0xff]  ;;  %v13402_v39 = vld [vmem:[#allocation165_spill] sm:$0xff] }
 0x577   : > { %13392 = vst [vmem:[#allocation76_spill] sm:$0xff] %v11743_v34  ;;  %13393 = vst [vmem:[#allocation77_spill] sm:$0xff] %v11745_v5  ;;  %v5972_v0 = vrot.slane %v5958_v57, 3  ;;  %v5992_v53 = vmul.f32 %v5991_v17, %v13237_v14  ;;  %v4462_v47 = vadd.f32 %v11305_v46, %v4445_v52  ;;  %v5968_v45 = vsel %vm962_vm4, %v5966_v50, %v5967_v49  ;;  %v13401_v57 = vld [vmem:[#allocation164_spill] sm:$0xff] }
 0x578   : > { %5944 = vrot.lane.b32.xlu1 %v5937_v33, %s7353_s17  ;;  %5942 = vrot.lane.b32.xlu0 %v5935_v25, %s7353_s17  ;;  %v5975_v16 = vsel %vm962_vm4, %v5970_v62, %v5974_v30  ;;  %v11775_v33 = vmul.f32 %v5991_v17, %v13241_v59  ;;  %v13399_v25 = vld [vmem:[#allocation163_spill] sm:$0xff]  ;;  %v4534_v46 = vsel %vm355_vm8, %v13402_v39, %v13401_v57  ;;  %v6007_v52 = vrot.slane %v5993_v6, 3  ;;  %v13406_v57 = vld [vmem:[#allocation168_spill] sm:$0xff]  ;;  %v13407_v6 = vld [vmem:[#allocation169_spill] sm:$0xff] }
 0x579   : > { %v4495_v15 = vsel %vm330_vm7, %v13400_v24, %v13399_v25  ;;  %v6008_v20 = vrot.slane %v11751_v43, 3  ;;  %v4461_v50 = vadd.f32 %v13403_v23, %v4444_v21  ;;  %v4500_v48 = vadd.f32 %v4496_v32, %v4462_v47  ;;  %v13404_v25 = vld [vmem:[#allocation166_spill] sm:$0xff]  ;;  %v13405_v24 = vld [vmem:[#allocation167_spill] sm:$0xff] }
 0x57a   : > { %v11768_v13 = vpop.permute.xlu1 %5378  ;;  %v11770_v29 = vpop.permute.xlu0 %5376  ;;  %v5997_v62 = vmul.f32 %v5991_v17, %v13262_v56  ;;  %v6029_v30 = vstv %s11737_s20  ;;  %v4533_v5 = vsel %vm355_vm8, %v13405_v24, %v13404_v25  ;;  %v4572_v43 = vsel %vm380_vm9, %v13407_v6, %v13406_v57  ;;  %v13412_v24 = vld [vmem:[#allocation172_spill] sm:$0xff]  ;;  %s12221_s20 = sld [smem:[#allocation6 + $0xb9]] }
 0x57b   : > { %13397 = vst [vmem:[#allocation74_spill] sm:$0xff] %v11768_v13  ;;  %13398 = vst [vmem:[#allocation75_spill] sm:$0xff] %v11770_v29  ;;  %v5973_v39 = vsel %vm962_vm4, %v5967_v49, %v5972_v0  ;;  %v6004_v34 = vrot.slane %v5992_v53, 3  ;;  %v4499_v21 = vadd.f32 %v4495_v15, %v4461_v50  ;;  %v4538_v23 = vadd.f32 %v4534_v46, %v4500_v48  ;;  %v13410_v29 = vld [vmem:[#allocation170_spill] sm:$0xff]  ;;  %v13411_v13 = vld [vmem:[#allocation171_spill] sm:$0xff] }
 0x57c   : > { %5978 = vrot.lane.b32.xlu1 %v5971_v22, %s7354_s19  ;;  %5976 = vrot.lane.b32.xlu0 %v5968_v45, %s7354_s19  ;;  %v6005_v47 = vrot.slane %v11775_v33, 3  ;;  %v5996_v45 = vmul.f32 %v5991_v17, %v8470_v11  ;;  %v4571_v25 = vsel %vm380_vm9, %v13411_v13, %v13410_v29  ;;  %v4610_v57 = vsel %vm405_vm10, %v13413_v18, %v13412_v24  ;;  %v13414_v13 = vld [vmem:[#allocation174_spill] sm:$0xff]  ;;  %v13415_v29 = vld [vmem:[#allocation175_spill] sm:$0xff]  ;;  %v13416_v18 = vld [vmem:[#allocation176_spill] sm:$0xff] }
 0x57d   : > { %v6009_v49 = vsel %vm962_vm4, %v6007_v52, %v6008_v20  ;;  %v6031_v48 = vmul.f32 %v6029_v30, %v13236_v3  ;;  %v4537_v0 = vadd.f32 %v4533_v5, %v4499_v21  ;;  %v4576_v53 = vadd.f32 %v4572_v43, %v4538_v23  ;;  %v13417_v46 = vld [vmem:[#allocation177_spill] sm:$0xff]  ;;  %v13418_v23 = vld [vmem:[#allocation178_spill] sm:$0xff]  ;;  %v13419_v24 = vld [vmem:[#allocation179_spill] sm:$0xff] }
 0x57e   : > { %v11798_v32 = vpop.permute.xlu1 %5412  ;;  %v11800_v22 = vpop.permute.xlu0 %5410  ;;  %v6012_v17 = vrot.slane %v5997_v62, 3  ;;  %v11815_v33 = vmul.f32 %v6029_v30, %v13240_v55  ;;  %v4609_v15 = vsel %vm405_vm10, %v13415_v29, %v13414_v13  ;;  %v4648_v52 = vsel %vm430_vm11, %v13417_v46, %v13416_v18  ;;  %v13420_v29 = vld [vmem:[#allocation182_spill] sm:$0xff]  ;;  %v13421_v18 = vld [vmem:[#allocation183_spill] sm:$0xff] }
 0x57f   : > { %13408 = vst [vmem:[#allocation80_spill] sm:$0xff] %v11798_v32  ;;  %13409 = vst [vmem:[#allocation81_spill] sm:$0xff] %v11800_v22  ;;  %v6030_v5 = vmul.f32 %v6029_v30, %v13237_v14  ;;  %v11825_v50 = vmul.f32 %v6029_v30, %v13241_v59  ;;  %v4614_v6 = vadd.f32 %v4610_v57, %v4576_v53  ;;  %v6010_v21 = vrot.slane %v5996_v45, 3  ;;  %v13423_v53 = vld [vmem:[#allocation181_spill] sm:$0xff] }
 0x580   : > { %5982 = vrot.lane.b32.xlu1 %v5975_v16, %s7354_s19  ;;  %5980 = vrot.lane.b32.xlu0 %v5973_v39, %s7354_s19  ;;  %v4575_v16 = vadd.f32 %v4571_v25, %v4537_v0  ;;  %v6006_v39 = vsel %vm962_vm4, %v6004_v34, %v6005_v47  ;;  %v4647_v13 = vsel %vm430_vm11, %v13419_v24, %v13418_v23  ;;  %v6045_v22 = vrot.slane %v6031_v48, 3  ;;  %v13422_v0 = vld [vmem:[#allocation180_spill] sm:$0xff] }
 0x581   : > { %v4686_v46 = vsel %vm455_vm12, %v13421_v18, %v13420_v29  ;;  %v6084_v32 = vstv %s11784_s29  ;;  %v4652_v57 = vadd.f32 %v4648_v52, %v4614_v6  ;;  %v6046_v34 = vrot.slane %v11815_v33, 3  ;;  %s12256_s29 = sld [smem:[#allocation6 + $0xa8]] }
 0x582   : > { %v11827_v43 = vpop.permute.xlu1 %5416  ;;  %v11829_v62 = vpop.permute.xlu0 %5414  ;;  %v4613_v25 = vadd.f32 %v4609_v15, %v4575_v16  ;;  %v6035_v45 = vmul.f32 %v6029_v30, %v13262_v56  ;;  %v4685_v23 = vsel %vm455_vm12, %v13423_v53, %v13422_v0  ;;  %v6042_v24 = vrot.slane %v6030_v5, 3  ;;  %v13430_v0 = vld [vmem:[#allocation18_spill] sm:$0xff] }
 0x583   : > { %v6043_v48 = vrot.slane %v11825_v50, 3  ;;  %v6034_v29 = vmul.f32 %v6029_v30, %v8470_v11  ;;  %v4690_v15 = vadd.f32 %v4686_v46, %v4652_v57  ;;  %v6086_v16 = vmul.f32 %v6084_v32, %v13236_v3  ;;  %v13429_v57 = vld [vmem:[#allocation20_spill] sm:$0xff] }
 0x584   : > { %6016 = vrot.lane.b32.xlu1 %v6009_v49, %s7355_s27  ;;  %6014 = vrot.lane.b32.xlu0 %v6006_v39, %s7355_s27  ;;  %v4651_v18 = vadd.f32 %v4647_v13, %v4613_v25  ;;  %v11856_v33 = vmul.f32 %v6084_v32, %v13240_v55  ;;  %v13426_v6 = vrot.slane %v11667_v61, 1  ;;  %v13427_v39 = vrot.slane %v11659_v27, 1 }
 0x585   : > { %v11867_v30 = vmul.f32 %v11633_v4, %v8470_v11  ;;  %v6013_v50 = vsel %vm962_vm4, %v6008_v20, %v6012_v17  ;;  %v6011_v13 = vsel %vm962_vm4, %v6005_v47, %v6010_v21  ;;  %v6085_v25 = vmul.f32 %v6084_v32, %v13237_v14 }
 0x586   : > { %v11850_v52 = vpop.permute.xlu1 %5450  ;;  %v11852_v49 = vpop.permute.xlu0 %5448  ;;  %v11863_v5 = vsel %vm470_vm2, %v13427_v39, %v13426_v6  ;;  %v4689_v46 = vadd.f32 %v4685_v23, %v4651_v18  ;;  %v11875_v27 = vmul.f32 %v6084_v32, %v13241_v59  ;;  %v4741_v4 = vsel %vm330_vm7, %v13430_v0, %v13429_v57  ;;  %v13435_v57 = vld [vmem:[#allocation24_spill] sm:$0xff]  ;;  %v13436_v0 = vld [vmem:[#allocation21_spill] sm:$0xff] }
 0x587   : > { %13424 = vst [vmem:[#allocation78_spill] sm:$0xff] %v11850_v52  ;;  %13425 = vst [vmem:[#allocation79_spill] sm:$0xff] %v11852_v49  ;;  %v6047_v53 = vsel %vm962_vm4, %v6045_v22, %v6046_v34  ;;  %v6050_v20 = vrot.slane %v6035_v45, 3  ;;  %v6048_v17 = vrot.slane %v6034_v29, 3  ;;  %v4707_v47 = vadd.f32 %v11311_v26, %v4690_v15 }
 0x588   : > { %13428 = vst [vmem:[#allocation82_spill] sm:$0xff] %v11863_v5  ;;  %6020 = vrot.lane.b32.xlu1 %v6013_v50, %s7355_s27  ;;  %6018 = vrot.lane.b32.xlu0 %v6011_v13, %s7355_s27  ;;  %v6044_v18 = vsel %vm962_vm4, %v6042_v24, %v6043_v48  ;;  %v6100_v6 = vrot.slane %v6086_v16, 4  ;;  %v6101_v39 = vrot.slane %v11856_v33, 4  ;;  %v13433_v50 = vld [vmem:[#allocation184_spill] sm:$0xff]  ;;  %v13434_v13 = vld [vmem:[#allocation185_spill] sm:$0xff]  ;;  %v4779_v22 = vsel %vm355_vm8, %v13436_v0, %v13435_v57  ;;  %v13437_v33 = vld [vmem:[#allocation19_spill] sm:$0xff] }
 0x589   : > { %v4740_v49 = vsel %vm330_vm7, %v13434_v13, %v13433_v50  ;;  %v6090_v45 = vmul.f32 %v6084_v32, %v13262_v56  ;;  %v6122_v26 = vstv %s11839_s8  ;;  %v4706_v29 = vadd.f32 %v11308_v63, %v4689_v46  ;;  %v13438_v50 = vld [vmem:[#allocation23_spill] sm:$0xff]  ;;  %v13439_v57 = vld [vmem:[#allocation28_spill] sm:$0xff]  ;;  %v13440_v0 = vld [vmem:[#allocation25_spill] sm:$0xff]  ;;  %s12291_s8 = sld [smem:[#allocation6 + $0xba]] }
 0x58a   : > { %v11882_v21 = vpop.permute.xlu1 %5454  ;;  %v11884_v23 = vpop.permute.xlu0 %5452  ;;  %v4745_v15 = vadd.f32 %v4741_v4, %v4707_v47  ;;  %v6097_v24 = vrot.slane %v6085_v25, 4  ;;  %v6098_v16 = vrot.slane %v11875_v27, 4  ;;  %v4778_v13 = vsel %vm355_vm8, %v13438_v50, %v13437_v33  ;;  %v13444_v33 = vld [vmem:[#allocation27_spill] sm:$0xff] }
 0x58b   : > { %13431 = vst [vmem:[#allocation83_spill] sm:$0xff] %v11882_v21  ;;  %13432 = vst [vmem:[#allocation94_spill] sm:$0xff] %v11884_v23  ;;  %v4817_v52 = vsel %vm380_vm9, %v13440_v0, %v13439_v57  ;;  %v6051_v63 = vsel %vm962_vm4, %v6046_v34, %v6050_v20  ;;  %v6049_v46 = vsel %vm962_vm4, %v6043_v48, %v6048_v17  ;;  %v13443_v23 = vld [vmem:[#allocation22_spill] sm:$0xff]  ;;  %v13445_v21 = vld [vmem:[#allocation29_spill] sm:$0xff] }
 0x58c   : > { %6054 = vrot.lane.b32.xlu1 %v6047_v53, %s7356_s6  ;;  %6052 = vrot.lane.b32.xlu0 %v6044_v18, %s7356_s6  ;;  %v4744_v4 = vadd.f32 %v4740_v49, %v4706_v29  ;;  %v4783_v53 = vadd.f32 %v4779_v22, %v4745_v15  ;;  %v6089_v27 = vmul.f32 %v6084_v32, %v8470_v11  ;;  %v13446_v57 = vld [vmem:[#allocation30_spill] sm:$0xff]  ;;  %v6105_v22 = vrot.slane %v6090_v45, 4  ;;  %v13448_v29 = vld [vmem:[#allocation31_spill] sm:$0xff]  ;;  %v13450_v0 = vld [vmem:[#allocation17_spill] sm:$0xff] }
 0x58d   : > { %v6124_v18 = vmul.f32 %v6122_v26, %v13236_v3  ;;  %v4816_v50 = vsel %vm380_vm9, %v13444_v33, %v13443_v23  ;;  %v4855_v34 = vsel %vm405_vm10, %v13446_v57, %v13445_v21  ;;  %v6102_v48 = vsel %vm1208_vm5, %v6100_v6, %v6101_v39  ;;  %v13447_v23 = vld [vmem:[#allocation26_spill] sm:$0xff]  ;;  %v13449_v21 = vld [vmem:[#allocation16_spill] sm:$0xff]  ;;  %v13453_v57 = vld [vmem:[#allocation35_spill] sm:$0xff] }
 0x58e   : > { %v11912_v47 = vpop.permute.xlu1 %5488  ;;  %v11914_v25 = vpop.permute.xlu0 %5486  ;;  %v11926_v49 = vmul.f32 %v6122_v26, %v13240_v55  ;;  %v4782_v20 = vadd.f32 %v4778_v13, %v4744_v4  ;;  %v4821_v17 = vadd.f32 %v4817_v52, %v4783_v53  ;;  %v6099_v32 = vsel %vm1208_vm5, %v6097_v24, %v6098_v16  ;;  %v13452_v53 = vld [vmem:[#allocation34_spill] sm:$0xff] }
 0x58f   : > { %13441 = vst [vmem:[#allocation93_spill] sm:$0xff] %v11912_v47  ;;  %13442 = vst [vmem:[#allocation100_spill] sm:$0xff] %v11914_v25  ;;  %v4854_v15 = vsel %vm405_vm10, %v13448_v29, %v13447_v23  ;;  %v4893_v6 = vsel %vm430_vm11, %v13450_v0, %v13449_v21  ;;  %v6123_v33 = vmul.f32 %v6122_v26, %v13237_v14  ;;  %v6103_v45 = vrot.slane %v6089_v27, 4  ;;  %v13454_v29 = vld [vmem:[#allocation36_spill] sm:$0xff]  ;;  %v13455_v21 = vld [vmem:[#allocation37_spill] sm:$0xff] }
 0x590   : > { %6058 = vrot.lane.b32.xlu1 %v6051_v63, %s7356_s6  ;;  %6056 = vrot.lane.b32.xlu0 %v6049_v46, %s7356_s6  ;;  %v11939_v52 = vmul.f32 %v6122_v26, %v13241_v59  ;;  %v4820_v13 = vadd.f32 %v4816_v50, %v4782_v20  ;;  %v4859_v63 = vadd.f32 %v4855_v34, %v4821_v17  ;;  %v6138_v4 = vrot.slane %v6124_v18, 4  ;;  %v13456_v34 = vld [vmem:[#allocation32_spill] sm:$0xff]  ;;  %v13457_v20 = vld [vmem:[#allocation33_spill] sm:$0xff] }
 0x591   : > { %v4892_v23 = vsel %vm430_vm11, %v13453_v57, %v13452_v53  ;;  %v4931_v0 = vsel %vm455_vm12, %v13455_v21, %v13454_v29  ;;  %v6139_v25 = vrot.slane %v11926_v49, 4  ;;  %v5577_v47 = vstv %s11896_s9  ;;  %s12341_s9 = sld [smem:[#allocation6 + $0xbb]] }
 0x592   : > { %v11941_v46 = vpop.permute.xlu1 %5492  ;;  %v11943_v24 = vpop.permute.xlu0 %5490  ;;  %v4858_v5 = vadd.f32 %v4854_v15, %v4820_v13  ;;  %v4897_v50 = vadd.f32 %v4893_v6, %v4859_v63  ;;  %v6106_v27 = vsel %vm1208_vm5, %v6101_v39, %v6105_v22  ;;  %v6160_v18 = vstv %s11902_s23  ;;  %v13464_v13 = vld [vmem:[#allocation38_spill] sm:$0xff]  ;;  %s12376_s23 = sld [smem:[#allocation6 + $0xbc]] }
 0x593   : > { %13451 = vst [vmem:[#allocation99_spill] sm:$0xff] %v11943_v24  ;;  %v4930_v17 = vsel %vm455_vm12, %v13457_v20, %v13456_v34  ;;  %v6135_v53 = vrot.slane %v6123_v33, 4  ;;  %v6136_v57 = vrot.slane %v11939_v52, 4  ;;  %v6128_v29 = vmul.f32 %v6122_v26, %v13262_v56  ;;  %v13475_v24 = vld [vmem:[#allocation57_spill] sm:$0xff] }
 0x594   : > { %6109 = vrot.lane.b32.xlu1 %v6102_v48, %s7351_s28  ;;  %6107 = vrot.lane.b32.xlu0 %v6099_v32, %s7351_s28  ;;  %v4896_v49 = vadd.f32 %v4892_v23, %v4858_v5  ;;  %v4935_v21 = vadd.f32 %v4931_v0, %v4897_v50  ;;  %v11967_v48 = vmul.f32 %v5577_v47, %v13237_v14 }
 0x595   : > { %v6127_v39 = vmul.f32 %v6122_v26, %v8470_v11  ;;  %v6104_v32 = vsel %vm1208_vm5, %v6098_v16, %v6103_v45  ;;  %v6140_v22 = vsel %vm1208_vm5, %v6138_v4, %v6139_v25  ;;  %v6162_v33 = vmul.f32 %v6160_v18, %v13236_v3  ;;  %v13460_v16 = vld [vmem:[#allocation42_spill] sm:$0xff]  ;;  %v13461_v45 = vld [vmem:[#allocation43_spill] sm:$0xff] }
 0x596   : > { %v11962_v15 = vpop.permute.xlu1 %5526  ;;  %v11964_v6 = vpop.permute.xlu0 %5524  ;;  %v11976_v5 = vmul.f32 %v6160_v18, %v13240_v55  ;;  %v4934_v52 = vadd.f32 %v4930_v17, %v4896_v49  ;;  %v6161_v26 = vmul.f32 %v6160_v18, %v13237_v14  ;;  %v11983_v63 = vmul.f32 %v6160_v18, %v13241_v59  ;;  %v13472_v17 = vld [vmem:[#allocation45_spill] sm:$0xff] }
 0x597   : > { %13458 = vst [vmem:[#allocation119_spill] sm:$0xff] %v11962_v15  ;;  %13459 = vst [vmem:[#allocation84_spill] sm:$0xff] %v11964_v6  ;;  %v4986_v4 = vsel %vm330_vm7, %v13461_v45, %v13460_v16  ;;  %v6137_v23 = vsel %vm1208_vm5, %v6135_v53, %v6136_v57  ;;  %v11990_v0 = vmul.f32 %v5577_v47, %v13241_v59  ;;  %v6143_v50 = vrot.slane %v6128_v29, 4  ;;  %v13465_v16 = vld [vmem:[#allocation39_spill] sm:$0xff]  ;;  %v13467_v6 = vld [vmem:[#allocation44_spill] sm:$0xff] }
 0x598   : > { %6113 = vrot.lane.b32.xlu1 %v6106_v27, %s7351_s28  ;;  %6111 = vrot.lane.b32.xlu0 %v6104_v32, %s7351_s28  ;;  %v4952_v34 = vadd.f32 %v11541_v54, %v4935_v21  ;;  %v6141_v49 = vrot.slane %v6127_v39, 4  ;;  %v11999_v32 = vmul.f32 %v5577_v47, %v8470_v11  ;;  %v4985_v53 = vsel %vm330_vm7, %v13465_v16, %v13464_v13  ;;  %v13466_v45 = vld [vmem:[#allocation47_spill] sm:$0xff]  ;;  %v13468_v13 = vld [vmem:[#allocation40_spill] sm:$0xff]  ;;  %v13469_v16 = vld [vmem:[#allocation41_spill] sm:$0xff] }
 0x599   : > { %v5024_v29 = vsel %vm355_vm8, %v13467_v6, %v13466_v45  ;;  %v6176_v15 = vrot.slane %v6162_v33, 4  ;;  %v6177_v54 = vrot.slane %v11976_v5, 4  ;;  %v4951_v21 = vadd.f32 %v11534_v1, %v4934_v52  ;;  %v13470_v33 = vld [vmem:[#allocation48_spill] sm:$0xff]  ;;  %v13471_v45 = vld [vmem:[#allocation49_spill] sm:$0xff] }
 0x59a   : > { %v11993_v27 = vpop.permute.xlu1 %5530  ;;  %v11995_v20 = vpop.permute.xlu0 %5528  ;;  %v6173_v47 = vrot.slane %v6161_v26, 4  ;;  %v6174_v39 = vrot.slane %v11983_v63, 4  ;;  %v5023_v6 = vsel %vm355_vm8, %v13469_v16, %v13468_v13  ;;  %v5062_v5 = vsel %vm380_vm9, %v13471_v45, %v13470_v33  ;;  %v13474_v16 = vld [vmem:[#allocation56_spill] sm:$0xff] }
 0x59b   : > { %13462 = vst [vmem:[#allocation87_spill] sm:$0xff] %v11993_v27  ;;  %13463 = vst [vmem:[#allocation88_spill] sm:$0xff] %v11995_v20  ;;  %v4990_v20 = vadd.f32 %v4986_v4, %v4952_v34  ;;  %v6144_v1 = vsel %vm1208_vm5, %v6139_v25, %v6143_v50  ;;  %v6166_v52 = vmul.f32 %v6160_v18, %v13262_v56  ;;  %v6198_v34 = vstv %s11970_s26  ;;  %v13473_v27 = vld [vmem:[#allocation50_spill] sm:$0xff]  ;;  %s7116_s26 = sld [smem:[#allocation6 + $0xbe]] }
 0x59c   : > { %6147 = vrot.lane.b32.xlu1 %v6140_v22, %s7352_s30  ;;  %6145 = vrot.lane.b32.xlu0 %v6137_v23, %s7352_s30  ;;  %v4989_v22 = vadd.f32 %v4985_v53, %v4951_v21  ;;  %v6165_v63 = vmul.f32 %v6160_v18, %v8470_v11  ;;  %v5061_v13 = vsel %vm380_vm9, %v13473_v27, %v13472_v17  ;;  %v13476_v27 = vld [vmem:[#allocation52_spill] sm:$0xff] }
 0x59d   : > { %v5028_v4 = vadd.f32 %v5024_v29, %v4990_v20  ;;  %v5100_v33 = vsel %vm405_vm10, %v13475_v24, %v13474_v16  ;;  %v6142_v25 = vsel %vm1208_vm5, %v6136_v57, %v6141_v49  ;;  %v6178_v50 = vsel %vm1208_vm5, %v6176_v15, %v6177_v54  ;;  %v13477_v24 = vld [vmem:[#allocation53_spill] sm:$0xff] }
 0x59e   : > { %v12022_v23 = vpop.permute.xlu1 %5564  ;;  %v12024_v26 = vpop.permute.xlu0 %5562  ;;  %v5027_v20 = vadd.f32 %v5023_v6, %v4989_v22  ;;  %v5585_v29 = vrot.slane %v11990_v0, 2  ;;  %v6175_v18 = vsel %vm1208_vm5, %v6173_v47, %v6174_v39  ;;  %v5099_v57 = vsel %vm405_vm10, %v13477_v24, %v13476_v27 }
 0x59f   : > { %v5066_v53 = vadd.f32 %v5062_v5, %v5028_v4  ;;  %v5138_v15 = vsel %vm430_vm11, %v11326_v9, %v11324_v7  ;;  %v6200_v17 = vmul.f32 %v6198_v34, %v13236_v3  ;;  %v6202_v49 = vmul.f32 %v6198_v34, %v13240_v55 }
 0x5a0   : > { %6151 = vrot.lane.b32.xlu1 %v6144_v1, %s7352_s30  ;;  %6149 = vrot.lane.b32.xlu0 %v6142_v25, %s7352_s30  ;;  %v5065_v21 = vadd.f32 %v5061_v13, %v5027_v20  ;;  %v6181_v5 = vrot.slane %v6166_v52, 4  ;;  %v6179_v1 = vrot.slane %v6165_v63, 4  ;;  %v5137_v22 = vsel %vm430_vm11, %v11288_v19, %v11286_v58 }
 0x5a1   : > { %v5104_v6 = vadd.f32 %v5100_v33, %v5066_v53  ;;  %v5176_v7 = vsel %vm455_vm12, %v11385_v40, %v11383_v36  ;;  %v6199_v9 = vmul.f32 %v6198_v34, %v13237_v14  ;;  %v6201_v4 = vmul.f32 %v6198_v34, %v13241_v59 }
 0x5a2   : > { %v12052_v47 = vpop.permute.xlu1 %5568  ;;  %v12054_v45 = vpop.permute.xlu0 %5566  ;;  %v5103_v13 = vadd.f32 %v5099_v57, %v5065_v21  ;;  %v5587_v33 = vrot.slane %v11999_v32, 2  ;;  %v6236_v52 = vstv %s12012_s7  ;;  %v5175_v58 = vsel %vm455_vm12, %v11358_v60, %v11356_v31  ;;  %v13497_v32 = vld [vmem:[#allocation76_spill] sm:$0xff]  ;;  %s7117_s7 = sld [smem:[#allocation6 + $0xbf]] }
 0x5a3   : > { %v5142_v16 = vadd.f32 %v5138_v15, %v5104_v6  ;;  %v6214_v19 = vrot.slane %v6200_v17, 4  ;;  %v6215_v63 = vrot.slane %v6202_v49, 4  ;;  %v6204_v36 = vmul.f32 %v6198_v34, %v13262_v56 }
 0x5a4   : > { %6185 = vrot.lane.b32.xlu1 %v6178_v50, %s7353_s17  ;;  %6183 = vrot.lane.b32.xlu0 %v6175_v18, %s7353_s17  ;;  %v5141_v40 = vadd.f32 %v5137_v22, %v5103_v13  ;;  %v6182_v50 = vsel %vm1208_vm5, %v6177_v54, %v6181_v5  ;;  %v6203_v18 = vmul.f32 %v6198_v34, %v8470_v11  ;;  %v6211_v24 = vrot.slane %v6199_v9, 4 }
 0x5a5   : > { %v5180_v25 = vadd.f32 %v5176_v7, %v5142_v16  ;;  %v6180_v27 = vsel %vm1208_vm5, %v6174_v39, %v6179_v1  ;;  %v6212_v31 = vrot.slane %v6201_v4, 4  ;;  %v6238_v60 = vmul.f32 %v6236_v52, %v13236_v3 }
 0x5a6   : > { %v12072_v20 = vpop.permute.xlu1 %5619  ;;  %v12074_v53 = vpop.permute.xlu0 %5617  ;;  %v5179_v57 = vadd.f32 %v5175_v58, %v5141_v40  ;;  %v6240_v15 = vmul.f32 %v6236_v52, %v13240_v55  ;;  %v6274_v17 = vstv %s12040_s4  ;;  %v12085_v49 = vstv %s12042_s11  ;;  %s7118_s4 = sld [smem:[#allocation6 + $0xc0]]  ;;  %s7101_s11 = sld [smem:[#allocation6 + $0xaf]] }
 0x5a7   : > { %v5206_v54 = vsel %vm330_vm7, %v11427_v44, %v11425_v35  ;;  %v6216_v39 = vsel %vm1208_vm5, %v6214_v19, %v6215_v63  ;;  %v6219_v34 = vrot.slane %v6204_v36, 4  ;;  %v6237_v21 = vmul.f32 %v6236_v52, %v13237_v14 }
 0x5a8   : > { %6189 = vrot.lane.b32.xlu1 %v6182_v50, %s7353_s17  ;;  %6187 = vrot.lane.b32.xlu0 %v6180_v27, %s7353_s17  ;;  %v5186_v6 = vadd.f32 %v11756_v2, %v5180_v25  ;;  %v6217_v22 = vrot.slane %v6203_v18, 4  ;;  %v12098_v7 = vmul.f32 %v6236_v52, %v13241_v59  ;;  %v6242_v9 = vmul.f32 %v6236_v52, %v13262_v56  ;;  %v13478_v18 = vld [vmem:[#allocation60_spill] sm:$0xff]  ;;  %v13479_v27 = vld [vmem:[#allocation61_spill] sm:$0xff] }
 0x5a9   : > { %v5205_v35 = vsel %vm330_vm7, %v11406_v51, %v11404_v10  ;;  %v5230_v44 = vsel %vm355_vm8, %v11488_v12, %v11486_v37  ;;  %v6213_v2 = vsel %vm1208_vm5, %v6211_v24, %v6212_v31  ;;  %v6252_v4 = vrot.slane %v6238_v60, 4  ;;  %v13481_v24 = vld [vmem:[#allocation64_spill] sm:$0xff] }
 0x5aa   : > { %v12093_v5 = vpop.permute.xlu1 %5623  ;;  %v12095_v1 = vpop.permute.xlu0 %5621  ;;  %v5185_v13 = vadd.f32 %v11643_v28, %v5179_v57  ;;  %v5210_v16 = vadd.f32 %v5206_v54, %v5186_v6  ;;  %v6253_v58 = vrot.slane %v6240_v15, 4  ;;  %v6241_v19 = vmul.f32 %v6236_v52, %v8470_v11  ;;  %v13484_v6 = vld [vmem:[#allocation70_spill] sm:$0xff] }
 0x5ab   : > { %v5229_v10 = vsel %vm355_vm8, %v11457_v38, %v11455_v42  ;;  %v5254_v51 = vsel %vm380_vm9, %v11553_v8, %v11551_v41  ;;  %v6220_v37 = vsel %vm1208_vm5, %v6215_v63, %v6219_v34  ;;  %v6249_v12 = vrot.slane %v6237_v21, 4  ;;  %v13480_v38 = vld [vmem:[#allocation66_spill] sm:$0xff]  ;;  %v13483_v34 = vld [vmem:[#allocation63_spill] sm:$0xff] }
 0x5ac   : > { %6223 = vrot.lane.b32.xlu1 %v6216_v39, %s7354_s19  ;;  %6221 = vrot.lane.b32.xlu0 %v6213_v2, %s7354_s19  ;;  %v5209_v28 = vadd.f32 %v5205_v35, %v5185_v13  ;;  %v5234_v36 = vadd.f32 %v5230_v44, %v5210_v16  ;;  %v6250_v50 = vrot.slane %v12098_v7, 4  ;;  %v6257_v52 = vrot.slane %v6242_v9, 4  ;;  %v13482_v39 = vld [vmem:[#allocation62_spill] sm:$0xff]  ;;  %v13485_v7 = vld [vmem:[#allocation67_spill] sm:$0xff] }
 0x5ad   : > { %v5253_v42 = vsel %vm380_vm9, %v13479_v27, %v13478_v18  ;;  %v5278_v41 = vsel %vm405_vm10, %v13481_v24, %v13480_v38  ;;  %v6218_v8 = vsel %vm1208_vm5, %v6212_v31, %v6217_v22  ;;  %v6276_v63 = vmul.f32 %v6274_v17, %v13236_v3  ;;  %v13491_v24 = vld [vmem:[#allocation71_spill] sm:$0xff] }
 0x5ae   : > { %v12119_v40 = vpop.permute.xlu1 %5657  ;;  %v12121_v25 = vpop.permute.xlu0 %5655  ;;  %v5233_v60 = vadd.f32 %v5229_v10, %v5209_v28  ;;  %v5258_v57 = vadd.f32 %v5254_v51, %v5234_v36  ;;  %v6254_v15 = vsel %vm1208_vm5, %v6252_v4, %v6253_v58  ;;  %v6255_v54 = vrot.slane %v6241_v19, 4  ;;  %v13486_v19 = vld [vmem:[#allocation65_spill] sm:$0xff] }
 0x5af   : > { %v5277_v21 = vsel %vm405_vm10, %v13483_v34, %v13482_v39  ;;  %v5302_v9 = vsel %vm430_vm11, %v13485_v7, %v13484_v6  ;;  %v6278_v31 = vmul.f32 %v6274_v17, %v13240_v55  ;;  %v6275_v22 = vmul.f32 %v6274_v17, %v13237_v14  ;;  %v13487_v10 = vld [vmem:[#allocation69_spill] sm:$0xff] }
 0x5b0   : > { %6227 = vrot.lane.b32.xlu1 %v6220_v37, %s7354_s19  ;;  %6225 = vrot.lane.b32.xlu0 %v6218_v8, %s7354_s19  ;;  %v5257_v35 = vadd.f32 %v5253_v42, %v5233_v60  ;;  %v5282_v44 = vadd.f32 %v5278_v41, %v5258_v57  ;;  %v6251_v4 = vsel %vm1208_vm5, %v6249_v12, %v6250_v50  ;;  %v13488_v37 = vld [vmem:[#allocation72_spill] sm:$0xff]  ;;  %v13489_v28 = vld [vmem:[#allocation73_spill] sm:$0xff]  ;;  %v6290_v12 = vrot.slane %v6276_v63, 4 }
 0x5b1   : > { %v6258_v16 = vsel %vm1208_vm5, %v6253_v58, %v6257_v52  ;;  %v5301_v51 = vsel %vm430_vm11, %v13487_v10, %v13486_v19  ;;  %v5326_v36 = vsel %vm455_vm12, %v13489_v28, %v13488_v37  ;;  %v6277_v18 = vmul.f32 %v6274_v17, %v13241_v59  ;;  %v13490_v52 = vld [vmem:[#allocation68_spill] sm:$0xff] }
 0x5b2   : > { %v12143_v2 = vpop.permute.xlu1 %5661  ;;  %v12145_v13 = vpop.permute.xlu0 %5659  ;;  %v6280_v27 = vmul.f32 %v6274_v17, %v13262_v56  ;;  %v5281_v42 = vadd.f32 %v5277_v21, %v5257_v35  ;;  %v5306_v38 = vadd.f32 %v5302_v9, %v5282_v44  ;;  %v6279_v58 = vmul.f32 %v6274_v17, %v8470_v11 }
 0x5b3   : > { %v5325_v41 = vsel %vm455_vm12, %v13491_v24, %v13490_v52  ;;  %v6291_v8 = vrot.slane %v6278_v31, 4  ;;  %v6331_v60 = vmul.f32 %v12085_v49, %v13236_v3  ;;  %v12169_v57 = vmul.f32 %v12085_v49, %v13240_v55  ;;  %v13499_v52 = vld [vmem:[#allocation82_spill] sm:$0xff] }
 0x5b4   : > { %6261 = vrot.lane.b32.xlu1 %v6254_v15, %s7355_s27  ;;  %6259 = vrot.lane.b32.xlu0 %v6251_v4, %s7355_s27  ;;  %v5305_v15 = vadd.f32 %v5301_v51, %v5281_v42  ;;  %v5330_v39 = vadd.f32 %v5326_v36, %v5306_v38  ;;  %v6330_v17 = vmul.f32 %v12085_v49, %v13237_v14  ;;  %v6287_v7 = vrot.slane %v6275_v22, 4  ;;  %v13496_v22 = vld [vmem:[#allocation75_spill] sm:$0xff]  ;;  %v13498_v38 = vld [vmem:[#allocation77_spill] sm:$0xff] }
 0x5b5   : > { %v12179_v21 = vmul.f32 %v12085_v49, %v13241_v59  ;;  %v6256_v6 = vsel %vm1208_vm5, %v6250_v50, %v6255_v54  ;;  %v6288_v9 = vrot.slane %v6277_v18, 4  ;;  %v6295_v31 = vrot.slane %v6280_v27, 4  ;;  %v13495_v54 = vld [vmem:[#allocation74_spill] sm:$0xff] }
 0x5b6   : > { %v12171_v34 = vpop.permute.xlu1 %5695  ;;  %v12173_v63 = vpop.permute.xlu0 %5693  ;;  %v5329_v35 = vadd.f32 %v5325_v41, %v5305_v15  ;;  %v13492_v44 = vrot.slane %v11867_v30, 1  ;;  %v13493_v4 = vrot.slane %v11667_v61, 1  ;;  %v13494_v10 = vrot.slane %v11967_v48, 2  ;;  %v13500_v15 = vld [vmem:[#allocation80_spill] sm:$0xff] }
 0x5b7   : > { %v6293_v50 = vrot.slane %v6279_v58, 4  ;;  %v5381_v30 = vsel %vm330_vm7, %v13496_v22, %v13495_v54  ;;  %v12204_v61 = vsel %vm716_vm3, %v5585_v29, %v5587_v33  ;;  %v6345_v48 = vrot.slane %v6331_v60, 5  ;;  %v13506_v22 = vld [vmem:[#allocation99_spill] sm:$0xff] }
 0x5b8   : > { %v5343_v19 = vsel %vm470_vm2, %v13493_v4, %v13492_v44  ;;  %v12192_v51 = vsel %vm716_vm3, %v13494_v10, %v5585_v29  ;;  %6265 = vrot.lane.b32.xlu1 %v6258_v16, %s7355_s27  ;;  %6263 = vrot.lane.b32.xlu0 %v6256_v6, %s7355_s27  ;;  %v6346_v37 = vrot.slane %v12169_v57, 5  ;;  %v6292_v18 = vsel %vm1208_vm5, %v6290_v12, %v6291_v8  ;;  %v13504_v10 = vld [vmem:[#allocation78_spill] sm:$0xff] }
 0x5b9   : > { %v5347_v28 = vadd.f32 %v5343_v19, %v5330_v39  ;;  %v6342_v27 = vrot.slane %v6330_v17, 5  ;;  %v6343_v42 = vrot.slane %v12179_v21, 5  ;;  %v5380_v0 = vsel %vm330_vm7, %v13498_v38, %v13497_v32  ;;  %v13501_v39 = vld [vmem:[#allocation81_spill] sm:$0xff]  ;;  %v13503_v17 = vld [vmem:[#allocation94_spill] sm:$0xff]  ;;  %v13508_v38 = vld [vmem:[#allocation100_spill] sm:$0xff] }
 0x5ba   : > { %v12207_v16 = vpop.permute.xlu1 %5699  ;;  %v12209_v36 = vpop.permute.xlu0 %5697  ;;  %v5419_v29 = vsel %vm355_vm8, %v11829_v62, %v11827_v43  ;;  %v6289_v33 = vsel %vm1208_vm5, %v6287_v7, %v6288_v9  ;;  %v6296_v58 = vsel %vm1208_vm5, %v6291_v8, %v6295_v31  ;;  %v5346_v24 = vadd.f32 %v13499_v52, %v5329_v35  ;;  %v13502_v62 = vld [vmem:[#allocation83_spill] sm:$0xff] }
 0x5bb   : > { %v5385_v12 = vadd.f32 %v5381_v30, %v5347_v28  ;;  %v6294_v41 = vsel %vm1208_vm5, %v6288_v9, %v6293_v50  ;;  %v6367_v60 = vstv %s12160_s10  ;;  %v5418_v43 = vsel %vm355_vm8, %v13501_v39, %v13500_v15  ;;  %v13505_v50 = vld [vmem:[#allocation79_spill] sm:$0xff]  ;;  %s12442_s10 = sld [smem:[#allocation6 + $0xc1]] }
 0x5bc   : > { %6299 = vrot.lane.b32.xlu1 %v6292_v18, %s7356_s6  ;;  %6297 = vrot.lane.b32.xlu0 %v6289_v33, %s7356_s6  ;;  %v5457_v8 = vsel %vm380_vm9, %v13503_v17, %v13502_v62  ;;  %v6347_v6 = vsel %vm255_vm1, %v6345_v48, %v6346_v37  ;;  %v6335_v7 = vmul.f32 %v12085_v49, %v13262_v56  ;;  %v13511_v62 = vld [vmem:[#allocation119_spill] sm:$0xff]  ;;  %v13512_v17 = vld [vmem:[#allocation84_spill] sm:$0xff] }
 0x5bd   : > { %v5384_v31 = vadd.f32 %v5380_v0, %v5346_v24  ;;  %v5423_v35 = vadd.f32 %v5419_v29, %v5385_v12  ;;  %v6344_v4 = vsel %vm255_vm1, %v6342_v27, %v6343_v42  ;;  %v6334_v19 = vmul.f32 %v12085_v49, %v8470_v11  ;;  %v13507_v27 = vld [vmem:[#allocation93_spill] sm:$0xff]  ;;  %v13510_v29 = vld [vmem:[#allocation88_spill] sm:$0xff] }
 0x5be   : > { %v12239_v44 = vpop.permute.xlu1 %5733  ;;  %v12241_v9 = vpop.permute.xlu0 %5731  ;;  %v5456_v54 = vsel %vm380_vm9, %v13505_v50, %v13504_v10  ;;  %v5495_v30 = vsel %vm405_vm10, %v13506_v22, %v11941_v46  ;;  %v6369_v48 = vmul.f32 %v6367_v60, %v13236_v3  ;;  %v6371_v28 = vmul.f32 %v6367_v60, %v13240_v55  ;;  %v13509_v46 = vld [vmem:[#allocation87_spill] sm:$0xff] }
 0x5bf   : > { %v5422_v18 = vadd.f32 %v5418_v43, %v5384_v31  ;;  %v5461_v32 = vadd.f32 %v5457_v8, %v5423_v35  ;;  %v6368_v49 = vmul.f32 %v6367_v60, %v13237_v14  ;;  %v5494_v0 = vsel %vm405_vm10, %v13508_v38, %v13507_v27 }
 0x5c0   : > { %6303 = vrot.lane.b32.xlu1 %v6296_v58, %s7356_s6  ;;  %6301 = vrot.lane.b32.xlu0 %v6294_v41, %s7356_s6  ;;  %v5533_v33 = vsel %vm430_vm11, %v13510_v29, %v13509_v46  ;;  %v6370_v52 = vmul.f32 %v6367_v60, %v13241_v59  ;;  %v6373_v24 = vmul.f32 %v6367_v60, %v13262_v56  ;;  %v6350_v41 = vrot.slane %v6335_v7, 5 }
 0x5c1   : > { %v5460_v12 = vadd.f32 %v5456_v54, %v5422_v18  ;;  %v5499_v15 = vadd.f32 %v5495_v30, %v5461_v32  ;;  %v6372_v43 = vmul.f32 %v6367_v60, %v8470_v11  ;;  %v5532_v8 = vsel %vm430_vm11, %v13512_v17, %v13511_v62 }
 0x5c2   : > { %v12269_v58 = vpop.permute.xlu1 %5737  ;;  %v12271_v39 = vpop.permute.xlu0 %5735  ;;  %v5571_v31 = vsel %vm455_vm12, %v12054_v45, %v12052_v47  ;;  %v6348_v35 = vrot.slane %v6334_v19, 5  ;;  %v6405_v10 = vstv %s12221_s20  ;;  %v6383_v22 = vrot.slane %v6369_v48, 5 }
 0x5c3   : > { %v5498_v50 = vadd.f32 %v5494_v0, %v5460_v12  ;;  %v5537_v54 = vadd.f32 %v5533_v33, %v5499_v15  ;;  %v6384_v7 = vrot.slane %v6371_v28, 5  ;;  %v5570_v60 = vsel %vm455_vm12, %v12024_v26, %v12022_v23 }
 0x5c4   : > { %6354 = vrot.lane.b32.xlu1 %v6347_v6, %s7351_s28  ;;  %6352 = vrot.lane.b32.xlu0 %v6344_v4, %s7351_s28  ;;  %v6380_v30 = vrot.slane %v6368_v49, 5  ;;  %v6381_v18 = vrot.slane %v6370_v52, 5  ;;  %v6388_v32 = vrot.slane %v6373_v24, 5  ;;  %v6386_v38 = vrot.slane %v6372_v43, 5 }
 0x5c5   : > { %v5536_v27 = vadd.f32 %v5532_v8, %v5498_v50  ;;  %v5575_v47 = vadd.f32 %v5571_v31, %v5537_v54  ;;  %v6407_v6 = vmul.f32 %v6405_v10, %v13236_v3  ;;  %v6351_v4 = vsel %vm255_vm1, %v6346_v37, %v6350_v41 }
 0x5c6   : > { %v12286_v45 = vpop.permute.xlu1 %5771  ;;  %v12288_v19 = vpop.permute.xlu0 %5769  ;;  %v6349_v23 = vsel %vm255_vm1, %v6343_v42, %v6348_v35  ;;  %v12300_v26 = vmul.f32 %v6405_v10, %v13240_v55  ;;  %v5822_v48 = vstv %s12256_s29  ;;  %v6385_v49 = vsel %vm255_vm1, %v6383_v22, %v6384_v7 }
 0x5c7   : > { %v5574_v28 = vadd.f32 %v5570_v60, %v5536_v27  ;;  %v6406_v0 = vmul.f32 %v6405_v10, %v13237_v14  ;;  %v5626_v57 = vsel %vm330_vm7, %v12095_v1, %v12093_v5  ;;  %v6382_v21 = vsel %vm255_vm1, %v6380_v30, %v6381_v18 }
 0x5c8   : > { %6358 = vrot.lane.b32.xlu1 %v6351_v4, %s7351_s28  ;;  %6356 = vrot.lane.b32.xlu0 %v6349_v23, %s7351_s28  ;;  %v6389_v37 = vsel %vm255_vm1, %v6384_v7, %v6388_v32  ;;  %v6408_v42 = vmul.f32 %v6405_v10, %v13241_v59  ;;  %v5592_v46 = vadd.f32 %v12204_v61, %v5575_v47  ;;  %v6421_v24 = vrot.slane %v6407_v6, 5 }
 0x5c9   : > { %v6387_v52 = vsel %vm255_vm1, %v6381_v18, %v6386_v38  ;;  %v12316_v12 = vmul.f32 %v5822_v48, %v13237_v14  ;;  %v5625_v5 = vsel %vm330_vm7, %v12074_v53, %v12072_v20  ;;  %v5664_v1 = vsel %vm355_vm8, %v12145_v13, %v12143_v2 }
 0x5ca   : > { %v5776_v29 = vpop.permute.xlu1 %5775  ;;  %v5774_v33 = vpop.permute.xlu0 %5773  ;;  %v6422_v15 = vrot.slane %v12300_v26, 5  ;;  %v12326_v61 = vmul.f32 %v5822_v48, %v13241_v59  ;;  %v5591_v41 = vadd.f32 %v12192_v51, %v5574_v28  ;;  %v5630_v43 = vadd.f32 %v5626_v57, %v5592_v46 }
 0x5cb   : > { %v6418_v62 = vrot.slane %v6406_v0, 5  ;;  %v6411_v20 = vmul.f32 %v6405_v10, %v13262_v56  ;;  %v5663_v53 = vsel %vm355_vm8, %v12121_v25, %v12119_v40  ;;  %v5702_v2 = vsel %vm380_vm9, %v12209_v36, %v12207_v16 }
 0x5cc   : > { %6392 = vrot.lane.b32.xlu1 %v6385_v49, %s7352_s30  ;;  %6390 = vrot.lane.b32.xlu0 %v6382_v21, %s7352_s30  ;;  %v6419_v13 = vrot.slane %v6408_v42, 5  ;;  %v6410_v17 = vmul.f32 %v6405_v10, %v8470_v11  ;;  %v5629_v51 = vadd.f32 %v5625_v5, %v5591_v41  ;;  %v5668_v8 = vadd.f32 %v5664_v1, %v5630_v43 }
 0x5cd   : > { %v5829_v50 = vrot.slane %v12316_v12, 3  ;;  %v6443_v54 = vstv %s12291_s8  ;;  %v5701_v40 = vsel %vm380_vm9, %v12173_v63, %v12171_v34  ;;  %v5740_v25 = vsel %vm405_vm10, %v12271_v39, %v12269_v58 }
 0x5ce   : > { %v5810_v31 = vpop.permute.xlu1 %5809  ;;  %v5808_v35 = vpop.permute.xlu0 %5807  ;;  %v6423_v16 = vsel %vm255_vm1, %v6421_v24, %v6422_v15  ;;  %v5830_v36 = vrot.slane %v12326_v61, 3  ;;  %v5667_v10 = vadd.f32 %v5663_v53, %v5629_v51  ;;  %v5706_v22 = vadd.f32 %v5702_v2, %v5668_v8 }
 0x5cf   : > { %v6426_v7 = vrot.slane %v6411_v20, 5  ;;  %v5825_v60 = vmul.f32 %v5822_v48, %v8470_v11  ;;  %v5739_v34 = vsel %vm405_vm10, %v12241_v9, %v12239_v44  ;;  %v5778_v63 = vsel %vm430_vm11, %v5774_v33, %v5776_v29 }
 0x5d0   : > { %6396 = vrot.lane.b32.xlu1 %v6389_v37, %s7352_s30  ;;  %6394 = vrot.lane.b32.xlu0 %v6387_v52, %s7352_s30  ;;  %v6424_v58 = vrot.slane %v6410_v17, 5  ;;  %v6445_v39 = vmul.f32 %v6443_v54, %v13236_v3  ;;  %v5705_v30 = vadd.f32 %v5701_v40, %v5667_v10  ;;  %v5744_v18 = vadd.f32 %v5740_v25, %v5706_v22 }
 0x5d1   : > { %v6420_v47 = vsel %vm255_vm1, %v6418_v62, %v6419_v13  ;;  %v6447_v38 = vmul.f32 %v6443_v54, %v13240_v55  ;;  %v5777_v6 = vsel %vm430_vm11, %v12288_v19, %v12286_v45  ;;  %v6444_v44 = vmul.f32 %v6443_v54, %v13237_v14 }
 0x5d2   : > { %v5814_v32 = vpop.permute.xlu1 %5813  ;;  %v5812_v27 = vpop.permute.xlu0 %5811  ;;  %v6446_v9 = vmul.f32 %v6443_v54, %v13241_v59  ;;  %v5743_v23 = vadd.f32 %v5739_v34, %v5705_v30  ;;  %v5782_v26 = vadd.f32 %v5778_v63, %v5744_v18  ;;  %v6427_v48 = vsel %vm255_vm1, %v6422_v15, %v6426_v7 }
 0x5d3   : > { %v5816_v4 = vsel %vm455_vm12, %v5812_v27, %v5814_v32  ;;  %v5832_v28 = vrot.slane %v5825_v60, 3  ;;  %v5815_v49 = vsel %vm455_vm12, %v5808_v35, %v5810_v31  ;;  %v6425_v45 = vsel %vm255_vm1, %v6419_v13, %v6424_v58 }
 0x5d4   : > { %6430 = vrot.lane.b32.xlu1 %v6423_v16, %s7353_s17  ;;  %6428 = vrot.lane.b32.xlu0 %v6420_v47, %s7353_s17  ;;  %v6459_v19 = vrot.slane %v6445_v39, 5  ;;  %v6449_v0 = vmul.f32 %v6443_v54, %v13262_v56  ;;  %v5781_v57 = vadd.f32 %v5777_v6, %v5743_v23  ;;  %v5820_v21 = vadd.f32 %v5816_v4, %v5782_v26 }
 0x5d5   : > { %v6448_v46 = vmul.f32 %v6443_v54, %v8470_v11  ;;  %v6481_v29 = vstv %s12341_s9  ;;  %v6460_v52 = vrot.slane %v6447_v38, 5  ;;  %v6456_v24 = vrot.slane %v6444_v44, 5  ;;  %s6805_s9 = scalar_lea.sflag [#allocation4], %s7518_s5 }
 0x5d6   : > { %v5865_v37 = vpop.permute.xlu1 %5864  ;;  %v5863_v42 = vpop.permute.xlu0 %5862  ;;  %v6457_v12 = vrot.slane %v6446_v9, 5  ;;  %v5819_v5 = vadd.f32 %v5815_v49, %v5781_v57  ;;  %v5833_v1 = vsel %vm962_vm4, %v5830_v36, %v5832_v28  ;;  %v6464_v15 = vrot.slane %v6449_v0, 5 }
 0x5d7   : > { %v5870_v33 = vsel %vm330_vm7, %v5863_v42, %v5865_v37  ;;  %v6483_v61 = vmul.f32 %v6481_v29, %v13236_v3  ;;  %v6485_v41 = vmul.f32 %v6481_v29, %v13240_v55  ;;  %v5837_v62 = vadd.f32 %v5833_v1, %v5820_v21 }
 0x5d8   : > { %6434 = vrot.lane.b32.xlu1 %v6427_v48, %s7353_s17  ;;  %6432 = vrot.lane.b32.xlu0 %v6425_v45, %s7353_s17  ;;  %v6462_v53 = vrot.slane %v6448_v46, 5  ;;  %v6482_v2 = vmul.f32 %v6481_v29, %v13237_v14  ;;  %v6484_v13 = vmul.f32 %v6481_v29, %v13241_v59  ;;  %v5831_v17 = vsel %vm962_vm4, %v5829_v50, %v5830_v36 }
 0x5d9   : > { %v6461_v8 = vsel %vm255_vm1, %v6459_v19, %v6460_v52  ;;  %v6458_v31 = vsel %vm255_vm1, %v6456_v24, %v6457_v12  ;;  %v5836_v35 = vadd.f32 %v5831_v17, %v5819_v5  ;;  %v6465_v40 = vsel %vm255_vm1, %v6460_v52, %v6464_v15 }
 0x5da   : > { %v5869_v43 = vpop.permute.xlu1 %5868  ;;  %v5867_v20 = vpop.permute.xlu0 %5866  ;;  %v6497_v25 = vrot.slane %v6483_v61, 5  ;;  %v6498_v16 = vrot.slane %v6485_v41, 5  ;;  %v6463_v22 = vsel %vm255_vm1, %v6457_v12, %v6462_v53  ;;  %v6494_v7 = vrot.slane %v6482_v2, 5 }
 0x5db   : > { %v5871_v51 = vsel %vm330_vm7, %v5867_v20, %v5869_v43  ;;  %v5874_v10 = vadd.f32 %v5870_v33, %v5836_v35  ;;  %v6495_v60 = vrot.slane %v6484_v13, 5  ;;  %v6487_v63 = vmul.f32 %v6481_v29, %v13262_v56 }
 0x5dc   : > { %v5875_v54 = vadd.f32 %v5871_v51, %v5837_v62  ;;  %6468 = vrot.lane.b32.xlu1 %v6461_v8, %s7354_s19  ;;  %6466 = vrot.lane.b32.xlu0 %v6458_v31, %s7354_s19  ;;  %v6486_v58 = vmul.f32 %v6481_v29, %v8470_v11  ;;  %v6519_v39 = vstv %s12376_s23  ;;  %v6499_v18 = vsel %vm255_vm1, %v6497_v25, %v6498_v16  ;;  %s7357_s23 = smov [#allocation9]  }
 0x5dd   : > { %v6521_v47 = vmul.f32 %v6519_v39, %v13236_v3  ;;  %v6523_v38 = vmul.f32 %v6519_v39, %v13240_v55  ;;  %v6520_v6 = vmul.f32 %v6519_v39, %v13237_v14  ;;  %v6522_v4 = vmul.f32 %v6519_v39, %v13241_v59 }
 0x5de   : > { %v5903_v50 = vpop.permute.xlu1 %5902  ;;  %v5901_v36 = vpop.permute.xlu0 %5900  ;;  %v6496_v9 = vsel %vm255_vm1, %v6494_v7, %v6495_v60  ;;  %v6502_v23 = vrot.slane %v6487_v63, 5  ;;  %v6500_v26 = vrot.slane %v6486_v58, 5  ;;  %v6525_v28 = vmul.f32 %v6519_v39, %v13262_v56 }
 0x5df   : > { %v5908_v34 = vsel %vm355_vm8, %v5901_v36, %v5903_v50  ;;  %v6574_v49 = vstv %s7116_s26  ;;  %v6535_v0 = vrot.slane %v6521_v47, 5  ;;  %v6536_v57 = vrot.slane %v6523_v38, 5  ;;  %s7273_s26 = sshll.u32 %s7357_s23, 4  ;;  %s7274_s26 = int_to_ptr.vmem [resolvable:$false] %s7273_s26 }
 0x5e0   : > { %v5912_v30 = vadd.f32 %v5908_v34, %v5874_v10  ;;  %6472 = vrot.lane.b32.xlu1 %v6465_v40, %s7354_s19  ;;  %6470 = vrot.lane.b32.xlu0 %v6463_v22, %s7354_s19  ;;  %v6532_v21 = vrot.slane %v6520_v6, 5  ;;  %v6533_v37 = vrot.slane %v6522_v4, 5  ;;  %v6503_v46 = vsel %vm255_vm1, %v6498_v16, %v6502_v23 }
 0x5e1   : > { %v6501_v29 = vsel %vm255_vm1, %v6495_v60, %v6500_v26  ;;  %v6524_v33 = vmul.f32 %v6519_v39, %v8470_v11  ;;  %v6540_v24 = vrot.slane %v6525_v28, 5  ;;  %v6576_v12 = vmul.f32 %v6574_v49, %v13236_v3 }
 0x5e2   : > { %v5907_v32 = vpop.permute.xlu1 %5906  ;;  %v5905_v27 = vpop.permute.xlu0 %5904  ;;  %v6537_v15 = vsel %vm255_vm1, %v6535_v0, %v6536_v57  ;;  %v6534_v61 = vsel %vm255_vm1, %v6532_v21, %v6533_v37  ;;  %v6578_v41 = vmul.f32 %v6574_v49, %v13240_v55  ;;  %v6575_v20 = vmul.f32 %v6574_v49, %v13237_v14 }
 0x5e3   : > { %v5909_v44 = vsel %vm355_vm8, %v5905_v27, %v5907_v32  ;;  %v6538_v62 = vrot.slane %v6524_v33, 5  ;;  %v6577_v53 = vmul.f32 %v6574_v49, %v13241_v59  ;;  %v6541_v13 = vsel %vm255_vm1, %v6536_v57, %v6540_v24 }
 0x5e4   : > { %v5913_v48 = vadd.f32 %v5909_v44, %v5875_v54  ;;  %6506 = vrot.lane.b32.xlu1 %v6499_v18, %s7355_s27  ;;  %6504 = vrot.lane.b32.xlu0 %v6496_v9, %s7355_s27  ;;  %v6590_v17 = vrot.slane %v6576_v12, 6  ;;  %v6591_v31 = vrot.slane %v6578_v41, 6  ;;  %v6580_v35 = vmul.f32 %v6574_v49, %v13262_v56 }
 0x5e5   : > { %v6579_v54 = vmul.f32 %v6574_v49, %v8470_v11  ;;  %v6612_v40 = vstv %s7117_s7  ;;  %v6539_v16 = vsel %vm255_vm1, %v6533_v37, %v6538_v62  ;;  %v6587_v10 = vrot.slane %v6575_v20, 6  ;;  %s7275_s7 = scalar_lea.vmem %s7274_s26, 1024 }
 0x5e6   : > { %v5941_v45 = vpop.permute.xlu1 %5940  ;;  %v5939_v19 = vpop.permute.xlu0 %5938  ;;  %v6588_v50 = vrot.slane %v6577_v53, 6  ;;  %v6614_v22 = vmul.f32 %v6612_v40, %v13236_v3  ;;  %v6616_v7 = vmul.f32 %v6612_v40, %v13240_v55  ;;  %v6595_v63 = vrot.slane %v6580_v35, 6 }
 0x5e7   : > { %v5946_v42 = vsel %vm380_vm9, %v5939_v19, %v5941_v45  ;;  %v6593_v58 = vrot.slane %v6579_v54, 6  ;;  %v6613_v39 = vmul.f32 %v6612_v40, %v13237_v14  ;;  %v6592_v18 = vsel %vm1699_vm6, %v6590_v17, %v6591_v31 }
 0x5e8   : > { %v5950_v52 = vadd.f32 %v5946_v42, %v5912_v30  ;;  %6510 = vrot.lane.b32.xlu1 %v6503_v46, %s7355_s27  ;;  %6508 = vrot.lane.b32.xlu0 %v6501_v29, %s7355_s27  ;;  %v6589_v32 = vsel %vm1699_vm6, %v6587_v10, %v6588_v50  ;;  %v6615_v27 = vmul.f32 %v6612_v40, %v13241_v59  ;;  %v6628_v38 = vrot.slane %v6614_v22, 6 }
 0x5e9   : > { %v6629_v6 = vrot.slane %v6616_v7, 6  ;;  %v6596_v9 = vsel %vm1699_vm6, %v6591_v31, %v6595_v63  ;;  %v6594_v23 = vsel %vm1699_vm6, %v6588_v50, %v6593_v58  ;;  %v6625_v26 = vrot.slane %v6613_v39, 6 }
 0x5ea   : > { %v5945_v5 = vpop.permute.xlu1 %5944  ;;  %v5943_v1 = vpop.permute.xlu0 %5942  ;;  %v6626_v49 = vrot.slane %v6615_v27, 6  ;;  %v6618_v45 = vmul.f32 %v6612_v40, %v13262_v56  ;;  %v6617_v19 = vmul.f32 %v6612_v40, %v8470_v11  ;;  %v6067_v21 = vstv %s7101_s11 }
 0x5eb   : > { %v5947_v43 = vsel %vm380_vm9, %v5943_v1, %v5945_v5  ;;  %v6630_v46 = vsel %vm1699_vm6, %v6628_v38, %v6629_v6  ;;  %v6069_v62 = vmul.f32 %v6067_v21, %v13241_v59  ;;  %v6070_v50 = vmul.f32 %v6067_v21, %v8470_v11 }
 0x5ec   : > { %v5951_v2 = vadd.f32 %v5947_v43, %v5913_v48  ;;  %6544 = vrot.lane.b32.xlu1 %v6537_v15, %s7356_s6  ;;  %6542 = vrot.lane.b32.xlu0 %v6534_v61, %s7356_s6  ;;  %v6650_v48 = vstv %s7118_s4  ;;  %v6627_v12 = vsel %vm1699_vm6, %v6625_v26, %v6626_v49  ;;  %v6633_v5 = vrot.slane %v6618_v45, 6 }
 0x5ed   : > { %v6652_v57 = vmul.f32 %v6650_v48, %v13236_v3  ;;  %v6654_v29 = vmul.f32 %v6650_v48, %v13240_v55  ;;  %v6651_v33 = vmul.f32 %v6650_v48, %v13237_v14  ;;  %v6631_v1 = vrot.slane %v6617_v19, 6 }
 0x5ee   : > { %v5979_v51 = vpop.permute.xlu1 %5978  ;;  %v5977_v8 = vpop.permute.xlu0 %5976  ;;  %v6068_v61 = vmul.f32 %v6067_v21, %v13237_v14  ;;  %v6656_v41 = vmul.f32 %v6650_v48, %v13262_v56  ;;  %v6634_v31 = vsel %vm1699_vm6, %v6629_v6, %v6633_v5  ;;  %v6655_v54 = vmul.f32 %v6650_v48, %v8470_v11 }
 0x5ef   : > { %v5984_v25 = vsel %vm405_vm10, %v5977_v8, %v5979_v51  ;;  %v6666_v43 = vrot.slane %v6652_v57, 6  ;;  %v6688_v51 = vstv %s12442_s10  ;;  %v6632_v35 = vsel %vm1699_vm6, %v6626_v49, %v6631_v1 }
 0x5f0   : > { %v5988_v36 = vadd.f32 %v5984_v25, %v5950_v52  ;;  %6548 = vrot.lane.b32.xlu1 %v6541_v13, %s7356_s6  ;;  %6546 = vrot.lane.b32.xlu0 %v6539_v16, %s7356_s6  ;;  %v6653_v52 = vmul.f32 %v6650_v48, %v13241_v59  ;;  %v6663_v13 = vrot.slane %v6651_v33, 6  ;;  %v6074_v25 = vrot.slane %v6068_v61, 4 }
 0x5f1   : > { %v6671_v16 = vrot.slane %v6656_v41, 6  ;;  %v6075_v10 = vrot.slane %v6069_v62, 4  ;;  %v6692_v22 = vmul.f32 %v6688_v51, %v13240_v55  ;;  %v6669_v39 = vrot.slane %v6655_v54, 6 }
 0x5f2   : > { %v5983_v60 = vpop.permute.xlu1 %5982  ;;  %v5981_v34 = vpop.permute.xlu0 %5980  ;;  %v6664_v17 = vrot.slane %v6653_v52, 6  ;;  %v6077_v38 = vrot.slane %v6070_v50, 4  ;;  %v6694_v26 = vmul.f32 %v6688_v51, %v13262_v56  ;;  %v6693_v48 = vmul.f32 %v6688_v51, %v8470_v11 }
 0x5f3   : > { %v5985_v30 = vsel %vm405_vm10, %v5981_v34, %v5983_v60 }
 0x5f4   : > { %v5989_v47 = vadd.f32 %v5985_v30, %v5951_v2  ;;  %6599 = vrot.lane.b32.xlu1 %v6592_v18, %s7351_s28  ;;  %6597 = vrot.lane.b32.xlu0 %v6589_v32, %s7351_s28  ;;  %v6667_v2 = vrot.slane %v6654_v29, 6  ;;  %v6665_v63 = vsel %vm1699_vm6, %v6663_v13, %v6664_v17  ;;  %v6689_v30 = vmul.f32 %v6688_v51, %v13237_v14 }
 0x5f5   : > { %v6691_v18 = vmul.f32 %v6688_v51, %v13241_v59  ;;  %v6670_v45 = vsel %vm1699_vm6, %v6664_v17, %v6669_v39  ;;  %v6078_v21 = vsel %vm1208_vm5, %v6075_v10, %v6077_v38  ;;  %v6709_v52 = vrot.slane %v6694_v26, 6 }
 0x5f6   : > { %v6017_v4 = vpop.permute.xlu1 %6016  ;;  %v6015_v44 = vpop.permute.xlu0 %6014  ;;  %v6668_v34 = vsel %vm1699_vm6, %v6666_v43, %v6667_v2  ;;  %v6672_v27 = vsel %vm1699_vm6, %v6667_v2, %v6671_v16  ;;  %v6701_v19 = vrot.slane %v6689_v30, 6 }
 0x5f7   : > { %v6022_v28 = vsel %vm430_vm11, %v6015_v44, %v6017_v4  ;;  %v6705_v4 = vrot.slane %v6692_v22, 6 }
 0x5f8   : > { %v6026_v0 = vadd.f32 %v6022_v28, %v5988_v36  ;;  %6603 = vrot.lane.b32.xlu1 %v6596_v9, %s7351_s28  ;;  %6601 = vrot.lane.b32.xlu0 %v6594_v23, %s7351_s28  ;;  %s12462_s28 = sld [smem:[#allocation6 + $0xc2]]  ;;  %v6690_v36 = vmul.f32 %v6688_v51, %v13236_v3 }
 0x5f9   : > { %v6710_v2 = vsel %vm1699_vm6, %v6705_v4, %v6709_v52 }
 0x5fa   : > { %v6021_v37 = vpop.permute.xlu1 %6020  ;;  %v6019_v42 = vpop.permute.xlu0 %6018  ;;  %v6704_v6 = vrot.slane %v6690_v36, 6 }
 0x5fb   : > { %v6023_v24 = vsel %vm430_vm11, %v6019_v42, %v6021_v37 }
 0x5fc   : > { %v6027_v15 = vadd.f32 %v6023_v24, %v5989_v47  ;;  %6637 = vrot.lane.b32.xlu1 %v6630_v46, %s7352_s30  ;;  %6635 = vrot.lane.b32.xlu0 %v6627_v12, %s7352_s30  ;;  %v6076_v47 = vsel %vm1208_vm5, %v6074_v25, %v6075_v10  ;;  %v6706_v37 = vsel %vm1699_vm6, %v6704_v6, %v6705_v4  ;;  %v6707_v24 = vrot.slane %v6693_v48, 6 }
 0x5fe   : > { %v6055_v20 = vpop.permute.xlu1 %6054  ;;  %v6053_v53 = vpop.permute.xlu0 %6052  ;;  %v6726_v28 = vstv %s12462_s28 }
 0x5ff   : > { %v6060_v8 = vsel %vm455_vm12, %v6053_v53, %v6055_v20  ;;  %v6728_v42 = vmul.f32 %v6726_v28, %v13236_v3  ;;  %v6730_v12 = vmul.f32 %v6726_v28, %v13240_v55  ;;  %v6729_v61 = vmul.f32 %v6726_v28, %v13241_v59 }
 0x600   : > { %v6064_v40 = vadd.f32 %v6060_v8, %v6026_v0  ;;  %6641 = vrot.lane.b32.xlu1 %v6634_v31, %s7352_s30  ;;  %6639 = vrot.lane.b32.xlu0 %v6632_v35, %s7352_s30  ;;  %s12482_s30 = sld [smem:[#allocation6 + $0xc3]]  ;;  %v6702_v0 = vrot.slane %v6691_v18, 6  ;;  %v6732_v43 = vmul.f32 %v6726_v28, %v13262_v56  ;;  %v6731_v51 = vmul.f32 %v6726_v28, %v8470_v11 }
 0x601   : > { %v6742_v13 = vrot.slane %v6728_v42, 6  ;;  %v6743_v17 = vrot.slane %v6730_v12, 6  ;;  %v6740_v54 = vrot.slane %v6729_v61, 6 }
 0x602   : > { %v6059_v7 = vpop.permute.xlu1 %6058  ;;  %v6057_v60 = vpop.permute.xlu0 %6056  ;;  %v6081_v9 = vadd.f32 %v6076_v47, %v6064_v40  ;;  %v6703_v1 = vsel %vm1699_vm6, %v6701_v19, %v6702_v0  ;;  %v6708_v31 = vsel %vm1699_vm6, %v6702_v0, %v6707_v24  ;;  %v6747_v25 = vrot.slane %v6732_v43, 6 }
 0x603   : > { %v6061_v58 = vsel %vm455_vm12, %v6057_v60, %v6059_v7  ;;  %v6744_v50 = vsel %vm1699_vm6, %v6742_v13, %v6743_v17  ;;  %v6745_v36 = vrot.slane %v6731_v51, 6 }
 0x604   : > { %v6065_v32 = vadd.f32 %v6061_v58, %v6027_v15  ;;  %6675 = vrot.lane.b32.xlu1 %v6668_v34, %s7353_s17  ;;  %6673 = vrot.lane.b32.xlu0 %v6665_v63, %s7353_s17  ;;  %v6727_v15 = vmul.f32 %v6726_v28, %v13237_v14  ;;  %v6748_v30 = vsel %vm1699_vm6, %v6743_v17, %v6747_v25 }
 0x606   : > { %v6110_v44 = vpop.permute.xlu1 %6109  ;;  %v6108_v23 = vpop.permute.xlu0 %6107  ;;  %v6082_v29 = vadd.f32 %v6078_v21, %v6065_v32  ;;  %v6764_v62 = vstv %s12482_s30  ;;  %v6739_v35 = vrot.slane %v6727_v15, 6 }
 0x607   : > { %v6115_v49 = vsel %vm330_vm7, %v6108_v23, %v6110_v44  ;;  %v6766_v22 = vmul.f32 %v6764_v62, %v13236_v3  ;;  %v6768_v7 = vmul.f32 %v6764_v62, %v13240_v55  ;;  %v6765_v63 = vmul.f32 %v6764_v62, %v13237_v14 }
 0x608   : > { %v6119_v57 = vadd.f32 %v6115_v49, %v6081_v9  ;;  %6679 = vrot.lane.b32.xlu1 %v6672_v27, %s7353_s17  ;;  %6677 = vrot.lane.b32.xlu0 %v6670_v45, %s7353_s17  ;;  %v6741_v34 = vsel %vm1699_vm6, %v6739_v35, %v6740_v54  ;;  %v6767_v58 = vmul.f32 %v6764_v62, %v13241_v59  ;;  %s7108_s17 = sld [smem:[#allocation6 + $0xb6]] }
 0x609   : > { %v6746_v3 = vsel %vm1699_vm6, %v6740_v54, %v6745_v36  ;;  %v6780_v55 = vrot.slane %v6766_v22, 6  ;;  %v6781_v27 = vrot.slane %v6768_v7, 6  ;;  %v6770_v47 = vmul.f32 %v6764_v62, %v13262_v56 }
 0x60a   : > { %v6114_v46 = vpop.permute.xlu1 %6113  ;;  %v6112_v33 = vpop.permute.xlu0 %6111  ;;  %v6777_v6 = vrot.slane %v6765_v63, 6  ;;  %v6778_v4 = vrot.slane %v6767_v58, 6  ;;  %v6769_v44 = vmul.f32 %v6764_v62, %v8470_v11 }
 0x60b   : > { %v6116_v5 = vsel %vm330_vm7, %v6112_v33, %v6114_v46  ;;  %v6785_v48 = vrot.slane %v6770_v47, 6  ;;  %v6782_v49 = vsel %vm1699_vm6, %v6780_v55, %v6781_v27 }
 0x60c   : > { %v6120_v41 = vadd.f32 %v6116_v5, %v6082_v29  ;;  %6713 = vrot.lane.b32.xlu1 %v6706_v37, %s7354_s19  ;;  %6711 = vrot.lane.b32.xlu0 %v6703_v1, %s7354_s19  ;;  %v6779_v56 = vsel %vm1699_vm6, %v6777_v6, %v6778_v4  ;;  %v6783_v45 = vrot.slane %v6769_v44, 6 }
 0x60d   : > { %v6786_v37 = vsel %vm1699_vm6, %v6781_v27, %v6785_v48 }
 0x60e   : > { %v6148_v20 = vpop.permute.xlu1 %6147  ;;  %v6146_v53 = vpop.permute.xlu0 %6145  ;;  %v6784_v42 = vsel %vm1699_vm6, %v6778_v4, %v6783_v45  ;;  %v6312_v43 = vstv %s7108_s17 }
 0x60f   : > { %v6153_v8 = vsel %vm355_vm8, %v6146_v53, %v6148_v20  ;;  %v6313_v53 = vmul.f32 %v6312_v43, %v13237_v14  ;;  %v6315_v54 = vmul.f32 %v6312_v43, %v8470_v11 }
 0x610   : > { %v6157_v40 = vadd.f32 %v6153_v8, %v6119_v57  ;;  %6717 = vrot.lane.b32.xlu1 %v6710_v2, %s7354_s19  ;;  %6715 = vrot.lane.b32.xlu0 %v6708_v31, %s7354_s19  ;;  %v6314_v2 = vmul.f32 %v6312_v43, %v13241_v59  ;;  %s7115_s19 = sld [smem:[#allocation6 + $0xbd]] }
 0x611   : > { %v6319_v31 = vrot.slane %v6313_v53, 5  ;;  %v6322_v36 = vrot.slane %v6315_v54, 5 }
 0x612   : > { %v6152_v16 = vpop.permute.xlu1 %6151  ;;  %v6150_v10 = vpop.permute.xlu0 %6149  ;;  %v6320_v35 = vrot.slane %v6314_v2, 5 }
 0x613   : > { %v6154_v60 = vsel %vm355_vm8, %v6150_v10, %v6152_v16 }
 0x614   : > { %v6158_v39 = vadd.f32 %v6154_v60, %v6120_v41  ;;  %6751 = vrot.lane.b32.xlu1 %v6744_v50, %s7355_s27  ;;  %6749 = vrot.lane.b32.xlu0 %v6741_v34, %s7355_s27  ;;  %v6321_v50 = vsel %vm255_vm1, %v6319_v31, %v6320_v35  ;;  %v6323_v58 = vsel %vm255_vm1, %v6320_v35, %v6322_v36 }
 0x616   : > { %v6186_v18 = vpop.permute.xlu1 %6185  ;;  %v6184_v32 = vpop.permute.xlu0 %6183 }
 0x617   : > { %v6191_v38 = vsel %vm380_vm9, %v6184_v32, %v6186_v18 }
 0x618   : > { %v6195_v9 = vadd.f32 %v6191_v38, %v6157_v40  ;;  %6755 = vrot.lane.b32.xlu1 %v6748_v30, %s7355_s27  ;;  %6753 = vrot.lane.b32.xlu0 %v6746_v3, %s7355_s27  ;;  %s6818_s27 = sshll.u32 %s10329_s22, 4  ;;  %s12575_s27 = int_to_ptr.vmem [resolvable:$true] %s6818_s27 }
 0x619   : > { %p7276_p4 = scmp.lt.s32.totalorder %s12575_s27, %s7274_s26 }
 0x61a   : > { %v6190_v23 = vpop.permute.xlu1 %6189  ;;  %v6188_v26 = vpop.permute.xlu0 %6187 }
 0x61b   : > { %v6192_v28 = vsel %vm380_vm9, %v6188_v26, %v6190_v23 }
 0x61c   : > { %v6196_v19 = vadd.f32 %v6192_v28, %v6158_v39  ;;  %6789 = vrot.lane.b32.xlu1 %v6782_v49, %s7356_s6  ;;  %6787 = vrot.lane.b32.xlu0 %v6779_v56, %s7356_s6 }
 0x61e   : > { %v6224_v0 = vpop.permute.xlu1 %6223  ;;  %v6222_v57 = vpop.permute.xlu0 %6221 }
 0x61f   : > { %v6229_v21 = vsel %vm405_vm10, %v6222_v57, %v6224_v0 }
 0x620   : > { %v6233_v46 = vadd.f32 %v6229_v21, %v6195_v9  ;;  %6793 = vrot.lane.b32.xlu1 %v6786_v37, %s7356_s6  ;;  %6791 = vrot.lane.b32.xlu0 %v6784_v42, %s7356_s6  ;;  %s7130_s6 = sshll.u32 %s7401_s16, 9  ;;  %s7269_s16 = scalar_lea.vmem %s12575_s27, 512 }
 0x621   : > { %s12582_s8 = scalar_lea.hbm %s12630_s3, %s7130_s6  ;;  %p7270_p5 = scmp.ne.s32.totalorder %s12575_s27, %s7269_s16 }
 0x622   : > { %v6228_v29 = vpop.permute.xlu1 %6227  ;;  %v6226_v33 = vpop.permute.xlu0 %6225  ;;  %p7277_p12 = scmp.lt.s32.totalorder %s7275_s7, %s7269_s16 }
 0x623   : > { %v6230_v52 = vsel %vm405_vm10, %v6226_v33, %v6228_v29  ;;  %p7271_p8 = pnand %p7270_p5, %p13513_p2 }
 0x624   : > { %v6234_v24 = vadd.f32 %v6230_v52, %v6196_v19  ;;  %p7278_p0 = por %p7277_p12, %p7276_p4 }
 0x625   : > { %p7272_p10 = pneg %p7271_p8 }
 0x626   : > { %v6262_v12 = vpop.permute.xlu1 %6261  ;;  %v6260_v5 = vpop.permute.xlu0 %6259 }
 0x627   : > { %v6267_v1 = vsel %vm430_vm11, %v6260_v5, %v6262_v12  ;;  %p7279_p7 = pnand %p7278_p0, %p7272_p10 }
 0x628   : > { %v6271_v15 = vadd.f32 %v6267_v1, %v6233_v46 }
 0x62a   : > { %v6266_v61 = vpop.permute.xlu1 %6265  ;;  %v6264_v41 = vpop.permute.xlu0 %6263 }
 0x62b   : > { %v6268_v62 = vsel %vm430_vm11, %v6264_v41, %v6266_v61 }
 0x62c   : > { %v6272_v20 = vadd.f32 %v6268_v62, %v6234_v24  ;;  %v6557_v62 = vstv %s7115_s19 }
 0x62d   : > { %v6558_v31 = vmul.f32 %v6557_v62, %v13237_v14  ;;  %v6559_v35 = vmul.f32 %v6557_v62, %v13241_v59 }
 0x62e   : > { %v6300_v13 = vpop.permute.xlu1 %6299  ;;  %v6298_v17 = vpop.permute.xlu0 %6297 }
 0x62f   : > { %v6305_v51 = vsel %vm455_vm12, %v6298_v17, %v6300_v13 }
 0x630   : > { %v6309_v8 = vadd.f32 %v6305_v51, %v6271_v15 }
 0x632   : > { %v6304_v40 = vpop.permute.xlu1 %6303  ;;  %v6302_v25 = vpop.permute.xlu0 %6301  ;;  %v6326_v7 = vadd.f32 %v6321_v50, %v6309_v8 }
 0x633   : > { %v6306_v16 = vsel %vm455_vm12, %v6302_v25, %v6304_v40 }
 0x634   : > { %v6310_v10 = vadd.f32 %v6306_v16, %v6272_v20 }
 0x636   : > { %v6355_v22 = vpop.permute.xlu1 %6354  ;;  %v6353_v60 = vpop.permute.xlu0 %6352  ;;  %v6327_v30 = vadd.f32 %v6323_v58, %v6310_v10 }
 0x637   : > { %v6360_v34 = vsel %vm330_vm7, %v6353_v60, %v6355_v22  ;;  %v6564_v60 = vrot.slane %v6558_v31, 6 }
 0x638   : > { %v6364_v63 = vadd.f32 %v6360_v34, %v6326_v7  ;;  %v6565_v34 = vrot.slane %v6559_v35, 6 }
 0x63a   : > { %v6359_v39 = vpop.permute.xlu1 %6358  ;;  %v6357_v18 = vpop.permute.xlu0 %6356 }
 0x63b   : > { %v6361_v32 = vsel %vm330_vm7, %v6357_v18, %v6359_v39 }
 0x63c   : > { %v6365_v3 = vadd.f32 %v6361_v32, %v6327_v30  ;;  %v6566_v32 = vsel %vm1699_vm6, %v6564_v60, %v6565_v34 }
 0x63e   : > { %v6393_v55 = vpop.permute.xlu1 %6392  ;;  %v6391_v27 = vpop.permute.xlu0 %6390 }
 0x63f   : > { %v6398_v1 = vsel %vm355_vm8, %v6391_v27, %v6393_v55 }
 0x640   : > { %v6402_v43 = vadd.f32 %v6398_v1, %v6364_v63  ;;  %v6560_v63 = vmul.f32 %v6557_v62, %v8470_v11 }
 0x642   : > { %v6397_v47 = vpop.permute.xlu1 %6396  ;;  %v6395_v38 = vpop.permute.xlu0 %6394  ;;  %v6567_v55 = vrot.slane %v6560_v63, 6 }
 0x643   : > { %v6399_v20 = vsel %vm355_vm8, %v6395_v38, %v6397_v47 }
 0x644   : > { %v6403_v54 = vadd.f32 %v6399_v20, %v6365_v3  ;;  %v6568_v11 = vsel %vm1699_vm6, %v6565_v34, %v6567_v55 }
 0x646   : > { %v6431_v6 = vpop.permute.xlu1 %6430  ;;  %v6429_v4 = vpop.permute.xlu0 %6428 }
 0x647   : > { %v6436_v41 = vsel %vm380_vm9, %v6429_v4, %v6431_v6 }
 0x648   : > { %v6440_v2 = vadd.f32 %v6436_v41, %v6402_v43 }
 0x64a   : > { %v6435_v44 = vpop.permute.xlu1 %6434  ;;  %v6433_v9 = vpop.permute.xlu0 %6432 }
 0x64b   : > { %v6437_v51 = vsel %vm380_vm9, %v6433_v9, %v6435_v44 }
 0x64c   : > { %v6441_v10 = vadd.f32 %v6437_v51, %v6403_v54 }
 0x64e   : > { %v6469_v23 = vpop.permute.xlu1 %6468  ;;  %v6467_v26 = vpop.permute.xlu0 %6466 }
 0x64f   : > { %v6474_v53 = vsel %vm405_vm10, %v6467_v26, %v6469_v23 }
 0x650   : > { %v6478_v40 = vadd.f32 %v6474_v53, %v6440_v2 }
 0x652   : > { %v6473_v48 = vpop.permute.xlu1 %6472  ;;  %v6471_v28 = vpop.permute.xlu0 %6470 }
 0x653   : > { %v6475_v25 = vsel %vm405_vm10, %v6471_v28, %v6473_v48 }
 0x654   : > { %v6479_v58 = vadd.f32 %v6475_v25, %v6441_v10 }
 0x656   : > { %v6507_v49 = vpop.permute.xlu1 %6506  ;;  %v6505_v56 = vpop.permute.xlu0 %6504 }
 0x657   : > { %v6512_v8 = vsel %vm430_vm11, %v6505_v56, %v6507_v49 }
 0x658   : > { %v6516_v50 = vadd.f32 %v6512_v8, %v6478_v40 }
 0x65a   : > { %v6511_v45 = vpop.permute.xlu1 %6510  ;;  %v6509_v19 = vpop.permute.xlu0 %6508 }
 0x65b   : > { %v6513_v7 = vsel %vm430_vm11, %v6509_v19, %v6511_v45 }
 0x65c   : > { %v6517_v39 = vadd.f32 %v6513_v7, %v6479_v58 }
 0x65e   : > { %v6545_v0 = vpop.permute.xlu1 %6544  ;;  %v6543_v57 = vpop.permute.xlu0 %6542 }
 0x65f   : > { %v6550_v16 = vsel %vm455_vm12, %v6543_v57, %v6545_v0 }
 0x660   : > { %v6554_v14 = vadd.f32 %v6550_v16, %v6516_v50 }
 0x662   : > { %v6549_v21 = vpop.permute.xlu1 %6548  ;;  %v6547_v37 = vpop.permute.xlu0 %6546  ;;  %v6571_v47 = vadd.f32 %v6566_v32, %v6554_v14 }
 0x663   : > { %v6551_v59 = vsel %vm455_vm12, %v6547_v37, %v6549_v21 }
 0x664   : > { %v6555_v27 = vadd.f32 %v6551_v59, %v6517_v39 }
 0x666   : > { %v6600_v42 = vpop.permute.xlu1 %6599  ;;  %v6598_v46 = vpop.permute.xlu0 %6597  ;;  %v6572_v26 = vadd.f32 %v6568_v11, %v6555_v27 }
 0x667   : > { %v6605_v3 = vsel %vm330_vm7, %v6598_v46, %v6600_v42 }
 0x668   : > { %v6609_v6 = vadd.f32 %v6605_v3, %v6571_v47 }
 0x66a   : > { %v6604_v29 = vpop.permute.xlu1 %6603  ;;  %v6602_v33 = vpop.permute.xlu0 %6601 }
 0x66b   : > { %v6606_v9 = vsel %vm330_vm7, %v6602_v33, %v6604_v29 }
 0x66c   : > { %v6610_v56 = vadd.f32 %v6606_v9, %v6572_v26 }
 0x66e   : > { %v6638_v52 = vpop.permute.xlu1 %6637  ;;  %v6636_v24 = vpop.permute.xlu0 %6635 }
 0x66f   : > { %v6643_v38 = vsel %vm355_vm8, %v6636_v24, %v6638_v52 }
 0x670   : > { %v6647_v48 = vadd.f32 %v6643_v38, %v6609_v6 }
 0x672   : > { %v6642_v12 = vpop.permute.xlu1 %6641  ;;  %v6640_v5 = vpop.permute.xlu0 %6639 }
 0x673   : > { %v6644_v28 = vsel %vm355_vm8, %v6640_v5, %v6642_v12 }
 0x674   : > { %v6648_v37 = vadd.f32 %v6644_v28, %v6610_v56 }
 0x676   : > { %v6676_v15 = vpop.permute.xlu1 %6675  ;;  %v6674_v61 = vpop.permute.xlu0 %6673 }
 0x677   : > { %v6681_v23 = vsel %vm380_vm9, %v6674_v61, %v6676_v15 }
 0x678   : > { %v6685_v45 = vadd.f32 %v6681_v23, %v6647_v48 }
 0x67a   : > { %v6680_v13 = vpop.permute.xlu1 %6679  ;;  %v6678_v17 = vpop.permute.xlu0 %6677 }
 0x67b   : > { %v6682_v57 = vsel %vm380_vm9, %v6678_v17, %v6680_v13 }
 0x67c   : > { %v6686_v29 = vadd.f32 %v6682_v57, %v6648_v37 }
 0x67e   : > { %v6714_v36 = vpop.permute.xlu1 %6713  ;;  %v6712_v22 = vpop.permute.xlu0 %6711 }
 0x67f   : > { %v6719_v49 = vsel %vm405_vm10, %v6712_v22, %v6714_v36 }
 0x680   : > { %v6723_v42 = vadd.f32 %v6719_v49, %v6685_v45 }
 0x682   : > { %v6718_v30 = vpop.permute.xlu1 %6717  ;;  %v6716_v18 = vpop.permute.xlu0 %6715 }
 0x683   : > { %v6720_v46 = vsel %vm405_vm10, %v6716_v18, %v6718_v30 }
 0x684   : > { %v6724_v1 = vadd.f32 %v6720_v46, %v6686_v29 }
 0x686   : > { %v6752_v4 = vpop.permute.xlu1 %6751  ;;  %v6750_v44 = vpop.permute.xlu0 %6749 }
 0x687   : > { %v6757_v21 = vsel %vm430_vm11, %v6750_v44, %v6752_v4 }
 0x688   : > { %v6761_v33 = vadd.f32 %v6757_v21, %v6723_v42 }
 0x68a   : > { %v6756_v19 = vpop.permute.xlu1 %6755  ;;  %v6754_v0 = vpop.permute.xlu0 %6753 }
 0x68b   : > { %v6758_v12 = vsel %vm430_vm11, %v6754_v0, %v6756_v19 }
 0x68c   : > { %v6762_v61 = vadd.f32 %v6758_v12, %v6724_v1 }
 0x68e   : > { %v6790_v52 = vpop.permute.xlu1 %6789  ;;  %v6788_v24 = vpop.permute.xlu0 %6787 }
 0x68f   : > { %v6795_v5 = vsel %vm455_vm12, %v6788_v24, %v6790_v52 }
 0x690   : > { %v6799_v15 = vadd.f32 %v6795_v5, %v6761_v33 }
 0x692   : > { %7122 = vst [vmem:[%s10329_s22 + $0x10] sm:$0xff] %v6799_v15  ;;  %v6794_v41 = vpop.permute.xlu1 %6793  ;;  %v6792_v43 = vpop.permute.xlu0 %6791 }
 0x693   : > { %v6796_v62 = vsel %vm455_vm12, %v6792_v43, %v6794_v41 }
 0x694   : > { %v6800_v20 = vadd.f32 %v6796_v62, %v6762_v61 }
 0x696   : > { %7123 = vst [vmem:[%s10329_s22 + $0x18] sm:$0xff] %v6800_v20 }
 0x697   : > { %7282 = shalt.err (!%p7279_p7)
}
 0x698   : > { %s7283_s22 = scalar_lea.hbm %s12582_s8, 512  ;;  %s7287_s10 = scalar_lea.hbm %s12630_s3, 1024 }
 0x699   : > { %p7284_p11 = scmp.ne.s32.totalorder %s12582_s8, %s7283_s22  ;;  %p7288_p6 = scmp.lt.u32.totalorder %s12582_s8, %s12630_s3 }
 0x69a   : > { %p7289_p9 = scmp.lt.u32.totalorder %s7287_s10, %s7283_s22  ;;  %p7291_p5 = scmp.lt.u32.totalorder %s7283_s22, %s12582_s8 }
 0x69b   : > { %p7285_p13 = pnand %p7284_p11, %p13513_p2 }
 0x69c   : > { %p7290_p1 = por %p7289_p9, %p7288_p6 }
 0x69d   : > { %p7286_p3 = pneg %p7285_p13 }
 0x69e   : > { %p7292_p8 = por %p7291_p5, %p7290_p1 }
 0x6a0   : > { %p7293_p10 = pnand %p7292_p8, %p7286_p3 }
 0x6a2   : > { %7296 = shalt.err (!%p7293_p10)
}
 0x6a3   : > { %s7358_s17 = smov 128   ;;  %s7359_s19 = smov 8  }
 0x6a4   : > { %7141 = dma.vmem_to_hbm [thread:$0]  (%p13513_p2), %s12575_s27, 512, %s12582_s8, %s6805_s9, %s7358_s17, %s7358_s17, %s7359_s19  }
 0x6a5 PF: > { %s6833_s6 = sand.u32 1, %s7331_s12   ;;  %p13514_p4 = scmp.ne.s32.totalorder %s12661_s25, 0 }
 0x6a6   : > { %p13515_p12 = scmp.ge.s32.totalorder %s7343_s15, 2  ;;  %s6834_s20 = scalar_lea.sflag [#allocation4], %s6833_s6 }
 0x6a8   : > { %p7155_p0 = pnand %p13515_p12, %p13514_p4 }
 0x6aa   : > { %7326 = dma.done.wait (!%p7155_p0), %s6834_s20, 512  }
 0x6ab   : > { %7328 = vsyncadd (!%p7155_p0), %s6834_s20, 4294966784  ;;  %p18_p7 = scmp.ge.s32.totalorder %s7405_s18, 4   ;;  %s13516_s12 = smov %s7335_s13 }
 0x6ac   : > { %s13517_s13 = smov %s7339_s14  ;;  %s13518_s14 = smov %s7417_s21 }
 0x6ad   : > { %s13519_s15 = smov %s7405_s18  ;;  %20 = sbr.rel (!%p18_p7) target bundleno = 7 (0x7), region = 87 }
 0x6b4   :  { %6839 = vsyncpa [#allocation3], 1 }
 0x6b5   :  { %6841 = vsyncpa [#allocation3 + $0x1], 1 }
 0x6b6   :  { %6842 = vsyncpa [#allocation4], 1 }
 0x6b7   :  { %6844 = vsyncpa [#allocation4 + $0x1], 1 }
 0x6b8   :  { %6845 = vsyncpa [#allocation5], 1 }
 0x6b9   :  { %6847 = vsyncpa [#allocation5 + $0x1], 1 }
 0x6ba   :  { %6848 = vsyncpa [#allocation8], 1 }

</bundles_post_ra>
